<compile_context>
chip_gen: v7x
topology: tpu7x:2x2x1
jax: 0.10.0
libtpu: 0.0.40
codegen_flags: <defaults>
</compile_context>

<pallas_src>
import jax
import jax.numpy as jnp
from jax.experimental import pallas as pl
from jax.experimental.pallas import tpu as pltpu

EPS = 1e-5          # PyTorch InstanceNorm2d default eps
NEG_SLOPE = 0.2     # LeakyReLU slope
LANE = 128


def _round_up(x, m):
    return ((x + m - 1) // m) * m


# ------------------------- Pallas kernels -------------------------

def conv_inorm_lrelu_kernel(p_ref, w_ref, b_ref, o_ref):
    """Fused Conv (im2col matmul) + bias + InstanceNorm + LeakyReLU for one image.

    p_ref: [1, L, K]  bf16 patches (L = Ho*Wo rows on sublanes, K = 9*Cin padded to 128)
    w_ref: [K, C]     bf16 weights (grid-invariant block, stays resident in VMEM)
    b_ref: [1, C]     f32 bias
    o_ref: [1, L, C]  bf16 output (lane-dense: channels on lanes)
    """
    acc = jnp.dot(p_ref[0], w_ref[...], preferred_element_type=jnp.float32)
    acc = acc + b_ref[...]                                  # [L, C] f32
    mean = jnp.mean(acc, axis=0, keepdims=True)             # sublane reduce -> [1, C]
    cent = acc - mean
    var = jnp.mean(cent * cent, axis=0, keepdims=True)      # biased var (torch default)
    y = cent * jax.lax.rsqrt(var + EPS)
    y = jnp.where(y >= 0.0, y, NEG_SLOPE * y)
    o_ref[0] = y.astype(o_ref.dtype)


def conv_bias_kernel(p_ref, w_ref, b_ref, o_ref):
    """Final Conv (no norm / activation): matmul + bias, f32 output."""
    acc = jnp.dot(p_ref[0], w_ref[...], preferred_element_type=jnp.float32)
    o_ref[0] = (acc + b_ref[...]).astype(o_ref.dtype)


def _call_conv(kernel, patches, w2d, b2d, out_dtype):
    n, l, k = patches.shape
    c = w2d.shape[1]
    return pl.pallas_call(
        kernel,
        out_shape=jax.ShapeDtypeStruct((n, l, c), out_dtype),
        grid=(n,),
        in_specs=[
            pl.BlockSpec((1, l, k), lambda i: (i, 0, 0)),
            pl.BlockSpec((k, c), lambda i: (0, 0)),
            pl.BlockSpec((1, c), lambda i: (0, 0)),
        ],
        out_specs=pl.BlockSpec((1, l, c), lambda i: (i, 0, 0)),
        compiler_params=pltpu.CompilerParams(
            dimension_semantics=("parallel",)),
    )(patches, w2d, b2d)


# ------------------------- JAX glue (im2col, param prep) -------------------------

# TODO(synk): build patches from haloed NHWC tiles inside the kernel (9 shifted dots into
# a VMEM accumulator) to remove the per-layer im2col HBM materialization entirely.
def im2col(x_nhwc, stride, k_pad):
    """3x3, pad=1 patch extraction -> ([N, Ho*Wo, k_pad] bf16, Ho, Wo)."""
    n, h, w, c = x_nhwc.shape
    xp = jnp.pad(x_nhwc, ((0, 0), (1, 1), (1, 1), (0, 0)))
    h_out = (h + 2 - 3) // stride + 1
    w_out = (w + 2 - 3) // stride + 1
    cols = []
    for dh in range(3):
        for dw in range(3):
            cols.append(
                xp[:, dh:dh + stride * (h_out - 1) + 1:stride,
                      dw:dw + stride * (w_out - 1) + 1:stride, :])
    patches = jnp.stack(cols, axis=3)                       # [N, Ho, Wo, 9, C]
    patches = patches.reshape(n, h_out * w_out, 9 * c).astype(jnp.bfloat16)
    if k_pad > 9 * c:
        patches = jnp.pad(patches, ((0, 0), (0, 0), (0, k_pad - 9 * c)))
    return patches, h_out, w_out


def prepare_params(params):
    """Hoisted (outside jit) weight prep: [Cout,Cin,3,3] -> bf16 [K_pad, C_pad]."""
    prep = {}
    for i in range(5):
        w, b = params[f"w{i}"], params[f"b{i}"]
        cout, cin = int(w.shape[0]), int(w.shape[1])
        k = 9 * cin
        kp = _round_up(k, LANE)
        cp = cout if i < 4 else _round_up(cout, LANE)       # pad final Cout=1 -> 128 lanes
        w2d = jnp.transpose(w, (2, 3, 1, 0)).reshape(k, cout)   # (kh,kw,Cin) major order
        w2d = jnp.pad(w2d, ((0, kp - k), (0, cp - cout))).astype(jnp.bfloat16)
        prep[f"w{i}"] = w2d
        prep[f"b{i}"] = jnp.pad(b, (0, cp - cout)).reshape(1, cp).astype(jnp.float32)
    return prep


def discriminator_forward(img_ab_nchw, prep):
    n = img_ab_nchw.shape[0]
    x = jnp.transpose(img_ab_nchw, (0, 2, 3, 1)).astype(jnp.float32)   # NCHW -> NHWC
    for i in range(4):
        w2d, b2d = prep[f"w{i}"], prep[f"b{i}"]
        kp, c = w2d.shape
        patches, ho, wo = im2col(x, stride=2, k_pad=kp)
        y = _call_conv(conv_inorm_lrelu_kernel, patches, w2d, b2d, jnp.bfloat16)
        x = y.reshape(n, ho, wo, c)
    w2d, b2d = prep["w4"], prep["b4"]
    kp, cp = w2d.shape
    patches, ho, wo = im2col(x, stride=1, k_pad=kp)
    y = _call_conv(conv_bias_kernel, patches, w2d, b2d, jnp.float32)
    y = y.reshape(n, ho, wo, cp)[..., :1]                   # drop lane padding (Cout=1)
    return jnp.transpose(y, (0, 3, 1, 2))                   # back to NCHW


# ------------------------- deterministic parameter init -------------------------

def init_params(key, in_channels=3):
    # Conv weights ~ N(0, 0.02) per weights_init(); biases use PyTorch's default
    # uniform(-1/sqrt(fan_in), 1/sqrt(fan_in)) (weights_init does not touch conv bias).
    chans = [in_channels, 64, 128, 256, 512, 1]
    params = {}
    keys = jax.random.split(key, 10)
    for i in range(5):
        cin, cout = chans[i], chans[i + 1]
        params[f"w{i}"] = 0.02 * jax.random.normal(
            keys[2 * i], (cout, cin, 3, 3), jnp.float32)
        bound = (cin * 9.0) ** -0.5
        params[f"b{i}"] = jax.random.uniform(
            keys[2 * i + 1], (cout,), jnp.float32, -bound, bound)
    return params


# ------------------------- pure-JAX reference (f32) -------------------------

def reference_forward(x_nchw, params):
    x = x_nchw.astype(jnp.float32)
    for i in range(5):
        w, b = params[f"w{i}"], params[f"b{i}"]
        stride = 2 if i < 4 else 1
        x = jax.lax.conv_general_dilated(
            x, w, (stride, stride), ((1, 1), (1, 1)),
            dimension_numbers=("NCHW", "OIHW", "NCHW")) + b.reshape(1, -1, 1, 1)
        if i < 4:
            mean = jnp.mean(x, axis=(2, 3), keepdims=True)
            var = jnp.mean((x - mean) ** 2, axis=(2, 3), keepdims=True)
            x = (x - mean) * jax.lax.rsqrt(var + EPS)
            x = jnp.where(x >= 0, x, NEG_SLOPE * x)
    return x


# ------------------------- main -------------------------

if __name__ == "__main__":
    key = jax.random.PRNGKey(0)
    pkey, xkey = jax.random.split(key)

    in_channels = 3
    params = init_params(pkey, in_channels=in_channels)
    prep = prepare_params(params)

    # small NCHW input: spatial 32 -> 16 -> 8 -> 4 -> 2; final conv keeps 2x2
    x = jax.random.normal(xkey, (2, in_channels, 32, 32), jnp.float32)

    fwd = jax.jit(discriminator_forward)
    out = jax.block_until_ready(fwd(x, prep))

    assert out.shape == (2, 1, 2, 2), out.shape
    assert bool(jnp.all(jnp.isfinite(out)))

    # loose tolerance: MXU runs in bf16 (f32 accumulation / f32 norm statistics)
    ref = reference_forward(x, params)
    max_err = float(jnp.max(jnp.abs(out - ref)))
    assert max_err < 5e-2 * (1.0 + float(jnp.max(jnp.abs(ref)))), max_err

    print("KERNEL_OK")
</pallas_src>

<mosaic_0001>
module attributes {stable_mosaic.version = 11 : i64} {
  func.func @conv_inorm_lrelu_kernel(%arg0: i32, %arg1: memref<1x256x128xbf16, #tpu.memory_space<vmem>>, %arg2: memref<128x64xbf16, #tpu.memory_space<vmem>>, %arg3: memref<1x64xf32, #tpu.memory_space<vmem>>, %arg4: memref<1x256x64xbf16, #tpu.memory_space<vmem>>) attributes {dimension_semantics = [#tpu.dimension_semantics<parallel>], iteration_bounds = array<i64: 2>, scalar_prefetch = 0 : i64, scratch_operands = 0 : i64, tpu.core_type = #tpu.core_type<tc>, window_params = [{transform_indices = @transform_0, window_bounds = array<i64: 1, 256, 128>}, {pipeline_mode = #tpu.pipeline_mode<synchronous>, transform_indices = @transform_1, window_bounds = array<i64: 128, 64>}, {pipeline_mode = #tpu.pipeline_mode<synchronous>, transform_indices = @transform_2, window_bounds = array<i64: 1, 64>}, {transform_indices = @transform_3, window_bounds = array<i64: 1, 256, 64>}]} {
    %c0 = arith.constant 0 : index
    %c0_0 = arith.constant 0 : index
    %c0_1 = arith.constant 0 : index
    %0 = vector.load %arg1[%c0, %c0_0, %c0_1] : memref<1x256x128xbf16, #tpu.memory_space<vmem>>, vector<1x256x128xbf16>
    %1 = vector.shape_cast %0 : vector<1x256x128xbf16> to vector<256x128xbf16>
    %c0_2 = arith.constant 0 : index
    %c0_3 = arith.constant 0 : index
    %2 = vector.load %arg2[%c0_2, %c0_3] : memref<128x64xbf16, #tpu.memory_space<vmem>>, vector<128x64xbf16>
    %cst = arith.constant dense<0.000000e+00> : vector<256x64xf32>
    %3 = tpu.matmul %1, %2, %cst {dimension_numbers = #tpu.dot_dimension_numbers<[1], [0], [0], [1], [0, 0, 1, 1], [], []>} : vector<256x128xbf16>, vector<128x64xbf16>, vector<256x64xf32> -> vector<256x64xf32>
    %c0_4 = arith.constant 0 : index
    %c0_5 = arith.constant 0 : index
    %4 = vector.load %arg3[%c0_4, %c0_5] : memref<1x64xf32, #tpu.memory_space<vmem>>, vector<1x64xf32>
    %5 = vector.broadcast %4 : vector<1x64xf32> to vector<256x64xf32>
    %6 = arith.addf %3, %5 : vector<256x64xf32>
    %cst_6 = arith.constant dense<0.000000e+00> : vector<64xf32>
    %7 = vector.multi_reduction <add>, %6, %cst_6 [0] : vector<256x64xf32> to vector<64xf32>
    %8 = vector.shape_cast %7 : vector<64xf32> to vector<1x64xf32>
    %cst_7 = arith.constant 2.560000e+02 : f32
    %9 = vector.broadcast %cst_7 : f32 to vector<1x64xf32>
    %10 = arith.divf %8, %9 : vector<1x64xf32>
    %11 = vector.broadcast %10 : vector<1x64xf32> to vector<256x64xf32>
    %12 = arith.subf %6, %11 : vector<256x64xf32>
    %13 = arith.mulf %12, %12 : vector<256x64xf32>
    %cst_8 = arith.constant dense<0.000000e+00> : vector<64xf32>
    %14 = vector.multi_reduction <add>, %13, %cst_8 [0] : vector<256x64xf32> to vector<64xf32>
    %15 = vector.shape_cast %14 : vector<64xf32> to vector<1x64xf32>
    %cst_9 = arith.constant 2.560000e+02 : f32
    %16 = vector.broadcast %cst_9 : f32 to vector<1x64xf32>
    %17 = arith.divf %15, %16 : vector<1x64xf32>
    %cst_10 = arith.constant 9.99999974E-6 : f32
    %18 = vector.broadcast %cst_10 : f32 to vector<1x64xf32>
    %19 = arith.addf %17, %18 : vector<1x64xf32>
    %20 = math.rsqrt %19 : vector<1x64xf32>
    %21 = vector.broadcast %20 : vector<1x64xf32> to vector<256x64xf32>
    %22 = arith.mulf %12, %21 : vector<256x64xf32>
    %cst_11 = arith.constant 0.000000e+00 : f32
    %23 = vector.broadcast %cst_11 : f32 to vector<256x64xf32>
    %24 = arith.cmpf oge, %22, %23 : vector<256x64xf32>
    %cst_12 = arith.constant 2.000000e-01 : f32
    %25 = vector.broadcast %cst_12 : f32 to vector<256x64xf32>
    %26 = arith.mulf %25, %22 : vector<256x64xf32>
    %27 = arith.select %24, %22, %26 : vector<256x64xi1>, vector<256x64xf32>
    %28 = arith.truncf %27 : vector<256x64xf32> to vector<256x64xbf16>
    %c0_13 = arith.constant 0 : index
    %c0_14 = arith.constant 0 : index
    %c0_15 = arith.constant 0 : index
    %29 = vector.load %arg4[%c0_13, %c0_14, %c0_15] : memref<1x256x64xbf16, #tpu.memory_space<vmem>>, vector<1x256x64xbf16>
    %30 = vector.shape_cast %29 : vector<1x256x64xbf16> to vector<256x64xbf16>
    %31 = vector.shape_cast %28 : vector<256x64xbf16> to vector<1x256x64xbf16>
    tpu.vector_store %arg4[%c0_13, %c0_14, %c0_15], %31 {strides = array<i32>} : memref<1x256x64xbf16, #tpu.memory_space<vmem>>, vector<1x256x64xbf16>,
    return
  }
  func.func @transform_0(%arg0: i32) -> (i32, i32, i32) {
    %c0_i32 = arith.constant 0 : i32
    %c0_i32_0 = arith.constant 0 : i32
    %c0_i32_1 = arith.constant 0 : i32
    return %arg0, %c0_i32, %c0_i32_0 : i32, i32, i32
  }
  func.func @transform_1(%arg0: i32) -> (i32, i32) {
    %c0_i32 = arith.constant 0 : i32
    %c0_i32_0 = arith.constant 0 : i32
    %c0_i32_1 = arith.constant 0 : i32
    return %c0_i32, %c0_i32_0 : i32, i32
  }
  func.func @transform_2(%arg0: i32) -> (i32, i32) {
    %c0_i32 = arith.constant 0 : i32
    %c0_i32_0 = arith.constant 0 : i32
    %c0_i32_1 = arith.constant 0 : i32
    return %c0_i32, %c0_i32_0 : i32, i32
  }
  func.func @transform_3(%arg0: i32) -> (i32, i32, i32) {
    %c0_i32 = arith.constant 0 : i32
    %c0_i32_0 = arith.constant 0 : i32
    %c0_i32_1 = arith.constant 0 : i32
    return %arg0, %c0_i32, %c0_i32_0 : i32, i32, i32
  }
}

module attributes {stable_mosaic.version = 11 : i64} {
  func.func @conv_inorm_lrelu_kernel(%arg0: i32, %arg1: memref<1x64x640xbf16, #tpu.memory_space<vmem>>, %arg2: memref<640x128xbf16, #tpu.memory_space<vmem>>, %arg3: memref<1x128xf32, #tpu.memory_space<vmem>>, %arg4: memref<1x64x128xbf16, #tpu.memory_space<vmem>>) attributes {dimension_semantics = [#tpu.dimension_semantics<parallel>], iteration_bounds = array<i64: 2>, scalar_prefetch = 0 : i64, scratch_operands = 0 : i64, tpu.core_type = #tpu.core_type<tc>, window_params = [{transform_indices = @transform_0, window_bounds = array<i64: 1, 64, 640>}, {pipeline_mode = #tpu.pipeline_mode<synchronous>, transform_indices = @transform_1, window_bounds = array<i64: 640, 128>}, {pipeline_mode = #tpu.pipeline_mode<synchronous>, transform_indices = @transform_2, window_bounds = array<i64: 1, 128>}, {transform_indices = @transform_3, window_bounds = array<i64: 1, 64, 128>}]} {
    %c0 = arith.constant 0 : index
    %c0_0 = arith.constant 0 : index
    %c0_1 = arith.constant 0 : index
    %0 = vector.load %arg1[%c0, %c0_0, %c0_1] : memref<1x64x640xbf16, #tpu.memory_space<vmem>>, vector<1x64x640xbf16>
    %1 = vector.shape_cast %0 : vector<1x64x640xbf16> to vector<64x640xbf16>
    %c0_2 = arith.constant 0 : index
    %c0_3 = arith.constant 0 : index
    %2 = vector.load %arg2[%c0_2, %c0_3] : memref<640x128xbf16, #tpu.memory_space<vmem>>, vector<640x128xbf16>
    %cst = arith.constant dense<0.000000e+00> : vector<64x128xf32>
    %3 = tpu.matmul %1, %2, %cst {dimension_numbers = #tpu.dot_dimension_numbers<[1], [0], [0], [1], [0, 0, 1, 1], [], []>} : vector<64x640xbf16>, vector<640x128xbf16>, vector<64x128xf32> -> vector<64x128xf32>
    %c0_4 = arith.constant 0 : index
    %c0_5 = arith.constant 0 : index
    %4 = vector.load %arg3[%c0_4, %c0_5] : memref<1x128xf32, #tpu.memory_space<vmem>>, vector<1x128xf32>
    %5 = vector.broadcast %4 : vector<1x128xf32> to vector<64x128xf32>
    %6 = arith.addf %3, %5 : vector<64x128xf32>
    %cst_6 = arith.constant dense<0.000000e+00> : vector<128xf32>
    %7 = vector.multi_reduction <add>, %6, %cst_6 [0] : vector<64x128xf32> to vector<128xf32>
    %8 = vector.shape_cast %7 : vector<128xf32> to vector<1x128xf32>
    %cst_7 = arith.constant 6.400000e+01 : f32
    %9 = vector.broadcast %cst_7 : f32 to vector<1x128xf32>
    %10 = arith.divf %8, %9 : vector<1x128xf32>
    %11 = vector.broadcast %10 : vector<1x128xf32> to vector<64x128xf32>
    %12 = arith.subf %6, %11 : vector<64x128xf32>
    %13 = arith.mulf %12, %12 : vector<64x128xf32>
    %cst_8 = arith.constant dense<0.000000e+00> : vector<128xf32>
    %14 = vector.multi_reduction <add>, %13, %cst_8 [0] : vector<64x128xf32> to vector<128xf32>
    %15 = vector.shape_cast %14 : vector<128xf32> to vector<1x128xf32>
    %cst_9 = arith.constant 6.400000e+01 : f32
    %16 = vector.broadcast %cst_9 : f32 to vector<1x128xf32>
    %17 = arith.divf %15, %16 : vector<1x128xf32>
    %cst_10 = arith.constant 9.99999974E-6 : f32
    %18 = vector.broadcast %cst_10 : f32 to vector<1x128xf32>
    %19 = arith.addf %17, %18 : vector<1x128xf32>
    %20 = math.rsqrt %19 : vector<1x128xf32>
    %21 = vector.broadcast %20 : vector<1x128xf32> to vector<64x128xf32>
    %22 = arith.mulf %12, %21 : vector<64x128xf32>
    %cst_11 = arith.constant 0.000000e+00 : f32
    %23 = vector.broadcast %cst_11 : f32 to vector<64x128xf32>
    %24 = arith.cmpf oge, %22, %23 : vector<64x128xf32>
    %cst_12 = arith.constant 2.000000e-01 : f32
    %25 = vector.broadcast %cst_12 : f32 to vector<64x128xf32>
    %26 = arith.mulf %25, %22 : vector<64x128xf32>
    %27 = arith.select %24, %22, %26 : vector<64x128xi1>, vector<64x128xf32>
    %28 = arith.truncf %27 : vector<64x128xf32> to vector<64x128xbf16>
    %c0_13 = arith.constant 0 : index
    %c0_14 = arith.constant 0 : index
    %c0_15 = arith.constant 0 : index
    %29 = vector.load %arg4[%c0_13, %c0_14, %c0_15] : memref<1x64x128xbf16, #tpu.memory_space<vmem>>, vector<1x64x128xbf16>
    %30 = vector.shape_cast %29 : vector<1x64x128xbf16> to vector<64x128xbf16>
    %31 = vector.shape_cast %28 : vector<64x128xbf16> to vector<1x64x128xbf16>
    tpu.vector_store %arg4[%c0_13, %c0_14, %c0_15], %31 {strides = array<i32>} : memref<1x64x128xbf16, #tpu.memory_space<vmem>>, vector<1x64x128xbf16>,
    return
  }
  func.func @transform_0(%arg0: i32) -> (i32, i32, i32) {
    %c0_i32 = arith.constant 0 : i32
    %c0_i32_0 = arith.constant 0 : i32
    %c0_i32_1 = arith.constant 0 : i32
    return %arg0, %c0_i32, %c0_i32_0 : i32, i32, i32
  }
  func.func @transform_1(%arg0: i32) -> (i32, i32) {
    %c0_i32 = arith.constant 0 : i32
    %c0_i32_0 = arith.constant 0 : i32
    %c0_i32_1 = arith.constant 0 : i32
    return %c0_i32, %c0_i32_0 : i32, i32
  }
  func.func @transform_2(%arg0: i32) -> (i32, i32) {
    %c0_i32 = arith.constant 0 : i32
    %c0_i32_0 = arith.constant 0 : i32
    %c0_i32_1 = arith.constant 0 : i32
    return %c0_i32, %c0_i32_0 : i32, i32
  }
  func.func @transform_3(%arg0: i32) -> (i32, i32, i32) {
    %c0_i32 = arith.constant 0 : i32
    %c0_i32_0 = arith.constant 0 : i32
    %c0_i32_1 = arith.constant 0 : i32
    return %arg0, %c0_i32, %c0_i32_0 : i32, i32, i32
  }
}

module attributes {stable_mosaic.version = 11 : i64} {
  func.func @conv_inorm_lrelu_kernel(%arg0: i32, %arg1: memref<1x16x1152xbf16, #tpu.memory_space<vmem>>, %arg2: memref<1152x256xbf16, #tpu.memory_space<vmem>>, %arg3: memref<1x256xf32, #tpu.memory_space<vmem>>, %arg4: memref<1x16x256xbf16, #tpu.memory_space<vmem>>) attributes {dimension_semantics = [#tpu.dimension_semantics<parallel>], iteration_bounds = array<i64: 2>, scalar_prefetch = 0 : i64, scratch_operands = 0 : i64, tpu.core_type = #tpu.core_type<tc>, window_params = [{transform_indices = @transform_0, window_bounds = array<i64: 1, 16, 1152>}, {pipeline_mode = #tpu.pipeline_mode<synchronous>, transform_indices = @transform_1, window_bounds = array<i64: 1152, 256>}, {pipeline_mode = #tpu.pipeline_mode<synchronous>, transform_indices = @transform_2, window_bounds = array<i64: 1, 256>}, {transform_indices = @transform_3, window_bounds = array<i64: 1, 16, 256>}]} {
    %c0 = arith.constant 0 : index
    %c0_0 = arith.constant 0 : index
    %c0_1 = arith.constant 0 : index
    %0 = vector.load %arg1[%c0, %c0_0, %c0_1] : memref<1x16x1152xbf16, #tpu.memory_space<vmem>>, vector<1x16x1152xbf16>
    %1 = vector.shape_cast %0 : vector<1x16x1152xbf16> to vector<16x1152xbf16>
    %c0_2 = arith.constant 0 : index
    %c0_3 = arith.constant 0 : index
    %2 = vector.load %arg2[%c0_2, %c0_3] : memref<1152x256xbf16, #tpu.memory_space<vmem>>, vector<1152x256xbf16>
    %cst = arith.constant dense<0.000000e+00> : vector<16x256xf32>
    %3 = tpu.matmul %1, %2, %cst {dimension_numbers = #tpu.dot_dimension_numbers<[1], [0], [0], [1], [0, 0, 1, 1], [], []>} : vector<16x1152xbf16>, vector<1152x256xbf16>, vector<16x256xf32> -> vector<16x256xf32>
    %c0_4 = arith.constant 0 : index
    %c0_5 = arith.constant 0 : index
    %4 = vector.load %arg3[%c0_4, %c0_5] : memref<1x256xf32, #tpu.memory_space<vmem>>, vector<1x256xf32>
    %5 = vector.broadcast %4 : vector<1x256xf32> to vector<16x256xf32>
    %6 = arith.addf %3, %5 : vector<16x256xf32>
    %cst_6 = arith.constant dense<0.000000e+00> : vector<256xf32>
    %7 = vector.multi_reduction <add>, %6, %cst_6 [0] : vector<16x256xf32> to vector<256xf32>
    %8 = vector.shape_cast %7 : vector<256xf32> to vector<1x256xf32>
    %cst_7 = arith.constant 1.600000e+01 : f32
    %9 = vector.broadcast %cst_7 : f32 to vector<1x256xf32>
    %10 = arith.divf %8, %9 : vector<1x256xf32>
    %11 = vector.broadcast %10 : vector<1x256xf32> to vector<16x256xf32>
    %12 = arith.subf %6, %11 : vector<16x256xf32>
    %13 = arith.mulf %12, %12 : vector<16x256xf32>
    %cst_8 = arith.constant dense<0.000000e+00> : vector<256xf32>
    %14 = vector.multi_reduction <add>, %13, %cst_8 [0] : vector<16x256xf32> to vector<256xf32>
    %15 = vector.shape_cast %14 : vector<256xf32> to vector<1x256xf32>
    %cst_9 = arith.constant 1.600000e+01 : f32
    %16 = vector.broadcast %cst_9 : f32 to vector<1x256xf32>
    %17 = arith.divf %15, %16 : vector<1x256xf32>
    %cst_10 = arith.constant 9.99999974E-6 : f32
    %18 = vector.broadcast %cst_10 : f32 to vector<1x256xf32>
    %19 = arith.addf %17, %18 : vector<1x256xf32>
    %20 = math.rsqrt %19 : vector<1x256xf32>
    %21 = vector.broadcast %20 : vector<1x256xf32> to vector<16x256xf32>
    %22 = arith.mulf %12, %21 : vector<16x256xf32>
    %cst_11 = arith.constant 0.000000e+00 : f32
    %23 = vector.broadcast %cst_11 : f32 to vector<16x256xf32>
    %24 = arith.cmpf oge, %22, %23 : vector<16x256xf32>
    %cst_12 = arith.constant 2.000000e-01 : f32
    %25 = vector.broadcast %cst_12 : f32 to vector<16x256xf32>
    %26 = arith.mulf %25, %22 : vector<16x256xf32>
    %27 = arith.select %24, %22, %26 : vector<16x256xi1>, vector<16x256xf32>
    %28 = arith.truncf %27 : vector<16x256xf32> to vector<16x256xbf16>
    %c0_13 = arith.constant 0 : index
    %c0_14 = arith.constant 0 : index
    %c0_15 = arith.constant 0 : index
    %29 = vector.load %arg4[%c0_13, %c0_14, %c0_15] : memref<1x16x256xbf16, #tpu.memory_space<vmem>>, vector<1x16x256xbf16>
    %30 = vector.shape_cast %29 : vector<1x16x256xbf16> to vector<16x256xbf16>
    %31 = vector.shape_cast %28 : vector<16x256xbf16> to vector<1x16x256xbf16>
    tpu.vector_store %arg4[%c0_13, %c0_14, %c0_15], %31 {strides = array<i32>} : memref<1x16x256xbf16, #tpu.memory_space<vmem>>, vector<1x16x256xbf16>,
    return
  }
  func.func @transform_0(%arg0: i32) -> (i32, i32, i32) {
    %c0_i32 = arith.constant 0 : i32
    %c0_i32_0 = arith.constant 0 : i32
    %c0_i32_1 = arith.constant 0 : i32
    return %arg0, %c0_i32, %c0_i32_0 : i32, i32, i32
  }
  func.func @transform_1(%arg0: i32) -> (i32, i32) {
    %c0_i32 = arith.constant 0 : i32
    %c0_i32_0 = arith.constant 0 : i32
    %c0_i32_1 = arith.constant 0 : i32
    return %c0_i32, %c0_i32_0 : i32, i32
  }
  func.func @transform_2(%arg0: i32) -> (i32, i32) {
    %c0_i32 = arith.constant 0 : i32
    %c0_i32_0 = arith.constant 0 : i32
    %c0_i32_1 = arith.constant 0 : i32
    return %c0_i32, %c0_i32_0 : i32, i32
  }
  func.func @transform_3(%arg0: i32) -> (i32, i32, i32) {
    %c0_i32 = arith.constant 0 : i32
    %c0_i32_0 = arith.constant 0 : i32
    %c0_i32_1 = arith.constant 0 : i32
    return %arg0, %c0_i32, %c0_i32_0 : i32, i32, i32
  }
}

module attributes {stable_mosaic.version = 11 : i64} {
  func.func @conv_inorm_lrelu_kernel(%arg0: i32, %arg1: memref<1x4x2304xbf16, #tpu.memory_space<vmem>>, %arg2: memref<2304x512xbf16, #tpu.memory_space<vmem>>, %arg3: memref<1x512xf32, #tpu.memory_space<vmem>>, %arg4: memref<1x4x512xbf16, #tpu.memory_space<vmem>>) attributes {dimension_semantics = [#tpu.dimension_semantics<parallel>], iteration_bounds = array<i64: 2>, scalar_prefetch = 0 : i64, scratch_operands = 0 : i64, tpu.core_type = #tpu.core_type<tc>, window_params = [{transform_indices = @transform_0, window_bounds = array<i64: 1, 4, 2304>}, {pipeline_mode = #tpu.pipeline_mode<synchronous>, transform_indices = @transform_1, window_bounds = array<i64: 2304, 512>}, {pipeline_mode = #tpu.pipeline_mode<synchronous>, transform_indices = @transform_2, window_bounds = array<i64: 1, 512>}, {transform_indices = @transform_3, window_bounds = array<i64: 1, 4, 512>}]} {
    %c0 = arith.constant 0 : index
    %c0_0 = arith.constant 0 : index
    %c0_1 = arith.constant 0 : index
    %0 = vector.load %arg1[%c0, %c0_0, %c0_1] : memref<1x4x2304xbf16, #tpu.memory_space<vmem>>, vector<1x4x2304xbf16>
    %1 = vector.shape_cast %0 : vector<1x4x2304xbf16> to vector<4x2304xbf16>
    %c0_2 = arith.constant 0 : index
    %c0_3 = arith.constant 0 : index
    %2 = vector.load %arg2[%c0_2, %c0_3] : memref<2304x512xbf16, #tpu.memory_space<vmem>>, vector<2304x512xbf16>
    %cst = arith.constant dense<0.000000e+00> : vector<4x512xf32>
    %3 = tpu.matmul %1, %2, %cst {dimension_numbers = #tpu.dot_dimension_numbers<[1], [0], [0], [1], [0, 0, 1, 1], [], []>} : vector<4x2304xbf16>, vector<2304x512xbf16>, vector<4x512xf32> -> vector<4x512xf32>
    %c0_4 = arith.constant 0 : index
    %c0_5 = arith.constant 0 : index
    %4 = vector.load %arg3[%c0_4, %c0_5] : memref<1x512xf32, #tpu.memory_space<vmem>>, vector<1x512xf32>
    %5 = vector.broadcast %4 : vector<1x512xf32> to vector<4x512xf32>
    %6 = arith.addf %3, %5 : vector<4x512xf32>
    %cst_6 = arith.constant dense<0.000000e+00> : vector<512xf32>
    %7 = vector.multi_reduction <add>, %6, %cst_6 [0] : vector<4x512xf32> to vector<512xf32>
    %8 = vector.shape_cast %7 : vector<512xf32> to vector<1x512xf32>
    %cst_7 = arith.constant 4.000000e+00 : f32
    %9 = vector.broadcast %cst_7 : f32 to vector<1x512xf32>
    %10 = arith.divf %8, %9 : vector<1x512xf32>
    %11 = vector.broadcast %10 : vector<1x512xf32> to vector<4x512xf32>
    %12 = arith.subf %6, %11 : vector<4x512xf32>
    %13 = arith.mulf %12, %12 : vector<4x512xf32>
    %cst_8 = arith.constant dense<0.000000e+00> : vector<512xf32>
    %14 = vector.multi_reduction <add>, %13, %cst_8 [0] : vector<4x512xf32> to vector<512xf32>
    %15 = vector.shape_cast %14 : vector<512xf32> to vector<1x512xf32>
    %cst_9 = arith.constant 4.000000e+00 : f32
    %16 = vector.broadcast %cst_9 : f32 to vector<1x512xf32>
    %17 = arith.divf %15, %16 : vector<1x512xf32>
    %cst_10 = arith.constant 9.99999974E-6 : f32
    %18 = vector.broadcast %cst_10 : f32 to vector<1x512xf32>
    %19 = arith.addf %17, %18 : vector<1x512xf32>
    %20 = math.rsqrt %19 : vector<1x512xf32>
    %21 = vector.broadcast %20 : vector<1x512xf32> to vector<4x512xf32>
    %22 = arith.mulf %12, %21 : vector<4x512xf32>
    %cst_11 = arith.constant 0.000000e+00 : f32
    %23 = vector.broadcast %cst_11 : f32 to vector<4x512xf32>
    %24 = arith.cmpf oge, %22, %23 : vector<4x512xf32>
    %cst_12 = arith.constant 2.000000e-01 : f32
    %25 = vector.broadcast %cst_12 : f32 to vector<4x512xf32>
    %26 = arith.mulf %25, %22 : vector<4x512xf32>
    %27 = arith.select %24, %22, %26 : vector<4x512xi1>, vector<4x512xf32>
    %28 = arith.truncf %27 : vector<4x512xf32> to vector<4x512xbf16>
    %c0_13 = arith.constant 0 : index
    %c0_14 = arith.constant 0 : index
    %c0_15 = arith.constant 0 : index
    %29 = vector.load %arg4[%c0_13, %c0_14, %c0_15] : memref<1x4x512xbf16, #tpu.memory_space<vmem>>, vector<1x4x512xbf16>
    %30 = vector.shape_cast %29 : vector<1x4x512xbf16> to vector<4x512xbf16>
    %31 = vector.shape_cast %28 : vector<4x512xbf16> to vector<1x4x512xbf16>
    tpu.vector_store %arg4[%c0_13, %c0_14, %c0_15], %31 {strides = array<i32>} : memref<1x4x512xbf16, #tpu.memory_space<vmem>>, vector<1x4x512xbf16>,
    return
  }
  func.func @transform_0(%arg0: i32) -> (i32, i32, i32) {
    %c0_i32 = arith.constant 0 : i32
    %c0_i32_0 = arith.constant 0 : i32
    %c0_i32_1 = arith.constant 0 : i32
    return %arg0, %c0_i32, %c0_i32_0 : i32, i32, i32
  }
  func.func @transform_1(%arg0: i32) -> (i32, i32) {
    %c0_i32 = arith.constant 0 : i32
    %c0_i32_0 = arith.constant 0 : i32
    %c0_i32_1 = arith.constant 0 : i32
    return %c0_i32, %c0_i32_0 : i32, i32
  }
  func.func @transform_2(%arg0: i32) -> (i32, i32) {
    %c0_i32 = arith.constant 0 : i32
    %c0_i32_0 = arith.constant 0 : i32
    %c0_i32_1 = arith.constant 0 : i32
    return %c0_i32, %c0_i32_0 : i32, i32
  }
  func.func @transform_3(%arg0: i32) -> (i32, i32, i32) {
    %c0_i32 = arith.constant 0 : i32
    %c0_i32_0 = arith.constant 0 : i32
    %c0_i32_1 = arith.constant 0 : i32
    return %arg0, %c0_i32, %c0_i32_0 : i32, i32, i32
  }
}

module attributes {stable_mosaic.version = 11 : i64} {
  func.func @conv_bias_kernel(%arg0: i32, %arg1: memref<1x4x4608xbf16, #tpu.memory_space<vmem>>, %arg2: memref<4608x128xbf16, #tpu.memory_space<vmem>>, %arg3: memref<1x128xf32, #tpu.memory_space<vmem>>, %arg4: memref<1x4x128xf32, #tpu.memory_space<vmem>>) attributes {dimension_semantics = [#tpu.dimension_semantics<parallel>], iteration_bounds = array<i64: 2>, scalar_prefetch = 0 : i64, scratch_operands = 0 : i64, tpu.core_type = #tpu.core_type<tc>, window_params = [{transform_indices = @transform_0, window_bounds = array<i64: 1, 4, 4608>}, {pipeline_mode = #tpu.pipeline_mode<synchronous>, transform_indices = @transform_1, window_bounds = array<i64: 4608, 128>}, {pipeline_mode = #tpu.pipeline_mode<synchronous>, transform_indices = @transform_2, window_bounds = array<i64: 1, 128>}, {transform_indices = @transform_3, window_bounds = array<i64: 1, 4, 128>}]} {
    %c0 = arith.constant 0 : index
    %c0_0 = arith.constant 0 : index
    %c0_1 = arith.constant 0 : index
    %0 = vector.load %arg1[%c0, %c0_0, %c0_1] : memref<1x4x4608xbf16, #tpu.memory_space<vmem>>, vector<1x4x4608xbf16>
    %1 = vector.shape_cast %0 : vector<1x4x4608xbf16> to vector<4x4608xbf16>
    %c0_2 = arith.constant 0 : index
    %c0_3 = arith.constant 0 : index
    %2 = vector.load %arg2[%c0_2, %c0_3] : memref<4608x128xbf16, #tpu.memory_space<vmem>>, vector<4608x128xbf16>
    %cst = arith.constant dense<0.000000e+00> : vector<4x128xf32>
    %3 = tpu.matmul %1, %2, %cst {dimension_numbers = #tpu.dot_dimension_numbers<[1], [0], [0], [1], [0, 0, 1, 1], [], []>} : vector<4x4608xbf16>, vector<4608x128xbf16>, vector<4x128xf32> -> vector<4x128xf32>
    %c0_4 = arith.constant 0 : index
    %c0_5 = arith.constant 0 : index
    %4 = vector.load %arg3[%c0_4, %c0_5] : memref<1x128xf32, #tpu.memory_space<vmem>>, vector<1x128xf32>
    %5 = vector.broadcast %4 : vector<1x128xf32> to vector<4x128xf32>
    %6 = arith.addf %3, %5 : vector<4x128xf32>
    %c0_6 = arith.constant 0 : index
    %c0_7 = arith.constant 0 : index
    %c0_8 = arith.constant 0 : index
    %7 = vector.load %arg4[%c0_6, %c0_7, %c0_8] : memref<1x4x128xf32, #tpu.memory_space<vmem>>, vector<1x4x128xf32>
    %8 = vector.shape_cast %7 : vector<1x4x128xf32> to vector<4x128xf32>
    %9 = vector.shape_cast %6 : vector<4x128xf32> to vector<1x4x128xf32>
    tpu.vector_store %arg4[%c0_6, %c0_7, %c0_8], %9 {strides = array<i32>} : memref<1x4x128xf32, #tpu.memory_space<vmem>>, vector<1x4x128xf32>,
    return
  }
  func.func @transform_0(%arg0: i32) -> (i32, i32, i32) {
    %c0_i32 = arith.constant 0 : i32
    %c0_i32_0 = arith.constant 0 : i32
    %c0_i32_1 = arith.constant 0 : i32
    return %arg0, %c0_i32, %c0_i32_0 : i32, i32, i32
  }
  func.func @transform_1(%arg0: i32) -> (i32, i32) {
    %c0_i32 = arith.constant 0 : i32
    %c0_i32_0 = arith.constant 0 : i32
    %c0_i32_1 = arith.constant 0 : i32
    return %c0_i32, %c0_i32_0 : i32, i32
  }
  func.func @transform_2(%arg0: i32) -> (i32, i32) {
    %c0_i32 = arith.constant 0 : i32
    %c0_i32_0 = arith.constant 0 : i32
    %c0_i32_1 = arith.constant 0 : i32
    return %c0_i32, %c0_i32_0 : i32, i32
  }
  func.func @transform_3(%arg0: i32) -> (i32, i32, i32) {
    %c0_i32 = arith.constant 0 : i32
    %c0_i32_0 = arith.constant 0 : i32
    %c0_i32_1 = arith.constant 0 : i32
    return %arg0, %c0_i32, %c0_i32_0 : i32, i32, i32
  }
}

</mosaic_0001>

<bundles_post_ra>
// kernel: discriminator_forward.5
= control target key start
LH: loop header
LB: loop body
LE: loop exit
PB: predicated region body
PF: predicated region fallthrough
CT: control target
= control target key end

     0   :  { %8 = vsyncpa [#allocation3], 0  ;;  %s1407_s12 = smov 0   ;;  %s2266_s0 = inlined_call_operand.vmem [shape: bf16[2,256,128], index: 0, kind: input, shape index: {}]   ;;  %s2267_s1 = inlined_call_operand.vmem [shape: bf16[128,64], index: 1, kind: input, shape index: {}]   ;;  %s2268_s2 = inlined_call_operand.hbm [shape: f32[1,64], index: 2, kind: input, shape index: {}]   ;;  %s2269_s3 = inlined_call_operand.vmem [shape: bf16[2,256,64], index: 3, kind: output, shape index: {}]  }
   0x1 LB: > { %s1413_s13 = sadd.s32 4294967295, %s1384_s12   ;;  %p1111_p0 = scmp.ge.s32.totalorder %s1384_s12, 1  ;;  %s1384_s12 = sphi %s1407_s12, %s14_s12  }
   0x2   : > { %p113_p1 = scmp.lt.s32.totalorder %s1384_s12, 3  ;;  %p2270_p3 = scmp.eq.s32.totalorder %s1413_s13, 0 }
   0x3   : > { %s1386_s15 = smov [#allocation2]   ;;  %s1346_s20 = scalar_lea.hbm %s2268_s2, 16 }
   0x4   : > { %p1417_p2 = pnand %p1111_p0, %p113_p1  ;;  %s129_s16 = sshll.u32 %s1386_s15, 4  ;;  %s130_s16 = int_to_ptr.vmem [resolvable:$true] %s129_s16 }
   0x5   : > { %p1347_p6 = scmp.ne.s32.totalorder %s2268_s2, %s1346_s20  ;;  %p1353_p10 = scmp.lt.u32.totalorder %s1346_s20, %s2268_s2 }
   0x6   : > { %s2272_s14 = scalar_select %p1417_p2, 1, 0 }
   0x7   : > { %p1305_p4 = pneg %p1417_p2 }
   0x9   : > { %p1426_p5 = pnand %p2270_p3, %p1305_p4 }
   0xb   : > { %p1348_p7 = pneg %p1426_p5 }
   0xd   : > { %p1349_p8 = pnand %p1348_p7, %p1347_p6 }
   0xf   : > { %p1350_p9 = pneg %p1349_p8 }
  0x11   : > { %p1355_p11 = pnand %p1353_p10, %p1350_p9 }
  0x13   : > { %1358 = shalt.err (!%p1355_p11)
}
  0x14   : > { %s1359_s25 = scalar_lea.vmem %s130_s16, 16  ;;  %s1366_s26 = scalar_lea.vmem %s130_s16, 32 }
  0x15   : > { %p1360_p12 = scmp.ne.s32.totalorder %s130_s16, %s1359_s25  ;;  %p1367_p1 = scmp.lt.s32.totalorder %s130_s16, %s130_s16 }
  0x16   : > { %p1368_p4 = scmp.lt.s32.totalorder %s1366_s26, %s1359_s25 }
  0x17   : > { %p1362_p13 = pnand %p1360_p12, %p1348_p7 }
  0x18   : > { %p1369_p3 = por %p1368_p4, %p1367_p1 }
  0x19   : > { %p1363_p0 = pneg %p1362_p13 }
  0x1b   : > { %p1370_p2 = pnand %p1369_p3, %p1363_p0 }
  0x1d   : > { %1373 = shalt.err (!%p1370_p2)
}
  0x1e   : > { %1308 = dma.hbm_to_vmem [thread:$0]  (!%p1426_p5), %s2268_s2, 16, %s130_s16, [#allocation3]  }
  0x1f   : > { %p2274_p6 = scmp.ne.s32.totalorder %s2272_s14, 0 }
  0x20   : > { %p2275_p8 = scmp.eq.s32.totalorder (!%p2274_p6), %s1413_s13, 0 }
  0x21   : > { %150 = sbr.rel (%p2274_p6) target bundleno = 515 (0x203), region = 32 }
  0x28   : > { %1379 = dma.done.wait (%p2275_p8), [#allocation3], 16   ;;  %p2276_p7 = pmov %p2275_p8 }
  0x29   : > { %p174_p9 = scmp.lt.s32.totalorder %s1413_s13, 1  ;;  %v1320_v0 = vld [vmem:[%s2267_s1] sm:$0xff]   ;;  %v1321_v1 = vld [vmem:[%s2267_s1 + $0x8] sm:$0xff]   ;;  %v1322_v2 = vld [vmem:[%s2267_s1 + $0x10] sm:$0xff]   ;;  %vm545_vm0 = vcmask 523264  }
  0x2a   : > { %1381 = vsyncadd (%p2276_p7), [#allocation3], 4294967280  ;;  %1237 = vmatprep.subr.bf16.mxu0 %v1320_v0  ;;  %1285 = vmatprep.subr.bf16.mxu1 %v1320_v0  ;;  %v1323_v3 = vld [vmem:[%s2267_s1 + $0x18] sm:$0xff]   ;;  %v1324_v5 = vld [vmem:[%s2267_s1 + $0x20] sm:$0xff]  }
  0x2b   : > { %s2292_s13 = smov (!%p174_p9, %s1413_s13), 1  ;;  %1238 = vmatpush3.bf16.msra.mxu0 %v1320_v0  ;;  %1293 = vmatpush3.bf16.msra.mxu1 %v1320_v0  ;;  %v1325_v6 = vld [vmem:[%s2267_s1 + $0x28] sm:$0xff]   ;;  %v1326_v8 = vld [vmem:[%s2267_s1 + $0x30] sm:$0xff]   ;;  %v1327_v9 = vld [vmem:[%s2267_s1 + $0x38] sm:$0xff]  }
  0x2c   : > { %s1179_s6 = sshll.u32 %s2292_s13, 7  ;;  %1239 = vmatprep.subr.bf16.mxu0 %v1321_v1  ;;  %1286 = vmatprep.subr.bf16.mxu1 %v1321_v1  ;;  %v1504_v24 = vld [vmem:[#allocation2] ss:$0 sm:$0xff] }
  0x2d   : > { %s1471_s11 = scalar_lea.vmem %s2266_s0, %s1179_s6  ;;  %s2131_s26 = scalar_lea.vmem %s2269_s3, %s1179_s6 }
  0x2e   : > { %v1328_v4 = vld [vmem:[%s1471_s11] sm:$0xff]   ;;  %v1329_v10 = vld [vmem:[%s1471_s11 + $0x8] sm:$0xff]   ;;  %v1330_v12 = vld [vmem:[%s1471_s11 + $0x10] sm:$0xff]  }
  0x2f   : > { %1240 = vmatpush3.bf16.msra.mxu0 %v1321_v1  ;;  %1294 = vmatpush3.bf16.msra.mxu1 %v1321_v1  ;;  %v1336_v7 = vld [vmem:[%s1471_s11 + $0x40] sm:$0xff]   ;;  %v1337_v11 = vld [vmem:[%s1471_s11 + $0x48] sm:$0xff]   ;;  %v1338_v13 = vld [vmem:[%s1471_s11 + $0x50] sm:$0xff]  }
  0x30   : > { %1241 = vmatprep.subr.bf16.mxu0 %v1322_v2  ;;  %1287 = vmatprep.subr.bf16.mxu1 %v1322_v2  ;;  %v1331_v14 = vld [vmem:[%s1471_s11 + $0x18] sm:$0xff]   ;;  %v1332_v16 = vld [vmem:[%s1471_s11 + $0x20] sm:$0xff]   ;;  %v1333_v18 = vld [vmem:[%s1471_s11 + $0x28] sm:$0xff]  }
  0x31   : > { %1253 = vmatprep.mubr.bf16.mxu0 %v1328_v4  ;;  %1269 = vmatprep.mubr.bf16.mxu1 %v1336_v7  ;;  %v1339_v15 = vld [vmem:[%s1471_s11 + $0x58] sm:$0xff]   ;;  %v1340_v17 = vld [vmem:[%s1471_s11 + $0x60] sm:$0xff]   ;;  %v1341_v19 = vld [vmem:[%s1471_s11 + $0x68] sm:$0xff]  }
  0x32   : > { %v1334_v20 = vld [vmem:[%s1471_s11 + $0x30] sm:$0xff]   ;;  %v1335_v22 = vld [vmem:[%s1471_s11 + $0x38] sm:$0xff]  }
  0x33   : > { %1242 = vmatpush3.bf16.msra.mxu0 %v1322_v2  ;;  %1295 = vmatpush3.bf16.msra.mxu1 %v1322_v2  ;;  %v1342_v21 = vld [vmem:[%s1471_s11 + $0x70] sm:$0xff]   ;;  %v1343_v23 = vld [vmem:[%s1471_s11 + $0x78] sm:$0xff]  }
  0x34   : > { %1243 = vmatprep.subr.bf16.mxu0 %v1323_v3  ;;  %1288 = vmatprep.subr.bf16.mxu1 %v1323_v3 }
  0x37   : > { %1244 = vmatpush3.bf16.msra.mxu0 %v1323_v3  ;;  %1296 = vmatpush3.bf16.msra.mxu1 %v1323_v3 }
  0x38   : > { %1245 = vmatprep.subr.bf16.mxu0 %v1324_v5  ;;  %1289 = vmatprep.subr.bf16.mxu1 %v1324_v5 }
  0x3b   : > { %1246 = vmatpush3.bf16.msra.mxu0 %v1324_v5  ;;  %1297 = vmatpush3.bf16.msra.mxu1 %v1324_v5 }
  0x3c   : > { %1247 = vmatprep.subr.bf16.mxu0 %v1325_v6  ;;  %1290 = vmatprep.subr.bf16.mxu1 %v1325_v6 }
  0x3f   : > { %1248 = vmatpush3.bf16.msra.mxu0 %v1325_v6  ;;  %1298 = vmatpush3.bf16.msra.mxu1 %v1325_v6 }
  0x40   : > { %1249 = vmatprep.subr.bf16.mxu0 %v1326_v8  ;;  %1291 = vmatprep.subr.bf16.mxu1 %v1326_v8 }
  0x43   : > { %1250 = vmatpush3.bf16.msra.mxu0 %v1326_v8  ;;  %1299 = vmatpush3.bf16.msra.mxu1 %v1326_v8 }
  0x44   : > { %1251 = vmatprep.subr.bf16.mxu0 %v1327_v9  ;;  %1292 = vmatprep.subr.bf16.mxu1 %v1327_v9 }
  0x47   : > { %1252 = vmatpush3.bf16.msra.mxu0 %v1327_v9  ;;  %1300 = vmatpush3.bf16.msra.mxu1 %v1327_v9 }
  0x4a   : > { %1254 = vmatmul.mubr.bf16.vlgmr.msra.gmra.mrb[0].mxu0 %v1329_v10  ;;  %1270 = vmatmul.mubr.bf16.vlgmr.msra.gmra.mrb[0].mxu1 %v1337_v11 }
  0x4b   : > { %1257 = vmatprep.mubr.bf16.mxu0 %v1330_v12  ;;  %1273 = vmatprep.mubr.bf16.mxu1 %v1338_v13 }
  0x52   : > { %1258 = vmatmul.mubr.bf16.gmra.mrb[4].mxu0 %v1331_v14  ;;  %1274 = vmatmul.mubr.bf16.gmra.mrb[4].mxu1 %v1339_v15 }
  0x53   : > { %1261 = vmatprep.mubr.bf16.mxu0 %v1332_v16  ;;  %1277 = vmatprep.mubr.bf16.mxu1 %v1340_v17 }
  0x5a   : > { %1262 = vmatmul.mubr.bf16.gmra.mrb[8].mxu0 %v1333_v18  ;;  %1278 = vmatmul.mubr.bf16.gmra.mrb[8].mxu1 %v1341_v19 }
  0x5b   : > { %1265 = vmatprep.mubr.bf16.mxu0 %v1334_v20  ;;  %1281 = vmatprep.mubr.bf16.mxu1 %v1342_v21 }
  0x62   : > { %1266 = vmatmul.mubr.bf16.gmra.mrb[12].mxu0 %v1335_v22  ;;  %1282 = vmatmul.mubr.bf16.gmra.mrb[12].mxu1 %v1343_v23 }
 0x11d   : > { %v1255_v25 = vpop.f32.mrb[0].mxu0  ;;  %v1506_v26 = vpop.f32.mrb[0].mxu1 }
 0x11e   : > { %v418_v27 = vpop.f32.mrb[1].mxu0  ;;  %v1508_v28 = vpop.f32.mrb[1].mxu1  ;;  %v1518_v34 = vadd.f32 %v1255_v25, %v1504_v24 }
 0x11f   : > { %v1511_v29 = vadd.f32 %v1504_v24, %v418_v27  ;;  %v1256_v30 = vpop.f32.mrb[2].mxu0  ;;  %v1513_v31 = vpop.f32.mrb[2].mxu1 }
 0x120   : > { %v421_v32 = vpop.f32.mrb[3].mxu0  ;;  %v1515_v33 = vpop.f32.mrb[3].mxu1  ;;  %v1526_v37 = vadd.f32 %v1256_v30, %v1504_v24  ;;  %v549_v40 = vsel %vm545_vm0, %v1518_v34, 0.0 }
 0x121   : > { %v1521_v35 = vadd.f32 %v1504_v24, %v421_v32  ;;  %v546_v36 = vsel %vm545_vm0, %v1511_v29, 0.0 }
 0x122   : > { %v551_v46 = vsel %vm545_vm0, %v1526_v37, 0.0 }
 0x123   : > { %v547_v38 = vsel %vm545_vm0, %v1521_v35, 0.0 }
 0x124   : > { %v548_v39 = vadd.f32 %v547_v38, %v546_v36 }
 0x125   : > { %v1259_v41 = vpop.f32.mrb[4].mxu0  ;;  %v1532_v42 = vpop.f32.mrb[4].mxu1 }
 0x126   : > { %v550_v43 = vadd.f32 %v549_v40, %v548_v39  ;;  %v434_v44 = vpop.f32.mrb[5].mxu0  ;;  %v1534_v45 = vpop.f32.mrb[5].mxu1  ;;  %v1546_v53 = vadd.f32 %v1259_v41, %v1504_v24 }
 0x127   : > { %v1539_v47 = vadd.f32 %v1504_v24, %v434_v44  ;;  %v1260_v48 = vpop.f32.mrb[6].mxu0  ;;  %v1541_v49 = vpop.f32.mrb[6].mxu1 }
 0x128   : > { %v552_v50 = vadd.f32 %v551_v46, %v550_v43  ;;  %v437_v51 = vpop.f32.mrb[7].mxu0  ;;  %v1543_v52 = vpop.f32.mrb[7].mxu1  ;;  %v1554_v57 = vadd.f32 %v1260_v48, %v1504_v24  ;;  %v557_v60 = vsel %vm545_vm0, %v1546_v53, 0.0  ;;  %v1604_v46 = vadd.f32 %v1504_v24, %v1508_v28 }
 0x129   : > { %v553_v54 = vsel %vm545_vm0, %v1539_v47, 0.0  ;;  %v1551_v55 = vadd.f32 %v1504_v24, %v437_v51  ;;  %v1618_v28 = vadd.f32 %v1506_v26, %v1504_v24 }
 0x12a   : > { %v554_v56 = vadd.f32 %v553_v54, %v552_v50  ;;  %v559_v2 = vsel %vm545_vm0, %v1554_v57, 0.0 }
 0x12b   : > { %v555_v58 = vsel %vm545_vm0, %v1551_v55, 0.0 }
 0x12c   : > { %v556_v59 = vadd.f32 %v555_v58, %v554_v56  ;;  %v577_v56 = vsel %vm545_vm0, %v1604_v46, 0.0  ;;  %v1614_v58 = vadd.f32 %v1504_v24, %v1515_v33  ;;  %v581_v33 = vsel %vm545_vm0, %v1618_v28, 0.0 }
 0x12d   : > { %v1263_v61 = vpop.f32.mrb[8].mxu0  ;;  %v1560_v62 = vpop.f32.mrb[8].mxu1 }
 0x12e   : > { %v558_v63 = vadd.f32 %v557_v60, %v556_v59  ;;  %v450_v0 = vpop.f32.mrb[9].mxu0  ;;  %v514_v1 = vpop.f32.mrb[9].mxu1  ;;  %v1570_v9 = vadd.f32 %v1263_v61, %v1504_v24  ;;  %v1622_v61 = vadd.f32 %v1513_v31, %v1504_v24  ;;  %v1638_v31 = vadd.f32 %v1504_v24, %v1543_v52 }
 0x12f   : > { %v1565_v3 = vadd.f32 %v1504_v24, %v450_v0  ;;  %v1264_v4 = vpop.f32.mrb[10].mxu0  ;;  %v1567_v5 = vpop.f32.mrb[10].mxu1  ;;  %v1628_v0 = vadd.f32 %v1504_v24, %v1534_v45  ;;  %v1642_v45 = vadd.f32 %v1532_v42, %v1504_v24 }
 0x130   : > { %v560_v6 = vadd.f32 %v559_v2, %v558_v63  ;;  %v453_v7 = vpop.f32.mrb[11].mxu0  ;;  %v517_v8 = vpop.f32.mrb[11].mxu1  ;;  %v1578_v13 = vadd.f32 %v1264_v4, %v1504_v24  ;;  %v565_v16 = vsel %vm545_vm0, %v1570_v9, 0.0  ;;  %v579_v63 = vsel %vm545_vm0, %v1614_v58, 0.0 }
 0x131   : > { %v561_v10 = vsel %vm545_vm0, %v1565_v3, 0.0  ;;  %v1575_v11 = vadd.f32 %v1504_v24, %v453_v7  ;;  %v583_v26 = vsel %vm545_vm0, %v1622_v61, 0.0  ;;  %v589_v52 = vsel %vm545_vm0, %v1642_v45, 0.0 }
 0x132   : > { %v562_v12 = vadd.f32 %v561_v10, %v560_v6  ;;  %v567_v22 = vsel %vm545_vm0, %v1578_v13, 0.0  ;;  %v585_v6 = vsel %vm545_vm0, %v1628_v0, 0.0 }
 0x133   : > { %v563_v14 = vsel %vm545_vm0, %v1575_v11, 0.0 }
 0x134   : > { %v564_v15 = vadd.f32 %v563_v14, %v562_v12  ;;  %v1646_v12 = vadd.f32 %v1541_v49, %v1504_v24  ;;  %v587_v14 = vsel %vm545_vm0, %v1638_v31, 0.0  ;;  %v1660_v49 = vadd.f32 %v1504_v24, %v517_v8 }
 0x135   : > { %v1267_v17 = vpop.f32.mrb[12].mxu0  ;;  %v1283_v18 = vpop.f32.mrb[12].mxu1 }
 0x136   : > { %v566_v19 = vadd.f32 %v565_v16, %v564_v15  ;;  %v466_v20 = vpop.f32.mrb[13].mxu0  ;;  %v530_v21 = vpop.f32.mrb[13].mxu1  ;;  %v1590_v38 = vadd.f32 %v1267_v17, %v1504_v24  ;;  %v1651_v15 = vadd.f32 %v1504_v24, %v514_v1  ;;  %v591_v42 = vsel %vm545_vm0, %v1646_v12, 0.0 }
 0x137   : > { %v1587_v23 = vadd.f32 %v1504_v24, %v466_v20  ;;  %v1268_v25 = vpop.f32.mrb[14].mxu0  ;;  %v1284_v27 = vpop.f32.mrb[14].mxu1 }
 0x138   : > { %v568_v30 = vadd.f32 %v567_v22, %v566_v19  ;;  %v469_v32 = vpop.f32.mrb[15].mxu0  ;;  %v533_v36 = vpop.f32.mrb[15].mxu1  ;;  %v1598_v43 = vadd.f32 %v1268_v25, %v1504_v24  ;;  %v573_v50 = vsel %vm545_vm0, %v1590_v38, 0.0  ;;  %v593_v19 = vsel %vm545_vm0, %v1651_v15, 0.0 }
 0x139   : > { %v569_v39 = vsel %vm545_vm0, %v1587_v23, 0.0  ;;  %v1595_v40 = vadd.f32 %v1504_v24, %v469_v32  ;;  %v1664_v22 = vadd.f32 %v1560_v62, %v1504_v24  ;;  %v1668_v25 = vadd.f32 %v1567_v5, %v1504_v24 }
 0x13a   : > { %v570_v41 = vadd.f32 %v569_v39, %v568_v30  ;;  %v575_v54 = vsel %vm545_vm0, %v1598_v43, 0.0  ;;  %v595_v30 = vsel %vm545_vm0, %v1660_v49, 0.0  ;;  %v531_v32 = vadd.f32 %v1504_v24, %v530_v21 }
 0x13b   : > { %v571_v44 = vsel %vm545_vm0, %v1595_v40, 0.0  ;;  %v597_v8 = vsel %vm545_vm0, %v1664_v22, 0.0  ;;  %v539_v5 = vadd.f32 %v1283_v18, %v1504_v24 }
 0x13c   : > { %v572_v48 = vadd.f32 %v571_v44, %v570_v41  ;;  %v599_v44 = vsel %vm545_vm0, %v1668_v25, 0.0  ;;  %v601_v62 = vsel %vm545_vm0, %v531_v32, 0.0 }
 0x13e   : > { %v574_v51 = vadd.f32 %v573_v50, %v572_v48  ;;  %v534_v48 = vadd.f32 %v1504_v24, %v533_v36 }
 0x140   : > { %v576_v59 = vadd.f32 %v575_v54, %v574_v51  ;;  %v542_v54 = vadd.f32 %v1284_v27, %v1504_v24  ;;  %v603_v21 = vsel %vm545_vm0, %v534_v48, 0.0 }
 0x142   : > { %v578_v60 = vadd.f32 %v577_v56, %v576_v59  ;;  %v605_v59 = vsel %vm545_vm0, %v539_v5, 0.0 }
 0x144   : > { %v580_v2 = vadd.f32 %v579_v63, %v578_v60  ;;  %v607_v63 = vsel %vm545_vm0, %v542_v54, 0.0 }
 0x146   : > { %v582_v4 = vadd.f32 %v581_v33, %v580_v2 }
 0x148   : > { %v584_v7 = vadd.f32 %v583_v26, %v582_v4 }
 0x14a   : > { %v586_v10 = vadd.f32 %v585_v6, %v584_v7 }
 0x14c   : > { %v588_v16 = vadd.f32 %v587_v14, %v586_v10 }
 0x14e   : > { %v590_v17 = vadd.f32 %v589_v52, %v588_v16 }
 0x150   : > { %v592_v20 = vadd.f32 %v591_v42, %v590_v17 }
 0x152   : > { %v594_v1 = vadd.f32 %v593_v19, %v592_v20 }
 0x154   : > { %v596_v39 = vadd.f32 %v595_v30, %v594_v1 }
 0x156   : > { %v598_v41 = vadd.f32 %v597_v8, %v596_v39 }
 0x158   : > { %v600_v50 = vadd.f32 %v599_v44, %v598_v41 }
 0x15a   : > { %v602_v51 = vadd.f32 %v601_v62, %v600_v50 }
 0x15c   : > { %v604_v56 = vadd.f32 %v603_v21, %v602_v51 }
 0x15e   : > { %v606_v60 = vadd.f32 %v605_v59, %v604_v56 }
 0x160   : > { %v608_v2 = vadd.f32 %v607_v63, %v606_v60 }
 0x162   : > { %v609_v33 = vrot.slane %v608_v2, 4 }
 0x164   : > { %v610_v4 = vadd.f32 %v609_v33, %v608_v2 }
 0x166   : > { %v611_v26 = vrot.slane %v610_v4, 2 }
 0x168   : > { %v612_v6 = vadd.f32 %v611_v26, %v610_v4 }
 0x16a   : > { %v613_v36 = vrot.slane %v612_v6, 1 }
 0x16c   : > { %v614_v7 = vadd.f32 %v613_v36, %v612_v6 }
 0x16e   : > { %v1684_v10 = vmul.f32 0.00390625, %v614_v7 }
 0x170   : > { %v1688_v24 = vsub.f32 %v1575_v11, %v1684_v10  ;;  %v1692_v18 = vsub.f32 %v1578_v13, %v1684_v10  ;;  %v1696_v27 = vsub.f32 %v1587_v23, %v1684_v10  ;;  %v1700_v14 = vsub.f32 %v1595_v40, %v1684_v10 }
 0x171   : > { %v1704_v16 = vsub.f32 %v1590_v38, %v1684_v10  ;;  %v1708_v11 = vsub.f32 %v1598_v43, %v1684_v10  ;;  %v1711_v52 = vsub.f32 %v531_v32, %v1684_v10  ;;  %v1714_v13 = vsub.f32 %v534_v48, %v1684_v10 }
 0x172   : > { %v1717_v23 = vsub.f32 %v539_v5, %v1684_v10  ;;  %v1720_v40 = vsub.f32 %v542_v54, %v1684_v10  ;;  %v1724_v38 = vsub.f32 %v1511_v29, %v1684_v10  ;;  %v1728_v43 = vsub.f32 %v1521_v35, %v1684_v10 }
 0x173   : > { %v1732_v17 = vsub.f32 %v1518_v34, %v1684_v10  ;;  %v1736_v42 = vsub.f32 %v1526_v37, %v1684_v10  ;;  %v1744_v29 = vsub.f32 %v1539_v47, %v1684_v10  ;;  %v1750_v34 = vsub.f32 %v1551_v55, %v1684_v10 }
 0x174   : > { %v649_v19 = vmul.f32 %v1724_v38, %v1724_v38  ;;  %v650_v20 = vmul.f32 %v1728_v43, %v1728_v43  ;;  %v1758_v39 = vsub.f32 %v1546_v53, %v1684_v10  ;;  %v1765_v55 = vsub.f32 %v1554_v57, %v1684_v10 }
 0x175   : > { %v651_v35 = vmul.f32 %v1732_v17, %v1732_v17  ;;  %v652_v37 = vmul.f32 %v1736_v42, %v1736_v42  ;;  %v653_v47 = vmul.f32 %v1744_v29, %v1744_v29  ;;  %v654_v44 = vmul.f32 %v1750_v34, %v1750_v34 }
 0x176   : > { %v681_v1 = vsel %vm545_vm0, %v649_v19, 0.0  ;;  %v682_v30 = vsel %vm545_vm0, %v650_v20, 0.0  ;;  %v1772_v53 = vsub.f32 %v1565_v3, %v1684_v10  ;;  %v655_v50 = vmul.f32 %v1758_v39, %v1758_v39 }
 0x177   : > { %v683_v32 = vadd.f32 %v682_v30, %v681_v1  ;;  %v684_v8 = vsel %vm545_vm0, %v651_v35, 0.0  ;;  %v686_v62 = vsel %vm545_vm0, %v652_v37, 0.0  ;;  %v688_v5 = vsel %vm545_vm0, %v653_v47, 0.0 }
 0x178   : > { %v656_v57 = vmul.f32 %v1765_v55, %v1765_v55  ;;  %v690_v54 = vsel %vm545_vm0, %v654_v44, 0.0  ;;  %v1782_v56 = vsub.f32 %v1570_v9, %v1684_v10  ;;  %v657_v3 = vmul.f32 %v1772_v53, %v1772_v53 }
 0x179   : > { %v685_v41 = vadd.f32 %v684_v8, %v683_v32  ;;  %v692_v59 = vsel %vm545_vm0, %v655_v50, 0.0  ;;  %v658_v63 = vmul.f32 %v1688_v24, %v1688_v24  ;;  %v660_v9 = vmul.f32 %v1692_v18, %v1692_v18 }
 0x17a   : > { %v694_v2 = vsel %vm545_vm0, %v656_v57, 0.0  ;;  %v659_v4 = vmul.f32 %v1782_v56, %v1782_v56  ;;  %v696_v26 = vsel %vm545_vm0, %v657_v3, 0.0  ;;  %v661_v19 = vmul.f32 %v1696_v27, %v1696_v27 }
 0x17b   : > { %v687_v48 = vadd.f32 %v686_v62, %v685_v41  ;;  %v698_v36 = vsel %vm545_vm0, %v658_v63, 0.0  ;;  %v662_v37 = vmul.f32 %v1700_v14, %v1700_v14  ;;  %v702_v1 = vsel %vm545_vm0, %v660_v9, 0.0 }
 0x17c   : > { %v700_v20 = vsel %vm545_vm0, %v659_v4, 0.0  ;;  %v1804_v32 = vsub.f32 %v1604_v46, %v1684_v10  ;;  %v663_v47 = vmul.f32 %v1704_v16, %v1704_v16  ;;  %v704_v8 = vsel %vm545_vm0, %v661_v19, 0.0 }
 0x17d   : > { %v689_v51 = vadd.f32 %v688_v5, %v687_v48  ;;  %v1811_v44 = vsub.f32 %v1614_v58, %v1684_v10  ;;  %v664_v62 = vmul.f32 %v1708_v11, %v1708_v11  ;;  %v706_v48 = vsel %vm545_vm0, %v662_v37, 0.0 }
 0x17e   : > { %v1818_v46 = vsub.f32 %v1618_v28, %v1684_v10  ;;  %v665_v5 = vmul.f32 %v1804_v32, %v1804_v32  ;;  %v1825_v58 = vsub.f32 %v1622_v61, %v1684_v10  ;;  %v1832_v28 = vsub.f32 %v1628_v0, %v1684_v10 }
 0x17f   : > { %v691_v21 = vadd.f32 %v690_v54, %v689_v51  ;;  %v708_v51 = vsel %vm545_vm0, %v663_v47, 0.0  ;;  %v666_v54 = vmul.f32 %v1811_v44, %v1811_v44  ;;  %v1839_v61 = vsub.f32 %v1638_v31, %v1684_v10 }
 0x180   : > { %v639_v0 = vsub.f32 %v1642_v45, %v1684_v10 }
 0x181   : > { %v693_v60 = vadd.f32 %v692_v59, %v691_v21  ;;  %v710_v21 = vsel %vm545_vm0, %v664_v62, 0.0  ;;  %v667_v59 = vmul.f32 %v1818_v46, %v1818_v46  ;;  %v670_v31 = vmul.f32 %v1839_v61, %v1839_v61 }
 0x183   : > { %v695_v33 = vadd.f32 %v694_v2, %v693_v60  ;;  %v712_v60 = vsel %vm545_vm0, %v665_v5, 0.0  ;;  %v668_v2 = vmul.f32 %v1825_v58, %v1825_v58  ;;  %v722_v47 = vsel %vm545_vm0, %v670_v31, 0.0 }
 0x185   : > { %v697_v6 = vadd.f32 %v696_v26, %v695_v33  ;;  %v714_v33 = vsel %vm545_vm0, %v666_v54, 0.0  ;;  %v669_v26 = vmul.f32 %v1832_v28, %v1832_v28 }
 0x187   : > { %v699_v7 = vadd.f32 %v698_v36, %v697_v6  ;;  %v716_v6 = vsel %vm545_vm0, %v667_v59, 0.0  ;;  %v640_v36 = vsub.f32 %v1646_v12, %v1684_v10  ;;  %v720_v45 = vsel %vm545_vm0, %v669_v26, 0.0 }
 0x189   : > { %v701_v35 = vadd.f32 %v700_v20, %v699_v7  ;;  %v718_v7 = vsel %vm545_vm0, %v668_v2, 0.0  ;;  %v641_v20 = vsub.f32 %v1651_v15, %v1684_v10  ;;  %v644_v15 = vsub.f32 %v1668_v25, %v1684_v10 }
 0x18a   : > { %v678_v25 = vmul.f32 %v1714_v13, %v1714_v13 }
 0x18b   : > { %v703_v30 = vadd.f32 %v702_v1, %v701_v35  ;;  %v671_v35 = vmul.f32 %v639_v0, %v639_v0  ;;  %v642_v1 = vsub.f32 %v1660_v49, %v1684_v10 }
 0x18d   : > { %v705_v41 = vadd.f32 %v704_v8, %v703_v30  ;;  %v672_v30 = vmul.f32 %v640_v36, %v640_v36  ;;  %v643_v8 = vsub.f32 %v1664_v22, %v1684_v10  ;;  %v724_v62 = vsel %vm545_vm0, %v671_v35, 0.0 }
 0x18e   : > { %v677_v22 = vmul.f32 %v1711_v52, %v1711_v52 }
 0x18f   : > { %v707_v50 = vadd.f32 %v706_v48, %v705_v41  ;;  %v673_v41 = vmul.f32 %v641_v20, %v641_v20  ;;  %v726_v5 = vsel %vm545_vm0, %v672_v30, 0.0 }
 0x191   : > { %v709_v57 = vadd.f32 %v708_v51, %v707_v50  ;;  %v674_v50 = vmul.f32 %v642_v1, %v642_v1  ;;  %v728_v49 = vsel %vm545_vm0, %v673_v41, 0.0 }
 0x193   : > { %v711_v3 = vadd.f32 %v710_v21, %v709_v57  ;;  %v675_v57 = vmul.f32 %v643_v8, %v643_v8  ;;  %v676_v21 = vmul.f32 %v644_v15, %v644_v15 }
 0x195   : > { %v713_v63 = vadd.f32 %v712_v60, %v711_v3  ;;  %v730_v3 = vsel %vm545_vm0, %v674_v50, 0.0  ;;  %v732_v60 = vsel %vm545_vm0, %v675_v57, 0.0  ;;  %v734_v10 = vsel %vm545_vm0, %v676_v21, 0.0 }
 0x197   : > { %v715_v4 = vadd.f32 %v714_v33, %v713_v63  ;;  %v679_v33 = vmul.f32 %v1717_v23, %v1717_v23 }
 0x199   : > { %v717_v9 = vadd.f32 %v716_v6, %v715_v4  ;;  %v736_v4 = vsel %vm545_vm0, %v677_v22, 0.0  ;;  %v680_v6 = vmul.f32 %v1720_v40, %v1720_v40 }
 0x19b   : > { %v719_v19 = vadd.f32 %v718_v7, %v717_v9  ;;  %v738_v9 = vsel %vm545_vm0, %v678_v25, 0.0  ;;  %v740_v7 = vsel %vm545_vm0, %v679_v33, 0.0  ;;  %v742_v35 = vsel %vm545_vm0, %v680_v6, 0.0 }
 0x19d   : > { %v721_v37 = vadd.f32 %v720_v45, %v719_v19 }
 0x19f   : > { %v723_v12 = vadd.f32 %v722_v47, %v721_v37 }
 0x1a1   : > { %v725_v48 = vadd.f32 %v724_v62, %v723_v12 }
 0x1a3   : > { %v727_v51 = vadd.f32 %v726_v5, %v725_v48 }
 0x1a5   : > { %v729_v54 = vadd.f32 %v728_v49, %v727_v51 }
 0x1a7   : > { %v731_v59 = vadd.f32 %v730_v3, %v729_v54 }
 0x1a9   : > { %v733_v63 = vadd.f32 %v732_v60, %v731_v59 }
 0x1ab   : > { %v735_v2 = vadd.f32 %v734_v10, %v733_v63 }
 0x1ad   : > { %v737_v26 = vadd.f32 %v736_v4, %v735_v2 }
 0x1af   : > { %v739_v31 = vadd.f32 %v738_v9, %v737_v26 }
 0x1b1   : > { %v741_v19 = vadd.f32 %v740_v7, %v739_v31 }
 0x1b3   : > { %v743_v45 = vadd.f32 %v742_v35, %v741_v19 }
 0x1b5   : > { %v744_v37 = vrot.slane %v743_v45, 4 }
 0x1b7   : > { %v745_v30 = vadd.f32 %v744_v37, %v743_v45 }
 0x1b9   : > { %v746_v47 = vrot.slane %v745_v30, 2 }
 0x1bb   : > { %v747_v12 = vadd.f32 %v746_v47, %v745_v30 }
 0x1bd   : > { %v748_v41 = vrot.slane %v747_v12, 1 }
 0x1bf   : > { %v749_v62 = vadd.f32 %v748_v41, %v747_v12 }
 0x1c1   : > { %v750_v48 = vmul.f32 0.00390625, %v749_v62 }
 0x1c3   : > { %v751_v50 = vadd.f32 1e-05, %v750_v48 }
 0x1c5   : > { %1344 = vrsqrt.f32 %v751_v50 }
 0x1cf   : > { %v1345_v5 = vpop.eup %1344 }
 0x1d0   : > { %v1883_v51 = vmul.f32 %v1345_v5, %v1811_v44  ;;  %v1886_v57 = vmul.f32 %v1345_v5, %v1818_v46  ;;  %v1889_v49 = vmul.f32 %v1345_v5, %v1825_v58  ;;  %v1892_v54 = vmul.f32 %v1345_v5, %v1832_v28 }
 0x1d1   : > { %v1895_v21 = vmul.f32 %v1345_v5, %v1839_v61  ;;  %v1897_v3 = vmul.f32 %v1345_v5, %v639_v0  ;;  %v1899_v59 = vmul.f32 %v1345_v5, %v640_v36  ;;  %v1901_v22 = vmul.f32 %v1345_v5, %v641_v20 }
 0x1d2   : > { %v1903_v44 = vmul.f32 %v1345_v5, %v642_v1  ;;  %v1905_v60 = vmul.f32 %v1345_v5, %v643_v8  ;;  %v1907_v46 = vmul.f32 %v1345_v5, %v644_v15  ;;  %v1910_v58 = vmul.f32 %v1345_v5, %v1711_v52 }
 0x1d3   : > { %v1913_v28 = vmul.f32 %v1345_v5, %v1714_v13  ;;  %v1916_v61 = vmul.f32 %v1345_v5, %v1717_v23  ;;  %v1919_v0 = vmul.f32 %v1345_v5, %v1720_v40  ;;  %v753_v36 = vmul.f32 %v1345_v5, %v1724_v38 }
 0x1d4   : > { %v754_v20 = vmul.f32 %v1345_v5, %v1728_v43  ;;  %v1924_v1 = vmul.f32 %v1345_v5, %v1732_v17  ;;  %v1927_v8 = vmul.f32 %v1345_v5, %v1736_v42  ;;  %v1930_v52 = vmul.f32 %v1345_v5, %v1744_v29 }
 0x1d5   : > { %v1933_v13 = vmul.f32 %v1345_v5, %v1750_v34  ;;  %v1936_v23 = vmul.f32 %v1345_v5, %v1758_v39  ;;  %v1939_v40 = vmul.f32 %v1345_v5, %v1765_v55  ;;  %v1942_v38 = vmul.f32 %v1345_v5, %v1772_v53 }
 0x1d6   : > { %v1945_v43 = vmul.f32 %v1345_v5, %v1688_v24  ;;  %v1948_v17 = vmul.f32 %v1345_v5, %v1782_v56  ;;  %v1951_v42 = vmul.f32 %v1345_v5, %v1692_v18  ;;  %v1954_v29 = vmul.f32 %v1345_v5, %v1696_v27 }
 0x1d7   : > { %v1957_v34 = vmul.f32 %v1345_v5, %v1700_v14  ;;  %v1960_v39 = vmul.f32 %v1345_v5, %v1704_v16  ;;  %v1963_v55 = vmul.f32 %v1345_v5, %v1708_v11  ;;  %v1966_v24 = vmul.f32 %v1345_v5, %v1804_v32 }
 0x1d8   : > { %vm785_vm1 = vcmp.ge.f32.partialorder %v753_v36, 0.0  ;;  %vm786_vm2 = vcmp.ge.f32.partialorder %v754_v20, 0.0  ;;  %vm787_vm3 = vcmp.ge.f32.partialorder %v1924_v1, 0.0  ;;  %vm788_vm4 = vcmp.ge.f32.partialorder %v1927_v8, 0.0 }
 0x1d9   : > { %vm789_vm5 = vcmp.ge.f32.partialorder %v1930_v52, 0.0  ;;  %vm790_vm6 = vcmp.ge.f32.partialorder %v1933_v13, 0.0  ;;  %vm791_vm7 = vcmp.ge.f32.partialorder %v1936_v23, 0.0  ;;  %vm792_vm8 = vcmp.ge.f32.partialorder %v1939_v40, 0.0 }
 0x1da   : > { %vm795_vm11 = vcmp.ge.f32.partialorder %v1948_v17, 0.0  ;;  %v817_v18 = vmul.f32 0.2, %v753_v36  ;;  %v818_v27 = vmul.f32 0.2, %v754_v20  ;;  %vm800_vm0 = vcmp.ge.f32.partialorder %v1963_v55, 0.0 }
 0x1db   : > { %v819_v14 = vmul.f32 0.2, %v1924_v1  ;;  %v820_v16 = vmul.f32 0.2, %v1927_v8  ;;  %v821_v11 = vmul.f32 0.2, %v1930_v52 }
 0x1dc   : > { %v822_v53 = vmul.f32 0.2, %v1933_v13  ;;  %vm805_vm12 = vcmp.ge.f32.partialorder %v1892_v54, 0.0  ;;  %v823_v56 = vmul.f32 0.2, %v1936_v23  ;;  %v1996_v63 = vsel %vm785_vm1, %v753_v36, %v817_v18 }
 0x1dd   : > { %v824_v32 = vmul.f32 0.2, %v1939_v40  ;;  %v825_v15 = vmul.f32 0.2, %v1942_v38  ;;  %vm809_vm14 = vcmp.ge.f32.partialorder %v1901_v22, 0.0  ;;  %vm810_vm13 = vcmp.ge.f32.partialorder %v1903_v44, 0.0 }
 0x1de   : > { %v826_v25 = vmul.f32 0.2, %v1945_v43  ;;  %v827_v10 = vmul.f32 0.2, %v1948_v17  ;;  %v828_v2 = vmul.f32 0.2, %v1951_v42  ;;  %v2006_v33 = vsel %vm786_vm2, %v754_v20, %v818_v27 }
 0x1df   : > { %vm812_vm15 = vcmp.ge.f32.partialorder %v1907_v46, 0.0  ;;  %vm813_vm10 = vcmp.ge.f32.partialorder %v1910_v58, 0.0  ;;  %vm814_vm9 = vcmp.ge.f32.partialorder %v1913_v28, 0.0  ;;  %v829_v4 = vmul.f32 0.2, %v1954_v29 }
 0x1e0   : > { %v830_v26 = vmul.f32 0.2, %v1957_v34  ;;  %v831_v6 = vmul.f32 0.2, %v1960_v39  ;;  %v2018_v9 = vsel %vm787_vm3, %v1924_v1, %v819_v14  ;;  %vm815_vm2 = vcmp.ge.f32.partialorder %v1916_v61, 0.0 }
 0x1e1   : > { %vm816_vm1 = vcmp.ge.f32.partialorder %v1919_v0, 0.0  ;;  %v832_v31 = vmul.f32 0.2, %v1963_v55  ;;  %v833_v7 = vmul.f32 0.2, %v1966_v24  ;;  %v2028_v35 = vsel %vm788_vm4, %v1927_v8, %v820_v16 }
 0x1e2   : > { %v834_v19 = vmul.f32 0.2, %v1883_v51  ;;  %v835_v45 = vmul.f32 0.2, %v1886_v57  ;;  %v836_v37 = vmul.f32 0.2, %v1889_v49  ;;  %v853_v47 = vsel %vm789_vm5, %v1930_v52, %v821_v11 }
 0x1e3   : > { %v837_v30 = vmul.f32 0.2, %v1892_v54  ;;  %v838_v12 = vmul.f32 0.2, %v1895_v21  ;;  %v839_v41 = vmul.f32 0.2, %v1897_v3  ;;  %v854_v48 = vsel %vm790_vm6, %v1933_v13, %v822_v53 }
 0x1e4   : > { %v840_v62 = vmul.f32 0.2, %v1899_v59  ;;  %vm1009_vm3 = vcmask 519168   ;;  %v841_v50 = vmul.f32 0.2, %v1901_v22  ;;  %v855_v20 = vsel %vm791_vm7, %v1936_v23, %v823_v56 }
 0x1e5   : > { %v842_v5 = vmul.f32 0.2, %v1903_v44  ;;  %v843_v36 = vmul.f32 0.2, %v1905_v60  ;;  %v844_v1 = vmul.f32 0.2, %v1907_v46  ;;  %v856_v13 = vsel %vm792_vm8, %v1939_v40, %v824_v32 }
 0x1e6   : > { %v845_v8 = vmul.f32 0.2, %v1910_v58  ;;  %v846_v52 = vmul.f32 0.2, %v1913_v28  ;;  %v847_v18 = vmul.f32 0.2, %v1916_v61  ;;  %v859_v16 = vsel %vm795_vm11, %v1948_v17, %v827_v10 }
 0x1e7   : > { %v848_v27 = vmul.f32 0.2, %v1919_v0  ;;  %vm2277_vm4 = vcmp.ge.f32.partialorder %v1942_v38, 0.0  ;;  %vm2278_vm5 = vcmp.ge.f32.partialorder %v1945_v43, 0.0  ;;  %vm2279_vm6 = vcmp.ge.f32.partialorder %v1951_v42, 0.0 }
 0x1e8   : > { %v857_v14 = vsel %vm2277_vm4, %v1942_v38, %v825_v15  ;;  %v858_v23 = vsel %vm2278_vm5, %v1945_v43, %v826_v25  ;;  %v860_v40 = vsel %vm2279_vm6, %v1951_v42, %v828_v2  ;;  %vm2280_vm7 = vcmp.ge.f32.partialorder %v1954_v29, 0.0 }
 0x1e9   : > { %v861_v11 = vsel %vm2280_vm7, %v1954_v29, %v829_v4  ;;  %vm2281_vm8 = vcmp.ge.f32.partialorder %v1957_v34, 0.0  ;;  %vm2282_vm4 = vcmp.ge.f32.partialorder %v1960_v39, 0.0  ;;  %v864_v17 = vsel %vm800_vm0, %v1963_v55, %v832_v31 }
 0x1ea   : > { %v862_v38 = vsel %vm2281_vm8, %v1957_v34, %v830_v26  ;;  %v863_v43 = vsel %vm2282_vm4, %v1960_v39, %v831_v6  ;;  %vm2283_vm11 = vcmp.ge.f32.partialorder %v1966_v24, 0.0  ;;  %vm2284_vm5 = vcmp.ge.f32.partialorder %v1883_v51, 0.0 }
 0x1eb   : > { %v865_v42 = vsel %vm2283_vm11, %v1966_v24, %v833_v7  ;;  %v866_v29 = vsel %vm2284_vm5, %v1883_v51, %v834_v19  ;;  %vm2285_vm6 = vcmp.ge.f32.partialorder %v1886_v57, 0.0  ;;  %vm2286_vm7 = vcmp.ge.f32.partialorder %v1889_v49, 0.0 }
 0x1ec   : > { %v2089_v34 = vsel %vm2285_vm6, %v1886_v57, %v835_v45  ;;  %v2094_v39 = vsel %vm2286_vm7, %v1889_v49, %v836_v37  ;;  %v2099_v55 = vsel %vm805_vm12, %v1892_v54, %v837_v30  ;;  %vm2287_vm0 = vcmp.ge.f32.partialorder %v1895_v21, 0.0 }
 0x1ed   : > { %v2104_v24 = vsel %vm2287_vm0, %v1895_v21, %v838_v12  ;;  %vm2288_vm8 = vcmp.ge.f32.partialorder %v1897_v3, 0.0  ;;  %vm2289_vm4 = vcmp.ge.f32.partialorder %v1899_v59, 0.0  ;;  %v2119_v49 = vsel %vm809_vm14, %v1901_v22, %v841_v50 }
 0x1ee   : > { %v2109_v51 = vsel %vm2288_vm8, %v1897_v3, %v839_v41  ;;  %v2114_v57 = vsel %vm2289_vm4, %v1899_v59, %v840_v62  ;;  %v2124_v54 = vsel %vm810_vm13, %v1903_v44, %v842_v5  ;;  %vm2290_vm12 = vcmp.ge.f32.partialorder %v1905_v60, 0.0 }
 0x1ef   : > { %v2136_v21 = vsel %vm2290_vm12, %v1905_v60, %v843_v36  ;;  %v2141_v3 = vsel %vm812_vm15, %v1907_v46, %v844_v1  ;;  %v2146_v59 = vsel %vm813_vm10, %v1910_v58, %v845_v8  ;;  %v2151_v22 = vsel %vm814_vm9, %v1913_v28, %v846_v52 }
 0x1f0   : > { %v2156_v44 = vsel %vm815_vm2, %v1916_v61, %v847_v18  ;;  %v2161_v60 = vsel %vm816_vm1, %v1919_v0, %v848_v27  ;;  %v1181_v46 = vpack.c.bf16 %v1996_v63, %v1996_v63  ;;  %v1182_v58 = vpack.c.bf16 %v2006_v33, %v2006_v33 }
 0x1f1   : > { %v1183_v28 = vpack.c.bf16 %v2018_v9, %v2018_v9  ;;  %v1184_v61 = vpack.c.bf16 %v2028_v35, %v2028_v35  ;;  %v1185_v53 = vpack.c.bf16 %v853_v47, %v853_v47  ;;  %v1186_v56 = vpack.c.bf16 %v854_v48, %v854_v48 }
 0x1f2   : > { %v1187_v0 = vpack.c.bf16 %v855_v20, %v855_v20  ;;  %v1188_v32 = vpack.c.bf16 %v856_v13, %v856_v13  ;;  %v1189_v15 = vpack.c.bf16 %v857_v14, %v857_v14  ;;  %v1190_v63 = vpack.c.bf16 %v858_v23, %v858_v23  ;;  %1010 = vst.msk [vmem:[%s2131_s26] sm:$0xf] %vm1009_vm3, %v1181_v46 }
 0x1f3   : > { %1011 = vst.msk [vmem:[%s2131_s26 + $0x4] sm:$0xf] %vm1009_vm3, %v1182_v58  ;;  %v1191_v25 = vpack.c.bf16 %v859_v16, %v859_v16  ;;  %v1192_v10 = vpack.c.bf16 %v860_v40, %v860_v40  ;;  %v1193_v2 = vpack.c.bf16 %v861_v11, %v861_v11  ;;  %v1194_v33 = vpack.c.bf16 %v862_v38, %v862_v38 }
 0x1f4   : > { %1012 = vst.msk [vmem:[%s2131_s26 + $0x8] sm:$0xf] %vm1009_vm3, %v1183_v28  ;;  %1013 = vst.msk [vmem:[%s2131_s26 + $0xc] sm:$0xf] %vm1009_vm3, %v1184_v61  ;;  %v1195_v4 = vpack.c.bf16 %v863_v43, %v863_v43  ;;  %v1196_v26 = vpack.c.bf16 %v864_v17, %v864_v17  ;;  %v1197_v6 = vpack.c.bf16 %v865_v42, %v865_v42 }
 0x1f5   : > { %1014 = vst.msk [vmem:[%s2131_s26 + $0x10] sm:$0xf] %vm1009_vm3, %v1185_v53  ;;  %1015 = vst.msk [vmem:[%s2131_s26 + $0x14] sm:$0xf] %vm1009_vm3, %v1186_v56  ;;  %v1198_v9 = vpack.c.bf16 %v866_v29, %v866_v29  ;;  %v1199_v31 = vpack.c.bf16 %v2089_v34, %v2089_v34  ;;  %v1200_v7 = vpack.c.bf16 %v2094_v39, %v2094_v39 }
 0x1f6   : > { %1016 = vst.msk [vmem:[%s2131_s26 + $0x18] sm:$0xf] %vm1009_vm3, %v1187_v0  ;;  %1017 = vst.msk [vmem:[%s2131_s26 + $0x1c] sm:$0xf] %vm1009_vm3, %v1188_v32  ;;  %v1201_v19 = vpack.c.bf16 %v2099_v55, %v2099_v55  ;;  %v1202_v35 = vpack.c.bf16 %v2104_v24, %v2104_v24  ;;  %v1203_v45 = vpack.c.bf16 %v2109_v51, %v2109_v51 }
 0x1f7   : > { %1018 = vst.msk [vmem:[%s2131_s26 + $0x20] sm:$0xf] %vm1009_vm3, %v1189_v15  ;;  %1019 = vst.msk [vmem:[%s2131_s26 + $0x24] sm:$0xf] %vm1009_vm3, %v1190_v63  ;;  %v1204_v37 = vpack.c.bf16 %v2114_v57, %v2114_v57  ;;  %v1205_v30 = vpack.c.bf16 %v2119_v49, %v2119_v49  ;;  %v1206_v47 = vpack.c.bf16 %v2124_v54, %v2124_v54 }
 0x1f8   : > { %1020 = vst.msk [vmem:[%s2131_s26 + $0x28] sm:$0xf] %vm1009_vm3, %v1191_v25  ;;  %1021 = vst.msk [vmem:[%s2131_s26 + $0x2c] sm:$0xf] %vm1009_vm3, %v1192_v10  ;;  %v1207_v12 = vpack.c.bf16 %v2136_v21, %v2136_v21  ;;  %v1208_v41 = vpack.c.bf16 %v2141_v3, %v2141_v3  ;;  %v1209_v62 = vpack.c.bf16 %v2146_v59, %v2146_v59 }
 0x1f9   : > { %1022 = vst.msk [vmem:[%s2131_s26 + $0x30] sm:$0xf] %vm1009_vm3, %v1193_v2  ;;  %1023 = vst.msk [vmem:[%s2131_s26 + $0x34] sm:$0xf] %vm1009_vm3, %v1194_v33  ;;  %v1210_v48 = vpack.c.bf16 %v2151_v22, %v2151_v22  ;;  %v1211_v50 = vpack.c.bf16 %v2156_v44, %v2156_v44  ;;  %v1212_v5 = vpack.c.bf16 %v2161_v60, %v2161_v60 }
 0x1fa   : > { %1024 = vst.msk [vmem:[%s2131_s26 + $0x38] sm:$0xf] %vm1009_vm3, %v1195_v4  ;;  %1025 = vst.msk [vmem:[%s2131_s26 + $0x3c] sm:$0xf] %vm1009_vm3, %v1196_v26 }
 0x1fb   : > { %1026 = vst.msk [vmem:[%s2131_s26 + $0x40] sm:$0xf] %vm1009_vm3, %v1197_v6  ;;  %1027 = vst.msk [vmem:[%s2131_s26 + $0x44] sm:$0xf] %vm1009_vm3, %v1198_v9 }
 0x1fc   : > { %1028 = vst.msk [vmem:[%s2131_s26 + $0x48] sm:$0xf] %vm1009_vm3, %v1199_v31  ;;  %1029 = vst.msk [vmem:[%s2131_s26 + $0x4c] sm:$0xf] %vm1009_vm3, %v1200_v7 }
 0x1fd   : > { %1030 = vst.msk [vmem:[%s2131_s26 + $0x50] sm:$0xf] %vm1009_vm3, %v1201_v19  ;;  %1031 = vst.msk [vmem:[%s2131_s26 + $0x54] sm:$0xf] %vm1009_vm3, %v1202_v35 }
 0x1fe   : > { %1032 = vst.msk [vmem:[%s2131_s26 + $0x58] sm:$0xf] %vm1009_vm3, %v1203_v45  ;;  %1033 = vst.msk [vmem:[%s2131_s26 + $0x5c] sm:$0xf] %vm1009_vm3, %v1204_v37 }
 0x1ff   : > { %1034 = vst.msk [vmem:[%s2131_s26 + $0x60] sm:$0xf] %vm1009_vm3, %v1205_v30  ;;  %1035 = vst.msk [vmem:[%s2131_s26 + $0x64] sm:$0xf] %vm1009_vm3, %v1206_v47 }
 0x200   : > { %1036 = vst.msk [vmem:[%s2131_s26 + $0x68] sm:$0xf] %vm1009_vm3, %v1207_v12  ;;  %1037 = vst.msk [vmem:[%s2131_s26 + $0x6c] sm:$0xf] %vm1009_vm3, %v1208_v41 }
 0x201   : > { %1038 = vst.msk [vmem:[%s2131_s26 + $0x70] sm:$0xf] %vm1009_vm3, %v1209_v62  ;;  %1039 = vst.msk [vmem:[%s2131_s26 + $0x74] sm:$0xf] %vm1009_vm3, %v1210_v48 }
 0x202   : > { %1040 = vst.msk [vmem:[%s2131_s26 + $0x78] sm:$0xf] %vm1009_vm3, %v1211_v50  ;;  %1041 = vst.msk [vmem:[%s2131_s26 + $0x7c] sm:$0xf] %vm1009_vm3, %v1212_v5 }
 0x203 PF: > { %s14_s12 = sadd.s32 1, %s1384_s12  }
 0x204   : > { %p11_p2 = scmp.ge.s32.totalorder %s14_s12, 4  }
 0x206   :  { %13 = sbr.rel (!%p11_p2) target bundleno = 1 (0x1), region = 67 }
 0x20d   :  { %1063 = vsyncpa [#allocation3], 1 }
 0x20e   :  { %1065 = vsyncpa [#allocation3 + $0x1], 1 }

// kernel: discriminator_forward.6
= control target key start
LH: loop header
LB: loop body
LE: loop exit
PB: predicated region body
PF: predicated region fallthrough
CT: control target
= control target key end

     0   :  { %s1346_s12 = smov 0   ;;  %s1524_s0 = inlined_call_operand.vmem [shape: bf16[2,64,640], index: 0, kind: input, shape index: {}]   ;;  %s1525_s1 = inlined_call_operand.vmem [shape: bf16[640,128], index: 1, kind: input, shape index: {}]   ;;  %s1526_s2 = inlined_call_operand.vmem [shape: f32[1,128], index: 2, kind: input, shape index: {}]   ;;  %s1527_s3 = inlined_call_operand.vmem [shape: bf16[2,64,128], index: 3, kind: output, shape index: {}]  }
   0x1 LB: > { %s996_s13 = sadd.s32 4294967295, %s1324_s12   ;;  %p1000_p0 = scmp.ge.s32.totalorder %s1324_s12, 1  ;;  %s1324_s12 = sphi %s1346_s12, %s13_s12  }
   0x2   : > { %p137_p1 = scmp.lt.s32.totalorder %s1324_s12, 3 }
   0x4   : > { %p138_p2 = pnand %p1000_p0, %p137_p1 }
   0x5   : > { %v1248_v0 = vld [vmem:[%s1525_s1 + $0x40] sm:$0xff] (!%p138_p2)   ;;  %v1252_v4 = vld [vmem:[%s1525_s1 + $0x48] sm:$0xff] (!%p138_p2)   ;;  %v1256_v8 = vld [vmem:[%s1525_s1 + $0x50] sm:$0xff] (!%p138_p2)   ;;  %p161_p3 = scmp.lt.s32.totalorder (!%p138_p2), %s996_s13, 1 }
   0x6   : > { %141 = sbr.rel (%p138_p2) target bundleno = 374 (0x176), region = 32  ;;  %v1249_v1 = vld [vmem:[%s1525_s1 + $0xc0] sm:$0xff] (!%p138_p2)   ;;  %1107 = vmatprep.subr.bf16.mxu0 (!%p138_p2), %v1248_v0  ;;  %v1253_v5 = vld [vmem:[%s1525_s1 + $0xc8] sm:$0xff] (!%p138_p2)   ;;  %v1257_v9 = vld [vmem:[%s1525_s1 + $0xd0] sm:$0xff] (!%p138_p2)  }
   0x7   : > { %v1250_v2 = vld [vmem:[%s1525_s1] sm:$0xff] (!%p138_p2)   ;;  %1147 = vmatprep.subr.bf16.mxu1 (!%p138_p2), %v1249_v1  ;;  %v1254_v6 = vld [vmem:[%s1525_s1 + $0x8] sm:$0xff] (!%p138_p2)   ;;  %v1258_v10 = vld [vmem:[%s1525_s1 + $0x10] sm:$0xff] (!%p138_p2)  }
   0x8   : > { %v1251_v3 = vld [vmem:[%s1525_s1 + $0x80] sm:$0xff] (!%p138_p2)   ;;  %1108 = vmatpush3.bf16.msra.mxu0 (!%p138_p2), %v1250_v2  ;;  %v1255_v7 = vld [vmem:[%s1525_s1 + $0x88] sm:$0xff] (!%p138_p2)   ;;  %v1259_v11 = vld [vmem:[%s1525_s1 + $0x90] sm:$0xff] (!%p138_p2)  }
   0x9   : > { %1148 = vmatpush3.bf16.msra.mxu1 (!%p138_p2), %v1251_v3  ;;  %1109 = vmatprep.subr.bf16.mxu0 (!%p138_p2), %v1252_v4  ;;  %v1260_v12 = vld [vmem:[%s1525_s1 + $0x58] sm:$0xff] (!%p138_p2)   ;;  %v1264_v16 = vld [vmem:[%s1525_s1 + $0x60] sm:$0xff] (!%p138_p2)   ;;  %v1268_v20 = vld [vmem:[%s1525_s1 + $0x68] sm:$0xff] (!%p138_p2)  }
   0xa   : > { %1149 = vmatprep.subr.bf16.mxu1 (!%p138_p2), %v1253_v5  ;;  %v1261_v13 = vld [vmem:[%s1525_s1 + $0xd8] sm:$0xff] (!%p138_p2)   ;;  %v1265_v17 = vld [vmem:[%s1525_s1 + $0xe0] sm:$0xff] (!%p138_p2)   ;;  %v1269_v21 = vld [vmem:[%s1525_s1 + $0xe8] sm:$0xff] (!%p138_p2)  }
   0xb   : > { %v1262_v14 = vld [vmem:[%s1525_s1 + $0x18] sm:$0xff] (!%p138_p2)   ;;  %v1266_v18 = vld [vmem:[%s1525_s1 + $0x20] sm:$0xff] (!%p138_p2)   ;;  %v1270_v22 = vld [vmem:[%s1525_s1 + $0x28] sm:$0xff] (!%p138_p2)  }
   0xc   : > { %1110 = vmatpush3.bf16.msra.mxu0 (!%p138_p2), %v1254_v6  ;;  %v1263_v15 = vld [vmem:[%s1525_s1 + $0x98] sm:$0xff] (!%p138_p2)   ;;  %v1267_v19 = vld [vmem:[%s1525_s1 + $0xa0] sm:$0xff] (!%p138_p2)   ;;  %v1271_v23 = vld [vmem:[%s1525_s1 + $0xa8] sm:$0xff] (!%p138_p2)  }
   0xd   : > { %1150 = vmatpush3.bf16.msra.mxu1 %v1255_v7  ;;  %1111 = vmatprep.subr.bf16.mxu0 %v1256_v8  ;;  %s1529_s13 = smov (!%p161_p3, %s996_s13), 1  ;;  %v1272_v24 = vld [vmem:[%s1525_s1 + $0x70] sm:$0xff]   ;;  %v1276_v28 = vld [vmem:[%s1525_s1 + $0x78] sm:$0xff]   ;;  %v1286_v36 = vld [vmem:[%s1525_s1 + $0x100] sm:$0xff]  }
   0xe   : > { %1151 = vmatprep.subr.bf16.mxu1 %v1257_v9  ;;  %v1273_v25 = vld [vmem:[%s1525_s1 + $0xf0] sm:$0xff]   ;;  %s1239_s16 = smul.u32 160, %s1529_s13  ;;  %v1277_v29 = vld [vmem:[%s1525_s1 + $0xf8] sm:$0xff]   ;;  %v1287_v37 = vld [vmem:[%s1525_s1 + $0x108] sm:$0xff]   ;;  %s1075_s25 = sshll.u32 %s1529_s13, 5 }
   0xf   : > { %v1274_v26 = vld [vmem:[%s1525_s1 + $0x30] sm:$0xff]   ;;  %v1278_v30 = vld [vmem:[%s1525_s1 + $0x38] sm:$0xff]   ;;  %v1302_v46 = vld [vmem:[%s1525_s1 + $0x120] sm:$0xff]   ;;  %s170_s13 = scalar_lea.vmem %s1527_s3, %s1075_s25 }
  0x10   : > { %1112 = vmatpush3.bf16.msra.mxu0 %v1258_v10  ;;  %v1275_v27 = vld [vmem:[%s1525_s1 + $0xb0] sm:$0xff]   ;;  %s1454_s27 = scalar_lea.vmem %s1524_s0, %s1239_s16  ;;  %v1279_v31 = vld [vmem:[%s1525_s1 + $0xb8] sm:$0xff]   ;;  %v1303_v51 = vld [vmem:[%s1525_s1 + $0x128] sm:$0xff]  }
  0x11   : > { %1152 = vmatpush3.bf16.msra.mxu1 %v1259_v11  ;;  %1113 = vmatprep.subr.bf16.mxu0 %v1260_v12  ;;  %v1280_v32 = vld [vmem:[%s1454_s27] ss:$20 sps:$4 sm:$0xff]   ;;  %v1282_v33 = vld [vmem:[%s1454_s27 + $0x4] ss:$20 sps:$4 sm:$0xff]   ;;  %v1283_v34 = vld [vmem:[%s1454_s27 + $0x8] ss:$20 sps:$4 sm:$0xff]  }
  0x12   : > { %1153 = vmatprep.subr.bf16.mxu1 %v1261_v13  ;;  %v1285_v35 = vld [vmem:[%s1454_s27 + $0xc] ss:$20 sps:$4 sm:$0xff]   ;;  %659 = vmatprep.mubr.bf16.mxu0 %v1282_v33  ;;  %v1290_v39 = vld [vmem:[%s1454_s27 + $0x34] ss:$20 sps:$4 sm:$0xff]   ;;  %v1293_v42 = vld [vmem:[%s1454_s27 + $0x30] ss:$20 sps:$4 sm:$0xff]  }
  0x13   : > { %724 = vmatprep.mubr.bf16.mxu1 %v1285_v35  ;;  %v1288_v38 = vld [vmem:[%s1454_s27 + $0x2c] ss:$20 sps:$4 sm:$0xff]   ;;  %v1292_v40 = vld [vmem:[%s1454_s27 + $0x28] ss:$20 sps:$4 sm:$0xff]   ;;  %v1294_v41 = vld [vmem:[%s1525_s1 + $0x110] sm:$0xff]  }
  0x14   : > { %1114 = vmatpush3.bf16.msra.mxu0 %v1262_v14  ;;  %v1296_v43 = vld [vmem:[%s1454_s27 + $0x54] ss:$20 sps:$4 sm:$0xff]   ;;  %v1295_v44 = vld [vmem:[%s1525_s1 + $0x118] sm:$0xff]   ;;  %v1300_v47 = vld [vmem:[%s1454_s27 + $0x50] ss:$20 sps:$4 sm:$0xff]  }
  0x15   : > { %1154 = vmatpush3.bf16.msra.mxu1 %v1263_v15  ;;  %1115 = vmatprep.subr.bf16.mxu0 %v1264_v16  ;;  %v1298_v45 = vld [vmem:[%s1454_s27 + $0x5c] ss:$20 sps:$4 sm:$0xff]   ;;  %v1301_v48 = vld [vmem:[%s1454_s27 + $0x58] ss:$20 sps:$4 sm:$0xff]   ;;  %v1309_v54 = vld [vmem:[%s1454_s27 + $0x80] ss:$20 sps:$4 sm:$0xff]  }
  0x16   : > { %1155 = vmatprep.subr.bf16.mxu1 %v1265_v17  ;;  %v1304_v49 = vld [vmem:[%s1454_s27 + $0x7c] ss:$20 sps:$4 sm:$0xff]   ;;  %v1306_v50 = vld [vmem:[%s1454_s27 + $0x84] ss:$20 sps:$4 sm:$0xff]   ;;  %v1313_v56 = vld [vmem:[%s1454_s27 + $0x60] ss:$20 sps:$4 sm:$0xff]  }
  0x17   : > { %v1310_v52 = vld [vmem:[%s1525_s1 + $0x130] sm:$0xff]   ;;  %v1308_v53 = vld [vmem:[%s1454_s27 + $0x78] ss:$20 sps:$4 sm:$0xff]   ;;  %v1315_v59 = vld [vmem:[%s1454_s27 + $0x88] ss:$20 sps:$4 sm:$0xff]  }
  0x18   : > { %1116 = vmatpush3.bf16.msra.mxu0 %v1266_v18  ;;  %v1312_v55 = vld [vmem:[%s1454_s27 + $0x10] ss:$20 sps:$4 sm:$0xff]   ;;  %v1311_v57 = vld [vmem:[%s1525_s1 + $0x138] sm:$0xff]   ;;  %v1004_v61 = vld [vmem:[%s1526_s2] ss:$0 sm:$0xff] }
  0x19   : > { %1156 = vmatpush3.bf16.msra.mxu1 %v1267_v19  ;;  %1117 = vmatprep.subr.bf16.mxu0 %v1268_v20  ;;  %v1314_v58 = vld [vmem:[%s1454_s27 + $0x38] ss:$20 sps:$4 sm:$0xff]  }
  0x1a   : > { %1157 = vmatprep.subr.bf16.mxu1 %v1269_v21 }
  0x1c   : > { %1118 = vmatpush3.bf16.msra.mxu0 %v1270_v22 }
  0x1d   : > { %1158 = vmatpush3.bf16.msra.mxu1 %v1271_v23  ;;  %1119 = vmatprep.subr.bf16.mxu0 %v1272_v24 }
  0x1e   : > { %1159 = vmatprep.subr.bf16.mxu1 %v1273_v25 }
  0x20   : > { %1120 = vmatpush3.bf16.msra.mxu0 %v1274_v26 }
  0x21   : > { %1160 = vmatpush3.bf16.msra.mxu1 %v1275_v27  ;;  %1121 = vmatprep.subr.bf16.mxu0 %v1276_v28 }
  0x22   : > { %1161 = vmatprep.subr.bf16.mxu1 %v1277_v29 }
  0x24   : > { %1122 = vmatpush3.bf16.msra.mxu0 %v1278_v30 }
  0x25   : > { %1162 = vmatpush3.bf16.msra.mxu1 %v1279_v31  ;;  %1199 = vmatprep.subr.bf16.mxu0 %v1286_v36 }
  0x26   : > { %1223 = vmatprep.subr.bf16.mxu1 %v1286_v36 }
  0x27   : > { %660 = vmatmul.mubr.bf16.vlgmr.msra.gmra.mrb[0].mxu0 %v1280_v32 }
  0x28   : > { %725 = vmatmul.mubr.bf16.vlgmr.msra.gmra.mrb[0].mxu1 %v1283_v34  ;;  %1200 = vmatpush3.bf16.msra.mxu0 %v1286_v36 }
  0x29   : > { %1231 = vmatpush3.bf16.msra.mxu1 %v1286_v36  ;;  %1201 = vmatprep.subr.bf16.mxu0 %v1287_v37 }
  0x2a   : > { %1224 = vmatprep.subr.bf16.mxu1 %v1287_v37  ;;  %667 = vmatprep.mubr.bf16.mxu0 %v1288_v38 }
  0x2b   : > { %732 = vmatprep.mubr.bf16.mxu1 %v1290_v39 }
  0x2c   : > { %1202 = vmatpush3.bf16.msra.mxu0 %v1287_v37 }
  0x2d   : > { %1232 = vmatpush3.bf16.msra.mxu1 %v1287_v37  ;;  %1203 = vmatprep.subr.bf16.mxu0 %v1294_v41 }
  0x2e   : > { %1225 = vmatprep.subr.bf16.mxu1 %v1294_v41 }
  0x2f   : > { %668 = vmatmul.mubr.bf16.gmra.mrb[4].mxu0 %v1292_v40 }
  0x30   : > { %733 = vmatmul.mubr.bf16.gmra.mrb[4].mxu1 %v1293_v42  ;;  %675 = vmatprep.mubr.bf16.mxu0 %v1296_v43 }
  0x31   : > { %1204 = vmatpush3.bf16.msra.mxu0 %v1294_v41  ;;  %740 = vmatprep.mubr.bf16.mxu1 %v1298_v45 }
  0x32   : > { %1233 = vmatpush3.bf16.msra.mxu1 %v1294_v41  ;;  %1205 = vmatprep.subr.bf16.mxu0 %v1295_v44 }
  0x33   : > { %1226 = vmatprep.subr.bf16.mxu1 %v1295_v44 }
  0x35   : > { %1206 = vmatpush3.bf16.msra.mxu0 %v1295_v44 }
  0x36   : > { %1234 = vmatpush3.bf16.msra.mxu1 %v1295_v44  ;;  %1207 = vmatprep.subr.bf16.mxu0 %v1302_v46 }
  0x37   : > { %676 = vmatmul.mubr.bf16.gmra.mrb[8].mxu0 %v1300_v47  ;;  %1227 = vmatprep.subr.bf16.mxu1 %v1302_v46 }
  0x38   : > { %741 = vmatmul.mubr.bf16.gmra.mrb[8].mxu1 %v1301_v48  ;;  %683 = vmatprep.mubr.bf16.mxu0 %v1304_v49 }
  0x39   : > { %1208 = vmatpush3.bf16.msra.mxu0 %v1302_v46  ;;  %748 = vmatprep.mubr.bf16.mxu1 %v1306_v50 }
  0x3a   : > { %1235 = vmatpush3.bf16.msra.mxu1 %v1302_v46  ;;  %1209 = vmatprep.subr.bf16.mxu0 %v1303_v51 }
  0x3b   : > { %1228 = vmatprep.subr.bf16.mxu1 %v1303_v51 }
  0x3d   : > { %1210 = vmatpush3.bf16.msra.mxu0 %v1303_v51 }
  0x3e   : > { %1236 = vmatpush3.bf16.msra.mxu1 %v1303_v51  ;;  %1211 = vmatprep.subr.bf16.mxu0 %v1310_v52 }
  0x3f   : > { %684 = vmatmul.mubr.bf16.gmra.mrb[12].mxu0 %v1308_v53  ;;  %1229 = vmatprep.subr.bf16.mxu1 %v1310_v52 }
  0x40   : > { %749 = vmatmul.mubr.bf16.gmra.mrb[12].mxu1 %v1309_v54  ;;  %1215 = vmatprep.mubr.bf16.mxu0 %v1312_v55 }
  0x41   : > { %1212 = vmatpush3.bf16.msra.mxu0 %v1310_v52  ;;  %1219 = vmatprep.mubr.bf16.mxu1 %v1313_v56 }
  0x42   : > { %1237 = vmatpush3.bf16.msra.mxu1 %v1310_v52  ;;  %1213 = vmatprep.subr.bf16.mxu0 %v1311_v57 }
  0x43   : > { %1230 = vmatprep.subr.bf16.mxu1 %v1311_v57 }
  0x45   : > { %1214 = vmatpush3.bf16.msra.mxu0 %v1311_v57 }
  0x46   : > { %1238 = vmatpush3.bf16.msra.mxu1 %v1311_v57 }
  0x48   : > { %1216 = vmatmul.mubr.bf16.vlgmr.msra.gmra.mrb[16].mxu0 %v1314_v58 }
  0x49   : > { %1220 = vmatmul.mubr.bf16.vlgmr.msra.gmra.mrb[16].mxu1 %v1315_v59 }
  0xfa   : > { %v1123_v60 = vpop.f32.mrb[0].mxu0 }
  0xfb   : > { %v1124_v62 = vpop.f32.mrb[1].mxu0  ;;  %v1163_v63 = vpop.f32.mrb[0].mxu1 }
  0xfc   : > { %v1125_v0 = vadd.f32 %v1124_v62, %v1123_v60  ;;  %v1126_v1 = vpop.f32.mrb[2].mxu0  ;;  %v1164_v2 = vpop.f32.mrb[1].mxu1 }
  0xfd   : > { %v1127_v3 = vpop.f32.mrb[3].mxu0  ;;  %v1165_v4 = vadd.f32 %v1164_v2, %v1163_v63  ;;  %v1166_v5 = vpop.f32.mrb[2].mxu1 }
  0xfe   : > { %v662_v6 = vadd.f32 %v1125_v0, %v1004_v61  ;;  %v1128_v7 = vadd.f32 %v1127_v3, %v1126_v1  ;;  %v1167_v8 = vpop.f32.mrb[3].mxu1 }
  0xff   : > { %v1168_v9 = vadd.f32 %v1167_v8, %v1166_v5 }
 0x100   : > { %v665_v10 = vadd.f32 %v1128_v7, %v1004_v61  ;;  %v727_v11 = vadd.f32 %v1165_v4, %v662_v6 }
 0x102   : > { %v1129_v12 = vpop.f32.mrb[4].mxu0  ;;  %v730_v13 = vadd.f32 %v1168_v9, %v665_v10 }
 0x103   : > { %v1130_v14 = vpop.f32.mrb[5].mxu0  ;;  %v1169_v15 = vpop.f32.mrb[4].mxu1 }
 0x104   : > { %v1131_v16 = vadd.f32 %v1130_v14, %v1129_v12  ;;  %v1132_v17 = vpop.f32.mrb[6].mxu0  ;;  %v1170_v18 = vpop.f32.mrb[5].mxu1 }
 0x105   : > { %v1133_v19 = vpop.f32.mrb[7].mxu0  ;;  %v1171_v20 = vadd.f32 %v1170_v18, %v1169_v15  ;;  %v1172_v21 = vpop.f32.mrb[6].mxu1 }
 0x106   : > { %v670_v22 = vadd.f32 %v1131_v16, %v1004_v61  ;;  %v1134_v23 = vadd.f32 %v1133_v19, %v1132_v17  ;;  %v1173_v24 = vpop.f32.mrb[7].mxu1 }
 0x107   : > { %v1174_v25 = vadd.f32 %v1173_v24, %v1172_v21 }
 0x108   : > { %v673_v26 = vadd.f32 %v1134_v23, %v1004_v61  ;;  %v735_v27 = vadd.f32 %v1171_v20, %v670_v22 }
 0x10a   : > { %v1135_v28 = vpop.f32.mrb[8].mxu0  ;;  %v738_v29 = vadd.f32 %v1174_v25, %v673_v26 }
 0x10b   : > { %v1136_v30 = vpop.f32.mrb[9].mxu0  ;;  %v1175_v31 = vpop.f32.mrb[8].mxu1 }
 0x10c   : > { %v1137_v32 = vadd.f32 %v1136_v30, %v1135_v28  ;;  %v1138_v33 = vpop.f32.mrb[10].mxu0  ;;  %v1176_v34 = vpop.f32.mrb[9].mxu1 }
 0x10d   : > { %v1139_v35 = vpop.f32.mrb[11].mxu0  ;;  %v1177_v36 = vadd.f32 %v1176_v34, %v1175_v31  ;;  %v1178_v37 = vpop.f32.mrb[10].mxu1 }
 0x10e   : > { %v678_v38 = vadd.f32 %v1137_v32, %v1004_v61  ;;  %v1140_v39 = vadd.f32 %v1139_v35, %v1138_v33  ;;  %v1179_v40 = vpop.f32.mrb[11].mxu1 }
 0x10f   : > { %v1180_v41 = vadd.f32 %v1179_v40, %v1178_v37 }
 0x110   : > { %v681_v42 = vadd.f32 %v1140_v39, %v1004_v61  ;;  %v743_v43 = vadd.f32 %v1177_v36, %v678_v38 }
 0x112   : > { %v1141_v44 = vpop.f32.mrb[12].mxu0  ;;  %v746_v45 = vadd.f32 %v1180_v41, %v681_v42 }
 0x113   : > { %v1142_v46 = vpop.f32.mrb[13].mxu0  ;;  %v1181_v47 = vpop.f32.mrb[12].mxu1 }
 0x114   : > { %v1143_v48 = vadd.f32 %v1142_v46, %v1141_v44  ;;  %v1144_v49 = vpop.f32.mrb[14].mxu0  ;;  %v1182_v50 = vpop.f32.mrb[13].mxu1 }
 0x115   : > { %v1145_v51 = vpop.f32.mrb[15].mxu0  ;;  %v1183_v52 = vadd.f32 %v1182_v50, %v1181_v47  ;;  %v1184_v53 = vpop.f32.mrb[14].mxu1 }
 0x116   : > { %v686_v54 = vadd.f32 %v1143_v48, %v1004_v61  ;;  %v1146_v55 = vadd.f32 %v1145_v51, %v1144_v49  ;;  %v1185_v56 = vpop.f32.mrb[15].mxu1 }
 0x117   : > { %v1186_v57 = vadd.f32 %v1185_v56, %v1184_v53 }
 0x118   : > { %v689_v58 = vadd.f32 %v1146_v55, %v1004_v61  ;;  %v751_v59 = vadd.f32 %v1183_v52, %v686_v54 }
 0x11a   : > { %v754_v60 = vadd.f32 %v1186_v57, %v689_v58 }
 0x11b   : > { %v1217_v62 = vpop.f32.mrb[16].mxu0 }
 0x11c   : > { %v800_v63 = vadd.f32 %v1217_v62, %v735_v27  ;;  %v1221_v0 = vpop.f32.mrb[16].mxu1  ;;  %v791_v1 = vpop.f32.mrb[17].mxu0 }
 0x11d   : > { %v816_v2 = vadd.f32 %v1221_v0, %v751_v59  ;;  %v792_v3 = vadd.f32 %v791_v1, %v727_v11  ;;  %v807_v4 = vpop.f32.mrb[17].mxu1  ;;  %v1218_v5 = vpop.f32.mrb[18].mxu0 }
 0x11e   : > { %v808_v6 = vadd.f32 %v807_v4, %v743_v43  ;;  %v803_v7 = vadd.f32 %v1218_v5, %v738_v29  ;;  %v1222_v8 = vpop.f32.mrb[18].mxu1  ;;  %v794_v9 = vpop.f32.mrb[19].mxu0 }
 0x11f   : > { %v819_v10 = vadd.f32 %v1222_v8, %v754_v60  ;;  %v795_v12 = vadd.f32 %v794_v9, %v730_v13  ;;  %v810_v14 = vpop.f32.mrb[19].mxu1 }
 0x120   : > { %v811_v15 = vadd.f32 %v810_v14, %v746_v45 }
 0x121   : > { %v822_v16 = vadd.f32 %v795_v12, %v792_v3 }
 0x123   : > { %v823_v61 = vadd.f32 %v822_v16, %v800_v63 }
 0x125   : > { %v824_v17 = vadd.f32 %v823_v61, %v803_v7 }
 0x127   : > { %v825_v18 = vadd.f32 %v824_v17, %v808_v6 }
 0x129   : > { %v826_v19 = vadd.f32 %v825_v18, %v811_v15 }
 0x12b   : > { %v827_v20 = vadd.f32 %v826_v19, %v816_v2 }
 0x12d   : > { %v828_v21 = vadd.f32 %v827_v20, %v819_v10 }
 0x12f   : > { %v829_v22 = vrot.slane %v828_v21, 4 }
 0x131   : > { %v830_v23 = vadd.f32 %v829_v22, %v828_v21 }
 0x133   : > { %v831_v11 = vrot.slane %v830_v23, 2 }
 0x135   : > { %v832_v24 = vadd.f32 %v831_v11, %v830_v23 }
 0x137   : > { %v833_v25 = vrot.slane %v832_v24, 1 }
 0x139   : > { %v834_v26 = vadd.f32 %v833_v25, %v832_v24 }
 0x13b   : > { %v836_v27 = vmul.f32 0.015625, %v834_v26 }
 0x13d   : > { %v837_v28 = vsub.f32 %v792_v3, %v836_v27  ;;  %v838_v29 = vsub.f32 %v795_v12, %v836_v27  ;;  %v839_v30 = vsub.f32 %v800_v63, %v836_v27  ;;  %v840_v13 = vsub.f32 %v803_v7, %v836_v27 }
 0x13e   : > { %v841_v31 = vsub.f32 %v808_v6, %v836_v27  ;;  %v842_v32 = vsub.f32 %v811_v15, %v836_v27  ;;  %v843_v33 = vsub.f32 %v816_v2, %v836_v27  ;;  %v844_v34 = vsub.f32 %v819_v10, %v836_v27 }
 0x13f   : > { %v845_v35 = vmul.f32 %v837_v28, %v837_v28  ;;  %v846_v36 = vmul.f32 %v838_v29, %v838_v29  ;;  %v847_v37 = vmul.f32 %v839_v30, %v839_v30  ;;  %v848_v39 = vmul.f32 %v840_v13, %v840_v13 }
 0x140   : > { %v849_v41 = vmul.f32 %v841_v31, %v841_v31  ;;  %v850_v43 = vmul.f32 %v842_v32, %v842_v32  ;;  %v851_v45 = vmul.f32 %v843_v33, %v843_v33  ;;  %v852_v47 = vmul.f32 %v844_v34, %v844_v34 }
 0x141   : > { %v853_v38 = vadd.f32 %v846_v36, %v845_v35 }
 0x143   : > { %v854_v40 = vadd.f32 %v853_v38, %v847_v37 }
 0x145   : > { %v855_v42 = vadd.f32 %v854_v40, %v848_v39 }
 0x147   : > { %v856_v44 = vadd.f32 %v855_v42, %v849_v41 }
 0x149   : > { %v857_v46 = vadd.f32 %v856_v44, %v850_v43 }
 0x14b   : > { %v858_v48 = vadd.f32 %v857_v46, %v851_v45 }
 0x14d   : > { %v859_v49 = vadd.f32 %v858_v48, %v852_v47 }
 0x14f   : > { %v860_v50 = vrot.slane %v859_v49, 4 }
 0x151   : > { %v861_v51 = vadd.f32 %v860_v50, %v859_v49 }
 0x153   : > { %v862_v52 = vrot.slane %v861_v51, 2 }
 0x155   : > { %v863_v53 = vadd.f32 %v862_v52, %v861_v51 }
 0x157   : > { %v864_v54 = vrot.slane %v863_v53, 1 }
 0x159   : > { %v865_v55 = vadd.f32 %v864_v54, %v863_v53 }
 0x15b   : > { %v866_v56 = vmul.f32 0.015625, %v865_v55 }
 0x15d   : > { %v867_v57 = vadd.f32 1e-05, %v866_v56 }
 0x15f   : > { %1316 = vrsqrt.f32 %v867_v57 }
 0x169   : > { %v1317_v58 = vpop.eup %1316 }
 0x16a   : > { %v869_v59 = vmul.f32 %v1317_v58, %v837_v28  ;;  %v870_v60 = vmul.f32 %v1317_v58, %v838_v29  ;;  %v871_v62 = vmul.f32 %v1317_v58, %v839_v30  ;;  %v872_v63 = vmul.f32 %v1317_v58, %v840_v13 }
 0x16b   : > { %v873_v0 = vmul.f32 %v1317_v58, %v841_v31  ;;  %v874_v1 = vmul.f32 %v1317_v58, %v842_v32  ;;  %v875_v2 = vmul.f32 %v1317_v58, %v843_v33  ;;  %v876_v3 = vmul.f32 %v1317_v58, %v844_v34 }
 0x16c   : > { %vm877_vm0 = vcmp.ge.f32.partialorder %v869_v59, 0.0  ;;  %vm878_vm1 = vcmp.ge.f32.partialorder %v870_v60, 0.0  ;;  %vm879_vm2 = vcmp.ge.f32.partialorder %v871_v62, 0.0  ;;  %vm880_vm3 = vcmp.ge.f32.partialorder %v872_v63, 0.0 }
 0x16d   : > { %vm881_vm4 = vcmp.ge.f32.partialorder %v873_v0, 0.0  ;;  %vm882_vm5 = vcmp.ge.f32.partialorder %v874_v1, 0.0  ;;  %vm883_vm6 = vcmp.ge.f32.partialorder %v875_v2, 0.0  ;;  %vm884_vm7 = vcmp.ge.f32.partialorder %v876_v3, 0.0 }
 0x16e   : > { %v885_v4 = vmul.f32 0.2, %v869_v59  ;;  %v886_v5 = vmul.f32 0.2, %v870_v60  ;;  %v887_v6 = vmul.f32 0.2, %v871_v62 }
 0x16f   : > { %v888_v7 = vmul.f32 0.2, %v872_v63  ;;  %v889_v8 = vmul.f32 0.2, %v873_v0  ;;  %v890_v9 = vmul.f32 0.2, %v874_v1 }
 0x170   : > { %v891_v10 = vmul.f32 0.2, %v875_v2  ;;  %v892_v12 = vmul.f32 0.2, %v876_v3  ;;  %v893_v14 = vsel %vm877_vm0, %v869_v59, %v885_v4  ;;  %v894_v15 = vsel %vm878_vm1, %v870_v60, %v886_v5 }
 0x171   : > { %v895_v16 = vsel %vm879_vm2, %v871_v62, %v887_v6  ;;  %v896_v61 = vsel %vm880_vm3, %v872_v63, %v888_v7  ;;  %v897_v17 = vsel %vm881_vm4, %v873_v0, %v889_v8  ;;  %v898_v18 = vsel %vm882_vm5, %v874_v1, %v890_v9 }
 0x172   : > { %v899_v19 = vsel %vm883_vm6, %v875_v2, %v891_v10  ;;  %v900_v20 = vsel %vm884_vm7, %v876_v3, %v892_v12  ;;  %v1087_v21 = vpack.c.bf16 %v894_v15, %v893_v14  ;;  %v1092_v22 = vpack.c.bf16 %v896_v61, %v895_v16 }
 0x173   : > { %v1097_v23 = vpack.c.bf16 %v898_v18, %v897_v17  ;;  %v1102_v11 = vpack.c.bf16 %v900_v20, %v899_v19 }
 0x174   : > { %1088 = vst [vmem:[%s170_s13] sm:$0xff] %v1087_v21   ;;  %1104 = vst [vmem:[%s170_s13 + $0x8] sm:$0xff] %v1092_v22  }
 0x175   : > { %1105 = vst [vmem:[%s170_s13 + $0x10] sm:$0xff] %v1097_v23   ;;  %1106 = vst [vmem:[%s170_s13 + $0x18] sm:$0xff] %v1102_v11  }
 0x176 PF: > { %s13_s12 = sadd.s32 1, %s1324_s12  }
 0x177   : > { %p10_p4 = scmp.ge.s32.totalorder %s13_s12, 4  }
 0x179   :  { %12 = sbr.rel (!%p10_p4) target bundleno = 1 (0x1), region = 62 }

// kernel: discriminator_forward.7
= control target key start
LH: loop header
LB: loop body
LE: loop exit
PB: predicated region body
PF: predicated region fallthrough
CT: control target
= control target key end

     0   :  { %s1909_s12 = smov 0   ;;  %s2380_s0 = inlined_call_operand.vmem [shape: bf16[2,16,1152], index: 0, kind: input, shape index: {}]   ;;  %s2381_s1 = inlined_call_operand.vmem [shape: bf16[1152,256], index: 1, kind: input, shape index: {}]   ;;  %s2382_s2 = inlined_call_operand.vmem [shape: f32[1,256], index: 2, kind: input, shape index: {}]   ;;  %s2383_s3 = inlined_call_operand.vmem [shape: bf16[2,16,256], index: 3, kind: output, shape index: {}]  }
   0x1 LB: > { %s1449_s13 = sadd.s32 4294967295, %s1886_s12   ;;  %p1453_p0 = scmp.ge.s32.totalorder %s1886_s12, 1  ;;  %s1886_s12 = sphi %s1909_s12, %s13_s12  }
   0x2   : > { %p137_p1 = scmp.lt.s32.totalorder %s1886_s12, 3 }
   0x4   : > { %p138_p2 = pnand %p1453_p0, %p137_p1 }
   0x5   : > { %v1647_v0 = vld [vmem:[%s2381_s1 + $0x4] ss:$8 sps:$4 sm:$0xff] (!%p138_p2)   ;;  %v1651_v2 = vld [vmem:[%s2381_s1] ss:$8 sps:$4 sm:$0xff] (!%p138_p2)   ;;  %v1653_v4 = vld [vmem:[%s2381_s1 + $0x14] ss:$8 sps:$4 sm:$0xff] (!%p138_p2)  }
   0x6   : > { %141 = sbr.rel (%p138_p2) target bundleno = 441 (0x1b9), region = 32  ;;  %v1649_v1 = vld [vmem:[%s2381_s1 + $0x204] ss:$8 sps:$4 sm:$0xff] (!%p138_p2)   ;;  %1104 = vmatprep.subr.bf16.mxu1 (!%p138_p2), %v1647_v0  ;;  %v1652_v3 = vld [vmem:[%s2381_s1 + $0x200] ss:$8 sps:$4 sm:$0xff] (!%p138_p2)   ;;  %p161_p3 = scmp.lt.s32.totalorder (!%p138_p2), %s1449_s13, 1 }
   0x7   : > { %1190 = vmatprep.subr.bf16.mxu0 (!%p138_p2), %v1649_v1  ;;  %1105 = vmatpush1.bf16.msra.mxu1 (!%p138_p2), %v1651_v2  ;;  %v1655_v5 = vld [vmem:[%s2381_s1 + $0x214] ss:$8 sps:$4 sm:$0xff] (!%p138_p2)   ;;  %v1657_v6 = vld [vmem:[%s2381_s1 + $0x10] ss:$8 sps:$4 sm:$0xff] (!%p138_p2)   ;;  %v1659_v8 = vld [vmem:[%s2381_s1 + $0x24] ss:$8 sps:$4 sm:$0xff] (!%p138_p2)  }
   0x8   : > { %1191 = vmatpush1.bf16.msra.mxu0 (!%p138_p2), %v1652_v3  ;;  %1106 = vmatprep.subr.bf16.mxu1 (!%p138_p2), %v1653_v4  ;;  %v1658_v7 = vld [vmem:[%s2381_s1 + $0x210] ss:$8 sps:$4 sm:$0xff] (!%p138_p2)   ;;  %v1661_v9 = vld [vmem:[%s2381_s1 + $0x224] ss:$8 sps:$4 sm:$0xff] (!%p138_p2)   ;;  %v1663_v10 = vld [vmem:[%s2381_s1 + $0x20] ss:$8 sps:$4 sm:$0xff] (!%p138_p2)  }
   0x9   : > { %1192 = vmatprep.subr.bf16.mxu0 (!%p138_p2), %v1655_v5  ;;  %v1664_v11 = vld [vmem:[%s2381_s1 + $0x220] ss:$8 sps:$4 sm:$0xff] (!%p138_p2)   ;;  %v1665_v12 = vld [vmem:[%s2381_s1 + $0x34] ss:$8 sps:$4 sm:$0xff] (!%p138_p2)   ;;  %v1669_v14 = vld [vmem:[%s2381_s1 + $0x30] ss:$8 sps:$4 sm:$0xff] (!%p138_p2)  }
   0xa   : > { %v1667_v13 = vld [vmem:[%s2381_s1 + $0x234] ss:$8 sps:$4 sm:$0xff] (!%p138_p2)   ;;  %v1670_v15 = vld [vmem:[%s2381_s1 + $0x230] ss:$8 sps:$4 sm:$0xff] (!%p138_p2)   ;;  %v1671_v16 = vld [vmem:[%s2381_s1 + $0x44] ss:$8 sps:$4 sm:$0xff] (!%p138_p2)  }
   0xb   : > { %1107 = vmatpush1.bf16.msra.mxu1 (!%p138_p2), %v1657_v6  ;;  %v1673_v17 = vld [vmem:[%s2381_s1 + $0x244] ss:$8 sps:$4 sm:$0xff] (!%p138_p2)   ;;  %v1675_v18 = vld [vmem:[%s2381_s1 + $0x40] ss:$8 sps:$4 sm:$0xff] (!%p138_p2)   ;;  %v1677_v20 = vld [vmem:[%s2381_s1 + $0x54] ss:$8 sps:$4 sm:$0xff] (!%p138_p2)  }
   0xc   : > { %1193 = vmatpush1.bf16.msra.mxu0 (!%p138_p2), %v1658_v7  ;;  %1108 = vmatprep.subr.bf16.mxu1 (!%p138_p2), %v1659_v8  ;;  %v1676_v19 = vld [vmem:[%s2381_s1 + $0x240] ss:$8 sps:$4 sm:$0xff] (!%p138_p2)   ;;  %v1679_v21 = vld [vmem:[%s2381_s1 + $0x254] ss:$8 sps:$4 sm:$0xff] (!%p138_p2)   ;;  %v1681_v22 = vld [vmem:[%s2381_s1 + $0x50] ss:$8 sps:$4 sm:$0xff] (!%p138_p2)  }
   0xd   : > { %1194 = vmatprep.subr.bf16.mxu0 %v1661_v9  ;;  %v1682_v23 = vld [vmem:[%s2381_s1 + $0x250] ss:$8 sps:$4 sm:$0xff]   ;;  %v1683_v24 = vld [vmem:[%s2381_s1 + $0x64] ss:$8 sps:$4 sm:$0xff]   ;;  %v1687_v26 = vld [vmem:[%s2381_s1 + $0x60] ss:$8 sps:$4 sm:$0xff]  }
   0xe   : > { %v1685_v25 = vld [vmem:[%s2381_s1 + $0x264] ss:$8 sps:$4 sm:$0xff]   ;;  %v1688_v27 = vld [vmem:[%s2381_s1 + $0x260] ss:$8 sps:$4 sm:$0xff]   ;;  %v1689_v28 = vld [vmem:[%s2381_s1 + $0x74] ss:$8 sps:$4 sm:$0xff]  }
   0xf   : > { %1109 = vmatpush1.bf16.msra.mxu1 %v1663_v10  ;;  %v1691_v29 = vld [vmem:[%s2381_s1 + $0x274] ss:$8 sps:$4 sm:$0xff]   ;;  %v1693_v30 = vld [vmem:[%s2381_s1 + $0x70] ss:$8 sps:$4 sm:$0xff]   ;;  %v1695_v32 = vld [vmem:[%s2381_s1 + $0x84] ss:$8 sps:$4 sm:$0xff]  }
  0x10   : > { %1195 = vmatpush1.bf16.msra.mxu0 %v1664_v11  ;;  %1110 = vmatprep.subr.bf16.mxu1 %v1665_v12  ;;  %v1694_v31 = vld [vmem:[%s2381_s1 + $0x270] ss:$8 sps:$4 sm:$0xff]   ;;  %v1697_v33 = vld [vmem:[%s2381_s1 + $0x284] ss:$8 sps:$4 sm:$0xff]   ;;  %v1699_v34 = vld [vmem:[%s2381_s1 + $0x80] ss:$8 sps:$4 sm:$0xff]  }
  0x11   : > { %1196 = vmatprep.subr.bf16.mxu0 %v1667_v13  ;;  %v1700_v35 = vld [vmem:[%s2381_s1 + $0x280] ss:$8 sps:$4 sm:$0xff]   ;;  %v1701_v36 = vld [vmem:[%s2381_s1 + $0x94] ss:$8 sps:$4 sm:$0xff]   ;;  %s2385_s13 = smov (!%p161_p3, %s1449_s13), 1 }
  0x12   : > { %v1703_v37 = vld [vmem:[%s2381_s1 + $0x294] ss:$8 sps:$4 sm:$0xff]   ;;  %v1705_v38 = vld [vmem:[%s2381_s1 + $0x90] ss:$8 sps:$4 sm:$0xff]   ;;  %v1707_v40 = vld [vmem:[%s2381_s1 + $0xa4] ss:$8 sps:$4 sm:$0xff]  }
  0x13   : > { %1111 = vmatpush1.bf16.msra.mxu1 %v1669_v14  ;;  %v1706_v39 = vld [vmem:[%s2381_s1 + $0x290] ss:$8 sps:$4 sm:$0xff]   ;;  %s1637_s21 = smul.u32 72, %s2385_s13  ;;  %v1709_v41 = vld [vmem:[%s2381_s1 + $0x2a4] ss:$8 sps:$4 sm:$0xff]  }
  0x14   : > { %1197 = vmatpush1.bf16.msra.mxu0 %v1670_v15  ;;  %1112 = vmatprep.subr.bf16.mxu1 %v1671_v16  ;;  %v1711_v42 = vld [vmem:[%s2381_s1 + $0xa0] ss:$8 sps:$4 sm:$0xff]   ;;  %v1713_v44 = vld [vmem:[%s2381_s1 + $0xb4] ss:$8 sps:$4 sm:$0xff]   ;;  %v1717_v46 = vld [vmem:[%s2381_s1 + $0xb0] ss:$8 sps:$4 sm:$0xff]  }
  0x15   : > { %1198 = vmatprep.subr.bf16.mxu0 %v1673_v17  ;;  %v1712_v43 = vld [vmem:[%s2381_s1 + $0x2a0] ss:$8 sps:$4 sm:$0xff]   ;;  %s2062_s5 = scalar_lea.vmem %s2380_s0, %s1637_s21  ;;  %v1715_v45 = vld [vmem:[%s2381_s1 + $0x2b4] ss:$8 sps:$4 sm:$0xff]   ;;  %v1718_v47 = vld [vmem:[%s2381_s1 + $0x2b0] ss:$8 sps:$4 sm:$0xff]  }
  0x16   : > { %v1745_v48 = vld [vmem:[%s2062_s5 + $0x4] ss:$36 sps:$4 sm:$0xff]   ;;  %v1751_v51 = vld [vmem:[%s2062_s5 + $0x14] ss:$36 sps:$4 sm:$0xff]  }
  0x17   : > { %1113 = vmatpush1.bf16.msra.mxu1 %v1675_v18  ;;  %v1719_v49 = vld [vmem:[%s2381_s1 + $0xc4] ss:$8 sps:$4 sm:$0xff]   ;;  %1136 = vmatprep.mubr.bf16.mxu1 %v1745_v48  ;;  %v1723_v52 = vld [vmem:[%s2381_s1 + $0xc0] ss:$8 sps:$4 sm:$0xff]   ;;  %v1725_v54 = vld [vmem:[%s2381_s1 + $0xd4] ss:$8 sps:$4 sm:$0xff]  }
  0x18   : > { %1199 = vmatpush1.bf16.msra.mxu0 %v1676_v19  ;;  %1114 = vmatprep.subr.bf16.mxu1 %v1677_v20  ;;  %v1721_v50 = vld [vmem:[%s2381_s1 + $0x2c4] ss:$8 sps:$4 sm:$0xff]   ;;  %v1724_v53 = vld [vmem:[%s2381_s1 + $0x2c0] ss:$8 sps:$4 sm:$0xff]   ;;  %v1727_v55 = vld [vmem:[%s2381_s1 + $0x2d4] ss:$8 sps:$4 sm:$0xff]  }
  0x19   : > { %1200 = vmatprep.subr.bf16.mxu0 %v1679_v21  ;;  %1222 = vmatprep.mubr.bf16.mxu0 %v1751_v51  ;;  %v1729_v56 = vld [vmem:[%s2381_s1 + $0xd0] ss:$8 sps:$4 sm:$0xff]   ;;  %v1731_v58 = vld [vmem:[%s2381_s1 + $0xe4] ss:$8 sps:$4 sm:$0xff]   ;;  %v1735_v60 = vld [vmem:[%s2381_s1 + $0xe0] ss:$8 sps:$4 sm:$0xff]  }
  0x1a   : > { %v1730_v57 = vld [vmem:[%s2381_s1 + $0x2d0] ss:$8 sps:$4 sm:$0xff]   ;;  %v1733_v59 = vld [vmem:[%s2381_s1 + $0x2e4] ss:$8 sps:$4 sm:$0xff]   ;;  %v1736_v61 = vld [vmem:[%s2381_s1 + $0x2e0] ss:$8 sps:$4 sm:$0xff]  }
  0x1b   : > { %1115 = vmatpush1.bf16.msra.mxu1 %v1681_v22  ;;  %v1737_v62 = vld [vmem:[%s2381_s1 + $0xf4] ss:$8 sps:$4 sm:$0xff]   ;;  %v1741_v0 = vld [vmem:[%s2381_s1 + $0xf0] ss:$8 sps:$4 sm:$0xff]   ;;  %v1748_v2 = vld [vmem:[%s2381_s1 + $0x104] ss:$8 sps:$4 sm:$0xff]  }
  0x1c   : > { %1201 = vmatpush1.bf16.msra.mxu0 %v1682_v23  ;;  %1116 = vmatprep.subr.bf16.mxu1 %v1683_v24  ;;  %v1739_v63 = vld [vmem:[%s2381_s1 + $0x2f4] ss:$8 sps:$4 sm:$0xff]   ;;  %v1742_v1 = vld [vmem:[%s2381_s1 + $0x2f0] ss:$8 sps:$4 sm:$0xff]   ;;  %v1754_v3 = vld [vmem:[%s2381_s1 + $0x304] ss:$8 sps:$4 sm:$0xff]  }
  0x1d   : > { %1202 = vmatprep.subr.bf16.mxu0 %v1685_v25  ;;  %v1743_v4 = vld [vmem:[%s2062_s5] ss:$36 sps:$4 sm:$0xff]   ;;  %v1749_v6 = vld [vmem:[%s2062_s5 + $0x10] ss:$36 sps:$4 sm:$0xff]  }
  0x1e   : > { %v1746_v5 = vld [vmem:[%s2381_s1 + $0x100] ss:$8 sps:$4 sm:$0xff]   ;;  %v1757_v8 = vld [vmem:[%s2381_s1 + $0x114] ss:$8 sps:$4 sm:$0xff]   ;;  %v1755_v10 = vld [vmem:[%s2381_s1 + $0x110] ss:$8 sps:$4 sm:$0xff]  }
  0x1f   : > { %1117 = vmatpush1.bf16.msra.mxu1 %v1687_v26  ;;  %v1752_v7 = vld [vmem:[%s2381_s1 + $0x300] ss:$8 sps:$4 sm:$0xff]   ;;  %v1760_v9 = vld [vmem:[%s2381_s1 + $0x314] ss:$8 sps:$4 sm:$0xff]   ;;  %v1758_v11 = vld [vmem:[%s2381_s1 + $0x310] ss:$8 sps:$4 sm:$0xff]  }
  0x20   : > { %1203 = vmatpush1.bf16.msra.mxu0 %v1688_v27  ;;  %1118 = vmatprep.subr.bf16.mxu1 %v1689_v28  ;;  %v1763_v12 = vld [vmem:[%s2381_s1 + $0x124] ss:$8 sps:$4 sm:$0xff]   ;;  %v1761_v14 = vld [vmem:[%s2381_s1 + $0x120] ss:$8 sps:$4 sm:$0xff]   ;;  %v1769_v16 = vld [vmem:[%s2381_s1 + $0x134] ss:$8 sps:$4 sm:$0xff]  }
  0x21   : > { %1204 = vmatprep.subr.bf16.mxu0 %v1691_v29  ;;  %v1766_v13 = vld [vmem:[%s2381_s1 + $0x324] ss:$8 sps:$4 sm:$0xff]   ;;  %v1764_v15 = vld [vmem:[%s2381_s1 + $0x320] ss:$8 sps:$4 sm:$0xff]   ;;  %v1772_v17 = vld [vmem:[%s2381_s1 + $0x334] ss:$8 sps:$4 sm:$0xff]  }
  0x22   : > { %v1767_v18 = vld [vmem:[%s2381_s1 + $0x130] ss:$8 sps:$4 sm:$0xff]   ;;  %v1775_v20 = vld [vmem:[%s2381_s1 + $0x144] ss:$8 sps:$4 sm:$0xff]   ;;  %v1773_v22 = vld [vmem:[%s2381_s1 + $0x140] ss:$8 sps:$4 sm:$0xff]  }
  0x23   : > { %1119 = vmatpush1.bf16.msra.mxu1 %v1693_v30  ;;  %v1770_v19 = vld [vmem:[%s2381_s1 + $0x330] ss:$8 sps:$4 sm:$0xff]   ;;  %v1778_v21 = vld [vmem:[%s2381_s1 + $0x344] ss:$8 sps:$4 sm:$0xff]   ;;  %v1776_v23 = vld [vmem:[%s2381_s1 + $0x340] ss:$8 sps:$4 sm:$0xff]  }
  0x24   : > { %1205 = vmatpush1.bf16.msra.mxu0 %v1694_v31  ;;  %1120 = vmatprep.subr.bf16.mxu1 %v1695_v32  ;;  %v1781_v24 = vld [vmem:[%s2381_s1 + $0x154] ss:$8 sps:$4 sm:$0xff]   ;;  %v1779_v26 = vld [vmem:[%s2381_s1 + $0x150] ss:$8 sps:$4 sm:$0xff]   ;;  %v1787_v28 = vld [vmem:[%s2381_s1 + $0x164] ss:$8 sps:$4 sm:$0xff]  }
  0x25   : > { %1206 = vmatprep.subr.bf16.mxu0 %v1697_v33  ;;  %v1784_v25 = vld [vmem:[%s2381_s1 + $0x354] ss:$8 sps:$4 sm:$0xff]   ;;  %v1782_v27 = vld [vmem:[%s2381_s1 + $0x350] ss:$8 sps:$4 sm:$0xff]   ;;  %v1790_v29 = vld [vmem:[%s2381_s1 + $0x364] ss:$8 sps:$4 sm:$0xff]  }
  0x26   : > { %v1785_v30 = vld [vmem:[%s2381_s1 + $0x160] ss:$8 sps:$4 sm:$0xff]   ;;  %v1793_v32 = vld [vmem:[%s2381_s1 + $0x174] ss:$8 sps:$4 sm:$0xff]  }
  0x27   : > { %1121 = vmatpush1.bf16.msra.mxu1 %v1699_v34  ;;  %v1788_v31 = vld [vmem:[%s2381_s1 + $0x360] ss:$8 sps:$4 sm:$0xff]   ;;  %v1796_v33 = vld [vmem:[%s2381_s1 + $0x374] ss:$8 sps:$4 sm:$0xff]   ;;  %v1847_v34 = vld [vmem:[%s2062_s5 + $0xc] ss:$36 sps:$4 sm:$0xff]  }
  0x28   : > { %1207 = vmatpush1.bf16.msra.mxu0 %v1700_v35  ;;  %1122 = vmatprep.subr.bf16.mxu1 %v1701_v36  ;;  %v1850_v35 = vld [vmem:[%s2062_s5 + $0x1c] ss:$36 sps:$4 sm:$0xff]   ;;  %v1791_v36 = vld [vmem:[%s2381_s1 + $0x170] ss:$8 sps:$4 sm:$0xff]  }
  0x29   : > { %1208 = vmatprep.subr.bf16.mxu0 %v1703_v37  ;;  %v1794_v37 = vld [vmem:[%s2381_s1 + $0x370] ss:$8 sps:$4 sm:$0xff]   ;;  %v1809_v48 = vld [vmem:[%s2381_s1 + $0x1a0] ss:$8 sps:$4 sm:$0xff]   ;;  %v1820_v51 = vld [vmem:[%s2381_s1 + $0x3b4] ss:$8 sps:$4 sm:$0xff]  }
  0x2b   : > { %1123 = vmatpush1.bf16.msra.mxu1 %v1705_v38  ;;  %v1799_v38 = vld [vmem:[%s2381_s1 + $0x184] ss:$8 sps:$4 sm:$0xff]  }
  0x2c   : > { %1209 = vmatpush1.bf16.msra.mxu0 %v1706_v39  ;;  %1124 = vmatprep.subr.bf16.mxu1 %v1707_v40  ;;  %v1802_v39 = vld [vmem:[%s2381_s1 + $0x384] ss:$8 sps:$4 sm:$0xff]   ;;  %v1797_v40 = vld [vmem:[%s2381_s1 + $0x180] ss:$8 sps:$4 sm:$0xff]  }
  0x2d   : > { %1210 = vmatprep.subr.bf16.mxu0 %v1709_v41  ;;  %v1800_v41 = vld [vmem:[%s2381_s1 + $0x380] ss:$8 sps:$4 sm:$0xff]  }
  0x2f   : > { %1125 = vmatpush1.bf16.msra.mxu1 %v1711_v42  ;;  %v1805_v42 = vld [vmem:[%s2381_s1 + $0x194] ss:$8 sps:$4 sm:$0xff]  }
  0x30   : > { %1211 = vmatpush1.bf16.msra.mxu0 %v1712_v43  ;;  %1126 = vmatprep.subr.bf16.mxu1 %v1713_v44  ;;  %v1808_v43 = vld [vmem:[%s2381_s1 + $0x394] ss:$8 sps:$4 sm:$0xff]   ;;  %v1803_v44 = vld [vmem:[%s2381_s1 + $0x190] ss:$8 sps:$4 sm:$0xff]  }
  0x31   : > { %1212 = vmatprep.subr.bf16.mxu0 %v1715_v45  ;;  %v1806_v45 = vld [vmem:[%s2381_s1 + $0x390] ss:$8 sps:$4 sm:$0xff]  }
  0x33   : > { %1127 = vmatpush1.bf16.msra.mxu1 %v1717_v46  ;;  %v1811_v46 = vld [vmem:[%s2381_s1 + $0x1a4] ss:$8 sps:$4 sm:$0xff]  }
  0x34   : > { %1213 = vmatpush1.bf16.msra.mxu0 %v1718_v47  ;;  %1128 = vmatprep.subr.bf16.mxu1 %v1719_v49  ;;  %v1814_v47 = vld [vmem:[%s2381_s1 + $0x3a4] ss:$8 sps:$4 sm:$0xff]   ;;  %v1812_v49 = vld [vmem:[%s2381_s1 + $0x3a0] ss:$8 sps:$4 sm:$0xff]  }
  0x35   : > { %1214 = vmatprep.subr.bf16.mxu0 %v1721_v50  ;;  %v1817_v50 = vld [vmem:[%s2381_s1 + $0x1b4] ss:$8 sps:$4 sm:$0xff]  }
  0x37   : > { %1129 = vmatpush1.bf16.msra.mxu1 %v1723_v52  ;;  %v1815_v52 = vld [vmem:[%s2381_s1 + $0x1b0] ss:$8 sps:$4 sm:$0xff]  }
  0x38   : > { %1215 = vmatpush1.bf16.msra.mxu0 %v1724_v53  ;;  %1130 = vmatprep.subr.bf16.mxu1 %v1725_v54  ;;  %v1818_v53 = vld [vmem:[%s2381_s1 + $0x3b0] ss:$8 sps:$4 sm:$0xff]   ;;  %v1823_v54 = vld [vmem:[%s2381_s1 + $0x1c4] ss:$8 sps:$4 sm:$0xff]  }
  0x39   : > { %1216 = vmatprep.subr.bf16.mxu0 %v1727_v55  ;;  %v1826_v55 = vld [vmem:[%s2381_s1 + $0x3c4] ss:$8 sps:$4 sm:$0xff]  }
  0x3b   : > { %1131 = vmatpush1.bf16.msra.mxu1 %v1729_v56  ;;  %v1821_v56 = vld [vmem:[%s2381_s1 + $0x1c0] ss:$8 sps:$4 sm:$0xff]  }
  0x3c   : > { %1217 = vmatpush1.bf16.msra.mxu0 %v1730_v57  ;;  %1132 = vmatprep.subr.bf16.mxu1 %v1731_v58  ;;  %v1824_v57 = vld [vmem:[%s2381_s1 + $0x3c0] ss:$8 sps:$4 sm:$0xff]   ;;  %v1829_v58 = vld [vmem:[%s2381_s1 + $0x1d4] ss:$8 sps:$4 sm:$0xff]  }
  0x3d   : > { %1218 = vmatprep.subr.bf16.mxu0 %v1733_v59  ;;  %v1832_v59 = vld [vmem:[%s2381_s1 + $0x3d4] ss:$8 sps:$4 sm:$0xff]  }
  0x3f   : > { %1133 = vmatpush1.bf16.msra.mxu1 %v1735_v60  ;;  %v1827_v60 = vld [vmem:[%s2381_s1 + $0x1d0] ss:$8 sps:$4 sm:$0xff]  }
  0x40   : > { %1219 = vmatpush1.bf16.msra.mxu0 %v1736_v61  ;;  %1134 = vmatprep.subr.bf16.mxu1 %v1737_v62  ;;  %v1830_v61 = vld [vmem:[%s2381_s1 + $0x3d0] ss:$8 sps:$4 sm:$0xff]   ;;  %v1835_v62 = vld [vmem:[%s2381_s1 + $0x1e4] ss:$8 sps:$4 sm:$0xff]  }
  0x41   : > { %1220 = vmatprep.subr.bf16.mxu0 %v1739_v63  ;;  %v1838_v63 = vld [vmem:[%s2381_s1 + $0x3e4] ss:$8 sps:$4 sm:$0xff]  }
  0x43   : > { %1135 = vmatpush1.bf16.msra.mxu1 %v1741_v0  ;;  %v1833_v0 = vld [vmem:[%s2381_s1 + $0x1e0] ss:$8 sps:$4 sm:$0xff]  }
  0x44   : > { %1221 = vmatpush1.bf16.msra.mxu0 %v1742_v1  ;;  %1147 = vmatprep.subr.bf16.mxu1 %v1748_v2  ;;  %v1836_v1 = vld [vmem:[%s2381_s1 + $0x3e0] ss:$8 sps:$4 sm:$0xff]   ;;  %v1841_v2 = vld [vmem:[%s2381_s1 + $0x1f4] ss:$8 sps:$4 sm:$0xff]  }
  0x45   : > { %1233 = vmatprep.subr.bf16.mxu0 %v1754_v3  ;;  %v1844_v3 = vld [vmem:[%s2381_s1 + $0x3f4] ss:$8 sps:$4 sm:$0xff]  }
  0x46   : > { %1137 = vmatmul.mubr.bf16.vlgmr.msra.gmra.mrb[0].mxu1 %v1743_v4  ;;  %v1839_v4 = vld [vmem:[%s2381_s1 + $0x1f0] ss:$8 sps:$4 sm:$0xff]  }
  0x47   : > { %1223 = vmatmul.mubr.bf16.vlgmr.msra.gmra.mrb[0].mxu0 %v1749_v6  ;;  %1148 = vmatpush1.bf16.msra.mxu1 %v1746_v5  ;;  %v1842_v5 = vld [vmem:[%s2381_s1 + $0x3f0] ss:$8 sps:$4 sm:$0xff]   ;;  %v1853_v6 = vld [vmem:[%s2381_s1 + $0x404] ss:$8 sps:$4 sm:$0xff]  }
  0x48   : > { %1234 = vmatpush1.bf16.msra.mxu0 %v1752_v7  ;;  %1149 = vmatprep.subr.bf16.mxu1 %v1757_v8  ;;  %v1845_v7 = vld [vmem:[%s2062_s5 + $0x8] ss:$36 sps:$4 sm:$0xff]   ;;  %v1848_v8 = vld [vmem:[%s2062_s5 + $0x18] ss:$36 sps:$4 sm:$0xff]  }
  0x49   : > { %1235 = vmatprep.subr.bf16.mxu0 %v1760_v9  ;;  %1179 = vmatprep.mubr.bf16.mxu1 %v1847_v34  ;;  %v1851_v9 = vld [vmem:[%s2381_s1 + $0x400] ss:$8 sps:$4 sm:$0xff]  }
  0x4a   : > { %1265 = vmatprep.mubr.bf16.mxu0 %v1850_v35 }
  0x4b   : > { %1150 = vmatpush1.bf16.msra.mxu1 %v1755_v10  ;;  %v1856_v10 = vld [vmem:[%s2381_s1 + $0x414] ss:$8 sps:$4 sm:$0xff]  }
  0x4c   : > { %1236 = vmatpush1.bf16.msra.mxu0 %v1758_v11  ;;  %1151 = vmatprep.subr.bf16.mxu1 %v1763_v12  ;;  %v1854_v11 = vld [vmem:[%s2381_s1 + $0x410] ss:$8 sps:$4 sm:$0xff]   ;;  %v1888_v12 = vmov 0  }
  0x4d   : > { %1237 = vmatprep.subr.bf16.mxu0 %v1766_v13  ;;  %v1859_v13 = vld [vmem:[%s2381_s1 + $0x424] ss:$8 sps:$4 sm:$0xff]  }
  0x4f   : > { %1152 = vmatpush1.bf16.msra.mxu1 %v1761_v14  ;;  %v1857_v14 = vld [vmem:[%s2381_s1 + $0x420] ss:$8 sps:$4 sm:$0xff]  }
  0x50   : > { %1238 = vmatpush1.bf16.msra.mxu0 %v1764_v15  ;;  %1153 = vmatprep.subr.bf16.mxu1 %v1769_v16  ;;  %v1862_v15 = vld [vmem:[%s2381_s1 + $0x434] ss:$8 sps:$4 sm:$0xff]   ;;  %v1860_v16 = vld [vmem:[%s2381_s1 + $0x430] ss:$8 sps:$4 sm:$0xff]  }
  0x51   : > { %1239 = vmatprep.subr.bf16.mxu0 %v1772_v17  ;;  %v1865_v17 = vld [vmem:[%s2381_s1 + $0x444] ss:$8 sps:$4 sm:$0xff]  }
  0x53   : > { %1154 = vmatpush1.bf16.msra.mxu1 %v1767_v18  ;;  %v1863_v18 = vld [vmem:[%s2381_s1 + $0x440] ss:$8 sps:$4 sm:$0xff]  }
  0x54   : > { %1240 = vmatpush1.bf16.msra.mxu0 %v1770_v19  ;;  %1155 = vmatprep.subr.bf16.mxu1 %v1775_v20  ;;  %v1868_v19 = vld [vmem:[%s2381_s1 + $0x454] ss:$8 sps:$4 sm:$0xff]   ;;  %v1866_v20 = vld [vmem:[%s2381_s1 + $0x450] ss:$8 sps:$4 sm:$0xff]  }
  0x55   : > { %1241 = vmatprep.subr.bf16.mxu0 %v1778_v21  ;;  %v1871_v21 = vld [vmem:[%s2381_s1 + $0x464] ss:$8 sps:$4 sm:$0xff]  }
  0x57   : > { %1156 = vmatpush1.bf16.msra.mxu1 %v1773_v22  ;;  %v1869_v22 = vld [vmem:[%s2381_s1 + $0x460] ss:$8 sps:$4 sm:$0xff]  }
  0x58   : > { %1242 = vmatpush1.bf16.msra.mxu0 %v1776_v23  ;;  %1157 = vmatprep.subr.bf16.mxu1 %v1781_v24  ;;  %v1874_v23 = vld [vmem:[%s2381_s1 + $0x474] ss:$8 sps:$4 sm:$0xff]   ;;  %v1872_v24 = vld [vmem:[%s2381_s1 + $0x470] ss:$8 sps:$4 sm:$0xff]  }
  0x59   : > { %1243 = vmatprep.subr.bf16.mxu0 %v1784_v25  ;;  %v1875_v25 = vld [vmem:[%s2062_s5 + $0x20] ss:$36 sps:$4 sm:$0xff]   ;;  %s1614_s5 = sshll.u32 %s2385_s13, 4 }
  0x5a   : > { %s170_s18 = scalar_lea.vmem %s2383_s3, %s1614_s5 }
  0x5b   : > { %1158 = vmatpush1.bf16.msra.mxu1 %v1779_v26 }
  0x5c   : > { %1244 = vmatpush1.bf16.msra.mxu0 %v1782_v27  ;;  %1159 = vmatprep.subr.bf16.mxu1 %v1787_v28 }
  0x5d   : > { %1245 = vmatprep.subr.bf16.mxu0 %v1790_v29 }
  0x5f   : > { %1160 = vmatpush1.bf16.msra.mxu1 %v1785_v30  ;;  %v328_v30 = vlaneseq }
  0x60   : > { %1246 = vmatpush1.bf16.msra.mxu0 %v1788_v31  ;;  %1161 = vmatprep.subr.bf16.mxu1 %v1793_v32 }
  0x61   : > { %1247 = vmatprep.subr.bf16.mxu0 %v1796_v33  ;;  %v329_v31 = vshrl.u32 %v328_v30, 7  ;;  %v326_v33 = vld [vmem:[%s2382_s2] sm:$0x3] }
  0x63   : > { %1162 = vmatpush1.bf16.msra.mxu1 %v1791_v36  ;;  %v330_v32 = vsub.s32 0, %v329_v31  ;;  %v334_v34 = vsub.s32 1, %v329_v31 }
  0x64   : > { %1248 = vmatpush1.bf16.msra.mxu0 %v1794_v37  ;;  %1163 = vmatprep.subr.bf16.mxu1 %v1799_v38 }
  0x65   : > { %1249 = vmatprep.subr.bf16.mxu0 %v1802_v39  ;;  %v331_v35 = vrot.slane %v326_v33, %v330_v32  ;;  %v335_v36 = vrot.slane %v326_v33, %v334_v34 }
  0x67   : > { %1164 = vmatpush1.bf16.msra.mxu1 %v1797_v40 }
  0x68   : > { %1250 = vmatpush1.bf16.msra.mxu0 %v1800_v41  ;;  %1165 = vmatprep.subr.bf16.mxu1 %v1805_v42 }
  0x69   : > { %1251 = vmatprep.subr.bf16.mxu0 %v1808_v43 }
  0x6b   : > { %1166 = vmatpush1.bf16.msra.mxu1 %v1803_v44 }
  0x6c   : > { %1252 = vmatpush1.bf16.msra.mxu0 %v1806_v45  ;;  %1167 = vmatprep.subr.bf16.mxu1 %v1811_v46 }
  0x6d   : > { %1253 = vmatprep.subr.bf16.mxu0 %v1814_v47 }
  0x6f   : > { %1168 = vmatpush1.bf16.msra.mxu1 %v1809_v48 }
  0x70   : > { %1254 = vmatpush1.bf16.msra.mxu0 %v1812_v49  ;;  %1169 = vmatprep.subr.bf16.mxu1 %v1817_v50 }
  0x71   : > { %1255 = vmatprep.subr.bf16.mxu0 %v1820_v51 }
  0x73   : > { %1170 = vmatpush1.bf16.msra.mxu1 %v1815_v52 }
  0x74   : > { %1256 = vmatpush1.bf16.msra.mxu0 %v1818_v53  ;;  %1171 = vmatprep.subr.bf16.mxu1 %v1823_v54 }
  0x75   : > { %1257 = vmatprep.subr.bf16.mxu0 %v1826_v55 }
  0x77   : > { %1172 = vmatpush1.bf16.msra.mxu1 %v1821_v56 }
  0x78   : > { %1258 = vmatpush1.bf16.msra.mxu0 %v1824_v57  ;;  %1173 = vmatprep.subr.bf16.mxu1 %v1829_v58 }
  0x79   : > { %1259 = vmatprep.subr.bf16.mxu0 %v1832_v59 }
  0x7b   : > { %1174 = vmatpush1.bf16.msra.mxu1 %v1827_v60 }
  0x7c   : > { %1260 = vmatpush1.bf16.msra.mxu0 %v1830_v61  ;;  %1175 = vmatprep.subr.bf16.mxu1 %v1835_v62 }
  0x7d   : > { %1261 = vmatprep.subr.bf16.mxu0 %v1838_v63 }
  0x7f   : > { %1176 = vmatpush1.bf16.msra.mxu1 %v1833_v0 }
  0x80   : > { %1262 = vmatpush1.bf16.msra.mxu0 %v1836_v1  ;;  %1177 = vmatprep.subr.bf16.mxu1 %v1841_v2 }
  0x81   : > { %1263 = vmatprep.subr.bf16.mxu0 %v1844_v3 }
  0x83   : > { %1178 = vmatpush1.bf16.msra.mxu1 %v1839_v4 }
  0x84   : > { %1264 = vmatpush1.bf16.msra.mxu0 %v1842_v5 }
  0x85   : > { %1276 = vmatprep.subr.bf16.mxu0 %v1853_v6 }
  0x86   : > { %1180 = vmatmul.mubr.bf16.vlgmr.msra.gmra.mrb[0].mxu1 %v1845_v7 }
  0x87   : > { %1266 = vmatmul.mubr.bf16.vlgmr.msra.gmra.mrb[0].mxu0 %v1848_v8 }
  0x88   : > { %1277 = vmatpush1.bf16.msra.mxu0 %v1851_v9  ;;  %1308 = vmatprep.mubr.bf16.mxu0 %v1888_v12 }
  0x89   : > { %1278 = vmatprep.subr.bf16.mxu0 %v1856_v10 }
  0x8c   : > { %1279 = vmatpush1.bf16.msra.mxu0 %v1854_v11 }
  0x8d   : > { %1280 = vmatprep.subr.bf16.mxu0 %v1859_v13 }
  0x90   : > { %1281 = vmatpush1.bf16.msra.mxu0 %v1857_v14 }
  0x91   : > { %1282 = vmatprep.subr.bf16.mxu0 %v1862_v15 }
  0x94   : > { %1283 = vmatpush1.bf16.msra.mxu0 %v1860_v16 }
  0x95   : > { %1284 = vmatprep.subr.bf16.mxu0 %v1865_v17 }
  0x98   : > { %1285 = vmatpush1.bf16.msra.mxu0 %v1863_v18 }
  0x99   : > { %1286 = vmatprep.subr.bf16.mxu0 %v1868_v19 }
  0x9c   : > { %1287 = vmatpush1.bf16.msra.mxu0 %v1866_v20 }
  0x9d   : > { %1288 = vmatprep.subr.bf16.mxu0 %v1871_v21 }
  0xa0   : > { %1289 = vmatpush1.bf16.msra.mxu0 %v1869_v22 }
  0xa1   : > { %1290 = vmatprep.subr.bf16.mxu0 %v1874_v23 }
  0xa4   : > { %1291 = vmatpush1.bf16.msra.mxu0 %v1872_v24 }
  0xa7   : > { %1309 = vmatmul.mubr.bf16.vlgmr.msra.gmra.mrb[0].mxu0 %v1875_v25 }
 0x159   : > { %v1181_v26 = vpop.f32.mrb[0].mxu1 }
 0x15a   : > { %v1183_v27 = vpop.f32.mrb[1].mxu1  ;;  %v1617_v37 = vadd.f32 %v1181_v26, %v331_v35 }
 0x15b   : > { %v1185_v28 = vpop.f32.mrb[2].mxu1  ;;  %v1619_v38 = vadd.f32 %v1183_v27, %v335_v36 }
 0x15c   : > { %v1187_v29 = vpop.f32.mrb[3].mxu1  ;;  %v1621_v40 = vadd.f32 %v1185_v28, %v331_v35 }
 0x15d   : > { %v1623_v43 = vadd.f32 %v1187_v29, %v335_v36 }
 0x17a   : > { %v1310_v39 = vpop.f32.mrb[0].mxu0 }
 0x17b   : > { %v1618_v41 = vadd.f32 %v1617_v37, %v1310_v39  ;;  %v1312_v42 = vpop.f32.mrb[1].mxu0 }
 0x17c   : > { %v1620_v44 = vadd.f32 %v1619_v38, %v1312_v42  ;;  %v1314_v45 = vpop.f32.mrb[2].mxu0 }
 0x17d   : > { %v1622_v46 = vadd.f32 %v1621_v40, %v1314_v45  ;;  %v1316_v47 = vpop.f32.mrb[3].mxu0 }
 0x17e   : > { %v1624_v48 = vadd.f32 %v1623_v43, %v1316_v47 }
 0x17f   : > { %v1319_v49 = vadd.f32 %v1622_v46, %v1618_v41 }
 0x180   : > { %v1326_v50 = vadd.f32 %v1624_v48, %v1620_v44 }
 0x181   : > { %v1320_v51 = vrot.slane %v1319_v49, 4 }
 0x182   : > { %v1327_v52 = vrot.slane %v1326_v50, 4 }
 0x183   : > { %v1321_v53 = vadd.f32 %v1320_v51, %v1319_v49 }
 0x184   : > { %v1328_v54 = vadd.f32 %v1327_v52, %v1326_v50 }
 0x185   : > { %v1322_v55 = vrot.slane %v1321_v53, 2 }
 0x186   : > { %v1329_v56 = vrot.slane %v1328_v54, 2 }
 0x187   : > { %v1323_v57 = vadd.f32 %v1322_v55, %v1321_v53 }
 0x188   : > { %v1330_v58 = vadd.f32 %v1329_v56, %v1328_v54 }
 0x189   : > { %v1324_v59 = vrot.slane %v1323_v57, 1 }
 0x18a   : > { %v1331_v60 = vrot.slane %v1330_v58, 1 }
 0x18b   : > { %v1325_v61 = vadd.f32 %v1324_v59, %v1323_v57 }
 0x18c   : > { %v1332_v62 = vadd.f32 %v1331_v60, %v1330_v58 }
 0x18d   : > { %v1334_v63 = vmul.f32 0.0625, %v1325_v61 }
 0x18e   : > { %v1335_v0 = vmul.f32 0.0625, %v1332_v62 }
 0x18f   : > { %v1336_v1 = vsub.f32 %v1618_v41, %v1334_v63  ;;  %v1338_v2 = vsub.f32 %v1622_v46, %v1334_v63 }
 0x190   : > { %v1337_v3 = vsub.f32 %v1620_v44, %v1335_v0  ;;  %v1339_v4 = vsub.f32 %v1624_v48, %v1335_v0 }
 0x191   : > { %v1340_v5 = vmul.f32 %v1336_v1, %v1336_v1  ;;  %v1342_v6 = vmul.f32 %v1338_v2, %v1338_v2 }
 0x192   : > { %v1341_v7 = vmul.f32 %v1337_v3, %v1337_v3  ;;  %v1343_v8 = vmul.f32 %v1339_v4, %v1339_v4 }
 0x193   : > { %v1344_v9 = vadd.f32 %v1342_v6, %v1340_v5 }
 0x194   : > { %v1351_v10 = vadd.f32 %v1343_v8, %v1341_v7 }
 0x195   : > { %v1345_v11 = vrot.slane %v1344_v9, 4 }
 0x196   : > { %v1352_v12 = vrot.slane %v1351_v10, 4 }
 0x197   : > { %v1346_v13 = vadd.f32 %v1345_v11, %v1344_v9 }
 0x198   : > { %v1353_v14 = vadd.f32 %v1352_v12, %v1351_v10 }
 0x199   : > { %v1347_v15 = vrot.slane %v1346_v13, 2 }
 0x19a   : > { %v1354_v16 = vrot.slane %v1353_v14, 2 }
 0x19b   : > { %v1348_v17 = vadd.f32 %v1347_v15, %v1346_v13 }
 0x19c   : > { %v1355_v18 = vadd.f32 %v1354_v16, %v1353_v14 }
 0x19d   : > { %v1349_v19 = vrot.slane %v1348_v17, 1 }
 0x19e   : > { %v1356_v20 = vrot.slane %v1355_v18, 1 }
 0x19f   : > { %v1350_v21 = vadd.f32 %v1349_v19, %v1348_v17 }
 0x1a0   : > { %v1357_v22 = vadd.f32 %v1356_v20, %v1355_v18 }
 0x1a1   : > { %v1358_v23 = vmul.f32 0.0625, %v1350_v21 }
 0x1a2   : > { %v1359_v24 = vmul.f32 0.0625, %v1357_v22 }
 0x1a3   : > { %v1360_v25 = vadd.f32 1e-05, %v1358_v23 }
 0x1a4   : > { %v1361_v26 = vadd.f32 1e-05, %v1359_v24 }
 0x1a5   : > { %1876 = vrsqrt.f32 %v1360_v25 }
 0x1a6   : > { %1878 = vrsqrt.f32 %v1361_v26 }
 0x1af   : > { %v1877_v27 = vpop.eup %1876 }
 0x1b0   : > { %v1879_v28 = vpop.eup %1878  ;;  %v1364_v29 = vmul.f32 %v1877_v27, %v1336_v1  ;;  %v1366_v30 = vmul.f32 %v1877_v27, %v1338_v2 }
 0x1b1   : > { %v1365_v31 = vmul.f32 %v1879_v28, %v1337_v3  ;;  %v1367_v32 = vmul.f32 %v1879_v28, %v1339_v4 }
 0x1b2   : > { %vm1368_vm0 = vcmp.ge.f32.partialorder %v1364_v29, 0.0  ;;  %vm1370_vm1 = vcmp.ge.f32.partialorder %v1366_v30, 0.0  ;;  %v1372_v33 = vmul.f32 0.2, %v1364_v29  ;;  %v1374_v34 = vmul.f32 0.2, %v1366_v30 }
 0x1b3   : > { %vm1369_vm2 = vcmp.ge.f32.partialorder %v1365_v31, 0.0  ;;  %vm1371_vm3 = vcmp.ge.f32.partialorder %v1367_v32, 0.0  ;;  %v1373_v35 = vmul.f32 0.2, %v1365_v31  ;;  %v1375_v36 = vmul.f32 0.2, %v1367_v32 }
 0x1b4   : > { %v1376_v37 = vsel %vm1368_vm0, %v1364_v29, %v1372_v33  ;;  %v1378_v38 = vsel %vm1370_vm1, %v1366_v30, %v1374_v34 }
 0x1b5   : > { %v1377_v39 = vsel %vm1369_vm2, %v1365_v31, %v1373_v35  ;;  %v1379_v40 = vsel %vm1371_vm3, %v1367_v32, %v1375_v36 }
 0x1b6   : > { %v1615_v41 = vpack.c.bf16 %v1377_v39, %v1376_v37  ;;  %v1616_v42 = vpack.c.bf16 %v1379_v40, %v1378_v38 }
 0x1b8   : > { %1392 = vst [vmem:[%s170_s18] sm:$0xff] %v1615_v41  ;;  %1393 = vst [vmem:[%s170_s18 + $0x8] sm:$0xff] %v1616_v42 }
 0x1b9 PF: > { %s13_s12 = sadd.s32 1, %s1886_s12  }
 0x1ba   : > { %p10_p4 = scmp.ge.s32.totalorder %s13_s12, 4  }
 0x1bc   :  { %12 = sbr.rel (!%p10_p4) target bundleno = 1 (0x1), region = 62 }

// kernel: discriminator_forward.9
= control target key start
LH: loop header
LB: loop body
LE: loop exit
PB: predicated region body
PF: predicated region fallthrough
CT: control target
= control target key end

     0   :  { %s4492_s12 = smov 0   ;;  %s5418_s0 = inlined_call_operand.vmem [shape: bf16[2,4,4608], index: 0, kind: input, shape index: {}]   ;;  %s5419_s1 = inlined_call_operand.vmem [shape: bf16[4608,128], index: 1, kind: input, shape index: {}]   ;;  %s5420_s2 = inlined_call_operand.vmem [shape: f32[1,128], index: 2, kind: input, shape index: {}]   ;;  %s5421_s3 = inlined_call_operand.vmem [shape: f32[2,4,128], index: 3, kind: output, shape index: {}]  }
   0x1 LB: > { %s3462_s13 = sadd.s32 4294967295, %s4469_s12   ;;  %p3466_p0 = scmp.ge.s32.totalorder %s4469_s12, 1  ;;  %s4469_s12 = sphi %s4492_s12, %s13_s12  }
   0x2   : > { %p137_p1 = scmp.lt.s32.totalorder %s4469_s12, 3 }
   0x4   : > { %p138_p2 = pnand %p3466_p0, %p137_p1 }
   0x5   : > { %v4166_v0 = vld [vmem:[%s5419_s1 + $0x40] sm:$0xff] (!%p138_p2)   ;;  %v4170_v4 = vld [vmem:[%s5419_s1 + $0x48] sm:$0xff] (!%p138_p2)   ;;  %v4174_v8 = vld [vmem:[%s5419_s1 + $0x50] sm:$0xff] (!%p138_p2)   ;;  %p160_p3 = scmp.lt.s32.totalorder (!%p138_p2), %s3462_s13, 1  ;;  %v775_v28 = vlaneseq (!%p138_p2)  ;;  %v4471_v36 = vmov (!%p138_p2), 1983009808  }
   0x6   : > { %141 = sbr.rel (%p138_p2) target bundleno = 515 (0x203), region = 32  ;;  %v4167_v1 = vld [vmem:[%s5419_s1 + $0xc0] sm:$0xff] (!%p138_p2)   ;;  %3760 = vmatprep.subr.bf16.mxu0 (!%p138_p2), %v4166_v0  ;;  %v4171_v5 = vld [vmem:[%s5419_s1 + $0xc8] sm:$0xff] (!%p138_p2)   ;;  %v4175_v9 = vld [vmem:[%s5419_s1 + $0xd0] sm:$0xff] (!%p138_p2)   ;;  %v773_v37 = vunpack.c.l.s4 (!%p138_p2), %v4471_v36 }
   0x7   : > { %v4168_v2 = vld [vmem:[%s5419_s1] sm:$0xff] (!%p138_p2)   ;;  %3782 = vmatprep.subr.bf16.mxu1 (!%p138_p2), %v4167_v1  ;;  %v4172_v6 = vld [vmem:[%s5419_s1 + $0x8] sm:$0xff] (!%p138_p2)   ;;  %v4176_v10 = vld [vmem:[%s5419_s1 + $0x10] sm:$0xff] (!%p138_p2)   ;;  %v776_v33 = vshrl.u32 (!%p138_p2), %v775_v28, 7 }
   0x8   : > { %v4169_v3 = vld [vmem:[%s5419_s1 + $0x80] sm:$0xff] (!%p138_p2)   ;;  %3761 = vmatpush3.bf16.msra.mxu0 (!%p138_p2), %v4168_v2  ;;  %v4173_v7 = vld [vmem:[%s5419_s1 + $0x88] sm:$0xff] (!%p138_p2)   ;;  %v4177_v11 = vld [vmem:[%s5419_s1 + $0x90] sm:$0xff] (!%p138_p2)   ;;  %v774_v39 = vunpack.c.0.s8 (!%p138_p2), %v773_v37 }
   0x9   : > { %3783 = vmatpush3.bf16.msra.mxu1 (!%p138_p2), %v4169_v3  ;;  %3762 = vmatprep.subr.bf16.mxu0 (!%p138_p2), %v4170_v4  ;;  %v4178_v12 = vld [vmem:[%s5419_s1 + $0x58] sm:$0xff] (!%p138_p2)   ;;  %v4182_v16 = vld [vmem:[%s5419_s1 + $0x60] sm:$0xff] (!%p138_p2)   ;;  %v4186_v20 = vld [vmem:[%s5419_s1 + $0x68] sm:$0xff] (!%p138_p2)  }
   0xa   : > { %3784 = vmatprep.subr.bf16.mxu1 (!%p138_p2), %v4171_v5  ;;  %v4179_v13 = vld [vmem:[%s5419_s1 + $0xd8] sm:$0xff] (!%p138_p2)   ;;  %v4183_v17 = vld [vmem:[%s5419_s1 + $0xe0] sm:$0xff] (!%p138_p2)   ;;  %v4187_v21 = vld [vmem:[%s5419_s1 + $0xe8] sm:$0xff] (!%p138_p2)   ;;  %v4615_v41 = vsub.s32 (!%p138_p2), %v774_v39, %v776_v33 }
   0xb   : > { %v4180_v14 = vld [vmem:[%s5419_s1 + $0x18] sm:$0xff] (!%p138_p2)   ;;  %v4184_v18 = vld [vmem:[%s5419_s1 + $0x20] sm:$0xff] (!%p138_p2)   ;;  %v4188_v22 = vld [vmem:[%s5419_s1 + $0x28] sm:$0xff] (!%p138_p2)  }
   0xc   : > { %3763 = vmatpush3.bf16.msra.mxu0 (!%p138_p2), %v4172_v6  ;;  %v4181_v15 = vld [vmem:[%s5419_s1 + $0x98] sm:$0xff] (!%p138_p2)   ;;  %v4185_v19 = vld [vmem:[%s5419_s1 + $0xa0] sm:$0xff] (!%p138_p2)   ;;  %v4189_v23 = vld [vmem:[%s5419_s1 + $0xa8] sm:$0xff] (!%p138_p2)  }
   0xd   : > { %3785 = vmatpush3.bf16.msra.mxu1 %v4173_v7  ;;  %3764 = vmatprep.subr.bf16.mxu0 %v4174_v8  ;;  %s5423_s13 = smov (!%p160_p3, %s3462_s13), 1  ;;  %v4190_v24 = vld [vmem:[%s5419_s1 + $0x70] sm:$0xff]   ;;  %v4194_v29 = vld [vmem:[%s5419_s1 + $0x78] sm:$0xff]   ;;  %v4199_v35 = vld [vmem:[%s5419_s1 + $0x140] sm:$0xff]  }
   0xe   : > { %3786 = vmatprep.subr.bf16.mxu1 %v4175_v9  ;;  %v4191_v25 = vld [vmem:[%s5419_s1 + $0xf0] sm:$0xff]   ;;  %s4156_s16 = smul.u32 72, %s5423_s13  ;;  %v4195_v30 = vld [vmem:[%s5419_s1 + $0xf8] sm:$0xff]   ;;  %v4200_v38 = vld [vmem:[%s5419_s1 + $0x1c0] sm:$0xff]  }
   0xf   : > { %v4192_v26 = vld [vmem:[%s5419_s1 + $0x30] sm:$0xff]   ;;  %v4196_v31 = vld [vmem:[%s5419_s1 + $0x38] sm:$0xff]   ;;  %v4201_v44 = vld [vmem:[%s5419_s1 + $0x100] sm:$0xff]  }
  0x10   : > { %3765 = vmatpush3.bf16.msra.mxu0 %v4176_v10  ;;  %v4193_v27 = vld [vmem:[%s5419_s1 + $0xb0] sm:$0xff]   ;;  %s4600_s27 = scalar_lea.vmem %s5418_s0, %s4156_s16  ;;  %v4197_v32 = vld [vmem:[%s5419_s1 + $0xb8] sm:$0xff]   ;;  %v4202_v45 = vld [vmem:[%s5419_s1 + $0x180] sm:$0xff]  }
  0x11   : > { %3787 = vmatpush3.bf16.msra.mxu1 %v4177_v11  ;;  %3766 = vmatprep.subr.bf16.mxu0 %v4178_v12  ;;  %v170_v34 = vld [vmem:[%s4600_s27] sm:$0xff]  ;;  %v4203_v48 = vld [vmem:[%s5419_s1 + $0x148] sm:$0xff]   ;;  %v4207_v52 = vld [vmem:[%s5419_s1 + $0x150] sm:$0xff]  }
  0x12   : > { %3788 = vmatprep.subr.bf16.mxu1 %v4179_v13  ;;  %v771_v40 = vcombine.high %v170_v34, %v170_v34  ;;  %v778_v42 = vrot.slane %v170_v34, %v4615_v41  ;;  %v4204_v49 = vld [vmem:[%s5419_s1 + $0x1c8] sm:$0xff]   ;;  %v4208_v53 = vld [vmem:[%s5419_s1 + $0x1d0] sm:$0xff]   ;;  %v4211_v56 = vld [vmem:[%s5419_s1 + $0x158] sm:$0xff]  }
  0x13   : > { %v4205_v50 = vld [vmem:[%s5419_s1 + $0x108] sm:$0xff]   ;;  %v4209_v54 = vld [vmem:[%s5419_s1 + $0x110] sm:$0xff]   ;;  %v4212_v57 = vld [vmem:[%s5419_s1 + $0x1d8] sm:$0xff]  }
  0x14   : > { %3767 = vmatpush3.bf16.msra.mxu0 %v4180_v14  ;;  %v785_v43 = vrot.slane %v771_v40, %v4615_v41  ;;  %v786_v46 = vcombine.high %v778_v42, %v778_v42  ;;  %v4206_v51 = vld [vmem:[%s5419_s1 + $0x188] sm:$0xff]   ;;  %v4210_v55 = vld [vmem:[%s5419_s1 + $0x190] sm:$0xff]   ;;  %v4213_v58 = vld [vmem:[%s5419_s1 + $0x118] sm:$0xff]  }
  0x15   : > { %3789 = vmatpush3.bf16.msra.mxu1 %v4181_v15  ;;  %3768 = vmatprep.subr.bf16.mxu0 %v4182_v16  ;;  %v4214_v59 = vld [vmem:[%s5419_s1 + $0x198] sm:$0xff]   ;;  %v4215_v60 = vld [vmem:[%s5419_s1 + $0x160] sm:$0xff]   ;;  %v4219_v0 = vld [vmem:[%s5419_s1 + $0x168] sm:$0xff]  }
  0x16   : > { %3790 = vmatprep.subr.bf16.mxu1 %v4183_v17  ;;  %v787_v47 = vcombine.high %v785_v43, %v785_v43  ;;  %2720 = vmatprep.mubr.bf16.mxu0 %v786_v46  ;;  %v4216_v61 = vld [vmem:[%s5419_s1 + $0x1e0] sm:$0xff]   ;;  %v4220_v1 = vld [vmem:[%s5419_s1 + $0x1e8] sm:$0xff]   ;;  %v4223_v4 = vld [vmem:[%s5419_s1 + $0x170] sm:$0xff]  }
  0x17   : > { %v4217_v62 = vld [vmem:[%s5419_s1 + $0x120] sm:$0xff]   ;;  %v4221_v2 = vld [vmem:[%s5419_s1 + $0x128] sm:$0xff]   ;;  %v4224_v5 = vld [vmem:[%s5419_s1 + $0x1f0] sm:$0xff]  }
  0x18   : > { %3769 = vmatpush3.bf16.msra.mxu0 %v4184_v18  ;;  %2760 = vmatprep.mubr.bf16.mxu1 %v787_v47  ;;  %v4218_v63 = vld [vmem:[%s5419_s1 + $0x1a0] sm:$0xff]   ;;  %v4222_v3 = vld [vmem:[%s5419_s1 + $0x1a8] sm:$0xff]   ;;  %v4225_v6 = vld [vmem:[%s5419_s1 + $0x130] sm:$0xff]  }
  0x19   : > { %3791 = vmatpush3.bf16.msra.mxu1 %v4185_v19  ;;  %3770 = vmatprep.subr.bf16.mxu0 %v4186_v20  ;;  %v4226_v7 = vld [vmem:[%s5419_s1 + $0x1b0] sm:$0xff]   ;;  %v171_v8 = vld [vmem:[%s4600_s27 + $0x8] sm:$0xff]  ;;  %v4227_v9 = vld [vmem:[%s5419_s1 + $0x178] sm:$0xff]  }
  0x1a   : > { %3792 = vmatprep.subr.bf16.mxu1 %v4187_v21  ;;  %v795_v10 = vrot.slane %v171_v8, %v4615_v41  ;;  %v788_v11 = vcombine.high %v171_v8, %v171_v8  ;;  %v4228_v12 = vld [vmem:[%s5419_s1 + $0x1f8] sm:$0xff]   ;;  %v4232_v18 = vld [vmem:[%s5419_s1 + $0x240] sm:$0xff]   ;;  %v4242_v28 = vld [vmem:[%s5419_s1 + $0x210] sm:$0xff]  }
  0x1b   : > { %v4229_v13 = vld [vmem:[%s5419_s1 + $0x138] sm:$0xff]   ;;  %v4233_v19 = vld [vmem:[%s5419_s1 + $0x2c0] sm:$0xff]   ;;  %v4253_v39 = vld [vmem:[%s5419_s1 + $0x2e8] sm:$0xff]  }
  0x1c   : > { %3771 = vmatpush3.bf16.msra.mxu0 %v4188_v22  ;;  %v803_v14 = vcombine.high %v795_v10, %v795_v10  ;;  %v802_v15 = vrot.slane %v788_v11, %v4615_v41  ;;  %v4230_v16 = vld [vmem:[%s5419_s1 + $0x1b8] sm:$0xff]   ;;  %v4234_v20 = vld [vmem:[%s5419_s1 + $0x200] sm:$0xff]   ;;  %v4236_v22 = vld [vmem:[%s5419_s1 + $0x248] sm:$0xff]  }
  0x1d   : > { %3793 = vmatpush3.bf16.msra.mxu1 %v4189_v23  ;;  %3772 = vmatprep.subr.bf16.mxu0 %v4190_v24  ;;  %v4235_v21 = vld [vmem:[%s5419_s1 + $0x280] sm:$0xff]   ;;  %v4237_v23 = vld [vmem:[%s5419_s1 + $0x2c8] sm:$0xff]   ;;  %v4247_v33 = vld [vmem:[%s5419_s1 + $0x298] sm:$0xff]  }
  0x1e   : > { %3794 = vmatprep.subr.bf16.mxu1 %v4191_v25  ;;  %v804_v17 = vcombine.high %v802_v15, %v802_v15  ;;  %v4238_v24 = vld [vmem:[%s5419_s1 + $0x208] sm:$0xff]   ;;  %v4248_v34 = vld [vmem:[%s5419_s1 + $0x260] sm:$0xff]   ;;  %v4259_v46 = vld [vmem:[%s5419_s1 + $0x2b0] sm:$0xff]  }
  0x1f   : > { %v4239_v25 = vld [vmem:[%s5419_s1 + $0x288] sm:$0xff]   ;;  %v4250_v36 = vld [vmem:[%s5419_s1 + $0x220] sm:$0xff]   ;;  %v172_v47 = vld [vmem:[%s4600_s27 + $0x10] sm:$0xff] }
  0x20   : > { %3773 = vmatpush3.bf16.msra.mxu0 %v4192_v26  ;;  %v4240_v26 = vld [vmem:[%s5419_s1 + $0x250] sm:$0xff]   ;;  %v4251_v37 = vld [vmem:[%s5419_s1 + $0x2a0] sm:$0xff]   ;;  %v4254_v40 = vld [vmem:[%s5419_s1 + $0x228] sm:$0xff]  }
  0x21   : > { %3795 = vmatpush3.bf16.msra.mxu1 %v4193_v27  ;;  %3774 = vmatprep.subr.bf16.mxu0 %v4194_v29  ;;  %v4241_v27 = vld [vmem:[%s5419_s1 + $0x2d0] sm:$0xff]   ;;  %v4280_v8 = vld [vmem:[%s5419_s1 + $0x398] sm:$0xff]   ;;  %v4283_v11 = vld [vmem:[%s5419_s1 + $0x320] sm:$0xff]  }
  0x22   : > { %3796 = vmatprep.subr.bf16.mxu1 %v4195_v30  ;;  %v4243_v29 = vld [vmem:[%s5419_s1 + $0x290] sm:$0xff]   ;;  %v4244_v30 = vld [vmem:[%s5419_s1 + $0x258] sm:$0xff]  }
  0x24   : > { %3775 = vmatpush3.bf16.msra.mxu0 %v4196_v31  ;;  %v4245_v31 = vld [vmem:[%s5419_s1 + $0x2d8] sm:$0xff]  }
  0x25   : > { %3797 = vmatpush3.bf16.msra.mxu1 %v4197_v32  ;;  %3804 = vmatprep.subr.bf16.mxu0 %v4199_v35  ;;  %v4246_v32 = vld [vmem:[%s5419_s1 + $0x218] sm:$0xff]   ;;  %v4249_v35 = vld [vmem:[%s5419_s1 + $0x2e0] sm:$0xff]  }
  0x26   : > { %3826 = vmatprep.subr.bf16.mxu1 %v4200_v38  ;;  %v4252_v38 = vld [vmem:[%s5419_s1 + $0x268] sm:$0xff]  }
  0x27   : > { %2721 = vmatmul.mubr.bf16.vlgmr.msra.gmra.mrb[0].mxu0 %v778_v42  ;;  %v4255_v42 = vld [vmem:[%s5419_s1 + $0x2a8] sm:$0xff]  }
  0x28   : > { %2761 = vmatmul.mubr.bf16.vlgmr.msra.gmra.mrb[0].mxu1 %v785_v43  ;;  %3805 = vmatpush3.bf16.msra.mxu0 %v4201_v44  ;;  %v4256_v43 = vld [vmem:[%s5419_s1 + $0x270] sm:$0xff]  }
  0x29   : > { %3827 = vmatpush3.bf16.msra.mxu1 %v4202_v45  ;;  %3806 = vmatprep.subr.bf16.mxu0 %v4203_v48  ;;  %v4257_v44 = vld [vmem:[%s5419_s1 + $0x2f0] sm:$0xff]   ;;  %v4260_v48 = vld [vmem:[%s5419_s1 + $0x278] sm:$0xff]  }
  0x2a   : > { %3828 = vmatprep.subr.bf16.mxu1 %v4204_v49  ;;  %2800 = vmatprep.mubr.bf16.mxu0 %v803_v14  ;;  %v4258_v45 = vld [vmem:[%s5419_s1 + $0x230] sm:$0xff]   ;;  %v812_v49 = vrot.slane %v172_v47, %v4615_v41  ;;  %v4286_v14 = vld [vmem:[%s5419_s1 + $0x3e8] sm:$0xff]  }
  0x2b   : > { %2840 = vmatprep.mubr.bf16.mxu1 %v804_v17  ;;  %v4289_v17 = vld [vmem:[%s5419_s1 + $0x370] sm:$0xff]  }
  0x2c   : > { %3807 = vmatpush3.bf16.msra.mxu0 %v4205_v50  ;;  %v805_v50 = vcombine.high %v172_v47, %v172_v47  ;;  %v4313_v47 = vld [vmem:[%s5419_s1 + $0x498] sm:$0xff]  }
  0x2d   : > { %3829 = vmatpush3.bf16.msra.mxu1 %v4206_v51  ;;  %3808 = vmatprep.subr.bf16.mxu0 %v4207_v52  ;;  %v4261_v51 = vld [vmem:[%s5419_s1 + $0x2f8] sm:$0xff]  }
  0x2e   : > { %3830 = vmatprep.subr.bf16.mxu1 %v4208_v53  ;;  %v4262_v52 = vld [vmem:[%s5419_s1 + $0x238] sm:$0xff]   ;;  %v820_v53 = vcombine.high %v812_v49, %v812_v49 }
  0x30   : > { %3809 = vmatpush3.bf16.msra.mxu0 %v4209_v54  ;;  %v819_v54 = vrot.slane %v805_v50, %v4615_v41  ;;  %v4316_v50 = vld [vmem:[%s5419_s1 + $0x420] sm:$0xff]  }
  0x31   : > { %3831 = vmatpush3.bf16.msra.mxu1 %v4210_v55  ;;  %3810 = vmatprep.subr.bf16.mxu0 %v4211_v56  ;;  %v4263_v55 = vld [vmem:[%s5419_s1 + $0x2b8] sm:$0xff]  }
  0x32   : > { %3832 = vmatprep.subr.bf16.mxu1 %v4212_v57  ;;  %v821_v56 = vcombine.high %v819_v54, %v819_v54  ;;  %v4265_v57 = vld [vmem:[%s5419_s1 + $0x340] sm:$0xff]  }
  0x34   : > { %3811 = vmatpush3.bf16.msra.mxu0 %v4213_v58  ;;  %v4266_v58 = vld [vmem:[%s5419_s1 + $0x3c0] sm:$0xff]  }
  0x35   : > { %3833 = vmatpush3.bf16.msra.mxu1 %v4214_v59  ;;  %3812 = vmatprep.subr.bf16.mxu0 %v4215_v60  ;;  %v4267_v59 = vld [vmem:[%s5419_s1 + $0x300] sm:$0xff]  }
  0x36   : > { %3834 = vmatprep.subr.bf16.mxu1 %v4216_v61  ;;  %v4268_v60 = vld [vmem:[%s5419_s1 + $0x380] sm:$0xff]   ;;  %v4269_v61 = vld [vmem:[%s5419_s1 + $0x348] sm:$0xff]  }
  0x38   : > { %3813 = vmatpush3.bf16.msra.mxu0 %v4217_v62  ;;  %v4270_v62 = vld [vmem:[%s5419_s1 + $0x3c8] sm:$0xff]  }
  0x39   : > { %3835 = vmatpush3.bf16.msra.mxu1 %v4218_v63  ;;  %3814 = vmatprep.subr.bf16.mxu0 %v4219_v0  ;;  %v4271_v63 = vld [vmem:[%s5419_s1 + $0x308] sm:$0xff]  }
  0x3a   : > { %3836 = vmatprep.subr.bf16.mxu1 %v4220_v1  ;;  %v4272_v0 = vld [vmem:[%s5419_s1 + $0x388] sm:$0xff]   ;;  %v4273_v1 = vld [vmem:[%s5419_s1 + $0x350] sm:$0xff]  }
  0x3c   : > { %3815 = vmatpush3.bf16.msra.mxu0 %v4221_v2  ;;  %v4274_v2 = vld [vmem:[%s5419_s1 + $0x3d0] sm:$0xff]  }
  0x3d   : > { %3837 = vmatpush3.bf16.msra.mxu1 %v4222_v3  ;;  %3816 = vmatprep.subr.bf16.mxu0 %v4223_v4  ;;  %v4275_v3 = vld [vmem:[%s5419_s1 + $0x310] sm:$0xff]  }
  0x3e   : > { %3838 = vmatprep.subr.bf16.mxu1 %v4224_v5  ;;  %v4276_v4 = vld [vmem:[%s5419_s1 + $0x390] sm:$0xff]   ;;  %v4277_v5 = vld [vmem:[%s5419_s1 + $0x358] sm:$0xff]  }
  0x40   : > { %3817 = vmatpush3.bf16.msra.mxu0 %v4225_v6  ;;  %v4278_v6 = vld [vmem:[%s5419_s1 + $0x3d8] sm:$0xff]  }
  0x41   : > { %3839 = vmatpush3.bf16.msra.mxu1 %v4226_v7  ;;  %3818 = vmatprep.subr.bf16.mxu0 %v4227_v9  ;;  %v4279_v7 = vld [vmem:[%s5419_s1 + $0x318] sm:$0xff]   ;;  %v4281_v9 = vld [vmem:[%s5419_s1 + $0x360] sm:$0xff]  }
  0x42   : > { %3840 = vmatprep.subr.bf16.mxu1 %v4228_v12  ;;  %v4284_v12 = vld [vmem:[%s5419_s1 + $0x3a0] sm:$0xff]  }
  0x44   : > { %3819 = vmatpush3.bf16.msra.mxu0 %v4229_v13  ;;  %v4285_v13 = vld [vmem:[%s5419_s1 + $0x368] sm:$0xff]  }
  0x45   : > { %3841 = vmatpush3.bf16.msra.mxu1 %v4230_v16  ;;  %3848 = vmatprep.subr.bf16.mxu0 %v4232_v18  ;;  %v4288_v16 = vld [vmem:[%s5419_s1 + $0x3a8] sm:$0xff]   ;;  %v4290_v18 = vld [vmem:[%s5419_s1 + $0x3f0] sm:$0xff]  }
  0x46   : > { %3870 = vmatprep.subr.bf16.mxu1 %v4233_v19  ;;  %v4291_v19 = vld [vmem:[%s5419_s1 + $0x330] sm:$0xff]  }
  0x47   : > { %2801 = vmatmul.mubr.bf16.vlgmr.msra.gmra.mrb[4].mxu0 %v795_v10  ;;  %v4282_v10 = vld [vmem:[%s5419_s1 + $0x3e0] sm:$0xff]  }
  0x48   : > { %2841 = vmatmul.mubr.bf16.vlgmr.msra.gmra.mrb[4].mxu1 %v802_v15  ;;  %3849 = vmatpush3.bf16.msra.mxu0 %v4234_v20  ;;  %v4287_v15 = vld [vmem:[%s5419_s1 + $0x328] sm:$0xff]   ;;  %v4292_v20 = vld [vmem:[%s5419_s1 + $0x3b0] sm:$0xff]  }
  0x49   : > { %3871 = vmatpush3.bf16.msra.mxu1 %v4235_v21  ;;  %3850 = vmatprep.subr.bf16.mxu0 %v4236_v22  ;;  %v4293_v21 = vld [vmem:[%s5419_s1 + $0x378] sm:$0xff]  }
  0x4a   : > { %3872 = vmatprep.subr.bf16.mxu1 %v4237_v23  ;;  %2880 = vmatprep.mubr.bf16.mxu0 %v820_v53  ;;  %v173_v22 = vld [vmem:[%s4600_s27 + $0x18] sm:$0xff]  ;;  %v4319_v53 = vld [vmem:[%s5419_s1 + $0x4e8] sm:$0xff]  }
  0x4b   : > { %2920 = vmatprep.mubr.bf16.mxu1 %v821_v56  ;;  %v4294_v23 = vld [vmem:[%s5419_s1 + $0x3f8] sm:$0xff]   ;;  %v4322_v56 = vld [vmem:[%s5419_s1 + $0x470] sm:$0xff]  }
  0x4c   : > { %3851 = vmatpush3.bf16.msra.mxu0 %v4238_v24  ;;  %v829_v24 = vrot.slane %v173_v22, %v4615_v41 }
  0x4d   : > { %3873 = vmatpush3.bf16.msra.mxu1 %v4239_v25  ;;  %3852 = vmatprep.subr.bf16.mxu0 %v4240_v26  ;;  %v822_v25 = vcombine.high %v173_v22, %v173_v22  ;;  %v4295_v26 = vld [vmem:[%s5419_s1 + $0x338] sm:$0xff]   ;;  %v4347_v22 = vld [vmem:[%s5419_s1 + $0x560] sm:$0xff]  }
  0x4e   : > { %3874 = vmatprep.subr.bf16.mxu1 %v4241_v27  ;;  %v4296_v27 = vld [vmem:[%s5419_s1 + $0x3b8] sm:$0xff]  }
  0x50   : > { %3853 = vmatpush3.bf16.msra.mxu0 %v4242_v28  ;;  %v837_v28 = vcombine.high %v829_v24, %v829_v24 }
  0x51   : > { %3875 = vmatpush3.bf16.msra.mxu1 %v4243_v29  ;;  %3854 = vmatprep.subr.bf16.mxu0 %v4244_v30  ;;  %v836_v29 = vrot.slane %v822_v25, %v4615_v41  ;;  %v4298_v30 = vld [vmem:[%s5419_s1 + $0x440] sm:$0xff]  }
  0x52   : > { %3876 = vmatprep.subr.bf16.mxu1 %v4245_v31  ;;  %v4350_v25 = vld [vmem:[%s5419_s1 + $0x5a0] sm:$0xff]  }
  0x53   : > { %v838_v31 = vcombine.high %v836_v29, %v836_v29 }
  0x54   : > { %3855 = vmatpush3.bf16.msra.mxu0 %v4246_v32  ;;  %v4299_v32 = vld [vmem:[%s5419_s1 + $0x4c0] sm:$0xff]  }
  0x55   : > { %3877 = vmatpush3.bf16.msra.mxu1 %v4247_v33  ;;  %3856 = vmatprep.subr.bf16.mxu0 %v4248_v34  ;;  %v4300_v33 = vld [vmem:[%s5419_s1 + $0x400] sm:$0xff]  }
  0x56   : > { %3878 = vmatprep.subr.bf16.mxu1 %v4249_v35  ;;  %v4301_v34 = vld [vmem:[%s5419_s1 + $0x480] sm:$0xff]   ;;  %v4302_v35 = vld [vmem:[%s5419_s1 + $0x448] sm:$0xff]  }
  0x58   : > { %3857 = vmatpush3.bf16.msra.mxu0 %v4250_v36  ;;  %v4303_v36 = vld [vmem:[%s5419_s1 + $0x4c8] sm:$0xff]  }
  0x59   : > { %3879 = vmatpush3.bf16.msra.mxu1 %v4251_v37  ;;  %3858 = vmatprep.subr.bf16.mxu0 %v4252_v38  ;;  %v4304_v37 = vld [vmem:[%s5419_s1 + $0x408] sm:$0xff]  }
  0x5a   : > { %3880 = vmatprep.subr.bf16.mxu1 %v4253_v39  ;;  %v4305_v38 = vld [vmem:[%s5419_s1 + $0x488] sm:$0xff]   ;;  %v4306_v39 = vld [vmem:[%s5419_s1 + $0x450] sm:$0xff]  }
  0x5c   : > { %3859 = vmatpush3.bf16.msra.mxu0 %v4254_v40  ;;  %v4307_v40 = vld [vmem:[%s5419_s1 + $0x4d0] sm:$0xff]  }
  0x5d   : > { %3881 = vmatpush3.bf16.msra.mxu1 %v4255_v42  ;;  %3860 = vmatprep.subr.bf16.mxu0 %v4256_v43  ;;  %v4308_v42 = vld [vmem:[%s5419_s1 + $0x410] sm:$0xff]  }
  0x5e   : > { %3882 = vmatprep.subr.bf16.mxu1 %v4257_v44  ;;  %v4309_v43 = vld [vmem:[%s5419_s1 + $0x490] sm:$0xff]   ;;  %v4310_v44 = vld [vmem:[%s5419_s1 + $0x458] sm:$0xff]  }
  0x60   : > { %3861 = vmatpush3.bf16.msra.mxu0 %v4258_v45  ;;  %v4311_v45 = vld [vmem:[%s5419_s1 + $0x4d8] sm:$0xff]  }
  0x61   : > { %3883 = vmatpush3.bf16.msra.mxu1 %v4259_v46  ;;  %3862 = vmatprep.subr.bf16.mxu0 %v4260_v48  ;;  %v4312_v46 = vld [vmem:[%s5419_s1 + $0x418] sm:$0xff]   ;;  %v4314_v48 = vld [vmem:[%s5419_s1 + $0x460] sm:$0xff]  }
  0x62   : > { %3884 = vmatprep.subr.bf16.mxu1 %v4261_v51  ;;  %v4317_v51 = vld [vmem:[%s5419_s1 + $0x4a0] sm:$0xff]  }
  0x64   : > { %3863 = vmatpush3.bf16.msra.mxu0 %v4262_v52  ;;  %v4318_v52 = vld [vmem:[%s5419_s1 + $0x468] sm:$0xff]  }
  0x65   : > { %3885 = vmatpush3.bf16.msra.mxu1 %v4263_v55  ;;  %3892 = vmatprep.subr.bf16.mxu0 %v4265_v57  ;;  %v4321_v55 = vld [vmem:[%s5419_s1 + $0x4a8] sm:$0xff]   ;;  %v4323_v57 = vld [vmem:[%s5419_s1 + $0x4f0] sm:$0xff]  }
  0x66   : > { %3914 = vmatprep.subr.bf16.mxu1 %v4266_v58  ;;  %v4324_v58 = vld [vmem:[%s5419_s1 + $0x430] sm:$0xff]  }
  0x67   : > { %2881 = vmatmul.mubr.bf16.vlgmr.msra.gmra.mrb[8].mxu0 %v812_v49  ;;  %v4315_v49 = vld [vmem:[%s5419_s1 + $0x4e0] sm:$0xff]  }
  0x68   : > { %2921 = vmatmul.mubr.bf16.vlgmr.msra.gmra.mrb[8].mxu1 %v819_v54  ;;  %3893 = vmatpush3.bf16.msra.mxu0 %v4267_v59  ;;  %v4320_v54 = vld [vmem:[%s5419_s1 + $0x428] sm:$0xff]   ;;  %v4325_v59 = vld [vmem:[%s5419_s1 + $0x4b0] sm:$0xff]  }
  0x69   : > { %3915 = vmatpush3.bf16.msra.mxu1 %v4268_v60  ;;  %3894 = vmatprep.subr.bf16.mxu0 %v4269_v61  ;;  %v4326_v60 = vld [vmem:[%s5419_s1 + $0x478] sm:$0xff]   ;;  %v174_v61 = vld [vmem:[%s4600_s27 + $0x20] sm:$0xff] }
  0x6a   : > { %3916 = vmatprep.subr.bf16.mxu1 %v4270_v62  ;;  %2960 = vmatprep.mubr.bf16.mxu0 %v837_v28  ;;  %v4327_v62 = vld [vmem:[%s5419_s1 + $0x4f8] sm:$0xff]   ;;  %v4353_v28 = vld [vmem:[%s5419_s1 + $0x528] sm:$0xff]  }
  0x6b   : > { %3000 = vmatprep.mubr.bf16.mxu1 %v838_v31  ;;  %v4356_v31 = vld [vmem:[%s5419_s1 + $0x5f0] sm:$0xff]  }
  0x6c   : > { %3895 = vmatpush3.bf16.msra.mxu0 %v4271_v63  ;;  %v846_v63 = vrot.slane %v174_v61, %v4615_v41 }
  0x6d   : > { %3917 = vmatpush3.bf16.msra.mxu1 %v4272_v0  ;;  %3896 = vmatprep.subr.bf16.mxu0 %v4273_v1  ;;  %v839_v0 = vcombine.high %v174_v61, %v174_v61  ;;  %v4328_v1 = vld [vmem:[%s5419_s1 + $0x438] sm:$0xff]   ;;  %v4380_v61 = vld [vmem:[%s5419_s1 + $0x660] sm:$0xff]  }
  0x6e   : > { %3918 = vmatprep.subr.bf16.mxu1 %v4274_v2  ;;  %v4329_v2 = vld [vmem:[%s5419_s1 + $0x4b8] sm:$0xff]  }
  0x70   : > { %3897 = vmatpush3.bf16.msra.mxu0 %v4275_v3  ;;  %v854_v3 = vcombine.high %v846_v63, %v846_v63 }
  0x71   : > { %3919 = vmatpush3.bf16.msra.mxu1 %v4276_v4  ;;  %3898 = vmatprep.subr.bf16.mxu0 %v4277_v5  ;;  %v853_v4 = vrot.slane %v839_v0, %v4615_v41  ;;  %v4331_v5 = vld [vmem:[%s5419_s1 + $0x540] sm:$0xff]  }
  0x72   : > { %3920 = vmatprep.subr.bf16.mxu1 %v4278_v6  ;;  %v4383_v0 = vld [vmem:[%s5419_s1 + $0x6a0] sm:$0xff]  }
  0x73   : > { %v855_v6 = vcombine.high %v853_v4, %v853_v4 }
  0x74   : > { %3899 = vmatpush3.bf16.msra.mxu0 %v4279_v7  ;;  %v4332_v7 = vld [vmem:[%s5419_s1 + $0x5c0] sm:$0xff]  }
  0x75   : > { %3921 = vmatpush3.bf16.msra.mxu1 %v4280_v8  ;;  %3900 = vmatprep.subr.bf16.mxu0 %v4281_v9  ;;  %v4333_v8 = vld [vmem:[%s5419_s1 + $0x500] sm:$0xff]  }
  0x76   : > { %3922 = vmatprep.subr.bf16.mxu1 %v4282_v10  ;;  %v4334_v9 = vld [vmem:[%s5419_s1 + $0x580] sm:$0xff]   ;;  %v4335_v10 = vld [vmem:[%s5419_s1 + $0x548] sm:$0xff]  }
  0x78   : > { %3901 = vmatpush3.bf16.msra.mxu0 %v4283_v11  ;;  %v4336_v11 = vld [vmem:[%s5419_s1 + $0x5c8] sm:$0xff]  }
  0x79   : > { %3923 = vmatpush3.bf16.msra.mxu1 %v4284_v12  ;;  %3902 = vmatprep.subr.bf16.mxu0 %v4285_v13  ;;  %v4337_v12 = vld [vmem:[%s5419_s1 + $0x508] sm:$0xff]  }
  0x7a   : > { %3924 = vmatprep.subr.bf16.mxu1 %v4286_v14  ;;  %v4338_v13 = vld [vmem:[%s5419_s1 + $0x588] sm:$0xff]   ;;  %v4339_v14 = vld [vmem:[%s5419_s1 + $0x550] sm:$0xff]  }
  0x7c   : > { %3903 = vmatpush3.bf16.msra.mxu0 %v4287_v15  ;;  %v4340_v15 = vld [vmem:[%s5419_s1 + $0x5d0] sm:$0xff]  }
  0x7d   : > { %3925 = vmatpush3.bf16.msra.mxu1 %v4288_v16  ;;  %3904 = vmatprep.subr.bf16.mxu0 %v4289_v17  ;;  %v4341_v16 = vld [vmem:[%s5419_s1 + $0x510] sm:$0xff]  }
  0x7e   : > { %3926 = vmatprep.subr.bf16.mxu1 %v4290_v18  ;;  %v4342_v17 = vld [vmem:[%s5419_s1 + $0x590] sm:$0xff]   ;;  %v4343_v18 = vld [vmem:[%s5419_s1 + $0x558] sm:$0xff]  }
  0x80   : > { %3905 = vmatpush3.bf16.msra.mxu0 %v4291_v19  ;;  %v4344_v19 = vld [vmem:[%s5419_s1 + $0x5d8] sm:$0xff]  }
  0x81   : > { %3927 = vmatpush3.bf16.msra.mxu1 %v4292_v20  ;;  %3906 = vmatprep.subr.bf16.mxu0 %v4293_v21  ;;  %v4345_v20 = vld [vmem:[%s5419_s1 + $0x518] sm:$0xff]  }
  0x82   : > { %3928 = vmatprep.subr.bf16.mxu1 %v4294_v23  ;;  %v4346_v21 = vld [vmem:[%s5419_s1 + $0x598] sm:$0xff]   ;;  %v4348_v23 = vld [vmem:[%s5419_s1 + $0x5e0] sm:$0xff]  }
  0x84   : > { %3907 = vmatpush3.bf16.msra.mxu0 %v4295_v26  ;;  %v4351_v26 = vld [vmem:[%s5419_s1 + $0x568] sm:$0xff]  }
  0x85   : > { %3929 = vmatpush3.bf16.msra.mxu1 %v4296_v27  ;;  %3936 = vmatprep.subr.bf16.mxu0 %v4298_v30  ;;  %v4352_v27 = vld [vmem:[%s5419_s1 + $0x5e8] sm:$0xff]   ;;  %v4355_v30 = vld [vmem:[%s5419_s1 + $0x570] sm:$0xff]  }
  0x86   : > { %3958 = vmatprep.subr.bf16.mxu1 %v4299_v32  ;;  %v4357_v32 = vld [vmem:[%s5419_s1 + $0x530] sm:$0xff]  }
  0x87   : > { %2961 = vmatmul.mubr.bf16.vlgmr.msra.gmra.mrb[12].mxu0 %v829_v24  ;;  %v4349_v24 = vld [vmem:[%s5419_s1 + $0x520] sm:$0xff]  }
  0x88   : > { %3001 = vmatmul.mubr.bf16.vlgmr.msra.gmra.mrb[12].mxu1 %v836_v29  ;;  %3937 = vmatpush3.bf16.msra.mxu0 %v4300_v33  ;;  %v4354_v29 = vld [vmem:[%s5419_s1 + $0x5a8] sm:$0xff]   ;;  %v4358_v33 = vld [vmem:[%s5419_s1 + $0x5b0] sm:$0xff]  }
  0x89   : > { %3959 = vmatpush3.bf16.msra.mxu1 %v4301_v34  ;;  %3938 = vmatprep.subr.bf16.mxu0 %v4302_v35  ;;  %v4359_v34 = vld [vmem:[%s5419_s1 + $0x578] sm:$0xff]   ;;  %v175_v35 = vld [vmem:[%s4600_s27 + $0x28] sm:$0xff] }
  0x8a   : > { %3960 = vmatprep.subr.bf16.mxu1 %v4303_v36  ;;  %3040 = vmatprep.mubr.bf16.mxu0 %v854_v3  ;;  %v4360_v36 = vld [vmem:[%s5419_s1 + $0x5f8] sm:$0xff]   ;;  %v4386_v3 = vld [vmem:[%s5419_s1 + $0x628] sm:$0xff]  }
  0x8b   : > { %3080 = vmatprep.mubr.bf16.mxu1 %v855_v6  ;;  %v4389_v6 = vld [vmem:[%s5419_s1 + $0x6f0] sm:$0xff]  }
  0x8c   : > { %3939 = vmatpush3.bf16.msra.mxu0 %v4304_v37  ;;  %v863_v37 = vrot.slane %v175_v35, %v4615_v41 }
  0x8d   : > { %3961 = vmatpush3.bf16.msra.mxu1 %v4305_v38  ;;  %3940 = vmatprep.subr.bf16.mxu0 %v4306_v39  ;;  %v856_v38 = vcombine.high %v175_v35, %v175_v35  ;;  %v4361_v39 = vld [vmem:[%s5419_s1 + $0x538] sm:$0xff]   ;;  %v4413_v35 = vld [vmem:[%s5419_s1 + $0x760] sm:$0xff]  }
  0x8e   : > { %3962 = vmatprep.subr.bf16.mxu1 %v4307_v40  ;;  %v4362_v40 = vld [vmem:[%s5419_s1 + $0x5b8] sm:$0xff]  }
  0x90   : > { %3941 = vmatpush3.bf16.msra.mxu0 %v4308_v42  ;;  %v871_v42 = vcombine.high %v863_v37, %v863_v37 }
  0x91   : > { %3963 = vmatpush3.bf16.msra.mxu1 %v4309_v43  ;;  %3942 = vmatprep.subr.bf16.mxu0 %v4310_v44  ;;  %v870_v43 = vrot.slane %v856_v38, %v4615_v41  ;;  %v4364_v44 = vld [vmem:[%s5419_s1 + $0x640] sm:$0xff]  }
  0x92   : > { %3964 = vmatprep.subr.bf16.mxu1 %v4311_v45  ;;  %v4416_v38 = vld [vmem:[%s5419_s1 + $0x7a0] sm:$0xff]  }
  0x93   : > { %v872_v45 = vcombine.high %v870_v43, %v870_v43 }
  0x94   : > { %3943 = vmatpush3.bf16.msra.mxu0 %v4312_v46  ;;  %v4365_v46 = vld [vmem:[%s5419_s1 + $0x6c0] sm:$0xff]  }
  0x95   : > { %3965 = vmatpush3.bf16.msra.mxu1 %v4313_v47  ;;  %3944 = vmatprep.subr.bf16.mxu0 %v4314_v48  ;;  %v4366_v47 = vld [vmem:[%s5419_s1 + $0x600] sm:$0xff]  }
  0x96   : > { %3966 = vmatprep.subr.bf16.mxu1 %v4315_v49  ;;  %v4367_v48 = vld [vmem:[%s5419_s1 + $0x680] sm:$0xff]   ;;  %v4368_v49 = vld [vmem:[%s5419_s1 + $0x648] sm:$0xff]  }
  0x98   : > { %3945 = vmatpush3.bf16.msra.mxu0 %v4316_v50  ;;  %v4369_v50 = vld [vmem:[%s5419_s1 + $0x6c8] sm:$0xff]  }
  0x99   : > { %3967 = vmatpush3.bf16.msra.mxu1 %v4317_v51  ;;  %3946 = vmatprep.subr.bf16.mxu0 %v4318_v52  ;;  %v4370_v51 = vld [vmem:[%s5419_s1 + $0x608] sm:$0xff]  }
  0x9a   : > { %3968 = vmatprep.subr.bf16.mxu1 %v4319_v53  ;;  %v4371_v52 = vld [vmem:[%s5419_s1 + $0x688] sm:$0xff]   ;;  %v4372_v53 = vld [vmem:[%s5419_s1 + $0x650] sm:$0xff]  }
  0x9c   : > { %3947 = vmatpush3.bf16.msra.mxu0 %v4320_v54  ;;  %v4373_v54 = vld [vmem:[%s5419_s1 + $0x6d0] sm:$0xff]  }
  0x9d   : > { %3969 = vmatpush3.bf16.msra.mxu1 %v4321_v55  ;;  %3948 = vmatprep.subr.bf16.mxu0 %v4322_v56  ;;  %v4374_v55 = vld [vmem:[%s5419_s1 + $0x610] sm:$0xff]  }
  0x9e   : > { %3970 = vmatprep.subr.bf16.mxu1 %v4323_v57  ;;  %v4375_v56 = vld [vmem:[%s5419_s1 + $0x690] sm:$0xff]   ;;  %v4376_v57 = vld [vmem:[%s5419_s1 + $0x658] sm:$0xff]  }
  0xa0   : > { %3949 = vmatpush3.bf16.msra.mxu0 %v4324_v58  ;;  %v4377_v58 = vld [vmem:[%s5419_s1 + $0x6d8] sm:$0xff]  }
  0xa1   : > { %3971 = vmatpush3.bf16.msra.mxu1 %v4325_v59  ;;  %3950 = vmatprep.subr.bf16.mxu0 %v4326_v60  ;;  %v4378_v59 = vld [vmem:[%s5419_s1 + $0x618] sm:$0xff]  }
  0xa2   : > { %3972 = vmatprep.subr.bf16.mxu1 %v4327_v62  ;;  %v4379_v60 = vld [vmem:[%s5419_s1 + $0x698] sm:$0xff]   ;;  %v4381_v62 = vld [vmem:[%s5419_s1 + $0x6e0] sm:$0xff]  }
  0xa4   : > { %3951 = vmatpush3.bf16.msra.mxu0 %v4328_v1  ;;  %v4384_v1 = vld [vmem:[%s5419_s1 + $0x668] sm:$0xff]  }
  0xa5   : > { %3973 = vmatpush3.bf16.msra.mxu1 %v4329_v2  ;;  %3980 = vmatprep.subr.bf16.mxu0 %v4331_v5  ;;  %v4385_v2 = vld [vmem:[%s5419_s1 + $0x6e8] sm:$0xff]   ;;  %v4388_v5 = vld [vmem:[%s5419_s1 + $0x670] sm:$0xff]  }
  0xa6   : > { %4002 = vmatprep.subr.bf16.mxu1 %v4332_v7  ;;  %v4390_v7 = vld [vmem:[%s5419_s1 + $0x630] sm:$0xff]  }
  0xa7   : > { %3041 = vmatmul.mubr.bf16.vlgmr.msra.gmra.mrb[16].mxu0 %v846_v63  ;;  %v4382_v63 = vld [vmem:[%s5419_s1 + $0x620] sm:$0xff]  }
  0xa8   : > { %3081 = vmatmul.mubr.bf16.vlgmr.msra.gmra.mrb[16].mxu1 %v853_v4  ;;  %3981 = vmatpush3.bf16.msra.mxu0 %v4333_v8  ;;  %v4387_v4 = vld [vmem:[%s5419_s1 + $0x6a8] sm:$0xff]   ;;  %v4391_v8 = vld [vmem:[%s5419_s1 + $0x6b0] sm:$0xff]  }
  0xa9   : > { %4003 = vmatpush3.bf16.msra.mxu1 %v4334_v9  ;;  %3982 = vmatprep.subr.bf16.mxu0 %v4335_v10  ;;  %v4392_v9 = vld [vmem:[%s5419_s1 + $0x678] sm:$0xff]  }
  0xaa   : > { %4004 = vmatprep.subr.bf16.mxu1 %v4336_v11  ;;  %3120 = vmatprep.mubr.bf16.mxu0 %v871_v42  ;;  %v4393_v10 = vld [vmem:[%s5419_s1 + $0x6f8] sm:$0xff]   ;;  %v176_v11 = vld [vmem:[%s4600_s27 + $0x30] sm:$0xff]  ;;  %v4419_v42 = vld [vmem:[%s5419_s1 + $0x728] sm:$0xff]  }
  0xab   : > { %3160 = vmatprep.mubr.bf16.mxu1 %v872_v45  ;;  %v3469_v45 = vld [vmem:[%s5420_s2] ss:$0 sm:$0xff] }
  0xac   : > { %3983 = vmatpush3.bf16.msra.mxu0 %v4337_v12  ;;  %v4394_v12 = vld [vmem:[%s5419_s1 + $0x638] sm:$0xff]  }
  0xad   : > { %4005 = vmatpush3.bf16.msra.mxu1 %v4338_v13  ;;  %3984 = vmatprep.subr.bf16.mxu0 %v4339_v14  ;;  %v880_v13 = vrot.slane %v176_v11, %v4615_v41  ;;  %v873_v14 = vcombine.high %v176_v11, %v176_v11  ;;  %v4434_v11 = vld [vmem:[%s5419_s1 + $0x848] sm:$0xff]  }
  0xae   : > { %4006 = vmatprep.subr.bf16.mxu1 %v4340_v15  ;;  %v4395_v15 = vld [vmem:[%s5419_s1 + $0x6b8] sm:$0xff]  }
  0xb0   : > { %3985 = vmatpush3.bf16.msra.mxu0 %v4341_v16  ;;  %v888_v16 = vcombine.high %v880_v13, %v880_v13 }
  0xb1   : > { %4007 = vmatpush3.bf16.msra.mxu1 %v4342_v17  ;;  %3986 = vmatprep.subr.bf16.mxu0 %v4343_v18  ;;  %v887_v17 = vrot.slane %v873_v14, %v4615_v41  ;;  %v4397_v18 = vld [vmem:[%s5419_s1 + $0x740] sm:$0xff]   ;;  %v4437_v14 = vld [vmem:[%s5419_s1 + $0x888] sm:$0xff]  }
  0xb2   : > { %4008 = vmatprep.subr.bf16.mxu1 %v4344_v19  ;;  %v4398_v19 = vld [vmem:[%s5419_s1 + $0x7c0] sm:$0xff]  }
  0xb4   : > { %3987 = vmatpush3.bf16.msra.mxu0 %v4345_v20  ;;  %v889_v20 = vcombine.high %v887_v17, %v887_v17 }
  0xb5   : > { %4009 = vmatpush3.bf16.msra.mxu1 %v4346_v21  ;;  %3988 = vmatprep.subr.bf16.mxu0 %v4347_v22  ;;  %v4399_v21 = vld [vmem:[%s5419_s1 + $0x700] sm:$0xff]  }
  0xb6   : > { %4010 = vmatprep.subr.bf16.mxu1 %v4348_v23  ;;  %v4400_v22 = vld [vmem:[%s5419_s1 + $0x780] sm:$0xff]   ;;  %v4401_v23 = vld [vmem:[%s5419_s1 + $0x748] sm:$0xff]  }
  0xb8   : > { %3989 = vmatpush3.bf16.msra.mxu0 %v4349_v24  ;;  %v4402_v24 = vld [vmem:[%s5419_s1 + $0x7c8] sm:$0xff]  }
  0xb9   : > { %4011 = vmatpush3.bf16.msra.mxu1 %v4350_v25  ;;  %3990 = vmatprep.subr.bf16.mxu0 %v4351_v26  ;;  %v4403_v25 = vld [vmem:[%s5419_s1 + $0x708] sm:$0xff]  }
  0xba   : > { %4012 = vmatprep.subr.bf16.mxu1 %v4352_v27  ;;  %v4404_v26 = vld [vmem:[%s5419_s1 + $0x788] sm:$0xff]   ;;  %v4405_v27 = vld [vmem:[%s5419_s1 + $0x750] sm:$0xff]  }
  0xbc   : > { %3991 = vmatpush3.bf16.msra.mxu0 %v4353_v28  ;;  %v4406_v28 = vld [vmem:[%s5419_s1 + $0x7d0] sm:$0xff]  }
  0xbd   : > { %4013 = vmatpush3.bf16.msra.mxu1 %v4354_v29  ;;  %3992 = vmatprep.subr.bf16.mxu0 %v4355_v30  ;;  %v4407_v29 = vld [vmem:[%s5419_s1 + $0x710] sm:$0xff]  }
  0xbe   : > { %4014 = vmatprep.subr.bf16.mxu1 %v4356_v31  ;;  %v4408_v30 = vld [vmem:[%s5419_s1 + $0x790] sm:$0xff]   ;;  %v4409_v31 = vld [vmem:[%s5419_s1 + $0x758] sm:$0xff]  }
  0xc0   : > { %3993 = vmatpush3.bf16.msra.mxu0 %v4357_v32  ;;  %v4410_v32 = vld [vmem:[%s5419_s1 + $0x7d8] sm:$0xff]  }
  0xc1   : > { %4015 = vmatpush3.bf16.msra.mxu1 %v4358_v33  ;;  %3994 = vmatprep.subr.bf16.mxu0 %v4359_v34  ;;  %v4411_v33 = vld [vmem:[%s5419_s1 + $0x718] sm:$0xff]  }
  0xc2   : > { %4016 = vmatprep.subr.bf16.mxu1 %v4360_v36  ;;  %v4412_v34 = vld [vmem:[%s5419_s1 + $0x798] sm:$0xff]   ;;  %v4414_v36 = vld [vmem:[%s5419_s1 + $0x7e0] sm:$0xff]  }
  0xc4   : > { %3995 = vmatpush3.bf16.msra.mxu0 %v4361_v39  ;;  %v4417_v39 = vld [vmem:[%s5419_s1 + $0x768] sm:$0xff]  }
  0xc5   : > { %4017 = vmatpush3.bf16.msra.mxu1 %v4362_v40  ;;  %4024 = vmatprep.subr.bf16.mxu0 %v4364_v44  ;;  %v4418_v40 = vld [vmem:[%s5419_s1 + $0x7e8] sm:$0xff]   ;;  %v4421_v44 = vld [vmem:[%s5419_s1 + $0x770] sm:$0xff]  }
  0xc6   : > { %4046 = vmatprep.subr.bf16.mxu1 %v4365_v46  ;;  %v4422_v46 = vld [vmem:[%s5419_s1 + $0x7f0] sm:$0xff]  }
  0xc7   : > { %3121 = vmatmul.mubr.bf16.vlgmr.msra.gmra.mrb[20].mxu0 %v863_v37  ;;  %v4415_v37 = vld [vmem:[%s5419_s1 + $0x720] sm:$0xff]  }
  0xc8   : > { %3161 = vmatmul.mubr.bf16.vlgmr.msra.gmra.mrb[20].mxu1 %v870_v43  ;;  %4025 = vmatpush3.bf16.msra.mxu0 %v4366_v47  ;;  %v4420_v43 = vld [vmem:[%s5419_s1 + $0x7a8] sm:$0xff]  }
  0xc9   : > { %4047 = vmatpush3.bf16.msra.mxu1 %v4367_v48  ;;  %4026 = vmatprep.subr.bf16.mxu0 %v4368_v49  ;;  %v4423_v49 = vld [vmem:[%s5419_s1 + $0x730] sm:$0xff]  }
  0xca   : > { %4048 = vmatprep.subr.bf16.mxu1 %v4369_v50  ;;  %3200 = vmatprep.mubr.bf16.mxu0 %v888_v16  ;;  %v4424_v50 = vld [vmem:[%s5419_s1 + $0x7b0] sm:$0xff]  }
  0xcb   : > { %3240 = vmatprep.mubr.bf16.mxu1 %v889_v20  ;;  %v4439_v16 = vld [vmem:[%s5419_s1 + $0x8d0] sm:$0xff]   ;;  %v4443_v20 = vld [vmem:[%s5419_s1 + $0x8d8] sm:$0xff]  }
  0xcc   : > { %4027 = vmatpush3.bf16.msra.mxu0 %v4370_v51 }
  0xcd   : > { %4049 = vmatpush3.bf16.msra.mxu1 %v4371_v52  ;;  %4028 = vmatprep.subr.bf16.mxu0 %v4372_v53 }
  0xce   : > { %4050 = vmatprep.subr.bf16.mxu1 %v4373_v54 }
  0xd0   : > { %4029 = vmatpush3.bf16.msra.mxu0 %v4374_v55 }
  0xd1   : > { %4051 = vmatpush3.bf16.msra.mxu1 %v4375_v56  ;;  %4030 = vmatprep.subr.bf16.mxu0 %v4376_v57 }
  0xd2   : > { %4052 = vmatprep.subr.bf16.mxu1 %v4377_v58 }
  0xd4   : > { %4031 = vmatpush3.bf16.msra.mxu0 %v4378_v59  ;;  %v4425_v59 = vld [vmem:[%s5419_s1 + $0x778] sm:$0xff]  }
  0xd5   : > { %4053 = vmatpush3.bf16.msra.mxu1 %v4379_v60  ;;  %4032 = vmatprep.subr.bf16.mxu0 %v4380_v61  ;;  %v4426_v60 = vld [vmem:[%s5419_s1 + $0x7f8] sm:$0xff]  }
  0xd6   : > { %4054 = vmatprep.subr.bf16.mxu1 %v4381_v62  ;;  %v4427_v62 = vld [vmem:[%s5419_s1 + $0x738] sm:$0xff]  }
  0xd8   : > { %4033 = vmatpush3.bf16.msra.mxu0 %v4382_v63  ;;  %v177_v63 = vld [vmem:[%s4600_s27 + $0x38] sm:$0xff] }
  0xd9   : > { %4055 = vmatpush3.bf16.msra.mxu1 %v4383_v0  ;;  %4034 = vmatprep.subr.bf16.mxu0 %v4384_v1  ;;  %v4428_v0 = vld [vmem:[%s5419_s1 + $0x7b8] sm:$0xff]   ;;  %v897_v1 = vrot.slane %v177_v63, %v4615_v41 }
  0xda   : > { %4056 = vmatprep.subr.bf16.mxu1 %v4385_v2  ;;  %v890_v2 = vcombine.high %v177_v63, %v177_v63 }
  0xdc   : > { %4035 = vmatpush3.bf16.msra.mxu0 %v4386_v3 }
  0xdd   : > { %4057 = vmatpush3.bf16.msra.mxu1 %v4387_v4  ;;  %4036 = vmatprep.subr.bf16.mxu0 %v4388_v5  ;;  %v4430_v4 = vld [vmem:[%s5419_s1 + $0x840] sm:$0xff]   ;;  %v905_v5 = vcombine.high %v897_v1, %v897_v1 }
  0xde   : > { %4058 = vmatprep.subr.bf16.mxu1 %v4389_v6  ;;  %v904_v6 = vrot.slane %v890_v2, %v4615_v41 }
  0xe0   : > { %4037 = vmatpush3.bf16.msra.mxu0 %v4390_v7  ;;  %v4431_v7 = vld [vmem:[%s5419_s1 + $0x8c0] sm:$0xff]  }
  0xe1   : > { %4059 = vmatpush3.bf16.msra.mxu1 %v4391_v8  ;;  %4038 = vmatprep.subr.bf16.mxu0 %v4392_v9  ;;  %v4432_v8 = vld [vmem:[%s5419_s1 + $0x800] sm:$0xff]   ;;  %v906_v9 = vcombine.high %v904_v6, %v904_v6 }
  0xe2   : > { %4060 = vmatprep.subr.bf16.mxu1 %v4393_v10  ;;  %v4433_v10 = vld [vmem:[%s5419_s1 + $0x880] sm:$0xff]  }
  0xe4   : > { %4039 = vmatpush3.bf16.msra.mxu0 %v4394_v12  ;;  %v4435_v12 = vld [vmem:[%s5419_s1 + $0x8c8] sm:$0xff]  }
  0xe5   : > { %4061 = vmatpush3.bf16.msra.mxu1 %v4395_v15  ;;  %4068 = vmatprep.subr.bf16.mxu0 %v4397_v18  ;;  %v4438_v15 = vld [vmem:[%s5419_s1 + $0x850] sm:$0xff]  }
  0xe6   : > { %4090 = vmatprep.subr.bf16.mxu1 %v4398_v19  ;;  %v4441_v18 = vld [vmem:[%s5419_s1 + $0x890] sm:$0xff]   ;;  %v4442_v19 = vld [vmem:[%s5419_s1 + $0x858] sm:$0xff]  }
  0xe7   : > { %3201 = vmatmul.mubr.bf16.vlgmr.msra.gmra.mrb[24].mxu0 %v880_v13  ;;  %v4436_v13 = vld [vmem:[%s5419_s1 + $0x808] sm:$0xff]  }
  0xe8   : > { %3241 = vmatmul.mubr.bf16.vlgmr.msra.gmra.mrb[24].mxu1 %v887_v17  ;;  %4069 = vmatpush3.bf16.msra.mxu0 %v4399_v21  ;;  %v4440_v17 = vld [vmem:[%s5419_s1 + $0x810] sm:$0xff]   ;;  %v4444_v21 = vld [vmem:[%s5419_s1 + $0x818] sm:$0xff]  }
  0xe9   : > { %4091 = vmatpush3.bf16.msra.mxu1 %v4400_v22  ;;  %4070 = vmatprep.subr.bf16.mxu0 %v4401_v23  ;;  %v4445_v22 = vld [vmem:[%s5419_s1 + $0x898] sm:$0xff]   ;;  %v4446_v23 = vld [vmem:[%s5419_s1 + $0x860] sm:$0xff]  }
  0xea   : > { %4092 = vmatprep.subr.bf16.mxu1 %v4402_v24  ;;  %3280 = vmatprep.mubr.bf16.mxu0 %v905_v5  ;;  %v4447_v24 = vld [vmem:[%s5419_s1 + $0x8e0] sm:$0xff]  }
  0xeb   : > { %3320 = vmatprep.mubr.bf16.mxu1 %v906_v9 }
  0xec   : > { %4071 = vmatpush3.bf16.msra.mxu0 %v4403_v25  ;;  %v4448_v25 = vld [vmem:[%s5419_s1 + $0x820] sm:$0xff]  }
  0xed   : > { %4093 = vmatpush3.bf16.msra.mxu1 %v4404_v26  ;;  %4072 = vmatprep.subr.bf16.mxu0 %v4405_v27  ;;  %v4449_v26 = vld [vmem:[%s5419_s1 + $0x8a0] sm:$0xff]   ;;  %v4450_v27 = vld [vmem:[%s5419_s1 + $0x868] sm:$0xff]  }
  0xee   : > { %4094 = vmatprep.subr.bf16.mxu1 %v4406_v28  ;;  %v4451_v28 = vld [vmem:[%s5419_s1 + $0x8e8] sm:$0xff]  }
  0xf0   : > { %4073 = vmatpush3.bf16.msra.mxu0 %v4407_v29  ;;  %v4452_v29 = vld [vmem:[%s5419_s1 + $0x828] sm:$0xff]  }
  0xf1   : > { %4095 = vmatpush3.bf16.msra.mxu1 %v4408_v30  ;;  %4074 = vmatprep.subr.bf16.mxu0 %v4409_v31  ;;  %v4453_v30 = vld [vmem:[%s5419_s1 + $0x8a8] sm:$0xff]   ;;  %v4454_v31 = vld [vmem:[%s5419_s1 + $0x870] sm:$0xff]  }
  0xf2   : > { %4096 = vmatprep.subr.bf16.mxu1 %v4410_v32  ;;  %v4455_v32 = vld [vmem:[%s5419_s1 + $0x8f0] sm:$0xff]  }
  0xf4   : > { %4075 = vmatpush3.bf16.msra.mxu0 %v4411_v33 }
  0xf5   : > { %4097 = vmatpush3.bf16.msra.mxu1 %v4412_v34  ;;  %4076 = vmatprep.subr.bf16.mxu0 %v4413_v35  ;;  %v4456_v35 = vld [vmem:[%s5419_s1 + $0x830] sm:$0xff]  }
  0xf6   : > { %4098 = vmatprep.subr.bf16.mxu1 %v4414_v36  ;;  %v4457_v36 = vld [vmem:[%s5419_s1 + $0x8b0] sm:$0xff]  }
  0xf8   : > { %4077 = vmatpush3.bf16.msra.mxu0 %v4415_v37 }
  0xf9   : > { %4099 = vmatpush3.bf16.msra.mxu1 %v4416_v38  ;;  %4078 = vmatprep.subr.bf16.mxu0 %v4417_v39 }
  0xfa   : > { %4100 = vmatprep.subr.bf16.mxu1 %v4418_v40  ;;  %v3776_v47 = vpop.f32.mrb[0].mxu0 }
  0xfb   : > { %v3798_v48 = vpop.f32.mrb[0].mxu1  ;;  %v3777_v51 = vpop.f32.mrb[1].mxu0 }
  0xfc   : > { %v3799_v52 = vpop.f32.mrb[1].mxu1  ;;  %v3778_v53 = vadd.f32 %v3777_v51, %v3776_v47  ;;  %v3779_v55 = vpop.f32.mrb[2].mxu0  ;;  %4079 = vmatpush3.bf16.msra.mxu0 %v4419_v42  ;;  %v4459_v47 = vld [vmem:[%s5419_s1 + $0x8f8] sm:$0xff]  }
  0xfd   : > { %v3800_v54 = vadd.f32 %v3799_v52, %v3798_v48  ;;  %v3801_v56 = vpop.f32.mrb[2].mxu1  ;;  %4101 = vmatpush3.bf16.msra.mxu1 %v4420_v43  ;;  %v3780_v57 = vpop.f32.mrb[3].mxu0  ;;  %4080 = vmatprep.subr.bf16.mxu0 %v4421_v44  ;;  %v4460_v51 = vld [vmem:[%s5419_s1 + $0x838] sm:$0xff]  }
  0xfe   : > { %v3802_v58 = vpop.f32.mrb[3].mxu1  ;;  %4102 = vmatprep.subr.bf16.mxu1 %v4422_v46  ;;  %v2723_v61 = vadd.f32 %v3778_v53, %v3469_v45  ;;  %v4458_v46 = vld [vmem:[%s5419_s1 + $0x878] sm:$0xff]  }
  0xff   : > { %v4461_v52 = vld [vmem:[%s5419_s1 + $0x8b8] sm:$0xff]  }
 0x100   : > { %v5308_v3 = vadd.f32 %v3800_v54, %v2723_v61  ;;  %4081 = vmatpush3.bf16.msra.mxu0 %v4423_v49  ;;  %v178_v49 = vld [vmem:[%s4600_s27 + $0x40] sm:$0xff]  ;;  %s3468_s27 = sshll.u32 %s5423_s13, 2 }
 0x101   : > { %4103 = vmatpush3.bf16.msra.mxu1 %v4424_v50  ;;  %4082 = vmatprep.subr.bf16.mxu0 %v4425_v59  ;;  %v914_v53 = vrot.slane %v178_v49, %v4615_v41  ;;  %v907_v54 = vcombine.high %v178_v49, %v178_v49  ;;  %s168_s19 = scalar_lea.vmem %s5421_s3, %s3468_s27 }
 0x102   : > { %4104 = vmatprep.subr.bf16.mxu1 %v4426_v60 }
 0x103   : > { %v922_v55 = vcombine.high %v914_v53, %v914_v53  ;;  %v921_v56 = vrot.slane %v907_v54, %v4615_v41 }
 0x104   : > { %4083 = vmatpush3.bf16.msra.mxu0 %v4427_v62 }
 0x105   : > { %4105 = vmatpush3.bf16.msra.mxu1 %v4428_v0  ;;  %4112 = vmatprep.subr.bf16.mxu0 %v4430_v4  ;;  %v923_v57 = vcombine.high %v921_v56, %v921_v56 }
 0x106   : > { %4134 = vmatprep.subr.bf16.mxu1 %v4431_v7 }
 0x107   : > { %3281 = vmatmul.mubr.bf16.vlgmr.msra.gmra.mrb[28].mxu0 %v897_v1 }
 0x108   : > { %3321 = vmatmul.mubr.bf16.vlgmr.msra.gmra.mrb[28].mxu1 %v904_v6  ;;  %4113 = vmatpush3.bf16.msra.mxu0 %v4432_v8 }
 0x109   : > { %4135 = vmatpush3.bf16.msra.mxu1 %v4433_v10  ;;  %4114 = vmatprep.subr.bf16.mxu0 %v4434_v11 }
 0x10a   : > { %4136 = vmatprep.subr.bf16.mxu1 %v4435_v12  ;;  %3360 = vmatprep.mubr.bf16.mxu0 %v922_v55 }
 0x10b   : > { %3400 = vmatprep.mubr.bf16.mxu1 %v923_v57 }
 0x10c   : > { %4115 = vmatpush3.bf16.msra.mxu0 %v4436_v13 }
 0x10d   : > { %4137 = vmatpush3.bf16.msra.mxu1 %v4437_v14  ;;  %4116 = vmatprep.subr.bf16.mxu0 %v4438_v15 }
 0x10e   : > { %4138 = vmatprep.subr.bf16.mxu1 %v4439_v16 }
 0x110   : > { %4117 = vmatpush3.bf16.msra.mxu0 %v4440_v17 }
 0x111   : > { %4139 = vmatpush3.bf16.msra.mxu1 %v4441_v18  ;;  %4118 = vmatprep.subr.bf16.mxu0 %v4442_v19 }
 0x112   : > { %4140 = vmatprep.subr.bf16.mxu1 %v4443_v20 }
 0x114   : > { %4119 = vmatpush3.bf16.msra.mxu0 %v4444_v21 }
 0x115   : > { %4141 = vmatpush3.bf16.msra.mxu1 %v4445_v22  ;;  %4120 = vmatprep.subr.bf16.mxu0 %v4446_v23 }
 0x116   : > { %4142 = vmatprep.subr.bf16.mxu1 %v4447_v24 }
 0x118   : > { %4121 = vmatpush3.bf16.msra.mxu0 %v4448_v25 }
 0x119   : > { %4143 = vmatpush3.bf16.msra.mxu1 %v4449_v26  ;;  %4122 = vmatprep.subr.bf16.mxu0 %v4450_v27 }
 0x11a   : > { %4144 = vmatprep.subr.bf16.mxu1 %v4451_v28  ;;  %v3820_v33 = vpop.f32.mrb[4].mxu0 }
 0x11b   : > { %v3842_v34 = vpop.f32.mrb[4].mxu1  ;;  %v3821_v37 = vpop.f32.mrb[5].mxu0 }
 0x11c   : > { %v3843_v38 = vpop.f32.mrb[5].mxu1  ;;  %v3822_v39 = vadd.f32 %v3821_v37, %v3820_v33  ;;  %v3823_v42 = vpop.f32.mrb[6].mxu0  ;;  %4123 = vmatpush3.bf16.msra.mxu0 %v4452_v29 }
 0x11d   : > { %v3844_v40 = vadd.f32 %v3843_v38, %v3842_v34  ;;  %v3845_v43 = vpop.f32.mrb[6].mxu1  ;;  %4145 = vmatpush3.bf16.msra.mxu1 %v4453_v30  ;;  %v3824_v44 = vpop.f32.mrb[7].mxu0  ;;  %4124 = vmatprep.subr.bf16.mxu0 %v4454_v31 }
 0x11e   : > { %v3846_v45 = vpop.f32.mrb[7].mxu1  ;;  %4146 = vmatprep.subr.bf16.mxu1 %v4455_v32  ;;  %v2803_v48 = vadd.f32 %v3822_v39, %v5308_v3 }
 0x120   : > { %v2843_v50 = vadd.f32 %v3844_v40, %v2803_v48  ;;  %4125 = vmatpush3.bf16.msra.mxu0 %v4456_v35 }
 0x121   : > { %4147 = vmatpush3.bf16.msra.mxu1 %v4457_v36  ;;  %4126 = vmatprep.subr.bf16.mxu0 %v4458_v46 }
 0x122   : > { %4148 = vmatprep.subr.bf16.mxu1 %v4459_v47 }
 0x124   : > { %4127 = vmatpush3.bf16.msra.mxu0 %v4460_v51 }
 0x125   : > { %4149 = vmatpush3.bf16.msra.mxu1 %v4461_v52 }
 0x127   : > { %3361 = vmatmul.mubr.bf16.vlgmr.msra.gmra.mrb[32].mxu0 %v914_v53 }
 0x128   : > { %3401 = vmatmul.mubr.bf16.vlgmr.msra.gmra.mrb[32].mxu1 %v921_v56 }
 0x13a   : > { %v3864_v58 = vpop.f32.mrb[8].mxu0 }
 0x13b   : > { %v3886_v59 = vpop.f32.mrb[8].mxu1  ;;  %v3865_v60 = vpop.f32.mrb[9].mxu0 }
 0x13c   : > { %v3887_v61 = vpop.f32.mrb[9].mxu1  ;;  %v3866_v62 = vadd.f32 %v3865_v60, %v3864_v58  ;;  %v3867_v0 = vpop.f32.mrb[10].mxu0 }
 0x13d   : > { %v3888_v63 = vadd.f32 %v3887_v61, %v3886_v59  ;;  %v3889_v1 = vpop.f32.mrb[10].mxu1  ;;  %v3868_v2 = vpop.f32.mrb[11].mxu0 }
 0x13e   : > { %v3890_v3 = vpop.f32.mrb[11].mxu1  ;;  %v2883_v4 = vadd.f32 %v3866_v62, %v2843_v50 }
 0x140   : > { %v2923_v5 = vadd.f32 %v3888_v63, %v2883_v4 }
 0x15a   : > { %v3908_v41 = vpop.f32.mrb[12].mxu0 }
 0x15b   : > { %v3930_v6 = vpop.f32.mrb[12].mxu1  ;;  %v3909_v7 = vpop.f32.mrb[13].mxu0 }
 0x15c   : > { %v3931_v8 = vpop.f32.mrb[13].mxu1  ;;  %v3910_v9 = vadd.f32 %v3909_v7, %v3908_v41  ;;  %v3911_v11 = vpop.f32.mrb[14].mxu0 }
 0x15d   : > { %v3932_v10 = vadd.f32 %v3931_v8, %v3930_v6  ;;  %v3933_v12 = vpop.f32.mrb[14].mxu1  ;;  %v3912_v13 = vpop.f32.mrb[15].mxu0 }
 0x15e   : > { %v3934_v14 = vpop.f32.mrb[15].mxu1  ;;  %v2963_v15 = vadd.f32 %v3910_v9, %v2923_v5 }
 0x160   : > { %v3003_v16 = vadd.f32 %v3932_v10, %v2963_v15 }
 0x17a   : > { %v3952_v17 = vpop.f32.mrb[16].mxu0 }
 0x17b   : > { %v3974_v18 = vpop.f32.mrb[16].mxu1  ;;  %v3953_v19 = vpop.f32.mrb[17].mxu0 }
 0x17c   : > { %v3975_v20 = vpop.f32.mrb[17].mxu1  ;;  %v3954_v21 = vadd.f32 %v3953_v19, %v3952_v17  ;;  %v3955_v23 = vpop.f32.mrb[18].mxu0 }
 0x17d   : > { %v3976_v22 = vadd.f32 %v3975_v20, %v3974_v18  ;;  %v3977_v24 = vpop.f32.mrb[18].mxu1  ;;  %v3956_v25 = vpop.f32.mrb[19].mxu0 }
 0x17e   : > { %v3978_v26 = vpop.f32.mrb[19].mxu1  ;;  %v3043_v27 = vadd.f32 %v3954_v21, %v3003_v16 }
 0x180   : > { %v3083_v28 = vadd.f32 %v3976_v22, %v3043_v27 }
 0x19a   : > { %v3996_v29 = vpop.f32.mrb[20].mxu0 }
 0x19b   : > { %v4018_v30 = vpop.f32.mrb[20].mxu1  ;;  %v3997_v31 = vpop.f32.mrb[21].mxu0 }
 0x19c   : > { %v4019_v32 = vpop.f32.mrb[21].mxu1  ;;  %v3998_v33 = vadd.f32 %v3997_v31, %v3996_v29  ;;  %v3999_v35 = vpop.f32.mrb[22].mxu0 }
 0x19d   : > { %v4020_v34 = vadd.f32 %v4019_v32, %v4018_v30  ;;  %v4021_v36 = vpop.f32.mrb[22].mxu1  ;;  %v4000_v37 = vpop.f32.mrb[23].mxu0 }
 0x19e   : > { %v4022_v38 = vpop.f32.mrb[23].mxu1  ;;  %v3123_v39 = vadd.f32 %v3998_v33, %v3083_v28 }
 0x1a0   : > { %v3163_v40 = vadd.f32 %v4020_v34, %v3123_v39 }
 0x1ba   : > { %v4040_v42 = vpop.f32.mrb[24].mxu0 }
 0x1bb   : > { %v4062_v43 = vpop.f32.mrb[24].mxu1  ;;  %v4041_v44 = vpop.f32.mrb[25].mxu0 }
 0x1bc   : > { %v4063_v45 = vpop.f32.mrb[25].mxu1  ;;  %v4042_v46 = vadd.f32 %v4041_v44, %v4040_v42  ;;  %v4043_v48 = vpop.f32.mrb[26].mxu0 }
 0x1bd   : > { %v4064_v47 = vadd.f32 %v4063_v45, %v4062_v43  ;;  %v4065_v49 = vpop.f32.mrb[26].mxu1  ;;  %v4044_v50 = vpop.f32.mrb[27].mxu0 }
 0x1be   : > { %v4066_v51 = vpop.f32.mrb[27].mxu1  ;;  %v3203_v52 = vadd.f32 %v4042_v46, %v3163_v40 }
 0x1c0   : > { %v3243_v53 = vadd.f32 %v4064_v47, %v3203_v52 }
 0x1da   : > { %v4084_v54 = vpop.f32.mrb[28].mxu0 }
 0x1db   : > { %v4106_v55 = vpop.f32.mrb[28].mxu1  ;;  %v4085_v56 = vpop.f32.mrb[29].mxu0 }
 0x1dc   : > { %v4107_v57 = vpop.f32.mrb[29].mxu1  ;;  %v4086_v58 = vadd.f32 %v4085_v56, %v4084_v54  ;;  %v4087_v60 = vpop.f32.mrb[30].mxu0 }
 0x1dd   : > { %v4108_v59 = vadd.f32 %v4107_v57, %v4106_v55  ;;  %v4109_v61 = vpop.f32.mrb[30].mxu1  ;;  %v4088_v62 = vpop.f32.mrb[31].mxu0 }
 0x1de   : > { %v4110_v63 = vpop.f32.mrb[31].mxu1  ;;  %v3283_v0 = vadd.f32 %v4086_v58, %v3243_v53 }
 0x1e0   : > { %v3323_v1 = vadd.f32 %v4108_v59, %v3283_v0 }
 0x1fa   : > { %v4128_v2 = vpop.f32.mrb[32].mxu0 }
 0x1fb   : > { %v4150_v3 = vpop.f32.mrb[32].mxu1  ;;  %v4129_v4 = vpop.f32.mrb[33].mxu0 }
 0x1fc   : > { %v4151_v5 = vpop.f32.mrb[33].mxu1  ;;  %v4130_v41 = vadd.f32 %v4129_v4, %v4128_v2  ;;  %v4131_v7 = vpop.f32.mrb[34].mxu0 }
 0x1fd   : > { %v4152_v6 = vadd.f32 %v4151_v5, %v4150_v3  ;;  %v4153_v8 = vpop.f32.mrb[34].mxu1  ;;  %v4132_v9 = vpop.f32.mrb[35].mxu0 }
 0x1fe   : > { %v4154_v10 = vpop.f32.mrb[35].mxu1  ;;  %v3363_v11 = vadd.f32 %v4130_v41, %v3323_v1 }
 0x200   : > { %v3403_v12 = vadd.f32 %v4152_v6, %v3363_v11 }
 0x202   : > { %3408 = vst [vmem:[%s168_s19] sm:$0xf] %v3403_v12 }
 0x203 PF: > { %s13_s12 = sadd.s32 1, %s4469_s12  }
 0x204   : > { %p10_p4 = scmp.ge.s32.totalorder %s13_s12, 4  }
 0x206   :  { %12 = sbr.rel (!%p10_p4) target bundleno = 1 (0x1), region = 62 }

// kernel: discriminator_forward.8
= control target key start
LH: loop header
LB: loop body
LE: loop exit
PB: predicated region body
PF: predicated region fallthrough
CT: control target
= control target key end

     0   :  { %s6244_s12 = smov 0   ;;  %s8097_s0 = inlined_call_operand.vmem [shape: bf16[2,4,2304], index: 0, kind: input, shape index: {}]   ;;  %s8098_s1 = inlined_call_operand.vmem [shape: bf16[2304,512], index: 1, kind: input, shape index: {}]   ;;  %s8099_s2 = inlined_call_operand.vmem [shape: f32[1,512], index: 2, kind: input, shape index: {}]   ;;  %s8100_s3 = inlined_call_operand.vmem [shape: bf16[2,4,512], index: 3, kind: output, shape index: {}]  }
   0x1 LB: > { %s4671_s13 = sadd.s32 4294967295, %s6221_s12   ;;  %p4675_p0 = scmp.ge.s32.totalorder %s6221_s12, 1  ;;  %s6221_s12 = sphi %s6244_s12, %s13_s12  }
   0x2   : > { %p137_p1 = scmp.lt.s32.totalorder %s6221_s12, 3 }
   0x4   : > { %p138_p2 = pnand %p4675_p0, %p137_p1 }
   0x5   : > { %v5339_v0 = vld [vmem:[%s8098_s1 + $0x4] ss:$16 sps:$4 sm:$0xff] (!%p138_p2)   ;;  %v5341_v1 = vld [vmem:[%s8098_s1 + $0xc] ss:$16 sps:$4 sm:$0xff] (!%p138_p2)   ;;  %v5343_v2 = vld [vmem:[%s8098_s1] ss:$16 sps:$4 sm:$0xff] (!%p138_p2)   ;;  %v754_v36 = vlaneseq (!%p138_p2) }
   0x6   : > { %141 = sbr.rel (%p138_p2) target bundleno = 858 (0x35a), region = 32  ;;  %3753 = vmatprep.subr.bf16.mxu0 (!%p138_p2), %v5339_v0  ;;  %v5344_v3 = vld [vmem:[%s8098_s1 + $0x8] ss:$16 sps:$4 sm:$0xff] (!%p138_p2)   ;;  %4122 = vmatprep.subr.bf16.mxu1 (!%p138_p2), %v5341_v1  ;;  %v5345_v4 = vld [vmem:[%s8098_s1 + $0x24] ss:$16 sps:$4 sm:$0xff] (!%p138_p2)   ;;  %p161_p3 = scmp.lt.s32.totalorder (!%p138_p2), %s4671_s13, 1 }
   0x7   : > { %3754 = vmatpush1.bf16.msra.mxu0 (!%p138_p2), %v5343_v2  ;;  %4123 = vmatpush1.bf16.msra.mxu1 (!%p138_p2), %v5344_v3  ;;  %v5347_v5 = vld [vmem:[%s8098_s1 + $0x2c] ss:$16 sps:$4 sm:$0xff] (!%p138_p2)   ;;  %v5349_v6 = vld [vmem:[%s8098_s1 + $0x20] ss:$16 sps:$4 sm:$0xff] (!%p138_p2)   ;;  %v5350_v7 = vld [vmem:[%s8098_s1 + $0x28] ss:$16 sps:$4 sm:$0xff] (!%p138_p2)  }
   0x8   : > { %3755 = vmatprep.subr.bf16.mxu0 (!%p138_p2), %v5345_v4  ;;  %4124 = vmatprep.subr.bf16.mxu1 (!%p138_p2), %v5347_v5  ;;  %v5351_v8 = vld [vmem:[%s8098_s1 + $0x44] ss:$16 sps:$4 sm:$0xff] (!%p138_p2)   ;;  %v5353_v9 = vld [vmem:[%s8098_s1 + $0x4c] ss:$16 sps:$4 sm:$0xff] (!%p138_p2)   ;;  %v5355_v10 = vld [vmem:[%s8098_s1 + $0x40] ss:$16 sps:$4 sm:$0xff] (!%p138_p2)  }
   0x9   : > { %v5356_v11 = vld [vmem:[%s8098_s1 + $0x48] ss:$16 sps:$4 sm:$0xff] (!%p138_p2)   ;;  %v5357_v12 = vld [vmem:[%s8098_s1 + $0x64] ss:$16 sps:$4 sm:$0xff] (!%p138_p2)   ;;  %v5359_v13 = vld [vmem:[%s8098_s1 + $0x6c] ss:$16 sps:$4 sm:$0xff] (!%p138_p2)  }
   0xa   : > { %v5361_v14 = vld [vmem:[%s8098_s1 + $0x60] ss:$16 sps:$4 sm:$0xff] (!%p138_p2)   ;;  %v5362_v15 = vld [vmem:[%s8098_s1 + $0x68] ss:$16 sps:$4 sm:$0xff] (!%p138_p2)   ;;  %v5363_v16 = vld [vmem:[%s8098_s1 + $0x84] ss:$16 sps:$4 sm:$0xff] (!%p138_p2)  }
   0xb   : > { %3756 = vmatpush1.bf16.msra.mxu0 (!%p138_p2), %v5349_v6  ;;  %4125 = vmatpush1.bf16.msra.mxu1 (!%p138_p2), %v5350_v7  ;;  %v5365_v17 = vld [vmem:[%s8098_s1 + $0x8c] ss:$16 sps:$4 sm:$0xff] (!%p138_p2)   ;;  %v5367_v18 = vld [vmem:[%s8098_s1 + $0x80] ss:$16 sps:$4 sm:$0xff] (!%p138_p2)   ;;  %v5368_v19 = vld [vmem:[%s8098_s1 + $0x88] ss:$16 sps:$4 sm:$0xff] (!%p138_p2)  }
   0xc   : > { %3757 = vmatprep.subr.bf16.mxu0 (!%p138_p2), %v5351_v8  ;;  %4126 = vmatprep.subr.bf16.mxu1 (!%p138_p2), %v5353_v9  ;;  %v5369_v20 = vld [vmem:[%s8098_s1 + $0xa4] ss:$16 sps:$4 sm:$0xff] (!%p138_p2)   ;;  %v5371_v21 = vld [vmem:[%s8098_s1 + $0xac] ss:$16 sps:$4 sm:$0xff] (!%p138_p2)   ;;  %v5373_v22 = vld [vmem:[%s8098_s1 + $0xa0] ss:$16 sps:$4 sm:$0xff] (!%p138_p2)  }
   0xd   : > { %v5374_v23 = vld [vmem:[%s8098_s1 + $0xa8] ss:$16 sps:$4 sm:$0xff]   ;;  %v5375_v24 = vld [vmem:[%s8098_s1 + $0xc4] ss:$16 sps:$4 sm:$0xff]   ;;  %v5377_v25 = vld [vmem:[%s8098_s1 + $0xcc] ss:$16 sps:$4 sm:$0xff]  }
   0xe   : > { %v5379_v26 = vld [vmem:[%s8098_s1 + $0xc0] ss:$16 sps:$4 sm:$0xff]   ;;  %v5380_v27 = vld [vmem:[%s8098_s1 + $0xc8] ss:$16 sps:$4 sm:$0xff]   ;;  %v5381_v28 = vld [vmem:[%s8098_s1 + $0xe4] ss:$16 sps:$4 sm:$0xff]  }
   0xf   : > { %3758 = vmatpush1.bf16.msra.mxu0 %v5355_v10  ;;  %4127 = vmatpush1.bf16.msra.mxu1 %v5356_v11  ;;  %v5383_v29 = vld [vmem:[%s8098_s1 + $0xec] ss:$16 sps:$4 sm:$0xff]   ;;  %v5385_v30 = vld [vmem:[%s8098_s1 + $0xe0] ss:$16 sps:$4 sm:$0xff]   ;;  %v5386_v31 = vld [vmem:[%s8098_s1 + $0xe8] ss:$16 sps:$4 sm:$0xff]  }
  0x10   : > { %3759 = vmatprep.subr.bf16.mxu0 %v5357_v12  ;;  %4128 = vmatprep.subr.bf16.mxu1 %v5359_v13  ;;  %v5387_v32 = vld [vmem:[%s8098_s1 + $0x104] ss:$16 sps:$4 sm:$0xff]   ;;  %v5389_v33 = vld [vmem:[%s8098_s1 + $0x10c] ss:$16 sps:$4 sm:$0xff]   ;;  %v5391_v34 = vld [vmem:[%s8098_s1 + $0x100] ss:$16 sps:$4 sm:$0xff]  }
  0x11   : > { %v5392_v35 = vld [vmem:[%s8098_s1 + $0x108] ss:$16 sps:$4 sm:$0xff]   ;;  %s8102_s13 = smov (!%p161_p3, %s4671_s13), 1  ;;  %v6223_v37 = vmov 1983009808   ;;  %v6376_v42 = vshrl.u32 %v754_v36, 7 }
  0x12   : > { %v781_v38 = vunpack.c.l.s4 %v6223_v37  ;;  %v5393_v39 = vld [vmem:[%s8098_s1 + $0x124] ss:$16 sps:$4 sm:$0xff]   ;;  %v5395_v40 = vld [vmem:[%s8098_s1 + $0x12c] ss:$16 sps:$4 sm:$0xff]   ;;  %v5397_v41 = vld [vmem:[%s8098_s1 + $0x120] ss:$16 sps:$4 sm:$0xff]  }
  0x13   : > { %3760 = vmatpush1.bf16.msra.mxu0 %v5361_v14  ;;  %4129 = vmatpush1.bf16.msra.mxu1 %v5362_v15  ;;  %s5329_s17 = smul.u32 36, %s8102_s13  ;;  %v5398_v44 = vld [vmem:[%s8098_s1 + $0x128] ss:$16 sps:$4 sm:$0xff]   ;;  %v5399_v45 = vld [vmem:[%s8098_s1 + $0x144] ss:$16 sps:$4 sm:$0xff]   ;;  %vm4491_vm0 = vcmask 1043456  }
  0x14   : > { %3761 = vmatprep.subr.bf16.mxu0 %v5363_v16  ;;  %4130 = vmatprep.subr.bf16.mxu1 %v5365_v17  ;;  %v782_v43 = vunpack.c.0.s8 %v781_v38  ;;  %v5401_v46 = vld [vmem:[%s8098_s1 + $0x14c] ss:$16 sps:$4 sm:$0xff]   ;;  %v5403_v47 = vld [vmem:[%s8098_s1 + $0x140] ss:$16 sps:$4 sm:$0xff]   ;;  %v5404_v48 = vld [vmem:[%s8098_s1 + $0x148] ss:$16 sps:$4 sm:$0xff]  }
  0x15   : > { %s6396_s30 = scalar_lea.vmem %s8097_s0, %s5329_s17  ;;  %v5405_v50 = vld [vmem:[%s8098_s1 + $0x164] ss:$16 sps:$4 sm:$0xff]   ;;  %v5407_v51 = vld [vmem:[%s8098_s1 + $0x16c] ss:$16 sps:$4 sm:$0xff]   ;;  %v5409_v53 = vld [vmem:[%s8098_s1 + $0x160] ss:$16 sps:$4 sm:$0xff]  }
  0x16   : > { %v6399_v49 = vsub.s32 %v782_v43, %v6376_v42  ;;  %v171_v52 = vld [vmem:[%s6396_s30] sm:$0xff]  ;;  %v5410_v55 = vld [vmem:[%s8098_s1 + $0x168] ss:$16 sps:$4 sm:$0xff]   ;;  %v5413_v57 = vld [vmem:[%s8098_s1 + $0x18c] ss:$16 sps:$4 sm:$0xff]   ;;  %s5260_s9 = sshll.u32 %s8102_s13, 3 }
  0x17   : > { %3762 = vmatpush1.bf16.msra.mxu0 %v5367_v18  ;;  %4131 = vmatpush1.bf16.msra.mxu1 %v5368_v19  ;;  %v5411_v56 = vld [vmem:[%s8098_s1 + $0x184] ss:$16 sps:$4 sm:$0xff]   ;;  %v5415_v59 = vld [vmem:[%s8098_s1 + $0x180] ss:$16 sps:$4 sm:$0xff]   ;;  %v5416_v60 = vld [vmem:[%s8098_s1 + $0x188] ss:$16 sps:$4 sm:$0xff]   ;;  %v779_v7 = vcombine.high %v171_v52, %v171_v52  ;;  %s170_s14 = scalar_lea.vmem %s8100_s3, %s5260_s9 }
  0x18   : > { %3763 = vmatprep.subr.bf16.mxu0 %v5369_v20  ;;  %4132 = vmatprep.subr.bf16.mxu1 %v5371_v21  ;;  %v786_v54 = vrot.slane %v171_v52, %v6399_v49  ;;  %v5417_v61 = vld [vmem:[%s8098_s1 + $0x1a4] ss:$16 sps:$4 sm:$0xff]   ;;  %v5419_v62 = vld [vmem:[%s8098_s1 + $0x1ac] ss:$16 sps:$4 sm:$0xff]   ;;  %v5421_v63 = vld [vmem:[%s8098_s1 + $0x1a0] ss:$16 sps:$4 sm:$0xff]  }
  0x19   : > { %v5422_v0 = vld [vmem:[%s8098_s1 + $0x1a8] ss:$16 sps:$4 sm:$0xff]   ;;  %v5423_v1 = vld [vmem:[%s8098_s1 + $0x1c4] ss:$16 sps:$4 sm:$0xff]   ;;  %v5425_v2 = vld [vmem:[%s8098_s1 + $0x1cc] ss:$16 sps:$4 sm:$0xff]   ;;  %v6470_v12 = vrot.slane %v779_v7, %v6399_v49 }
  0x1a   : > { %v794_v58 = vcombine.high %v786_v54, %v786_v54  ;;  %v5427_v3 = vld [vmem:[%s8098_s1 + $0x1c0] ss:$16 sps:$4 sm:$0xff]   ;;  %v5428_v4 = vld [vmem:[%s8098_s1 + $0x1c8] ss:$16 sps:$4 sm:$0xff]   ;;  %v5429_v5 = vld [vmem:[%s8098_s1 + $0x1e4] ss:$16 sps:$4 sm:$0xff]  }
  0x1b   : > { %3764 = vmatpush1.bf16.msra.mxu0 %v5373_v22  ;;  %4133 = vmatpush1.bf16.msra.mxu1 %v5374_v23  ;;  %v5431_v6 = vld [vmem:[%s8098_s1 + $0x1ec] ss:$16 sps:$4 sm:$0xff]   ;;  %v5433_v8 = vld [vmem:[%s8098_s1 + $0x1e0] ss:$16 sps:$4 sm:$0xff]   ;;  %v5434_v9 = vld [vmem:[%s8098_s1 + $0x1e8] ss:$16 sps:$4 sm:$0xff]   ;;  %v795_v17 = vcombine.high %v6470_v12, %v6470_v12 }
  0x1c   : > { %3765 = vmatprep.subr.bf16.mxu0 %v5375_v24  ;;  %4134 = vmatprep.subr.bf16.mxu1 %v5377_v25  ;;  %v5438_v10 = vld [vmem:[%s8098_s1 + $0x204] ss:$16 sps:$4 sm:$0xff]   ;;  %v5441_v11 = vld [vmem:[%s8098_s1 + $0x20c] ss:$16 sps:$4 sm:$0xff]   ;;  %v5436_v13 = vld [vmem:[%s8098_s1 + $0x200] ss:$16 sps:$4 sm:$0xff]  }
  0x1d   : > { %3785 = vmatprep.mubr.bf16.mxu0 %v794_v58  ;;  %4154 = vmatprep.mubr.bf16.mxu1 %v794_v58  ;;  %v5439_v14 = vld [vmem:[%s8098_s1 + $0x208] ss:$16 sps:$4 sm:$0xff]   ;;  %v5444_v15 = vld [vmem:[%s8098_s1 + $0x224] ss:$16 sps:$4 sm:$0xff]   ;;  %v5447_v16 = vld [vmem:[%s8098_s1 + $0x22c] ss:$16 sps:$4 sm:$0xff]  }
  0x1e   : > { %v5442_v18 = vld [vmem:[%s8098_s1 + $0x220] ss:$16 sps:$4 sm:$0xff]   ;;  %v5445_v19 = vld [vmem:[%s8098_s1 + $0x228] ss:$16 sps:$4 sm:$0xff]   ;;  %v5450_v20 = vld [vmem:[%s8098_s1 + $0x244] ss:$16 sps:$4 sm:$0xff]  }
  0x1f   : > { %3766 = vmatpush1.bf16.msra.mxu0 %v5379_v26  ;;  %4135 = vmatpush1.bf16.msra.mxu1 %v5380_v27  ;;  %v5453_v21 = vld [vmem:[%s8098_s1 + $0x24c] ss:$16 sps:$4 sm:$0xff]   ;;  %v5448_v22 = vld [vmem:[%s8098_s1 + $0x240] ss:$16 sps:$4 sm:$0xff]   ;;  %v5451_v23 = vld [vmem:[%s8098_s1 + $0x248] ss:$16 sps:$4 sm:$0xff]  }
  0x20   : > { %3767 = vmatprep.subr.bf16.mxu0 %v5381_v28  ;;  %4136 = vmatprep.subr.bf16.mxu1 %v5383_v29  ;;  %v5456_v24 = vld [vmem:[%s8098_s1 + $0x264] ss:$16 sps:$4 sm:$0xff]   ;;  %v5459_v25 = vld [vmem:[%s8098_s1 + $0x26c] ss:$16 sps:$4 sm:$0xff]   ;;  %v5454_v26 = vld [vmem:[%s8098_s1 + $0x260] ss:$16 sps:$4 sm:$0xff]  }
  0x21   : > { %v5457_v27 = vld [vmem:[%s8098_s1 + $0x268] ss:$16 sps:$4 sm:$0xff]   ;;  %v5462_v28 = vld [vmem:[%s8098_s1 + $0x284] ss:$16 sps:$4 sm:$0xff]   ;;  %v5465_v29 = vld [vmem:[%s8098_s1 + $0x28c] ss:$16 sps:$4 sm:$0xff]  }
  0x22   : > { %v5474_v36 = vld [vmem:[%s8098_s1 + $0x2c4] ss:$16 sps:$4 sm:$0xff]   ;;  %v5477_v37 = vld [vmem:[%s8098_s1 + $0x2cc] ss:$16 sps:$4 sm:$0xff]   ;;  %v5472_v38 = vld [vmem:[%s8098_s1 + $0x2c0] ss:$16 sps:$4 sm:$0xff]  }
  0x23   : > { %3768 = vmatpush1.bf16.msra.mxu0 %v5385_v30  ;;  %4137 = vmatpush1.bf16.msra.mxu1 %v5386_v31  ;;  %v5460_v30 = vld [vmem:[%s8098_s1 + $0x280] ss:$16 sps:$4 sm:$0xff]   ;;  %v5463_v31 = vld [vmem:[%s8098_s1 + $0x288] ss:$16 sps:$4 sm:$0xff]   ;;  %v5504_v58 = vld [vmem:[%s8098_s1 + $0x364] ss:$16 sps:$4 sm:$0xff]  }
  0x24   : > { %3769 = vmatprep.subr.bf16.mxu0 %v5387_v32  ;;  %4138 = vmatprep.subr.bf16.mxu1 %v5389_v33  ;;  %v5468_v32 = vld [vmem:[%s8098_s1 + $0x2a4] ss:$16 sps:$4 sm:$0xff]   ;;  %v5471_v33 = vld [vmem:[%s8098_s1 + $0x2ac] ss:$16 sps:$4 sm:$0xff]   ;;  %v5478_v43 = vld [vmem:[%s8098_s1 + $0x2e0] ss:$16 sps:$4 sm:$0xff]  }
  0x25   : > { %v5490_v52 = vld [vmem:[%s8098_s1 + $0x320] ss:$16 sps:$4 sm:$0xff]   ;;  %v5525_v7 = vld [vmem:[%s8098_s1 + $0x3cc] ss:$16 sps:$4 sm:$0xff]  }
  0x27   : > { %3770 = vmatpush1.bf16.msra.mxu0 %v5391_v34  ;;  %4139 = vmatpush1.bf16.msra.mxu1 %v5392_v35  ;;  %v5466_v34 = vld [vmem:[%s8098_s1 + $0x2a0] ss:$16 sps:$4 sm:$0xff]   ;;  %v5469_v35 = vld [vmem:[%s8098_s1 + $0x2a8] ss:$16 sps:$4 sm:$0xff]  }
  0x28   : > { %3771 = vmatprep.subr.bf16.mxu0 %v5393_v39  ;;  %4140 = vmatprep.subr.bf16.mxu1 %v5395_v40  ;;  %v5475_v39 = vld [vmem:[%s8098_s1 + $0x2c8] ss:$16 sps:$4 sm:$0xff]   ;;  %v5480_v40 = vld [vmem:[%s8098_s1 + $0x2e4] ss:$16 sps:$4 sm:$0xff]  }
  0x2b   : > { %3772 = vmatpush1.bf16.msra.mxu0 %v5397_v41  ;;  %4141 = vmatpush1.bf16.msra.mxu1 %v5398_v44  ;;  %v5483_v41 = vld [vmem:[%s8098_s1 + $0x2ec] ss:$16 sps:$4 sm:$0xff]   ;;  %v5481_v44 = vld [vmem:[%s8098_s1 + $0x2e8] ss:$16 sps:$4 sm:$0xff]  }
  0x2c   : > { %3773 = vmatprep.subr.bf16.mxu0 %v5399_v45  ;;  %4142 = vmatprep.subr.bf16.mxu1 %v5401_v46  ;;  %v5486_v45 = vld [vmem:[%s8098_s1 + $0x304] ss:$16 sps:$4 sm:$0xff]   ;;  %v5489_v46 = vld [vmem:[%s8098_s1 + $0x30c] ss:$16 sps:$4 sm:$0xff]  }
  0x2f   : > { %3774 = vmatpush1.bf16.msra.mxu0 %v5403_v47  ;;  %4143 = vmatpush1.bf16.msra.mxu1 %v5404_v48  ;;  %v5484_v47 = vld [vmem:[%s8098_s1 + $0x300] ss:$16 sps:$4 sm:$0xff]   ;;  %v5487_v48 = vld [vmem:[%s8098_s1 + $0x308] ss:$16 sps:$4 sm:$0xff]  }
  0x30   : > { %3775 = vmatprep.subr.bf16.mxu0 %v5405_v50  ;;  %4144 = vmatprep.subr.bf16.mxu1 %v5407_v51  ;;  %v5492_v50 = vld [vmem:[%s8098_s1 + $0x324] ss:$16 sps:$4 sm:$0xff]   ;;  %v5495_v51 = vld [vmem:[%s8098_s1 + $0x32c] ss:$16 sps:$4 sm:$0xff]  }
  0x33   : > { %3776 = vmatpush1.bf16.msra.mxu0 %v5409_v53  ;;  %4145 = vmatpush1.bf16.msra.mxu1 %v5410_v55  ;;  %v5493_v53 = vld [vmem:[%s8098_s1 + $0x328] ss:$16 sps:$4 sm:$0xff]   ;;  %v5501_v55 = vld [vmem:[%s8098_s1 + $0x34c] ss:$16 sps:$4 sm:$0xff]  }
  0x34   : > { %3777 = vmatprep.subr.bf16.mxu0 %v5411_v56  ;;  %4146 = vmatprep.subr.bf16.mxu1 %v5413_v57  ;;  %v5496_v56 = vld [vmem:[%s8098_s1 + $0x340] ss:$16 sps:$4 sm:$0xff]   ;;  %v5499_v57 = vld [vmem:[%s8098_s1 + $0x348] ss:$16 sps:$4 sm:$0xff]  }
  0x37   : > { %3778 = vmatpush1.bf16.msra.mxu0 %v5415_v59  ;;  %4147 = vmatpush1.bf16.msra.mxu1 %v5416_v60  ;;  %v5507_v59 = vld [vmem:[%s8098_s1 + $0x36c] ss:$16 sps:$4 sm:$0xff]   ;;  %v5502_v60 = vld [vmem:[%s8098_s1 + $0x360] ss:$16 sps:$4 sm:$0xff]  }
  0x38   : > { %3779 = vmatprep.subr.bf16.mxu0 %v5417_v61  ;;  %4148 = vmatprep.subr.bf16.mxu1 %v5419_v62  ;;  %v5505_v61 = vld [vmem:[%s8098_s1 + $0x368] ss:$16 sps:$4 sm:$0xff]   ;;  %v5510_v62 = vld [vmem:[%s8098_s1 + $0x384] ss:$16 sps:$4 sm:$0xff]  }
  0x3b   : > { %3780 = vmatpush1.bf16.msra.mxu0 %v5421_v63  ;;  %4149 = vmatpush1.bf16.msra.mxu1 %v5422_v0  ;;  %v5513_v63 = vld [vmem:[%s8098_s1 + $0x38c] ss:$16 sps:$4 sm:$0xff]   ;;  %v5508_v0 = vld [vmem:[%s8098_s1 + $0x380] ss:$16 sps:$4 sm:$0xff]  }
  0x3c   : > { %3781 = vmatprep.subr.bf16.mxu0 %v5423_v1  ;;  %4150 = vmatprep.subr.bf16.mxu1 %v5425_v2  ;;  %v5511_v1 = vld [vmem:[%s8098_s1 + $0x388] ss:$16 sps:$4 sm:$0xff]   ;;  %v5516_v2 = vld [vmem:[%s8098_s1 + $0x3a4] ss:$16 sps:$4 sm:$0xff]  }
  0x3f   : > { %3782 = vmatpush1.bf16.msra.mxu0 %v5427_v3  ;;  %4151 = vmatpush1.bf16.msra.mxu1 %v5428_v4  ;;  %v5519_v3 = vld [vmem:[%s8098_s1 + $0x3ac] ss:$16 sps:$4 sm:$0xff]   ;;  %v5514_v4 = vld [vmem:[%s8098_s1 + $0x3a0] ss:$16 sps:$4 sm:$0xff]  }
  0x40   : > { %3783 = vmatprep.subr.bf16.mxu0 %v5429_v5  ;;  %4152 = vmatprep.subr.bf16.mxu1 %v5431_v6  ;;  %v5517_v5 = vld [vmem:[%s8098_s1 + $0x3a8] ss:$16 sps:$4 sm:$0xff]   ;;  %v5522_v6 = vld [vmem:[%s8098_s1 + $0x3c4] ss:$16 sps:$4 sm:$0xff]  }
  0x43   : > { %3784 = vmatpush1.bf16.msra.mxu0 %v5433_v8  ;;  %4153 = vmatpush1.bf16.msra.mxu1 %v5434_v9  ;;  %v5520_v8 = vld [vmem:[%s8098_s1 + $0x3c0] ss:$16 sps:$4 sm:$0xff]   ;;  %v5523_v9 = vld [vmem:[%s8098_s1 + $0x3c8] ss:$16 sps:$4 sm:$0xff]  }
  0x44   : > { %3794 = vmatprep.subr.bf16.mxu0 %v5438_v10  ;;  %4163 = vmatprep.subr.bf16.mxu1 %v5441_v11  ;;  %v5528_v10 = vld [vmem:[%s8098_s1 + $0x3e4] ss:$16 sps:$4 sm:$0xff]   ;;  %v5531_v11 = vld [vmem:[%s8098_s1 + $0x3ec] ss:$16 sps:$4 sm:$0xff]  }
  0x46   : > { %3786 = vmatmul.mubr.bf16.vlgmr.msra.gmra.mrb[0].mxu0 %v786_v54  ;;  %4155 = vmatmul.mubr.bf16.vlgmr.msra.gmra.mrb[0].mxu1 %v786_v54  ;;  %v5498_v54 = vld [vmem:[%s8098_s1 + $0x344] ss:$16 sps:$4 sm:$0xff]  }
  0x47   : > { %3795 = vmatpush1.bf16.msra.mxu0 %v5436_v13  ;;  %4164 = vmatpush1.bf16.msra.mxu1 %v5439_v14  ;;  %v5526_v13 = vld [vmem:[%s8098_s1 + $0x3e0] ss:$16 sps:$4 sm:$0xff]   ;;  %v5529_v14 = vld [vmem:[%s8098_s1 + $0x3e8] ss:$16 sps:$4 sm:$0xff]  }
  0x48   : > { %3796 = vmatprep.subr.bf16.mxu0 %v5444_v15  ;;  %4165 = vmatprep.subr.bf16.mxu1 %v5447_v16  ;;  %v5534_v15 = vld [vmem:[%s8098_s1 + $0x404] ss:$16 sps:$4 sm:$0xff]   ;;  %v5537_v16 = vld [vmem:[%s8098_s1 + $0x40c] ss:$16 sps:$4 sm:$0xff]  }
  0x49   : > { %3826 = vmatprep.mubr.bf16.mxu0 %v795_v17  ;;  %4195 = vmatprep.mubr.bf16.mxu1 %v795_v17  ;;  %v5532_v17 = vld [vmem:[%s8098_s1 + $0x400] ss:$16 sps:$4 sm:$0xff]  }
  0x4b   : > { %3797 = vmatpush1.bf16.msra.mxu0 %v5442_v18  ;;  %4166 = vmatpush1.bf16.msra.mxu1 %v5445_v19  ;;  %v5535_v18 = vld [vmem:[%s8098_s1 + $0x408] ss:$16 sps:$4 sm:$0xff]  }
  0x4c   : > { %3798 = vmatprep.subr.bf16.mxu0 %v5450_v20  ;;  %4167 = vmatprep.subr.bf16.mxu1 %v5453_v21  ;;  %v6673_v19 = vld [vmem:[%s6396_s30 + $0x8] sm:$0xff]  ;;  %v5540_v20 = vld [vmem:[%s8098_s1 + $0x424] ss:$16 sps:$4 sm:$0xff]  }
  0x4d   : > { %v5543_v21 = vld [vmem:[%s8098_s1 + $0x42c] ss:$16 sps:$4 sm:$0xff]  }
  0x4f   : > { %3799 = vmatpush1.bf16.msra.mxu0 %v5448_v22  ;;  %4168 = vmatpush1.bf16.msra.mxu1 %v5451_v23  ;;  %v6683_v22 = vrot.slane %v6673_v19, %v6399_v49 }
  0x50   : > { %3800 = vmatprep.subr.bf16.mxu0 %v5456_v24  ;;  %4169 = vmatprep.subr.bf16.mxu1 %v5459_v25  ;;  %v5538_v24 = vld [vmem:[%s8098_s1 + $0x420] ss:$16 sps:$4 sm:$0xff]   ;;  %v5541_v25 = vld [vmem:[%s8098_s1 + $0x428] ss:$16 sps:$4 sm:$0xff]  }
  0x51   : > { %v811_v23 = vcombine.high %v6683_v22, %v6683_v22 }
  0x53   : > { %3801 = vmatpush1.bf16.msra.mxu0 %v5454_v26  ;;  %4170 = vmatpush1.bf16.msra.mxu1 %v5457_v27  ;;  %v5546_v26 = vld [vmem:[%s8098_s1 + $0x444] ss:$16 sps:$4 sm:$0xff]   ;;  %v5544_v27 = vld [vmem:[%s8098_s1 + $0x440] ss:$16 sps:$4 sm:$0xff]  }
  0x54   : > { %3802 = vmatprep.subr.bf16.mxu0 %v5462_v28  ;;  %4171 = vmatprep.subr.bf16.mxu1 %v5465_v29  ;;  %v5547_v28 = vld [vmem:[%s8098_s1 + $0x448] ss:$16 sps:$4 sm:$0xff]   ;;  %v5552_v29 = vld [vmem:[%s8098_s1 + $0x464] ss:$16 sps:$4 sm:$0xff]  }
  0x57   : > { %3803 = vmatpush1.bf16.msra.mxu0 %v5460_v30  ;;  %4172 = vmatpush1.bf16.msra.mxu1 %v5463_v31  ;;  %v5555_v30 = vld [vmem:[%s8098_s1 + $0x46c] ss:$16 sps:$4 sm:$0xff]   ;;  %v5550_v31 = vld [vmem:[%s8098_s1 + $0x460] ss:$16 sps:$4 sm:$0xff]  }
  0x58   : > { %3804 = vmatprep.subr.bf16.mxu0 %v5468_v32  ;;  %4173 = vmatprep.subr.bf16.mxu1 %v5471_v33  ;;  %v5553_v32 = vld [vmem:[%s8098_s1 + $0x468] ss:$16 sps:$4 sm:$0xff]   ;;  %v5558_v33 = vld [vmem:[%s8098_s1 + $0x484] ss:$16 sps:$4 sm:$0xff]  }
  0x5b   : > { %3805 = vmatpush1.bf16.msra.mxu0 %v5466_v34  ;;  %4174 = vmatpush1.bf16.msra.mxu1 %v5469_v35  ;;  %v5561_v34 = vld [vmem:[%s8098_s1 + $0x48c] ss:$16 sps:$4 sm:$0xff]   ;;  %v5556_v35 = vld [vmem:[%s8098_s1 + $0x480] ss:$16 sps:$4 sm:$0xff]  }
  0x5c   : > { %3806 = vmatprep.subr.bf16.mxu0 %v5474_v36  ;;  %4175 = vmatprep.subr.bf16.mxu1 %v5477_v37  ;;  %v5559_v36 = vld [vmem:[%s8098_s1 + $0x488] ss:$16 sps:$4 sm:$0xff]   ;;  %v5564_v37 = vld [vmem:[%s8098_s1 + $0x4a4] ss:$16 sps:$4 sm:$0xff]  }
  0x5f   : > { %3807 = vmatpush1.bf16.msra.mxu0 %v5472_v38  ;;  %4176 = vmatpush1.bf16.msra.mxu1 %v5475_v39  ;;  %v5567_v38 = vld [vmem:[%s8098_s1 + $0x4ac] ss:$16 sps:$4 sm:$0xff]   ;;  %v5562_v39 = vld [vmem:[%s8098_s1 + $0x4a0] ss:$16 sps:$4 sm:$0xff]  }
  0x60   : > { %3808 = vmatprep.subr.bf16.mxu0 %v5480_v40  ;;  %4177 = vmatprep.subr.bf16.mxu1 %v5483_v41  ;;  %v5565_v40 = vld [vmem:[%s8098_s1 + $0x4a8] ss:$16 sps:$4 sm:$0xff]   ;;  %v5570_v41 = vld [vmem:[%s8098_s1 + $0x4c4] ss:$16 sps:$4 sm:$0xff]  }
  0x63   : > { %3809 = vmatpush1.bf16.msra.mxu0 %v5478_v43  ;;  %4178 = vmatpush1.bf16.msra.mxu1 %v5481_v44  ;;  %v5573_v43 = vld [vmem:[%s8098_s1 + $0x4cc] ss:$16 sps:$4 sm:$0xff]   ;;  %v5568_v44 = vld [vmem:[%s8098_s1 + $0x4c0] ss:$16 sps:$4 sm:$0xff]  }
  0x64   : > { %3810 = vmatprep.subr.bf16.mxu0 %v5486_v45  ;;  %4179 = vmatprep.subr.bf16.mxu1 %v5489_v46  ;;  %v5571_v45 = vld [vmem:[%s8098_s1 + $0x4c8] ss:$16 sps:$4 sm:$0xff]   ;;  %v5576_v46 = vld [vmem:[%s8098_s1 + $0x4e4] ss:$16 sps:$4 sm:$0xff]  }
  0x67   : > { %3811 = vmatpush1.bf16.msra.mxu0 %v5484_v47  ;;  %4180 = vmatpush1.bf16.msra.mxu1 %v5487_v48  ;;  %v5579_v47 = vld [vmem:[%s8098_s1 + $0x4ec] ss:$16 sps:$4 sm:$0xff]   ;;  %v5574_v48 = vld [vmem:[%s8098_s1 + $0x4e0] ss:$16 sps:$4 sm:$0xff]  }
  0x68   : > { %3812 = vmatprep.subr.bf16.mxu0 %v5492_v50  ;;  %4181 = vmatprep.subr.bf16.mxu1 %v5495_v51  ;;  %v5577_v50 = vld [vmem:[%s8098_s1 + $0x4e8] ss:$16 sps:$4 sm:$0xff]   ;;  %v5582_v51 = vld [vmem:[%s8098_s1 + $0x504] ss:$16 sps:$4 sm:$0xff]  }
  0x6b   : > { %3813 = vmatpush1.bf16.msra.mxu0 %v5490_v52  ;;  %4182 = vmatpush1.bf16.msra.mxu1 %v5493_v53  ;;  %v5585_v52 = vld [vmem:[%s8098_s1 + $0x50c] ss:$16 sps:$4 sm:$0xff]   ;;  %v5580_v53 = vld [vmem:[%s8098_s1 + $0x500] ss:$16 sps:$4 sm:$0xff]  }
  0x6c   : > { %3814 = vmatprep.subr.bf16.mxu0 %v5498_v54  ;;  %4183 = vmatprep.subr.bf16.mxu1 %v5501_v55  ;;  %v5583_v54 = vld [vmem:[%s8098_s1 + $0x508] ss:$16 sps:$4 sm:$0xff]   ;;  %v5588_v55 = vld [vmem:[%s8098_s1 + $0x524] ss:$16 sps:$4 sm:$0xff]  }
  0x6f   : > { %3815 = vmatpush1.bf16.msra.mxu0 %v5496_v56  ;;  %4184 = vmatpush1.bf16.msra.mxu1 %v5499_v57  ;;  %v5591_v56 = vld [vmem:[%s8098_s1 + $0x52c] ss:$16 sps:$4 sm:$0xff]   ;;  %v5586_v57 = vld [vmem:[%s8098_s1 + $0x520] ss:$16 sps:$4 sm:$0xff]  }
  0x70   : > { %3816 = vmatprep.subr.bf16.mxu0 %v5504_v58  ;;  %4185 = vmatprep.subr.bf16.mxu1 %v5507_v59  ;;  %v5589_v58 = vld [vmem:[%s8098_s1 + $0x528] ss:$16 sps:$4 sm:$0xff]   ;;  %v5594_v59 = vld [vmem:[%s8098_s1 + $0x544] ss:$16 sps:$4 sm:$0xff]  }
  0x73   : > { %3817 = vmatpush1.bf16.msra.mxu0 %v5502_v60  ;;  %4186 = vmatpush1.bf16.msra.mxu1 %v5505_v61  ;;  %v5597_v60 = vld [vmem:[%s8098_s1 + $0x54c] ss:$16 sps:$4 sm:$0xff]   ;;  %v5592_v61 = vld [vmem:[%s8098_s1 + $0x540] ss:$16 sps:$4 sm:$0xff]  }
  0x74   : > { %3818 = vmatprep.subr.bf16.mxu0 %v5510_v62  ;;  %4187 = vmatprep.subr.bf16.mxu1 %v5513_v63  ;;  %v5595_v62 = vld [vmem:[%s8098_s1 + $0x548] ss:$16 sps:$4 sm:$0xff]   ;;  %v5600_v63 = vld [vmem:[%s8098_s1 + $0x564] ss:$16 sps:$4 sm:$0xff]  }
  0x77   : > { %3819 = vmatpush1.bf16.msra.mxu0 %v5508_v0  ;;  %4188 = vmatpush1.bf16.msra.mxu1 %v5511_v1  ;;  %v5603_v0 = vld [vmem:[%s8098_s1 + $0x56c] ss:$16 sps:$4 sm:$0xff]   ;;  %v5598_v1 = vld [vmem:[%s8098_s1 + $0x560] ss:$16 sps:$4 sm:$0xff]  }
  0x78   : > { %3820 = vmatprep.subr.bf16.mxu0 %v5516_v2  ;;  %4189 = vmatprep.subr.bf16.mxu1 %v5519_v3  ;;  %v5601_v2 = vld [vmem:[%s8098_s1 + $0x568] ss:$16 sps:$4 sm:$0xff]   ;;  %v5606_v3 = vld [vmem:[%s8098_s1 + $0x584] ss:$16 sps:$4 sm:$0xff]  }
  0x7b   : > { %3821 = vmatpush1.bf16.msra.mxu0 %v5514_v4  ;;  %4190 = vmatpush1.bf16.msra.mxu1 %v5517_v5  ;;  %v5609_v4 = vld [vmem:[%s8098_s1 + $0x58c] ss:$16 sps:$4 sm:$0xff]   ;;  %v5604_v5 = vld [vmem:[%s8098_s1 + $0x580] ss:$16 sps:$4 sm:$0xff]  }
  0x7c   : > { %3822 = vmatprep.subr.bf16.mxu0 %v5522_v6  ;;  %4191 = vmatprep.subr.bf16.mxu1 %v5525_v7  ;;  %v5607_v6 = vld [vmem:[%s8098_s1 + $0x588] ss:$16 sps:$4 sm:$0xff]   ;;  %v5612_v7 = vld [vmem:[%s8098_s1 + $0x5a4] ss:$16 sps:$4 sm:$0xff]  }
  0x7f   : > { %3823 = vmatpush1.bf16.msra.mxu0 %v5520_v8  ;;  %4192 = vmatpush1.bf16.msra.mxu1 %v5523_v9  ;;  %v5615_v8 = vld [vmem:[%s8098_s1 + $0x5ac] ss:$16 sps:$4 sm:$0xff]   ;;  %v5610_v9 = vld [vmem:[%s8098_s1 + $0x5a0] ss:$16 sps:$4 sm:$0xff]  }
  0x80   : > { %3824 = vmatprep.subr.bf16.mxu0 %v5528_v10  ;;  %4193 = vmatprep.subr.bf16.mxu1 %v5531_v11  ;;  %v5613_v10 = vld [vmem:[%s8098_s1 + $0x5a8] ss:$16 sps:$4 sm:$0xff]   ;;  %v5618_v11 = vld [vmem:[%s8098_s1 + $0x5c4] ss:$16 sps:$4 sm:$0xff]  }
  0x83   : > { %3825 = vmatpush1.bf16.msra.mxu0 %v5526_v13  ;;  %4194 = vmatpush1.bf16.msra.mxu1 %v5529_v14  ;;  %v5621_v13 = vld [vmem:[%s8098_s1 + $0x5cc] ss:$16 sps:$4 sm:$0xff]   ;;  %v5616_v14 = vld [vmem:[%s8098_s1 + $0x5c0] ss:$16 sps:$4 sm:$0xff]  }
  0x84   : > { %3835 = vmatprep.subr.bf16.mxu0 %v5534_v15  ;;  %4204 = vmatprep.subr.bf16.mxu1 %v5537_v16  ;;  %v5619_v15 = vld [vmem:[%s8098_s1 + $0x5c8] ss:$16 sps:$4 sm:$0xff]   ;;  %v5624_v16 = vld [vmem:[%s8098_s1 + $0x5e4] ss:$16 sps:$4 sm:$0xff]  }
  0x86   : > { %3827 = vmatmul.mubr.bf16.vlgmr.msra.gmra.mrb[0].mxu0 %v6470_v12  ;;  %4196 = vmatmul.mubr.bf16.vlgmr.msra.gmra.mrb[0].mxu1 %v6470_v12  ;;  %v5549_v12 = vld [vmem:[%s8098_s1 + $0x44c] ss:$16 sps:$4 sm:$0xff]  }
  0x87   : > { %3836 = vmatpush1.bf16.msra.mxu0 %v5532_v17  ;;  %4205 = vmatpush1.bf16.msra.mxu1 %v5535_v18  ;;  %v5627_v17 = vld [vmem:[%s8098_s1 + $0x5ec] ss:$16 sps:$4 sm:$0xff]   ;;  %v796_v18 = vcombine.high %v6673_v19, %v6673_v19 }
  0x88   : > { %3837 = vmatprep.subr.bf16.mxu0 %v5540_v20  ;;  %4206 = vmatprep.subr.bf16.mxu1 %v5543_v21  ;;  %v5622_v20 = vld [vmem:[%s8098_s1 + $0x5e0] ss:$16 sps:$4 sm:$0xff]   ;;  %v5625_v21 = vld [vmem:[%s8098_s1 + $0x5e8] ss:$16 sps:$4 sm:$0xff]   ;;  %v5633_v19 = vld [vmem:[%s8098_s1 + $0x60c] ss:$16 sps:$4 sm:$0xff]  }
  0x89   : > { %3867 = vmatprep.mubr.bf16.mxu0 %v811_v23  ;;  %4236 = vmatprep.mubr.bf16.mxu1 %v811_v23  ;;  %v5630_v23 = vld [vmem:[%s8098_s1 + $0x604] ss:$16 sps:$4 sm:$0xff]  }
  0x8b   : > { %3838 = vmatpush1.bf16.msra.mxu0 %v5538_v24  ;;  %4207 = vmatpush1.bf16.msra.mxu1 %v5541_v25  ;;  %v6872_v24 = vrot.slane %v796_v18, %v6399_v49  ;;  %v5628_v25 = vld [vmem:[%s8098_s1 + $0x600] ss:$16 sps:$4 sm:$0xff]   ;;  %v5717_v18 = vld [vmem:[%s8098_s1 + $0x7cc] ss:$16 sps:$4 sm:$0xff]  }
  0x8c   : > { %3839 = vmatprep.subr.bf16.mxu0 %v5546_v26  ;;  %4208 = vmatprep.subr.bf16.mxu1 %v5549_v12  ;;  %v5631_v26 = vld [vmem:[%s8098_s1 + $0x608] ss:$16 sps:$4 sm:$0xff]   ;;  %v5636_v12 = vld [vmem:[%s8098_s1 + $0x624] ss:$16 sps:$4 sm:$0xff]  }
  0x8f   : > { %3840 = vmatpush1.bf16.msra.mxu0 %v5544_v27  ;;  %4209 = vmatpush1.bf16.msra.mxu1 %v5547_v28  ;;  %v5639_v27 = vld [vmem:[%s8098_s1 + $0x62c] ss:$16 sps:$4 sm:$0xff]   ;;  %v812_v28 = vcombine.high %v6872_v24, %v6872_v24 }
  0x90   : > { %3841 = vmatprep.subr.bf16.mxu0 %v5552_v29  ;;  %4210 = vmatprep.subr.bf16.mxu1 %v5555_v30  ;;  %v5634_v29 = vld [vmem:[%s8098_s1 + $0x620] ss:$16 sps:$4 sm:$0xff]   ;;  %v5637_v30 = vld [vmem:[%s8098_s1 + $0x628] ss:$16 sps:$4 sm:$0xff]  }
  0x93   : > { %3842 = vmatpush1.bf16.msra.mxu0 %v5550_v31  ;;  %4211 = vmatpush1.bf16.msra.mxu1 %v5553_v32  ;;  %v5642_v31 = vld [vmem:[%s8098_s1 + $0x644] ss:$16 sps:$4 sm:$0xff]   ;;  %v5640_v32 = vld [vmem:[%s8098_s1 + $0x640] ss:$16 sps:$4 sm:$0xff]  }
  0x94   : > { %3843 = vmatprep.subr.bf16.mxu0 %v5558_v33  ;;  %4212 = vmatprep.subr.bf16.mxu1 %v5561_v34  ;;  %v5643_v33 = vld [vmem:[%s8098_s1 + $0x648] ss:$16 sps:$4 sm:$0xff]   ;;  %v5648_v34 = vld [vmem:[%s8098_s1 + $0x664] ss:$16 sps:$4 sm:$0xff]  }
  0x97   : > { %3844 = vmatpush1.bf16.msra.mxu0 %v5556_v35  ;;  %4213 = vmatpush1.bf16.msra.mxu1 %v5559_v36  ;;  %v5651_v35 = vld [vmem:[%s8098_s1 + $0x66c] ss:$16 sps:$4 sm:$0xff]   ;;  %v5646_v36 = vld [vmem:[%s8098_s1 + $0x660] ss:$16 sps:$4 sm:$0xff]  }
  0x98   : > { %3845 = vmatprep.subr.bf16.mxu0 %v5564_v37  ;;  %4214 = vmatprep.subr.bf16.mxu1 %v5567_v38  ;;  %v5649_v37 = vld [vmem:[%s8098_s1 + $0x668] ss:$16 sps:$4 sm:$0xff]   ;;  %v5654_v38 = vld [vmem:[%s8098_s1 + $0x684] ss:$16 sps:$4 sm:$0xff]  }
  0x9b   : > { %3846 = vmatpush1.bf16.msra.mxu0 %v5562_v39  ;;  %4215 = vmatpush1.bf16.msra.mxu1 %v5565_v40  ;;  %v5657_v39 = vld [vmem:[%s8098_s1 + $0x68c] ss:$16 sps:$4 sm:$0xff]   ;;  %v5652_v40 = vld [vmem:[%s8098_s1 + $0x680] ss:$16 sps:$4 sm:$0xff]  }
  0x9c   : > { %3847 = vmatprep.subr.bf16.mxu0 %v5570_v41  ;;  %4216 = vmatprep.subr.bf16.mxu1 %v5573_v43  ;;  %v5655_v41 = vld [vmem:[%s8098_s1 + $0x688] ss:$16 sps:$4 sm:$0xff]   ;;  %v5660_v43 = vld [vmem:[%s8098_s1 + $0x6a4] ss:$16 sps:$4 sm:$0xff]  }
  0x9f   : > { %3848 = vmatpush1.bf16.msra.mxu0 %v5568_v44  ;;  %4217 = vmatpush1.bf16.msra.mxu1 %v5571_v45  ;;  %v5663_v44 = vld [vmem:[%s8098_s1 + $0x6ac] ss:$16 sps:$4 sm:$0xff]   ;;  %v5658_v45 = vld [vmem:[%s8098_s1 + $0x6a0] ss:$16 sps:$4 sm:$0xff]  }
  0xa0   : > { %3849 = vmatprep.subr.bf16.mxu0 %v5576_v46  ;;  %4218 = vmatprep.subr.bf16.mxu1 %v5579_v47  ;;  %v5661_v46 = vld [vmem:[%s8098_s1 + $0x6a8] ss:$16 sps:$4 sm:$0xff]   ;;  %v5666_v47 = vld [vmem:[%s8098_s1 + $0x6c4] ss:$16 sps:$4 sm:$0xff]  }
  0xa3   : > { %3850 = vmatpush1.bf16.msra.mxu0 %v5574_v48  ;;  %4219 = vmatpush1.bf16.msra.mxu1 %v5577_v50  ;;  %v5669_v48 = vld [vmem:[%s8098_s1 + $0x6cc] ss:$16 sps:$4 sm:$0xff]   ;;  %v5664_v50 = vld [vmem:[%s8098_s1 + $0x6c0] ss:$16 sps:$4 sm:$0xff]  }
  0xa4   : > { %3851 = vmatprep.subr.bf16.mxu0 %v5582_v51  ;;  %4220 = vmatprep.subr.bf16.mxu1 %v5585_v52  ;;  %v5667_v51 = vld [vmem:[%s8098_s1 + $0x6c8] ss:$16 sps:$4 sm:$0xff]   ;;  %v5672_v52 = vld [vmem:[%s8098_s1 + $0x6e4] ss:$16 sps:$4 sm:$0xff]  }
  0xa7   : > { %3852 = vmatpush1.bf16.msra.mxu0 %v5580_v53  ;;  %4221 = vmatpush1.bf16.msra.mxu1 %v5583_v54  ;;  %v5675_v53 = vld [vmem:[%s8098_s1 + $0x6ec] ss:$16 sps:$4 sm:$0xff]   ;;  %v5670_v54 = vld [vmem:[%s8098_s1 + $0x6e0] ss:$16 sps:$4 sm:$0xff]  }
  0xa8   : > { %3853 = vmatprep.subr.bf16.mxu0 %v5588_v55  ;;  %4222 = vmatprep.subr.bf16.mxu1 %v5591_v56  ;;  %v5673_v55 = vld [vmem:[%s8098_s1 + $0x6e8] ss:$16 sps:$4 sm:$0xff]   ;;  %v5678_v56 = vld [vmem:[%s8098_s1 + $0x704] ss:$16 sps:$4 sm:$0xff]  }
  0xab   : > { %3854 = vmatpush1.bf16.msra.mxu0 %v5586_v57  ;;  %4223 = vmatpush1.bf16.msra.mxu1 %v5589_v58  ;;  %v5681_v57 = vld [vmem:[%s8098_s1 + $0x70c] ss:$16 sps:$4 sm:$0xff]   ;;  %v5676_v58 = vld [vmem:[%s8098_s1 + $0x700] ss:$16 sps:$4 sm:$0xff]  }
  0xac   : > { %3855 = vmatprep.subr.bf16.mxu0 %v5594_v59  ;;  %4224 = vmatprep.subr.bf16.mxu1 %v5597_v60  ;;  %v5679_v59 = vld [vmem:[%s8098_s1 + $0x708] ss:$16 sps:$4 sm:$0xff]   ;;  %v5684_v60 = vld [vmem:[%s8098_s1 + $0x724] ss:$16 sps:$4 sm:$0xff]  }
  0xaf   : > { %3856 = vmatpush1.bf16.msra.mxu0 %v5592_v61  ;;  %4225 = vmatpush1.bf16.msra.mxu1 %v5595_v62  ;;  %v5687_v61 = vld [vmem:[%s8098_s1 + $0x72c] ss:$16 sps:$4 sm:$0xff]   ;;  %v5682_v62 = vld [vmem:[%s8098_s1 + $0x720] ss:$16 sps:$4 sm:$0xff]  }
  0xb0   : > { %3857 = vmatprep.subr.bf16.mxu0 %v5600_v63  ;;  %4226 = vmatprep.subr.bf16.mxu1 %v5603_v0  ;;  %v5685_v63 = vld [vmem:[%s8098_s1 + $0x728] ss:$16 sps:$4 sm:$0xff]   ;;  %v5690_v0 = vld [vmem:[%s8098_s1 + $0x744] ss:$16 sps:$4 sm:$0xff]  }
  0xb3   : > { %3858 = vmatpush1.bf16.msra.mxu0 %v5598_v1  ;;  %4227 = vmatpush1.bf16.msra.mxu1 %v5601_v2  ;;  %v5693_v1 = vld [vmem:[%s8098_s1 + $0x74c] ss:$16 sps:$4 sm:$0xff]   ;;  %v5688_v2 = vld [vmem:[%s8098_s1 + $0x740] ss:$16 sps:$4 sm:$0xff]  }
  0xb4   : > { %3859 = vmatprep.subr.bf16.mxu0 %v5606_v3  ;;  %4228 = vmatprep.subr.bf16.mxu1 %v5609_v4  ;;  %v5691_v3 = vld [vmem:[%s8098_s1 + $0x748] ss:$16 sps:$4 sm:$0xff]   ;;  %v5696_v4 = vld [vmem:[%s8098_s1 + $0x764] ss:$16 sps:$4 sm:$0xff]  }
  0xb7   : > { %3860 = vmatpush1.bf16.msra.mxu0 %v5604_v5  ;;  %4229 = vmatpush1.bf16.msra.mxu1 %v5607_v6  ;;  %v5699_v5 = vld [vmem:[%s8098_s1 + $0x76c] ss:$16 sps:$4 sm:$0xff]   ;;  %v5694_v6 = vld [vmem:[%s8098_s1 + $0x760] ss:$16 sps:$4 sm:$0xff]  }
  0xb8   : > { %3861 = vmatprep.subr.bf16.mxu0 %v5612_v7  ;;  %4230 = vmatprep.subr.bf16.mxu1 %v5615_v8  ;;  %v5697_v7 = vld [vmem:[%s8098_s1 + $0x768] ss:$16 sps:$4 sm:$0xff]   ;;  %v5702_v8 = vld [vmem:[%s8098_s1 + $0x784] ss:$16 sps:$4 sm:$0xff]  }
  0xbb   : > { %3862 = vmatpush1.bf16.msra.mxu0 %v5610_v9  ;;  %4231 = vmatpush1.bf16.msra.mxu1 %v5613_v10  ;;  %v5705_v9 = vld [vmem:[%s8098_s1 + $0x78c] ss:$16 sps:$4 sm:$0xff]   ;;  %v5700_v10 = vld [vmem:[%s8098_s1 + $0x780] ss:$16 sps:$4 sm:$0xff]  }
  0xbc   : > { %3863 = vmatprep.subr.bf16.mxu0 %v5618_v11  ;;  %4232 = vmatprep.subr.bf16.mxu1 %v5621_v13  ;;  %v5703_v11 = vld [vmem:[%s8098_s1 + $0x788] ss:$16 sps:$4 sm:$0xff]   ;;  %v5708_v13 = vld [vmem:[%s8098_s1 + $0x7a4] ss:$16 sps:$4 sm:$0xff]  }
  0xbf   : > { %3864 = vmatpush1.bf16.msra.mxu0 %v5616_v14  ;;  %4233 = vmatpush1.bf16.msra.mxu1 %v5619_v15  ;;  %v5711_v14 = vld [vmem:[%s8098_s1 + $0x7ac] ss:$16 sps:$4 sm:$0xff]   ;;  %v5706_v15 = vld [vmem:[%s8098_s1 + $0x7a0] ss:$16 sps:$4 sm:$0xff]  }
  0xc0   : > { %3865 = vmatprep.subr.bf16.mxu0 %v5624_v16  ;;  %4234 = vmatprep.subr.bf16.mxu1 %v5627_v17  ;;  %v5709_v16 = vld [vmem:[%s8098_s1 + $0x7a8] ss:$16 sps:$4 sm:$0xff]   ;;  %v5714_v17 = vld [vmem:[%s8098_s1 + $0x7c4] ss:$16 sps:$4 sm:$0xff]  }
  0xc3   : > { %3866 = vmatpush1.bf16.msra.mxu0 %v5622_v20  ;;  %4235 = vmatpush1.bf16.msra.mxu1 %v5625_v21  ;;  %v5712_v20 = vld [vmem:[%s8098_s1 + $0x7c0] ss:$16 sps:$4 sm:$0xff]   ;;  %v5715_v21 = vld [vmem:[%s8098_s1 + $0x7c8] ss:$16 sps:$4 sm:$0xff]  }
  0xc4   : > { %3876 = vmatprep.subr.bf16.mxu0 %v5630_v23  ;;  %4245 = vmatprep.subr.bf16.mxu1 %v5633_v19  ;;  %v5720_v23 = vld [vmem:[%s8098_s1 + $0x7e4] ss:$16 sps:$4 sm:$0xff]   ;;  %v5723_v19 = vld [vmem:[%s8098_s1 + $0x7ec] ss:$16 sps:$4 sm:$0xff]  }
  0xc6   : > { %3868 = vmatmul.mubr.bf16.vlgmr.msra.gmra.mrb[0].mxu0 %v6683_v22  ;;  %4237 = vmatmul.mubr.bf16.vlgmr.msra.gmra.mrb[0].mxu1 %v6683_v22  ;;  %v5645_v22 = vld [vmem:[%s8098_s1 + $0x64c] ss:$16 sps:$4 sm:$0xff]  }
  0xc7   : > { %3877 = vmatpush1.bf16.msra.mxu0 %v5628_v25  ;;  %4246 = vmatpush1.bf16.msra.mxu1 %v5631_v26  ;;  %v5718_v25 = vld [vmem:[%s8098_s1 + $0x7e0] ss:$16 sps:$4 sm:$0xff]  }
  0xc8   : > { %3878 = vmatprep.subr.bf16.mxu0 %v5636_v12  ;;  %4247 = vmatprep.subr.bf16.mxu1 %v5639_v27  ;;  %v7062_v26 = vld [vmem:[%s6396_s30 + $0x10] sm:$0xff]  ;;  %v5721_v12 = vld [vmem:[%s8098_s1 + $0x7e8] ss:$16 sps:$4 sm:$0xff]  }
  0xc9   : > { %3908 = vmatprep.mubr.bf16.mxu0 %v812_v28  ;;  %4277 = vmatprep.mubr.bf16.mxu1 %v812_v28  ;;  %v5727_v27 = vld [vmem:[%s8098_s1 + $0x804] ss:$16 sps:$4 sm:$0xff]   ;;  %v5730_v28 = vld [vmem:[%s8098_s1 + $0x80c] ss:$16 sps:$4 sm:$0xff]  }
  0xcb   : > { %3879 = vmatpush1.bf16.msra.mxu0 %v5634_v29  ;;  %4248 = vmatpush1.bf16.msra.mxu1 %v5637_v30  ;;  %v7075_v29 = vrot.slane %v7062_v26, %v6399_v49  ;;  %v5725_v30 = vld [vmem:[%s8098_s1 + $0x800] ss:$16 sps:$4 sm:$0xff]  }
  0xcc   : > { %3880 = vmatprep.subr.bf16.mxu0 %v5642_v31  ;;  %4249 = vmatprep.subr.bf16.mxu1 %v5645_v22  ;;  %v5728_v31 = vld [vmem:[%s8098_s1 + $0x808] ss:$16 sps:$4 sm:$0xff]   ;;  %v5733_v22 = vld [vmem:[%s8098_s1 + $0x824] ss:$16 sps:$4 sm:$0xff]  }
  0xcf   : > { %3881 = vmatpush1.bf16.msra.mxu0 %v5640_v32  ;;  %4250 = vmatpush1.bf16.msra.mxu1 %v5643_v33  ;;  %v5736_v32 = vld [vmem:[%s8098_s1 + $0x82c] ss:$16 sps:$4 sm:$0xff]   ;;  %v828_v33 = vcombine.high %v7075_v29, %v7075_v29 }
  0xd0   : > { %3882 = vmatprep.subr.bf16.mxu0 %v5648_v34  ;;  %4251 = vmatprep.subr.bf16.mxu1 %v5651_v35  ;;  %v5731_v34 = vld [vmem:[%s8098_s1 + $0x820] ss:$16 sps:$4 sm:$0xff]   ;;  %v5734_v35 = vld [vmem:[%s8098_s1 + $0x828] ss:$16 sps:$4 sm:$0xff]  }
  0xd3   : > { %3883 = vmatpush1.bf16.msra.mxu0 %v5646_v36  ;;  %4252 = vmatpush1.bf16.msra.mxu1 %v5649_v37  ;;  %v5739_v36 = vld [vmem:[%s8098_s1 + $0x844] ss:$16 sps:$4 sm:$0xff]   ;;  %v5737_v37 = vld [vmem:[%s8098_s1 + $0x840] ss:$16 sps:$4 sm:$0xff]  }
  0xd4   : > { %3884 = vmatprep.subr.bf16.mxu0 %v5654_v38  ;;  %4253 = vmatprep.subr.bf16.mxu1 %v5657_v39  ;;  %v5740_v38 = vld [vmem:[%s8098_s1 + $0x848] ss:$16 sps:$4 sm:$0xff]   ;;  %v5745_v39 = vld [vmem:[%s8098_s1 + $0x864] ss:$16 sps:$4 sm:$0xff]  }
  0xd7   : > { %3885 = vmatpush1.bf16.msra.mxu0 %v5652_v40  ;;  %4254 = vmatpush1.bf16.msra.mxu1 %v5655_v41  ;;  %v5748_v40 = vld [vmem:[%s8098_s1 + $0x86c] ss:$16 sps:$4 sm:$0xff]   ;;  %v5743_v41 = vld [vmem:[%s8098_s1 + $0x860] ss:$16 sps:$4 sm:$0xff]  }
  0xd8   : > { %3886 = vmatprep.subr.bf16.mxu0 %v5660_v43  ;;  %4255 = vmatprep.subr.bf16.mxu1 %v5663_v44  ;;  %v5746_v43 = vld [vmem:[%s8098_s1 + $0x868] ss:$16 sps:$4 sm:$0xff]   ;;  %v5751_v44 = vld [vmem:[%s8098_s1 + $0x884] ss:$16 sps:$4 sm:$0xff]  }
  0xdb   : > { %3887 = vmatpush1.bf16.msra.mxu0 %v5658_v45  ;;  %4256 = vmatpush1.bf16.msra.mxu1 %v5661_v46  ;;  %v5754_v45 = vld [vmem:[%s8098_s1 + $0x88c] ss:$16 sps:$4 sm:$0xff]   ;;  %v5749_v46 = vld [vmem:[%s8098_s1 + $0x880] ss:$16 sps:$4 sm:$0xff]  }
  0xdc   : > { %3888 = vmatprep.subr.bf16.mxu0 %v5666_v47  ;;  %4257 = vmatprep.subr.bf16.mxu1 %v5669_v48  ;;  %v5752_v47 = vld [vmem:[%s8098_s1 + $0x888] ss:$16 sps:$4 sm:$0xff]   ;;  %v5757_v48 = vld [vmem:[%s8098_s1 + $0x8a4] ss:$16 sps:$4 sm:$0xff]  }
  0xdf   : > { %3889 = vmatpush1.bf16.msra.mxu0 %v5664_v50  ;;  %4258 = vmatpush1.bf16.msra.mxu1 %v5667_v51  ;;  %v5760_v50 = vld [vmem:[%s8098_s1 + $0x8ac] ss:$16 sps:$4 sm:$0xff]   ;;  %v5755_v51 = vld [vmem:[%s8098_s1 + $0x8a0] ss:$16 sps:$4 sm:$0xff]  }
  0xe0   : > { %3890 = vmatprep.subr.bf16.mxu0 %v5672_v52  ;;  %4259 = vmatprep.subr.bf16.mxu1 %v5675_v53  ;;  %v5758_v52 = vld [vmem:[%s8098_s1 + $0x8a8] ss:$16 sps:$4 sm:$0xff]   ;;  %v5763_v53 = vld [vmem:[%s8098_s1 + $0x8c4] ss:$16 sps:$4 sm:$0xff]  }
  0xe3   : > { %3891 = vmatpush1.bf16.msra.mxu0 %v5670_v54  ;;  %4260 = vmatpush1.bf16.msra.mxu1 %v5673_v55  ;;  %v5766_v54 = vld [vmem:[%s8098_s1 + $0x8cc] ss:$16 sps:$4 sm:$0xff]   ;;  %v5761_v55 = vld [vmem:[%s8098_s1 + $0x8c0] ss:$16 sps:$4 sm:$0xff]  }
  0xe4   : > { %3892 = vmatprep.subr.bf16.mxu0 %v5678_v56  ;;  %4261 = vmatprep.subr.bf16.mxu1 %v5681_v57  ;;  %v5764_v56 = vld [vmem:[%s8098_s1 + $0x8c8] ss:$16 sps:$4 sm:$0xff]   ;;  %v5769_v57 = vld [vmem:[%s8098_s1 + $0x8e4] ss:$16 sps:$4 sm:$0xff]  }
  0xe7   : > { %3893 = vmatpush1.bf16.msra.mxu0 %v5676_v58  ;;  %4262 = vmatpush1.bf16.msra.mxu1 %v5679_v59  ;;  %v5772_v58 = vld [vmem:[%s8098_s1 + $0x8ec] ss:$16 sps:$4 sm:$0xff]   ;;  %v5767_v59 = vld [vmem:[%s8098_s1 + $0x8e0] ss:$16 sps:$4 sm:$0xff]  }
  0xe8   : > { %3894 = vmatprep.subr.bf16.mxu0 %v5684_v60  ;;  %4263 = vmatprep.subr.bf16.mxu1 %v5687_v61  ;;  %v5770_v60 = vld [vmem:[%s8098_s1 + $0x8e8] ss:$16 sps:$4 sm:$0xff]   ;;  %v5775_v61 = vld [vmem:[%s8098_s1 + $0x904] ss:$16 sps:$4 sm:$0xff]  }
  0xeb   : > { %3895 = vmatpush1.bf16.msra.mxu0 %v5682_v62  ;;  %4264 = vmatpush1.bf16.msra.mxu1 %v5685_v63  ;;  %v5778_v62 = vld [vmem:[%s8098_s1 + $0x90c] ss:$16 sps:$4 sm:$0xff]   ;;  %v5773_v63 = vld [vmem:[%s8098_s1 + $0x900] ss:$16 sps:$4 sm:$0xff]  }
  0xec   : > { %3896 = vmatprep.subr.bf16.mxu0 %v5690_v0  ;;  %4265 = vmatprep.subr.bf16.mxu1 %v5693_v1  ;;  %v5776_v0 = vld [vmem:[%s8098_s1 + $0x908] ss:$16 sps:$4 sm:$0xff]   ;;  %v5781_v1 = vld [vmem:[%s8098_s1 + $0x924] ss:$16 sps:$4 sm:$0xff]  }
  0xef   : > { %3897 = vmatpush1.bf16.msra.mxu0 %v5688_v2  ;;  %4266 = vmatpush1.bf16.msra.mxu1 %v5691_v3  ;;  %v5784_v2 = vld [vmem:[%s8098_s1 + $0x92c] ss:$16 sps:$4 sm:$0xff]   ;;  %v5779_v3 = vld [vmem:[%s8098_s1 + $0x920] ss:$16 sps:$4 sm:$0xff]  }
  0xf0   : > { %3898 = vmatprep.subr.bf16.mxu0 %v5696_v4  ;;  %4267 = vmatprep.subr.bf16.mxu1 %v5699_v5  ;;  %v5782_v4 = vld [vmem:[%s8098_s1 + $0x928] ss:$16 sps:$4 sm:$0xff]   ;;  %v5787_v5 = vld [vmem:[%s8098_s1 + $0x944] ss:$16 sps:$4 sm:$0xff]  }
  0xf3   : > { %3899 = vmatpush1.bf16.msra.mxu0 %v5694_v6  ;;  %4268 = vmatpush1.bf16.msra.mxu1 %v5697_v7  ;;  %v5790_v6 = vld [vmem:[%s8098_s1 + $0x94c] ss:$16 sps:$4 sm:$0xff]   ;;  %v5785_v7 = vld [vmem:[%s8098_s1 + $0x940] ss:$16 sps:$4 sm:$0xff]  }
  0xf4   : > { %3900 = vmatprep.subr.bf16.mxu0 %v5702_v8  ;;  %4269 = vmatprep.subr.bf16.mxu1 %v5705_v9  ;;  %v5788_v8 = vld [vmem:[%s8098_s1 + $0x948] ss:$16 sps:$4 sm:$0xff]   ;;  %v5793_v9 = vld [vmem:[%s8098_s1 + $0x964] ss:$16 sps:$4 sm:$0xff]  }
  0xf7   : > { %3901 = vmatpush1.bf16.msra.mxu0 %v5700_v10  ;;  %4270 = vmatpush1.bf16.msra.mxu1 %v5703_v11  ;;  %v5796_v10 = vld [vmem:[%s8098_s1 + $0x96c] ss:$16 sps:$4 sm:$0xff]   ;;  %v5791_v11 = vld [vmem:[%s8098_s1 + $0x960] ss:$16 sps:$4 sm:$0xff]  }
  0xf8   : > { %3902 = vmatprep.subr.bf16.mxu0 %v5708_v13  ;;  %4271 = vmatprep.subr.bf16.mxu1 %v5711_v14  ;;  %v5794_v13 = vld [vmem:[%s8098_s1 + $0x968] ss:$16 sps:$4 sm:$0xff]   ;;  %v5799_v14 = vld [vmem:[%s8098_s1 + $0x984] ss:$16 sps:$4 sm:$0xff]  }
  0xfb   : > { %3903 = vmatpush1.bf16.msra.mxu0 %v5706_v15  ;;  %4272 = vmatpush1.bf16.msra.mxu1 %v5709_v16  ;;  %v5802_v15 = vld [vmem:[%s8098_s1 + $0x98c] ss:$16 sps:$4 sm:$0xff]   ;;  %v5797_v16 = vld [vmem:[%s8098_s1 + $0x980] ss:$16 sps:$4 sm:$0xff]  }
  0xfc   : > { %3904 = vmatprep.subr.bf16.mxu0 %v5714_v17  ;;  %4273 = vmatprep.subr.bf16.mxu1 %v5717_v18  ;;  %v5800_v17 = vld [vmem:[%s8098_s1 + $0x988] ss:$16 sps:$4 sm:$0xff]   ;;  %v5805_v18 = vld [vmem:[%s8098_s1 + $0x9a4] ss:$16 sps:$4 sm:$0xff]  }
  0xff   : > { %3905 = vmatpush1.bf16.msra.mxu0 %v5712_v20  ;;  %4274 = vmatpush1.bf16.msra.mxu1 %v5715_v21  ;;  %v5808_v20 = vld [vmem:[%s8098_s1 + $0x9ac] ss:$16 sps:$4 sm:$0xff]   ;;  %v5803_v21 = vld [vmem:[%s8098_s1 + $0x9a0] ss:$16 sps:$4 sm:$0xff]  }
 0x100   : > { %3906 = vmatprep.subr.bf16.mxu0 %v5720_v23  ;;  %4275 = vmatprep.subr.bf16.mxu1 %v5723_v19  ;;  %v5806_v23 = vld [vmem:[%s8098_s1 + $0x9a8] ss:$16 sps:$4 sm:$0xff]   ;;  %v5811_v19 = vld [vmem:[%s8098_s1 + $0x9c4] ss:$16 sps:$4 sm:$0xff]  }
 0x103   : > { %3907 = vmatpush1.bf16.msra.mxu0 %v5718_v25  ;;  %4276 = vmatpush1.bf16.msra.mxu1 %v5721_v12  ;;  %v5814_v25 = vld [vmem:[%s8098_s1 + $0x9cc] ss:$16 sps:$4 sm:$0xff]   ;;  %v5809_v12 = vld [vmem:[%s8098_s1 + $0x9c0] ss:$16 sps:$4 sm:$0xff]  }
 0x104   : > { %3917 = vmatprep.subr.bf16.mxu0 %v5727_v27  ;;  %4286 = vmatprep.subr.bf16.mxu1 %v5730_v28  ;;  %v5812_v27 = vld [vmem:[%s8098_s1 + $0x9c8] ss:$16 sps:$4 sm:$0xff]   ;;  %v5817_v28 = vld [vmem:[%s8098_s1 + $0x9e4] ss:$16 sps:$4 sm:$0xff]  }
 0x106   : > { %3909 = vmatmul.mubr.bf16.vlgmr.msra.gmra.mrb[0].mxu0 %v6872_v24  ;;  %4278 = vmatmul.mubr.bf16.vlgmr.msra.gmra.mrb[0].mxu1 %v6872_v24  ;;  %v5742_v24 = vld [vmem:[%s8098_s1 + $0x84c] ss:$16 sps:$4 sm:$0xff]  }
 0x107   : > { %3918 = vmatpush1.bf16.msra.mxu0 %v5725_v30  ;;  %4287 = vmatpush1.bf16.msra.mxu1 %v5728_v31  ;;  %v5820_v30 = vld [vmem:[%s8098_s1 + $0x9ec] ss:$16 sps:$4 sm:$0xff]   ;;  %v813_v31 = vcombine.high %v7062_v26, %v7062_v26 }
 0x108   : > { %3919 = vmatprep.subr.bf16.mxu0 %v5733_v22  ;;  %4288 = vmatprep.subr.bf16.mxu1 %v5736_v32  ;;  %v5815_v22 = vld [vmem:[%s8098_s1 + $0x9e0] ss:$16 sps:$4 sm:$0xff]   ;;  %v5818_v32 = vld [vmem:[%s8098_s1 + $0x9e8] ss:$16 sps:$4 sm:$0xff]   ;;  %v5826_v26 = vld [vmem:[%s8098_s1 + $0xa0c] ss:$16 sps:$4 sm:$0xff]  }
 0x109   : > { %3949 = vmatprep.mubr.bf16.mxu0 %v828_v33  ;;  %4318 = vmatprep.mubr.bf16.mxu1 %v828_v33  ;;  %v5823_v33 = vld [vmem:[%s8098_s1 + $0xa04] ss:$16 sps:$4 sm:$0xff]  }
 0x10b   : > { %3920 = vmatpush1.bf16.msra.mxu0 %v5731_v34  ;;  %4289 = vmatpush1.bf16.msra.mxu1 %v5734_v35  ;;  %v7276_v34 = vrot.slane %v813_v31, %v6399_v49  ;;  %v5821_v35 = vld [vmem:[%s8098_s1 + $0xa00] ss:$16 sps:$4 sm:$0xff]   ;;  %v5910_v31 = vld [vmem:[%s8098_s1 + $0xbcc] ss:$16 sps:$4 sm:$0xff]  }
 0x10c   : > { %3921 = vmatprep.subr.bf16.mxu0 %v5739_v36  ;;  %4290 = vmatprep.subr.bf16.mxu1 %v5742_v24  ;;  %v5824_v36 = vld [vmem:[%s8098_s1 + $0xa08] ss:$16 sps:$4 sm:$0xff]   ;;  %v5829_v24 = vld [vmem:[%s8098_s1 + $0xa24] ss:$16 sps:$4 sm:$0xff]  }
 0x10f   : > { %3922 = vmatpush1.bf16.msra.mxu0 %v5737_v37  ;;  %4291 = vmatpush1.bf16.msra.mxu1 %v5740_v38  ;;  %v5832_v37 = vld [vmem:[%s8098_s1 + $0xa2c] ss:$16 sps:$4 sm:$0xff]   ;;  %v829_v38 = vcombine.high %v7276_v34, %v7276_v34 }
 0x110   : > { %3923 = vmatprep.subr.bf16.mxu0 %v5745_v39  ;;  %4292 = vmatprep.subr.bf16.mxu1 %v5748_v40  ;;  %v5827_v39 = vld [vmem:[%s8098_s1 + $0xa20] ss:$16 sps:$4 sm:$0xff]   ;;  %v5830_v40 = vld [vmem:[%s8098_s1 + $0xa28] ss:$16 sps:$4 sm:$0xff]  }
 0x113   : > { %3924 = vmatpush1.bf16.msra.mxu0 %v5743_v41  ;;  %4293 = vmatpush1.bf16.msra.mxu1 %v5746_v43  ;;  %v5835_v41 = vld [vmem:[%s8098_s1 + $0xa44] ss:$16 sps:$4 sm:$0xff]   ;;  %v5833_v43 = vld [vmem:[%s8098_s1 + $0xa40] ss:$16 sps:$4 sm:$0xff]  }
 0x114   : > { %3925 = vmatprep.subr.bf16.mxu0 %v5751_v44  ;;  %4294 = vmatprep.subr.bf16.mxu1 %v5754_v45  ;;  %v5836_v44 = vld [vmem:[%s8098_s1 + $0xa48] ss:$16 sps:$4 sm:$0xff]   ;;  %v5841_v45 = vld [vmem:[%s8098_s1 + $0xa64] ss:$16 sps:$4 sm:$0xff]  }
 0x117   : > { %3926 = vmatpush1.bf16.msra.mxu0 %v5749_v46  ;;  %4295 = vmatpush1.bf16.msra.mxu1 %v5752_v47  ;;  %v5844_v46 = vld [vmem:[%s8098_s1 + $0xa6c] ss:$16 sps:$4 sm:$0xff]   ;;  %v5839_v47 = vld [vmem:[%s8098_s1 + $0xa60] ss:$16 sps:$4 sm:$0xff]  }
 0x118   : > { %3927 = vmatprep.subr.bf16.mxu0 %v5757_v48  ;;  %4296 = vmatprep.subr.bf16.mxu1 %v5760_v50  ;;  %v5842_v48 = vld [vmem:[%s8098_s1 + $0xa68] ss:$16 sps:$4 sm:$0xff]   ;;  %v5847_v50 = vld [vmem:[%s8098_s1 + $0xa84] ss:$16 sps:$4 sm:$0xff]  }
 0x11b   : > { %3928 = vmatpush1.bf16.msra.mxu0 %v5755_v51  ;;  %4297 = vmatpush1.bf16.msra.mxu1 %v5758_v52  ;;  %v5850_v51 = vld [vmem:[%s8098_s1 + $0xa8c] ss:$16 sps:$4 sm:$0xff]   ;;  %v5845_v52 = vld [vmem:[%s8098_s1 + $0xa80] ss:$16 sps:$4 sm:$0xff]  }
 0x11c   : > { %3929 = vmatprep.subr.bf16.mxu0 %v5763_v53  ;;  %4298 = vmatprep.subr.bf16.mxu1 %v5766_v54  ;;  %v5848_v53 = vld [vmem:[%s8098_s1 + $0xa88] ss:$16 sps:$4 sm:$0xff]   ;;  %v5853_v54 = vld [vmem:[%s8098_s1 + $0xaa4] ss:$16 sps:$4 sm:$0xff]  }
 0x11f   : > { %3930 = vmatpush1.bf16.msra.mxu0 %v5761_v55  ;;  %4299 = vmatpush1.bf16.msra.mxu1 %v5764_v56  ;;  %v5856_v55 = vld [vmem:[%s8098_s1 + $0xaac] ss:$16 sps:$4 sm:$0xff]   ;;  %v5851_v56 = vld [vmem:[%s8098_s1 + $0xaa0] ss:$16 sps:$4 sm:$0xff]  }
 0x120   : > { %3931 = vmatprep.subr.bf16.mxu0 %v5769_v57  ;;  %4300 = vmatprep.subr.bf16.mxu1 %v5772_v58  ;;  %v5854_v57 = vld [vmem:[%s8098_s1 + $0xaa8] ss:$16 sps:$4 sm:$0xff]   ;;  %v5859_v58 = vld [vmem:[%s8098_s1 + $0xac4] ss:$16 sps:$4 sm:$0xff]  }
 0x123   : > { %3932 = vmatpush1.bf16.msra.mxu0 %v5767_v59  ;;  %4301 = vmatpush1.bf16.msra.mxu1 %v5770_v60  ;;  %v5862_v59 = vld [vmem:[%s8098_s1 + $0xacc] ss:$16 sps:$4 sm:$0xff]   ;;  %v5857_v60 = vld [vmem:[%s8098_s1 + $0xac0] ss:$16 sps:$4 sm:$0xff]  }
 0x124   : > { %3933 = vmatprep.subr.bf16.mxu0 %v5775_v61  ;;  %4302 = vmatprep.subr.bf16.mxu1 %v5778_v62  ;;  %v5860_v61 = vld [vmem:[%s8098_s1 + $0xac8] ss:$16 sps:$4 sm:$0xff]   ;;  %v5865_v62 = vld [vmem:[%s8098_s1 + $0xae4] ss:$16 sps:$4 sm:$0xff]  }
 0x127   : > { %3934 = vmatpush1.bf16.msra.mxu0 %v5773_v63  ;;  %4303 = vmatpush1.bf16.msra.mxu1 %v5776_v0  ;;  %v5868_v63 = vld [vmem:[%s8098_s1 + $0xaec] ss:$16 sps:$4 sm:$0xff]   ;;  %v5863_v0 = vld [vmem:[%s8098_s1 + $0xae0] ss:$16 sps:$4 sm:$0xff]  }
 0x128   : > { %3935 = vmatprep.subr.bf16.mxu0 %v5781_v1  ;;  %4304 = vmatprep.subr.bf16.mxu1 %v5784_v2  ;;  %v5866_v1 = vld [vmem:[%s8098_s1 + $0xae8] ss:$16 sps:$4 sm:$0xff]   ;;  %v5871_v2 = vld [vmem:[%s8098_s1 + $0xb04] ss:$16 sps:$4 sm:$0xff]  }
 0x12b   : > { %3936 = vmatpush1.bf16.msra.mxu0 %v5779_v3  ;;  %4305 = vmatpush1.bf16.msra.mxu1 %v5782_v4  ;;  %v5874_v3 = vld [vmem:[%s8098_s1 + $0xb0c] ss:$16 sps:$4 sm:$0xff]   ;;  %v5869_v4 = vld [vmem:[%s8098_s1 + $0xb00] ss:$16 sps:$4 sm:$0xff]  }
 0x12c   : > { %3937 = vmatprep.subr.bf16.mxu0 %v5787_v5  ;;  %4306 = vmatprep.subr.bf16.mxu1 %v5790_v6  ;;  %v5872_v5 = vld [vmem:[%s8098_s1 + $0xb08] ss:$16 sps:$4 sm:$0xff]   ;;  %v5877_v6 = vld [vmem:[%s8098_s1 + $0xb24] ss:$16 sps:$4 sm:$0xff]  }
 0x12f   : > { %3938 = vmatpush1.bf16.msra.mxu0 %v5785_v7  ;;  %4307 = vmatpush1.bf16.msra.mxu1 %v5788_v8  ;;  %v5880_v7 = vld [vmem:[%s8098_s1 + $0xb2c] ss:$16 sps:$4 sm:$0xff]   ;;  %v5875_v8 = vld [vmem:[%s8098_s1 + $0xb20] ss:$16 sps:$4 sm:$0xff]  }
 0x130   : > { %3939 = vmatprep.subr.bf16.mxu0 %v5793_v9  ;;  %4308 = vmatprep.subr.bf16.mxu1 %v5796_v10  ;;  %v5878_v9 = vld [vmem:[%s8098_s1 + $0xb28] ss:$16 sps:$4 sm:$0xff]   ;;  %v5883_v10 = vld [vmem:[%s8098_s1 + $0xb44] ss:$16 sps:$4 sm:$0xff]  }
 0x133   : > { %3940 = vmatpush1.bf16.msra.mxu0 %v5791_v11  ;;  %4309 = vmatpush1.bf16.msra.mxu1 %v5794_v13  ;;  %v5886_v11 = vld [vmem:[%s8098_s1 + $0xb4c] ss:$16 sps:$4 sm:$0xff]   ;;  %v5881_v13 = vld [vmem:[%s8098_s1 + $0xb40] ss:$16 sps:$4 sm:$0xff]  }
 0x134   : > { %3941 = vmatprep.subr.bf16.mxu0 %v5799_v14  ;;  %4310 = vmatprep.subr.bf16.mxu1 %v5802_v15  ;;  %v5884_v14 = vld [vmem:[%s8098_s1 + $0xb48] ss:$16 sps:$4 sm:$0xff]   ;;  %v5889_v15 = vld [vmem:[%s8098_s1 + $0xb64] ss:$16 sps:$4 sm:$0xff]  }
 0x137   : > { %3942 = vmatpush1.bf16.msra.mxu0 %v5797_v16  ;;  %4311 = vmatpush1.bf16.msra.mxu1 %v5800_v17  ;;  %v5892_v16 = vld [vmem:[%s8098_s1 + $0xb6c] ss:$16 sps:$4 sm:$0xff]   ;;  %v5887_v17 = vld [vmem:[%s8098_s1 + $0xb60] ss:$16 sps:$4 sm:$0xff]  }
 0x138   : > { %3943 = vmatprep.subr.bf16.mxu0 %v5805_v18  ;;  %4312 = vmatprep.subr.bf16.mxu1 %v5808_v20  ;;  %v5890_v18 = vld [vmem:[%s8098_s1 + $0xb68] ss:$16 sps:$4 sm:$0xff]   ;;  %v5895_v20 = vld [vmem:[%s8098_s1 + $0xb84] ss:$16 sps:$4 sm:$0xff]  }
 0x13b   : > { %3944 = vmatpush1.bf16.msra.mxu0 %v5803_v21  ;;  %4313 = vmatpush1.bf16.msra.mxu1 %v5806_v23  ;;  %v5898_v21 = vld [vmem:[%s8098_s1 + $0xb8c] ss:$16 sps:$4 sm:$0xff]   ;;  %v5893_v23 = vld [vmem:[%s8098_s1 + $0xb80] ss:$16 sps:$4 sm:$0xff]  }
 0x13c   : > { %3945 = vmatprep.subr.bf16.mxu0 %v5811_v19  ;;  %4314 = vmatprep.subr.bf16.mxu1 %v5814_v25  ;;  %v5896_v19 = vld [vmem:[%s8098_s1 + $0xb88] ss:$16 sps:$4 sm:$0xff]   ;;  %v5901_v25 = vld [vmem:[%s8098_s1 + $0xba4] ss:$16 sps:$4 sm:$0xff]  }
 0x13f   : > { %3946 = vmatpush1.bf16.msra.mxu0 %v5809_v12  ;;  %4315 = vmatpush1.bf16.msra.mxu1 %v5812_v27  ;;  %v5904_v12 = vld [vmem:[%s8098_s1 + $0xbac] ss:$16 sps:$4 sm:$0xff]   ;;  %v5899_v27 = vld [vmem:[%s8098_s1 + $0xba0] ss:$16 sps:$4 sm:$0xff]  }
 0x140   : > { %3947 = vmatprep.subr.bf16.mxu0 %v5817_v28  ;;  %4316 = vmatprep.subr.bf16.mxu1 %v5820_v30  ;;  %v5902_v28 = vld [vmem:[%s8098_s1 + $0xba8] ss:$16 sps:$4 sm:$0xff]   ;;  %v5907_v30 = vld [vmem:[%s8098_s1 + $0xbc4] ss:$16 sps:$4 sm:$0xff]  }
 0x143   : > { %3948 = vmatpush1.bf16.msra.mxu0 %v5815_v22  ;;  %4317 = vmatpush1.bf16.msra.mxu1 %v5818_v32  ;;  %v5905_v22 = vld [vmem:[%s8098_s1 + $0xbc0] ss:$16 sps:$4 sm:$0xff]   ;;  %v5908_v32 = vld [vmem:[%s8098_s1 + $0xbc8] ss:$16 sps:$4 sm:$0xff]  }
 0x144   : > { %3958 = vmatprep.subr.bf16.mxu0 %v5823_v33  ;;  %4327 = vmatprep.subr.bf16.mxu1 %v5826_v26  ;;  %v5913_v33 = vld [vmem:[%s8098_s1 + $0xbe4] ss:$16 sps:$4 sm:$0xff]   ;;  %v5916_v26 = vld [vmem:[%s8098_s1 + $0xbec] ss:$16 sps:$4 sm:$0xff]  }
 0x146   : > { %3950 = vmatmul.mubr.bf16.vlgmr.msra.gmra.mrb[0].mxu0 %v7075_v29  ;;  %4319 = vmatmul.mubr.bf16.vlgmr.msra.gmra.mrb[0].mxu1 %v7075_v29  ;;  %v5838_v29 = vld [vmem:[%s8098_s1 + $0xa4c] ss:$16 sps:$4 sm:$0xff]  }
 0x147   : > { %3959 = vmatpush1.bf16.msra.mxu0 %v5821_v35  ;;  %4328 = vmatpush1.bf16.msra.mxu1 %v5824_v36  ;;  %v7463_v35 = vld [vmem:[%s6396_s30 + $0x18] sm:$0xff]  ;;  %v5911_v36 = vld [vmem:[%s8098_s1 + $0xbe0] ss:$16 sps:$4 sm:$0xff]  }
 0x148   : > { %3960 = vmatprep.subr.bf16.mxu0 %v5829_v24  ;;  %4329 = vmatprep.subr.bf16.mxu1 %v5832_v37  ;;  %v5914_v24 = vld [vmem:[%s8098_s1 + $0xbe8] ss:$16 sps:$4 sm:$0xff]   ;;  %v5920_v37 = vld [vmem:[%s8098_s1 + $0xc04] ss:$16 sps:$4 sm:$0xff]  }
 0x149   : > { %3990 = vmatprep.mubr.bf16.mxu0 %v829_v38  ;;  %4359 = vmatprep.mubr.bf16.mxu1 %v829_v38  ;;  %v5923_v38 = vld [vmem:[%s8098_s1 + $0xc0c] ss:$16 sps:$4 sm:$0xff]  }
 0x14b   : > { %3961 = vmatpush1.bf16.msra.mxu0 %v5827_v39  ;;  %4330 = vmatpush1.bf16.msra.mxu1 %v5830_v40  ;;  %v7479_v39 = vrot.slane %v7463_v35, %v6399_v49  ;;  %v5918_v40 = vld [vmem:[%s8098_s1 + $0xc00] ss:$16 sps:$4 sm:$0xff]  }
 0x14c   : > { %3962 = vmatprep.subr.bf16.mxu0 %v5835_v41  ;;  %4331 = vmatprep.subr.bf16.mxu1 %v5838_v29  ;;  %v5921_v41 = vld [vmem:[%s8098_s1 + $0xc08] ss:$16 sps:$4 sm:$0xff]   ;;  %v5926_v29 = vld [vmem:[%s8098_s1 + $0xc24] ss:$16 sps:$4 sm:$0xff]  }
 0x14f   : > { %3963 = vmatpush1.bf16.msra.mxu0 %v5833_v43  ;;  %4332 = vmatpush1.bf16.msra.mxu1 %v5836_v44  ;;  %v5929_v43 = vld [vmem:[%s8098_s1 + $0xc2c] ss:$16 sps:$4 sm:$0xff]   ;;  %v845_v44 = vcombine.high %v7479_v39, %v7479_v39 }
 0x150   : > { %3964 = vmatprep.subr.bf16.mxu0 %v5841_v45  ;;  %4333 = vmatprep.subr.bf16.mxu1 %v5844_v46  ;;  %v5924_v45 = vld [vmem:[%s8098_s1 + $0xc20] ss:$16 sps:$4 sm:$0xff]   ;;  %v5927_v46 = vld [vmem:[%s8098_s1 + $0xc28] ss:$16 sps:$4 sm:$0xff]  }
 0x153   : > { %3965 = vmatpush1.bf16.msra.mxu0 %v5839_v47  ;;  %4334 = vmatpush1.bf16.msra.mxu1 %v5842_v48  ;;  %v5932_v47 = vld [vmem:[%s8098_s1 + $0xc44] ss:$16 sps:$4 sm:$0xff]   ;;  %v5930_v48 = vld [vmem:[%s8098_s1 + $0xc40] ss:$16 sps:$4 sm:$0xff]  }
 0x154   : > { %3966 = vmatprep.subr.bf16.mxu0 %v5847_v50  ;;  %4335 = vmatprep.subr.bf16.mxu1 %v5850_v51  ;;  %v5933_v50 = vld [vmem:[%s8098_s1 + $0xc48] ss:$16 sps:$4 sm:$0xff]   ;;  %v5938_v51 = vld [vmem:[%s8098_s1 + $0xc64] ss:$16 sps:$4 sm:$0xff]  }
 0x157   : > { %3967 = vmatpush1.bf16.msra.mxu0 %v5845_v52  ;;  %4336 = vmatpush1.bf16.msra.mxu1 %v5848_v53  ;;  %v5941_v52 = vld [vmem:[%s8098_s1 + $0xc6c] ss:$16 sps:$4 sm:$0xff]   ;;  %v5936_v53 = vld [vmem:[%s8098_s1 + $0xc60] ss:$16 sps:$4 sm:$0xff]  }
 0x158   : > { %3968 = vmatprep.subr.bf16.mxu0 %v5853_v54  ;;  %4337 = vmatprep.subr.bf16.mxu1 %v5856_v55  ;;  %v5939_v54 = vld [vmem:[%s8098_s1 + $0xc68] ss:$16 sps:$4 sm:$0xff]   ;;  %v5944_v55 = vld [vmem:[%s8098_s1 + $0xc84] ss:$16 sps:$4 sm:$0xff]  }
 0x15b   : > { %3969 = vmatpush1.bf16.msra.mxu0 %v5851_v56  ;;  %4338 = vmatpush1.bf16.msra.mxu1 %v5854_v57  ;;  %v5947_v56 = vld [vmem:[%s8098_s1 + $0xc8c] ss:$16 sps:$4 sm:$0xff]   ;;  %v5942_v57 = vld [vmem:[%s8098_s1 + $0xc80] ss:$16 sps:$4 sm:$0xff]  }
 0x15c   : > { %3970 = vmatprep.subr.bf16.mxu0 %v5859_v58  ;;  %4339 = vmatprep.subr.bf16.mxu1 %v5862_v59  ;;  %v5945_v58 = vld [vmem:[%s8098_s1 + $0xc88] ss:$16 sps:$4 sm:$0xff]   ;;  %v5950_v59 = vld [vmem:[%s8098_s1 + $0xca4] ss:$16 sps:$4 sm:$0xff]  }
 0x15f   : > { %3971 = vmatpush1.bf16.msra.mxu0 %v5857_v60  ;;  %4340 = vmatpush1.bf16.msra.mxu1 %v5860_v61  ;;  %v5953_v60 = vld [vmem:[%s8098_s1 + $0xcac] ss:$16 sps:$4 sm:$0xff]   ;;  %v5948_v61 = vld [vmem:[%s8098_s1 + $0xca0] ss:$16 sps:$4 sm:$0xff]  }
 0x160   : > { %3972 = vmatprep.subr.bf16.mxu0 %v5865_v62  ;;  %4341 = vmatprep.subr.bf16.mxu1 %v5868_v63  ;;  %v5951_v62 = vld [vmem:[%s8098_s1 + $0xca8] ss:$16 sps:$4 sm:$0xff]   ;;  %v5956_v63 = vld [vmem:[%s8098_s1 + $0xcc4] ss:$16 sps:$4 sm:$0xff]  }
 0x163   : > { %3973 = vmatpush1.bf16.msra.mxu0 %v5863_v0  ;;  %4342 = vmatpush1.bf16.msra.mxu1 %v5866_v1  ;;  %v5959_v0 = vld [vmem:[%s8098_s1 + $0xccc] ss:$16 sps:$4 sm:$0xff]   ;;  %v5954_v1 = vld [vmem:[%s8098_s1 + $0xcc0] ss:$16 sps:$4 sm:$0xff]  }
 0x164   : > { %3974 = vmatprep.subr.bf16.mxu0 %v5871_v2  ;;  %4343 = vmatprep.subr.bf16.mxu1 %v5874_v3  ;;  %v5957_v2 = vld [vmem:[%s8098_s1 + $0xcc8] ss:$16 sps:$4 sm:$0xff]   ;;  %v5962_v3 = vld [vmem:[%s8098_s1 + $0xce4] ss:$16 sps:$4 sm:$0xff]  }
 0x167   : > { %3975 = vmatpush1.bf16.msra.mxu0 %v5869_v4  ;;  %4344 = vmatpush1.bf16.msra.mxu1 %v5872_v5  ;;  %v5965_v4 = vld [vmem:[%s8098_s1 + $0xcec] ss:$16 sps:$4 sm:$0xff]   ;;  %v5960_v5 = vld [vmem:[%s8098_s1 + $0xce0] ss:$16 sps:$4 sm:$0xff]  }
 0x168   : > { %3976 = vmatprep.subr.bf16.mxu0 %v5877_v6  ;;  %4345 = vmatprep.subr.bf16.mxu1 %v5880_v7  ;;  %v5963_v6 = vld [vmem:[%s8098_s1 + $0xce8] ss:$16 sps:$4 sm:$0xff]   ;;  %v5968_v7 = vld [vmem:[%s8098_s1 + $0xd04] ss:$16 sps:$4 sm:$0xff]  }
 0x16b   : > { %3977 = vmatpush1.bf16.msra.mxu0 %v5875_v8  ;;  %4346 = vmatpush1.bf16.msra.mxu1 %v5878_v9  ;;  %v5971_v8 = vld [vmem:[%s8098_s1 + $0xd0c] ss:$16 sps:$4 sm:$0xff]   ;;  %v5966_v9 = vld [vmem:[%s8098_s1 + $0xd00] ss:$16 sps:$4 sm:$0xff]  }
 0x16c   : > { %3978 = vmatprep.subr.bf16.mxu0 %v5883_v10  ;;  %4347 = vmatprep.subr.bf16.mxu1 %v5886_v11  ;;  %v5969_v10 = vld [vmem:[%s8098_s1 + $0xd08] ss:$16 sps:$4 sm:$0xff]   ;;  %v5974_v11 = vld [vmem:[%s8098_s1 + $0xd24] ss:$16 sps:$4 sm:$0xff]  }
 0x16f   : > { %3979 = vmatpush1.bf16.msra.mxu0 %v5881_v13  ;;  %4348 = vmatpush1.bf16.msra.mxu1 %v5884_v14  ;;  %v5977_v13 = vld [vmem:[%s8098_s1 + $0xd2c] ss:$16 sps:$4 sm:$0xff]   ;;  %v5972_v14 = vld [vmem:[%s8098_s1 + $0xd20] ss:$16 sps:$4 sm:$0xff]  }
 0x170   : > { %3980 = vmatprep.subr.bf16.mxu0 %v5889_v15  ;;  %4349 = vmatprep.subr.bf16.mxu1 %v5892_v16  ;;  %v5975_v15 = vld [vmem:[%s8098_s1 + $0xd28] ss:$16 sps:$4 sm:$0xff]   ;;  %v5980_v16 = vld [vmem:[%s8098_s1 + $0xd44] ss:$16 sps:$4 sm:$0xff]  }
 0x173   : > { %3981 = vmatpush1.bf16.msra.mxu0 %v5887_v17  ;;  %4350 = vmatpush1.bf16.msra.mxu1 %v5890_v18  ;;  %v5983_v17 = vld [vmem:[%s8098_s1 + $0xd4c] ss:$16 sps:$4 sm:$0xff]   ;;  %v5978_v18 = vld [vmem:[%s8098_s1 + $0xd40] ss:$16 sps:$4 sm:$0xff]  }
 0x174   : > { %3982 = vmatprep.subr.bf16.mxu0 %v5895_v20  ;;  %4351 = vmatprep.subr.bf16.mxu1 %v5898_v21  ;;  %v5981_v20 = vld [vmem:[%s8098_s1 + $0xd48] ss:$16 sps:$4 sm:$0xff]   ;;  %v5986_v21 = vld [vmem:[%s8098_s1 + $0xd64] ss:$16 sps:$4 sm:$0xff]  }
 0x177   : > { %3983 = vmatpush1.bf16.msra.mxu0 %v5893_v23  ;;  %4352 = vmatpush1.bf16.msra.mxu1 %v5896_v19  ;;  %v5989_v23 = vld [vmem:[%s8098_s1 + $0xd6c] ss:$16 sps:$4 sm:$0xff]   ;;  %v5984_v19 = vld [vmem:[%s8098_s1 + $0xd60] ss:$16 sps:$4 sm:$0xff]  }
 0x178   : > { %3984 = vmatprep.subr.bf16.mxu0 %v5901_v25  ;;  %4353 = vmatprep.subr.bf16.mxu1 %v5904_v12  ;;  %v5987_v25 = vld [vmem:[%s8098_s1 + $0xd68] ss:$16 sps:$4 sm:$0xff]   ;;  %v5992_v12 = vld [vmem:[%s8098_s1 + $0xd84] ss:$16 sps:$4 sm:$0xff]  }
 0x17b   : > { %3985 = vmatpush1.bf16.msra.mxu0 %v5899_v27  ;;  %4354 = vmatpush1.bf16.msra.mxu1 %v5902_v28  ;;  %v5995_v27 = vld [vmem:[%s8098_s1 + $0xd8c] ss:$16 sps:$4 sm:$0xff]   ;;  %v5990_v28 = vld [vmem:[%s8098_s1 + $0xd80] ss:$16 sps:$4 sm:$0xff]  }
 0x17c   : > { %3986 = vmatprep.subr.bf16.mxu0 %v5907_v30  ;;  %4355 = vmatprep.subr.bf16.mxu1 %v5910_v31  ;;  %v5993_v30 = vld [vmem:[%s8098_s1 + $0xd88] ss:$16 sps:$4 sm:$0xff]   ;;  %v5998_v31 = vld [vmem:[%s8098_s1 + $0xda4] ss:$16 sps:$4 sm:$0xff]  }
 0x17f   : > { %3987 = vmatpush1.bf16.msra.mxu0 %v5905_v22  ;;  %4356 = vmatpush1.bf16.msra.mxu1 %v5908_v32  ;;  %v6001_v22 = vld [vmem:[%s8098_s1 + $0xdac] ss:$16 sps:$4 sm:$0xff]   ;;  %v5996_v32 = vld [vmem:[%s8098_s1 + $0xda0] ss:$16 sps:$4 sm:$0xff]  }
 0x180   : > { %3988 = vmatprep.subr.bf16.mxu0 %v5913_v33  ;;  %4357 = vmatprep.subr.bf16.mxu1 %v5916_v26  ;;  %v5999_v33 = vld [vmem:[%s8098_s1 + $0xda8] ss:$16 sps:$4 sm:$0xff]   ;;  %v6004_v26 = vld [vmem:[%s8098_s1 + $0xdc4] ss:$16 sps:$4 sm:$0xff]  }
 0x183   : > { %3989 = vmatpush1.bf16.msra.mxu0 %v5911_v36  ;;  %4358 = vmatpush1.bf16.msra.mxu1 %v5914_v24  ;;  %v6007_v36 = vld [vmem:[%s8098_s1 + $0xdcc] ss:$16 sps:$4 sm:$0xff]   ;;  %v6002_v24 = vld [vmem:[%s8098_s1 + $0xdc0] ss:$16 sps:$4 sm:$0xff]  }
 0x184   : > { %3999 = vmatprep.subr.bf16.mxu0 %v5920_v37  ;;  %4368 = vmatprep.subr.bf16.mxu1 %v5923_v38  ;;  %v6005_v37 = vld [vmem:[%s8098_s1 + $0xdc8] ss:$16 sps:$4 sm:$0xff]   ;;  %v6010_v38 = vld [vmem:[%s8098_s1 + $0xde4] ss:$16 sps:$4 sm:$0xff]  }
 0x186   : > { %3991 = vmatmul.mubr.bf16.vlgmr.msra.gmra.mrb[0].mxu0 %v7276_v34  ;;  %4360 = vmatmul.mubr.bf16.vlgmr.msra.gmra.mrb[0].mxu1 %v7276_v34  ;;  %v5935_v34 = vld [vmem:[%s8098_s1 + $0xc4c] ss:$16 sps:$4 sm:$0xff]  }
 0x187   : > { %4000 = vmatpush1.bf16.msra.mxu0 %v5918_v40  ;;  %4369 = vmatpush1.bf16.msra.mxu1 %v5921_v41  ;;  %v6013_v40 = vld [vmem:[%s8098_s1 + $0xdec] ss:$16 sps:$4 sm:$0xff]   ;;  %v830_v41 = vcombine.high %v7463_v35, %v7463_v35 }
 0x188   : > { %4001 = vmatprep.subr.bf16.mxu0 %v5926_v29  ;;  %4370 = vmatprep.subr.bf16.mxu1 %v5929_v43  ;;  %v6008_v29 = vld [vmem:[%s8098_s1 + $0xde0] ss:$16 sps:$4 sm:$0xff]   ;;  %v6011_v43 = vld [vmem:[%s8098_s1 + $0xde8] ss:$16 sps:$4 sm:$0xff]   ;;  %v6019_v35 = vld [vmem:[%s8098_s1 + $0xe0c] ss:$16 sps:$4 sm:$0xff]  }
 0x189   : > { %4031 = vmatprep.mubr.bf16.mxu0 %v845_v44  ;;  %4400 = vmatprep.mubr.bf16.mxu1 %v845_v44  ;;  %v6016_v44 = vld [vmem:[%s8098_s1 + $0xe04] ss:$16 sps:$4 sm:$0xff]  }
 0x18b   : > { %4002 = vmatpush1.bf16.msra.mxu0 %v5924_v45  ;;  %4371 = vmatpush1.bf16.msra.mxu1 %v5927_v46  ;;  %v7680_v45 = vrot.slane %v830_v41, %v6399_v49  ;;  %v6014_v46 = vld [vmem:[%s8098_s1 + $0xe00] ss:$16 sps:$4 sm:$0xff]   ;;  %v6103_v41 = vld [vmem:[%s8098_s1 + $0xfcc] ss:$16 sps:$4 sm:$0xff]  }
 0x18c   : > { %4003 = vmatprep.subr.bf16.mxu0 %v5932_v47  ;;  %4372 = vmatprep.subr.bf16.mxu1 %v5935_v34  ;;  %v6017_v47 = vld [vmem:[%s8098_s1 + $0xe08] ss:$16 sps:$4 sm:$0xff]   ;;  %v6022_v34 = vld [vmem:[%s8098_s1 + $0xe24] ss:$16 sps:$4 sm:$0xff]  }
 0x18f   : > { %4004 = vmatpush1.bf16.msra.mxu0 %v5930_v48  ;;  %4373 = vmatpush1.bf16.msra.mxu1 %v5933_v50  ;;  %v6025_v48 = vld [vmem:[%s8098_s1 + $0xe2c] ss:$16 sps:$4 sm:$0xff]   ;;  %v846_v50 = vcombine.high %v7680_v45, %v7680_v45 }
 0x190   : > { %4005 = vmatprep.subr.bf16.mxu0 %v5938_v51  ;;  %4374 = vmatprep.subr.bf16.mxu1 %v5941_v52  ;;  %v6020_v51 = vld [vmem:[%s8098_s1 + $0xe20] ss:$16 sps:$4 sm:$0xff]   ;;  %v6023_v52 = vld [vmem:[%s8098_s1 + $0xe28] ss:$16 sps:$4 sm:$0xff]  }
 0x193   : > { %4006 = vmatpush1.bf16.msra.mxu0 %v5936_v53  ;;  %4375 = vmatpush1.bf16.msra.mxu1 %v5939_v54  ;;  %v6028_v53 = vld [vmem:[%s8098_s1 + $0xe44] ss:$16 sps:$4 sm:$0xff]   ;;  %v6026_v54 = vld [vmem:[%s8098_s1 + $0xe40] ss:$16 sps:$4 sm:$0xff]  }
 0x194   : > { %4007 = vmatprep.subr.bf16.mxu0 %v5944_v55  ;;  %4376 = vmatprep.subr.bf16.mxu1 %v5947_v56  ;;  %v6029_v55 = vld [vmem:[%s8098_s1 + $0xe48] ss:$16 sps:$4 sm:$0xff]   ;;  %v6034_v56 = vld [vmem:[%s8098_s1 + $0xe64] ss:$16 sps:$4 sm:$0xff]  }
 0x197   : > { %4008 = vmatpush1.bf16.msra.mxu0 %v5942_v57  ;;  %4377 = vmatpush1.bf16.msra.mxu1 %v5945_v58  ;;  %v6037_v57 = vld [vmem:[%s8098_s1 + $0xe6c] ss:$16 sps:$4 sm:$0xff]   ;;  %v6032_v58 = vld [vmem:[%s8098_s1 + $0xe60] ss:$16 sps:$4 sm:$0xff]  }
 0x198   : > { %4009 = vmatprep.subr.bf16.mxu0 %v5950_v59  ;;  %4378 = vmatprep.subr.bf16.mxu1 %v5953_v60  ;;  %v6035_v59 = vld [vmem:[%s8098_s1 + $0xe68] ss:$16 sps:$4 sm:$0xff]   ;;  %v6040_v60 = vld [vmem:[%s8098_s1 + $0xe84] ss:$16 sps:$4 sm:$0xff]  }
 0x19b   : > { %4010 = vmatpush1.bf16.msra.mxu0 %v5948_v61  ;;  %4379 = vmatpush1.bf16.msra.mxu1 %v5951_v62  ;;  %v6043_v61 = vld [vmem:[%s8098_s1 + $0xe8c] ss:$16 sps:$4 sm:$0xff]   ;;  %v6038_v62 = vld [vmem:[%s8098_s1 + $0xe80] ss:$16 sps:$4 sm:$0xff]  }
 0x19c   : > { %4011 = vmatprep.subr.bf16.mxu0 %v5956_v63  ;;  %4380 = vmatprep.subr.bf16.mxu1 %v5959_v0  ;;  %v6041_v63 = vld [vmem:[%s8098_s1 + $0xe88] ss:$16 sps:$4 sm:$0xff]   ;;  %v6046_v0 = vld [vmem:[%s8098_s1 + $0xea4] ss:$16 sps:$4 sm:$0xff]  }
 0x19f   : > { %4012 = vmatpush1.bf16.msra.mxu0 %v5954_v1  ;;  %4381 = vmatpush1.bf16.msra.mxu1 %v5957_v2  ;;  %v6049_v1 = vld [vmem:[%s8098_s1 + $0xeac] ss:$16 sps:$4 sm:$0xff]   ;;  %v6044_v2 = vld [vmem:[%s8098_s1 + $0xea0] ss:$16 sps:$4 sm:$0xff]  }
 0x1a0   : > { %4013 = vmatprep.subr.bf16.mxu0 %v5962_v3  ;;  %4382 = vmatprep.subr.bf16.mxu1 %v5965_v4  ;;  %v6047_v3 = vld [vmem:[%s8098_s1 + $0xea8] ss:$16 sps:$4 sm:$0xff]   ;;  %v6052_v4 = vld [vmem:[%s8098_s1 + $0xec4] ss:$16 sps:$4 sm:$0xff]  }
 0x1a3   : > { %4014 = vmatpush1.bf16.msra.mxu0 %v5960_v5  ;;  %4383 = vmatpush1.bf16.msra.mxu1 %v5963_v6  ;;  %v6055_v5 = vld [vmem:[%s8098_s1 + $0xecc] ss:$16 sps:$4 sm:$0xff]   ;;  %v6050_v6 = vld [vmem:[%s8098_s1 + $0xec0] ss:$16 sps:$4 sm:$0xff]  }
 0x1a4   : > { %4015 = vmatprep.subr.bf16.mxu0 %v5968_v7  ;;  %4384 = vmatprep.subr.bf16.mxu1 %v5971_v8  ;;  %v6053_v7 = vld [vmem:[%s8098_s1 + $0xec8] ss:$16 sps:$4 sm:$0xff]   ;;  %v6058_v8 = vld [vmem:[%s8098_s1 + $0xee4] ss:$16 sps:$4 sm:$0xff]  }
 0x1a7   : > { %4016 = vmatpush1.bf16.msra.mxu0 %v5966_v9  ;;  %4385 = vmatpush1.bf16.msra.mxu1 %v5969_v10  ;;  %v6061_v9 = vld [vmem:[%s8098_s1 + $0xeec] ss:$16 sps:$4 sm:$0xff]   ;;  %v6056_v10 = vld [vmem:[%s8098_s1 + $0xee0] ss:$16 sps:$4 sm:$0xff]  }
 0x1a8   : > { %4017 = vmatprep.subr.bf16.mxu0 %v5974_v11  ;;  %4386 = vmatprep.subr.bf16.mxu1 %v5977_v13  ;;  %v6059_v11 = vld [vmem:[%s8098_s1 + $0xee8] ss:$16 sps:$4 sm:$0xff]   ;;  %v6064_v13 = vld [vmem:[%s8098_s1 + $0xf04] ss:$16 sps:$4 sm:$0xff]  }
 0x1ab   : > { %4018 = vmatpush1.bf16.msra.mxu0 %v5972_v14  ;;  %4387 = vmatpush1.bf16.msra.mxu1 %v5975_v15  ;;  %v6067_v14 = vld [vmem:[%s8098_s1 + $0xf0c] ss:$16 sps:$4 sm:$0xff]   ;;  %v6062_v15 = vld [vmem:[%s8098_s1 + $0xf00] ss:$16 sps:$4 sm:$0xff]  }
 0x1ac   : > { %4019 = vmatprep.subr.bf16.mxu0 %v5980_v16  ;;  %4388 = vmatprep.subr.bf16.mxu1 %v5983_v17  ;;  %v6065_v16 = vld [vmem:[%s8098_s1 + $0xf08] ss:$16 sps:$4 sm:$0xff]   ;;  %v6070_v17 = vld [vmem:[%s8098_s1 + $0xf24] ss:$16 sps:$4 sm:$0xff]  }
 0x1af   : > { %4020 = vmatpush1.bf16.msra.mxu0 %v5978_v18  ;;  %4389 = vmatpush1.bf16.msra.mxu1 %v5981_v20  ;;  %v6073_v18 = vld [vmem:[%s8098_s1 + $0xf2c] ss:$16 sps:$4 sm:$0xff]   ;;  %v6068_v20 = vld [vmem:[%s8098_s1 + $0xf20] ss:$16 sps:$4 sm:$0xff]  }
 0x1b0   : > { %4021 = vmatprep.subr.bf16.mxu0 %v5986_v21  ;;  %4390 = vmatprep.subr.bf16.mxu1 %v5989_v23  ;;  %v6071_v21 = vld [vmem:[%s8098_s1 + $0xf28] ss:$16 sps:$4 sm:$0xff]   ;;  %v6076_v23 = vld [vmem:[%s8098_s1 + $0xf44] ss:$16 sps:$4 sm:$0xff]  }
 0x1b3   : > { %4022 = vmatpush1.bf16.msra.mxu0 %v5984_v19  ;;  %4391 = vmatpush1.bf16.msra.mxu1 %v5987_v25  ;;  %v6079_v19 = vld [vmem:[%s8098_s1 + $0xf4c] ss:$16 sps:$4 sm:$0xff]   ;;  %v6074_v25 = vld [vmem:[%s8098_s1 + $0xf40] ss:$16 sps:$4 sm:$0xff]  }
 0x1b4   : > { %4023 = vmatprep.subr.bf16.mxu0 %v5992_v12  ;;  %4392 = vmatprep.subr.bf16.mxu1 %v5995_v27  ;;  %v6077_v12 = vld [vmem:[%s8098_s1 + $0xf48] ss:$16 sps:$4 sm:$0xff]   ;;  %v6082_v27 = vld [vmem:[%s8098_s1 + $0xf64] ss:$16 sps:$4 sm:$0xff]  }
 0x1b7   : > { %4024 = vmatpush1.bf16.msra.mxu0 %v5990_v28  ;;  %4393 = vmatpush1.bf16.msra.mxu1 %v5993_v30  ;;  %v6085_v28 = vld [vmem:[%s8098_s1 + $0xf6c] ss:$16 sps:$4 sm:$0xff]   ;;  %v6080_v30 = vld [vmem:[%s8098_s1 + $0xf60] ss:$16 sps:$4 sm:$0xff]  }
 0x1b8   : > { %4025 = vmatprep.subr.bf16.mxu0 %v5998_v31  ;;  %4394 = vmatprep.subr.bf16.mxu1 %v6001_v22  ;;  %v6083_v31 = vld [vmem:[%s8098_s1 + $0xf68] ss:$16 sps:$4 sm:$0xff]   ;;  %v6088_v22 = vld [vmem:[%s8098_s1 + $0xf84] ss:$16 sps:$4 sm:$0xff]  }
 0x1bb   : > { %4026 = vmatpush1.bf16.msra.mxu0 %v5996_v32  ;;  %4395 = vmatpush1.bf16.msra.mxu1 %v5999_v33  ;;  %v6091_v32 = vld [vmem:[%s8098_s1 + $0xf8c] ss:$16 sps:$4 sm:$0xff]   ;;  %v6086_v33 = vld [vmem:[%s8098_s1 + $0xf80] ss:$16 sps:$4 sm:$0xff]  }
 0x1bc   : > { %4027 = vmatprep.subr.bf16.mxu0 %v6004_v26  ;;  %4396 = vmatprep.subr.bf16.mxu1 %v6007_v36  ;;  %v6089_v26 = vld [vmem:[%s8098_s1 + $0xf88] ss:$16 sps:$4 sm:$0xff]   ;;  %v6094_v36 = vld [vmem:[%s8098_s1 + $0xfa4] ss:$16 sps:$4 sm:$0xff]  }
 0x1bf   : > { %4028 = vmatpush1.bf16.msra.mxu0 %v6002_v24  ;;  %4397 = vmatpush1.bf16.msra.mxu1 %v6005_v37  ;;  %v6097_v24 = vld [vmem:[%s8098_s1 + $0xfac] ss:$16 sps:$4 sm:$0xff]   ;;  %v6092_v37 = vld [vmem:[%s8098_s1 + $0xfa0] ss:$16 sps:$4 sm:$0xff]  }
 0x1c0   : > { %4029 = vmatprep.subr.bf16.mxu0 %v6010_v38  ;;  %4398 = vmatprep.subr.bf16.mxu1 %v6013_v40  ;;  %v6095_v38 = vld [vmem:[%s8098_s1 + $0xfa8] ss:$16 sps:$4 sm:$0xff]   ;;  %v6100_v40 = vld [vmem:[%s8098_s1 + $0xfc4] ss:$16 sps:$4 sm:$0xff]  }
 0x1c3   : > { %4030 = vmatpush1.bf16.msra.mxu0 %v6008_v29  ;;  %4399 = vmatpush1.bf16.msra.mxu1 %v6011_v43  ;;  %v6098_v29 = vld [vmem:[%s8098_s1 + $0xfc0] ss:$16 sps:$4 sm:$0xff]   ;;  %v6101_v43 = vld [vmem:[%s8098_s1 + $0xfc8] ss:$16 sps:$4 sm:$0xff]  }
 0x1c4   : > { %4040 = vmatprep.subr.bf16.mxu0 %v6016_v44  ;;  %4409 = vmatprep.subr.bf16.mxu1 %v6019_v35  ;;  %v6106_v44 = vld [vmem:[%s8098_s1 + $0xfe4] ss:$16 sps:$4 sm:$0xff]   ;;  %v6109_v35 = vld [vmem:[%s8098_s1 + $0xfec] ss:$16 sps:$4 sm:$0xff]  }
 0x1c6   : > { %4032 = vmatmul.mubr.bf16.vlgmr.msra.gmra.mrb[0].mxu0 %v7479_v39  ;;  %4401 = vmatmul.mubr.bf16.vlgmr.msra.gmra.mrb[0].mxu1 %v7479_v39  ;;  %v6031_v39 = vld [vmem:[%s8098_s1 + $0xe4c] ss:$16 sps:$4 sm:$0xff]  }
 0x1c7   : > { %4041 = vmatpush1.bf16.msra.mxu0 %v6014_v46  ;;  %4410 = vmatpush1.bf16.msra.mxu1 %v6017_v47  ;;  %v6104_v46 = vld [vmem:[%s8098_s1 + $0xfe0] ss:$16 sps:$4 sm:$0xff]   ;;  %v6107_v47 = vld [vmem:[%s8098_s1 + $0xfe8] ss:$16 sps:$4 sm:$0xff]  }
 0x1c8   : > { %4042 = vmatprep.subr.bf16.mxu0 %v6022_v34  ;;  %4411 = vmatprep.subr.bf16.mxu1 %v6025_v48  ;;  %v6113_v34 = vld [vmem:[%s8098_s1 + $0x1004] ss:$16 sps:$4 sm:$0xff]   ;;  %v6116_v48 = vld [vmem:[%s8098_s1 + $0x100c] ss:$16 sps:$4 sm:$0xff]  }
 0x1c9   : > { %4072 = vmatprep.mubr.bf16.mxu0 %v846_v50  ;;  %4441 = vmatprep.mubr.bf16.mxu1 %v846_v50  ;;  %v7879_v50 = vld.sshfl [vmem:[%s6396_s30 + $0x20] sm:$0x33 pattern:$0x76325410] }
 0x1cb   : > { %4043 = vmatpush1.bf16.msra.mxu0 %v6020_v51  ;;  %4412 = vmatpush1.bf16.msra.mxu1 %v6023_v52  ;;  %v6111_v51 = vld [vmem:[%s8098_s1 + $0x1000] ss:$16 sps:$4 sm:$0xff]   ;;  %v6114_v52 = vld [vmem:[%s8098_s1 + $0x1008] ss:$16 sps:$4 sm:$0xff]  }
 0x1cc   : > { %4044 = vmatprep.subr.bf16.mxu0 %v6028_v53  ;;  %4413 = vmatprep.subr.bf16.mxu1 %v6031_v39  ;;  %v6119_v53 = vld [vmem:[%s8098_s1 + $0x1024] ss:$16 sps:$4 sm:$0xff]   ;;  %v6122_v39 = vld [vmem:[%s8098_s1 + $0x102c] ss:$16 sps:$4 sm:$0xff]  }
 0x1cf   : > { %4045 = vmatpush1.bf16.msra.mxu0 %v6026_v54  ;;  %4414 = vmatpush1.bf16.msra.mxu1 %v6029_v55  ;;  %v854_v54 = vcombine.high %v7879_v50, %v7879_v50  ;;  %v6117_v55 = vld [vmem:[%s8098_s1 + $0x1020] ss:$16 sps:$4 sm:$0xff]  }
 0x1d0   : > { %4046 = vmatprep.subr.bf16.mxu0 %v6034_v56  ;;  %4415 = vmatprep.subr.bf16.mxu1 %v6037_v57  ;;  %v6120_v56 = vld [vmem:[%s8098_s1 + $0x1028] ss:$16 sps:$4 sm:$0xff]   ;;  %v6125_v57 = vld [vmem:[%s8098_s1 + $0x1044] ss:$16 sps:$4 sm:$0xff]  }
 0x1d3   : > { %4047 = vmatpush1.bf16.msra.mxu0 %v6032_v58  ;;  %4416 = vmatpush1.bf16.msra.mxu1 %v6035_v59  ;;  %v6123_v58 = vld [vmem:[%s8098_s1 + $0x1040] ss:$16 sps:$4 sm:$0xff]   ;;  %v6126_v59 = vld [vmem:[%s8098_s1 + $0x1048] ss:$16 sps:$4 sm:$0xff]  }
 0x1d4   : > { %4048 = vmatprep.subr.bf16.mxu0 %v6040_v60  ;;  %4417 = vmatprep.subr.bf16.mxu1 %v6043_v61  ;;  %v6131_v60 = vld [vmem:[%s8098_s1 + $0x1064] ss:$16 sps:$4 sm:$0xff]   ;;  %v6134_v61 = vld [vmem:[%s8098_s1 + $0x106c] ss:$16 sps:$4 sm:$0xff]  }
 0x1d7   : > { %4049 = vmatpush1.bf16.msra.mxu0 %v6038_v62  ;;  %4418 = vmatpush1.bf16.msra.mxu1 %v6041_v63  ;;  %v6129_v62 = vld [vmem:[%s8098_s1 + $0x1060] ss:$16 sps:$4 sm:$0xff]   ;;  %v6132_v63 = vld [vmem:[%s8098_s1 + $0x1068] ss:$16 sps:$4 sm:$0xff]  }
 0x1d8   : > { %4050 = vmatprep.subr.bf16.mxu0 %v6046_v0  ;;  %4419 = vmatprep.subr.bf16.mxu1 %v6049_v1  ;;  %v6137_v0 = vld [vmem:[%s8098_s1 + $0x1084] ss:$16 sps:$4 sm:$0xff]   ;;  %v6140_v1 = vld [vmem:[%s8098_s1 + $0x108c] ss:$16 sps:$4 sm:$0xff]  }
 0x1db   : > { %4051 = vmatpush1.bf16.msra.mxu0 %v6044_v2  ;;  %4420 = vmatpush1.bf16.msra.mxu1 %v6047_v3  ;;  %v6135_v2 = vld [vmem:[%s8098_s1 + $0x1080] ss:$16 sps:$4 sm:$0xff]   ;;  %v6138_v3 = vld [vmem:[%s8098_s1 + $0x1088] ss:$16 sps:$4 sm:$0xff]  }
 0x1dc   : > { %4052 = vmatprep.subr.bf16.mxu0 %v6052_v4  ;;  %4421 = vmatprep.subr.bf16.mxu1 %v6055_v5  ;;  %v6143_v4 = vld [vmem:[%s8098_s1 + $0x10a4] ss:$16 sps:$4 sm:$0xff]   ;;  %v6146_v5 = vld [vmem:[%s8098_s1 + $0x10ac] ss:$16 sps:$4 sm:$0xff]  }
 0x1df   : > { %4053 = vmatpush1.bf16.msra.mxu0 %v6050_v6  ;;  %4422 = vmatpush1.bf16.msra.mxu1 %v6053_v7  ;;  %v6141_v6 = vld [vmem:[%s8098_s1 + $0x10a0] ss:$16 sps:$4 sm:$0xff]   ;;  %v6144_v7 = vld [vmem:[%s8098_s1 + $0x10a8] ss:$16 sps:$4 sm:$0xff]  }
 0x1e0   : > { %4054 = vmatprep.subr.bf16.mxu0 %v6058_v8  ;;  %4423 = vmatprep.subr.bf16.mxu1 %v6061_v9  ;;  %v6149_v8 = vld [vmem:[%s8098_s1 + $0x10c4] ss:$16 sps:$4 sm:$0xff]   ;;  %v6152_v9 = vld [vmem:[%s8098_s1 + $0x10cc] ss:$16 sps:$4 sm:$0xff]  }
 0x1e3   : > { %4055 = vmatpush1.bf16.msra.mxu0 %v6056_v10  ;;  %4424 = vmatpush1.bf16.msra.mxu1 %v6059_v11  ;;  %v6147_v10 = vld [vmem:[%s8098_s1 + $0x10c0] ss:$16 sps:$4 sm:$0xff]   ;;  %v6150_v11 = vld [vmem:[%s8098_s1 + $0x10c8] ss:$16 sps:$4 sm:$0xff]  }
 0x1e4   : > { %4056 = vmatprep.subr.bf16.mxu0 %v6064_v13  ;;  %4425 = vmatprep.subr.bf16.mxu1 %v6067_v14  ;;  %v6155_v13 = vld [vmem:[%s8098_s1 + $0x10e4] ss:$16 sps:$4 sm:$0xff]   ;;  %v6158_v14 = vld [vmem:[%s8098_s1 + $0x10ec] ss:$16 sps:$4 sm:$0xff]  }
 0x1e7   : > { %4057 = vmatpush1.bf16.msra.mxu0 %v6062_v15  ;;  %4426 = vmatpush1.bf16.msra.mxu1 %v6065_v16  ;;  %v6153_v15 = vld [vmem:[%s8098_s1 + $0x10e0] ss:$16 sps:$4 sm:$0xff]   ;;  %v6156_v16 = vld [vmem:[%s8098_s1 + $0x10e8] ss:$16 sps:$4 sm:$0xff]  }
 0x1e8   : > { %4058 = vmatprep.subr.bf16.mxu0 %v6070_v17  ;;  %4427 = vmatprep.subr.bf16.mxu1 %v6073_v18  ;;  %v6161_v17 = vld [vmem:[%s8098_s1 + $0x1104] ss:$16 sps:$4 sm:$0xff]   ;;  %v6164_v18 = vld [vmem:[%s8098_s1 + $0x110c] ss:$16 sps:$4 sm:$0xff]  }
 0x1eb   : > { %4059 = vmatpush1.bf16.msra.mxu0 %v6068_v20  ;;  %4428 = vmatpush1.bf16.msra.mxu1 %v6071_v21  ;;  %v6159_v20 = vld [vmem:[%s8098_s1 + $0x1100] ss:$16 sps:$4 sm:$0xff]   ;;  %v6162_v21 = vld [vmem:[%s8098_s1 + $0x1108] ss:$16 sps:$4 sm:$0xff]  }
 0x1ec   : > { %4060 = vmatprep.subr.bf16.mxu0 %v6076_v23  ;;  %4429 = vmatprep.subr.bf16.mxu1 %v6079_v19  ;;  %v6167_v23 = vld [vmem:[%s8098_s1 + $0x1124] ss:$16 sps:$4 sm:$0xff]   ;;  %v6170_v19 = vld [vmem:[%s8098_s1 + $0x112c] ss:$16 sps:$4 sm:$0xff]  }
 0x1ef   : > { %4061 = vmatpush1.bf16.msra.mxu0 %v6074_v25  ;;  %4430 = vmatpush1.bf16.msra.mxu1 %v6077_v12  ;;  %v6165_v25 = vld [vmem:[%s8098_s1 + $0x1120] ss:$16 sps:$4 sm:$0xff]   ;;  %v6168_v12 = vld [vmem:[%s8098_s1 + $0x1128] ss:$16 sps:$4 sm:$0xff]  }
 0x1f0   : > { %4062 = vmatprep.subr.bf16.mxu0 %v6082_v27  ;;  %4431 = vmatprep.subr.bf16.mxu1 %v6085_v28  ;;  %v6173_v27 = vld [vmem:[%s8098_s1 + $0x1144] ss:$16 sps:$4 sm:$0xff]   ;;  %v6176_v28 = vld [vmem:[%s8098_s1 + $0x114c] ss:$16 sps:$4 sm:$0xff]  }
 0x1f3   : > { %4063 = vmatpush1.bf16.msra.mxu0 %v6080_v30  ;;  %4432 = vmatpush1.bf16.msra.mxu1 %v6083_v31  ;;  %v6171_v30 = vld [vmem:[%s8098_s1 + $0x1140] ss:$16 sps:$4 sm:$0xff]   ;;  %v6174_v31 = vld [vmem:[%s8098_s1 + $0x1148] ss:$16 sps:$4 sm:$0xff]  }
 0x1f4   : > { %4064 = vmatprep.subr.bf16.mxu0 %v6088_v22  ;;  %4433 = vmatprep.subr.bf16.mxu1 %v6091_v32  ;;  %v6179_v22 = vld [vmem:[%s8098_s1 + $0x1164] ss:$16 sps:$4 sm:$0xff]   ;;  %v6182_v32 = vld [vmem:[%s8098_s1 + $0x116c] ss:$16 sps:$4 sm:$0xff]  }
 0x1f7   : > { %4065 = vmatpush1.bf16.msra.mxu0 %v6086_v33  ;;  %4434 = vmatpush1.bf16.msra.mxu1 %v6089_v26  ;;  %v6177_v33 = vld [vmem:[%s8098_s1 + $0x1160] ss:$16 sps:$4 sm:$0xff]   ;;  %v6180_v26 = vld [vmem:[%s8098_s1 + $0x1168] ss:$16 sps:$4 sm:$0xff]  }
 0x1f8   : > { %4066 = vmatprep.subr.bf16.mxu0 %v6094_v36  ;;  %4435 = vmatprep.subr.bf16.mxu1 %v6097_v24  ;;  %v6185_v36 = vld [vmem:[%s8098_s1 + $0x1184] ss:$16 sps:$4 sm:$0xff]   ;;  %v6188_v24 = vld [vmem:[%s8098_s1 + $0x118c] ss:$16 sps:$4 sm:$0xff]  }
 0x1fb   : > { %4067 = vmatpush1.bf16.msra.mxu0 %v6092_v37  ;;  %4436 = vmatpush1.bf16.msra.mxu1 %v6095_v38  ;;  %v6183_v37 = vld [vmem:[%s8098_s1 + $0x1180] ss:$16 sps:$4 sm:$0xff]   ;;  %v6186_v38 = vld [vmem:[%s8098_s1 + $0x1188] ss:$16 sps:$4 sm:$0xff]  }
 0x1fc   : > { %4068 = vmatprep.subr.bf16.mxu0 %v6100_v40  ;;  %4437 = vmatprep.subr.bf16.mxu1 %v6103_v41  ;;  %v6191_v40 = vld [vmem:[%s8098_s1 + $0x11a4] ss:$16 sps:$4 sm:$0xff]   ;;  %v6194_v41 = vld [vmem:[%s8098_s1 + $0x11ac] ss:$16 sps:$4 sm:$0xff]  }
 0x1ff   : > { %4069 = vmatpush1.bf16.msra.mxu0 %v6098_v29  ;;  %4438 = vmatpush1.bf16.msra.mxu1 %v6101_v43  ;;  %v6189_v29 = vld [vmem:[%s8098_s1 + $0x11a0] ss:$16 sps:$4 sm:$0xff]   ;;  %v6192_v43 = vld [vmem:[%s8098_s1 + $0x11a8] ss:$16 sps:$4 sm:$0xff]  }
 0x200   : > { %4070 = vmatprep.subr.bf16.mxu0 %v6106_v44  ;;  %4439 = vmatprep.subr.bf16.mxu1 %v6109_v35  ;;  %v6197_v44 = vld [vmem:[%s8098_s1 + $0x11c4] ss:$16 sps:$4 sm:$0xff]   ;;  %v6200_v35 = vld [vmem:[%s8098_s1 + $0x11cc] ss:$16 sps:$4 sm:$0xff]  }
 0x203   : > { %4071 = vmatpush1.bf16.msra.mxu0 %v6104_v46  ;;  %4440 = vmatpush1.bf16.msra.mxu1 %v6107_v47  ;;  %v6195_v46 = vld [vmem:[%s8098_s1 + $0x11c0] ss:$16 sps:$4 sm:$0xff]   ;;  %v6198_v47 = vld [vmem:[%s8098_s1 + $0x11c8] ss:$16 sps:$4 sm:$0xff]  }
 0x204   : > { %4081 = vmatprep.subr.bf16.mxu0 %v6113_v34  ;;  %4450 = vmatprep.subr.bf16.mxu1 %v6116_v48  ;;  %v6203_v34 = vld [vmem:[%s8098_s1 + $0x11e4] ss:$16 sps:$4 sm:$0xff]   ;;  %v6206_v48 = vld [vmem:[%s8098_s1 + $0x11ec] ss:$16 sps:$4 sm:$0xff]  }
 0x206   : > { %4073 = vmatmul.mubr.bf16.vlgmr.msra.gmra.mrb[0].mxu0 %v7680_v45  ;;  %4442 = vmatmul.mubr.bf16.vlgmr.msra.gmra.mrb[0].mxu1 %v7680_v45  ;;  %v6128_v45 = vld [vmem:[%s8098_s1 + $0x104c] ss:$16 sps:$4 sm:$0xff]  }
 0x207   : > { %4082 = vmatpush1.bf16.msra.mxu0 %v6111_v51  ;;  %4451 = vmatpush1.bf16.msra.mxu1 %v6114_v52  ;;  %v6201_v51 = vld [vmem:[%s8098_s1 + $0x11e0] ss:$16 sps:$4 sm:$0xff]   ;;  %v6204_v52 = vld [vmem:[%s8098_s1 + $0x11e8] ss:$16 sps:$4 sm:$0xff]  }
 0x208   : > { %4083 = vmatprep.subr.bf16.mxu0 %v6119_v53  ;;  %4452 = vmatprep.subr.bf16.mxu1 %v6122_v39  ;;  %v756_v53 = vsub.s32 0, %v6376_v42  ;;  %v764_v39 = vsub.s32 2, %v6376_v42 }
 0x209   : > { %4113 = vmatprep.mubr.bf16.mxu0 %v854_v54  ;;  %4482 = vmatprep.mubr.bf16.mxu1 %v854_v54  ;;  %v752_v54 = vld [vmem:[%s8099_s2] sm:$0xf] }
 0x20b   : > { %4084 = vmatpush1.bf16.msra.mxu0 %v6117_v55  ;;  %4453 = vmatpush1.bf16.msra.mxu1 %v6120_v56  ;;  %v760_v55 = vsub.s32 1, %v6376_v42  ;;  %v768_v56 = vsub.s32 3, %v6376_v42 }
 0x20c   : > { %4085 = vmatprep.subr.bf16.mxu0 %v6125_v57  ;;  %4454 = vmatprep.subr.bf16.mxu1 %v6128_v45  ;;  %v757_v57 = vrot.slane %v752_v54, %v756_v53  ;;  %v765_v45 = vrot.slane %v752_v54, %v764_v39 }
 0x20f   : > { %4086 = vmatpush1.bf16.msra.mxu0 %v6123_v58  ;;  %4455 = vmatpush1.bf16.msra.mxu1 %v6126_v59  ;;  %v761_v58 = vrot.slane %v752_v54, %v760_v55  ;;  %v769_v59 = vrot.slane %v752_v54, %v768_v56 }
 0x210   : > { %4087 = vmatprep.subr.bf16.mxu0 %v6131_v60  ;;  %4456 = vmatprep.subr.bf16.mxu1 %v6134_v61 }
 0x213   : > { %4088 = vmatpush1.bf16.msra.mxu0 %v6129_v62  ;;  %4457 = vmatpush1.bf16.msra.mxu1 %v6132_v63 }
 0x214   : > { %4089 = vmatprep.subr.bf16.mxu0 %v6137_v0  ;;  %4458 = vmatprep.subr.bf16.mxu1 %v6140_v1 }
 0x217   : > { %4090 = vmatpush1.bf16.msra.mxu0 %v6135_v2  ;;  %4459 = vmatpush1.bf16.msra.mxu1 %v6138_v3 }
 0x218   : > { %4091 = vmatprep.subr.bf16.mxu0 %v6143_v4  ;;  %4460 = vmatprep.subr.bf16.mxu1 %v6146_v5 }
 0x21b   : > { %4092 = vmatpush1.bf16.msra.mxu0 %v6141_v6  ;;  %4461 = vmatpush1.bf16.msra.mxu1 %v6144_v7 }
 0x21c   : > { %4093 = vmatprep.subr.bf16.mxu0 %v6149_v8  ;;  %4462 = vmatprep.subr.bf16.mxu1 %v6152_v9 }
 0x21f   : > { %4094 = vmatpush1.bf16.msra.mxu0 %v6147_v10  ;;  %4463 = vmatpush1.bf16.msra.mxu1 %v6150_v11 }
 0x220   : > { %4095 = vmatprep.subr.bf16.mxu0 %v6155_v13  ;;  %4464 = vmatprep.subr.bf16.mxu1 %v6158_v14 }
 0x223   : > { %4096 = vmatpush1.bf16.msra.mxu0 %v6153_v15  ;;  %4465 = vmatpush1.bf16.msra.mxu1 %v6156_v16 }
 0x224   : > { %4097 = vmatprep.subr.bf16.mxu0 %v6161_v17  ;;  %4466 = vmatprep.subr.bf16.mxu1 %v6164_v18 }
 0x227   : > { %4098 = vmatpush1.bf16.msra.mxu0 %v6159_v20  ;;  %4467 = vmatpush1.bf16.msra.mxu1 %v6162_v21 }
 0x228   : > { %4099 = vmatprep.subr.bf16.mxu0 %v6167_v23  ;;  %4468 = vmatprep.subr.bf16.mxu1 %v6170_v19 }
 0x22b   : > { %4100 = vmatpush1.bf16.msra.mxu0 %v6165_v25  ;;  %4469 = vmatpush1.bf16.msra.mxu1 %v6168_v12 }
 0x22c   : > { %4101 = vmatprep.subr.bf16.mxu0 %v6173_v27  ;;  %4470 = vmatprep.subr.bf16.mxu1 %v6176_v28 }
 0x22f   : > { %4102 = vmatpush1.bf16.msra.mxu0 %v6171_v30  ;;  %4471 = vmatpush1.bf16.msra.mxu1 %v6174_v31 }
 0x230   : > { %4103 = vmatprep.subr.bf16.mxu0 %v6179_v22  ;;  %4472 = vmatprep.subr.bf16.mxu1 %v6182_v32 }
 0x233   : > { %4104 = vmatpush1.bf16.msra.mxu0 %v6177_v33  ;;  %4473 = vmatpush1.bf16.msra.mxu1 %v6180_v26 }
 0x234   : > { %4105 = vmatprep.subr.bf16.mxu0 %v6185_v36  ;;  %4474 = vmatprep.subr.bf16.mxu1 %v6188_v24 }
 0x237   : > { %4106 = vmatpush1.bf16.msra.mxu0 %v6183_v37  ;;  %4475 = vmatpush1.bf16.msra.mxu1 %v6186_v38 }
 0x238   : > { %4107 = vmatprep.subr.bf16.mxu0 %v6191_v40  ;;  %4476 = vmatprep.subr.bf16.mxu1 %v6194_v41 }
 0x23b   : > { %4108 = vmatpush1.bf16.msra.mxu0 %v6189_v29  ;;  %4477 = vmatpush1.bf16.msra.mxu1 %v6192_v43 }
 0x23c   : > { %4109 = vmatprep.subr.bf16.mxu0 %v6197_v44  ;;  %4478 = vmatprep.subr.bf16.mxu1 %v6200_v35 }
 0x23f   : > { %4110 = vmatpush1.bf16.msra.mxu0 %v6195_v46  ;;  %4479 = vmatpush1.bf16.msra.mxu1 %v6198_v47 }
 0x240   : > { %4111 = vmatprep.subr.bf16.mxu0 %v6203_v34  ;;  %4480 = vmatprep.subr.bf16.mxu1 %v6206_v48 }
 0x243   : > { %4112 = vmatpush1.bf16.msra.mxu0 %v6201_v51  ;;  %4481 = vmatpush1.bf16.msra.mxu1 %v6204_v52 }
 0x246   : > { %4114 = vmatmul.mubr.bf16.vlgmr.msra.gmra.mrb[0].mxu0 %v7879_v50  ;;  %4483 = vmatmul.mubr.bf16.vlgmr.msra.gmra.mrb[0].mxu1 %v7879_v50 }
 0x319   : > { %v4115_v60 = vpop.f32.mrb[0].mxu0  ;;  %v4484_v61 = vpop.f32.mrb[0].mxu1 }
 0x31a   : > { %v5261_v50 = vadd.f32 %v4115_v60, %v757_v57  ;;  %v5263_v62 = vadd.f32 %v4484_v61, %v765_v45  ;;  %v4117_v63 = vpop.f32.mrb[1].mxu0  ;;  %v4486_v0 = vpop.f32.mrb[1].mxu1 }
 0x31b   : > { %v5262_v1 = vadd.f32 %v4117_v63, %v761_v58  ;;  %v5264_v2 = vadd.f32 %v4486_v0, %v769_v59  ;;  %v4119_v3 = vpop.f32.mrb[2].mxu0  ;;  %v4488_v4 = vpop.f32.mrb[2].mxu1 }
 0x31c   : > { %v4492_v5 = vsel %vm4491_vm0, %v5261_v50, 0.0  ;;  %v4506_v6 = vsel %vm4491_vm0, %v5263_v62, 0.0  ;;  %v4120_v42 = vpop.f32.mrb[3].mxu0  ;;  %v4489_v7 = vpop.f32.mrb[3].mxu1 }
 0x31d   : > { %v4493_v8 = vrot.slane %v4492_v5, 4  ;;  %v4507_v9 = vrot.slane %v4506_v6, 4  ;;  %v4499_v10 = vsel %vm4491_vm0, %v5262_v1, 0.0  ;;  %v4513_v11 = vsel %vm4491_vm0, %v5264_v2, 0.0 }
 0x31e   : > { %v4500_v13 = vrot.slane %v4499_v10, 4  ;;  %v4514_v14 = vrot.slane %v4513_v11, 4 }
 0x31f   : > { %v4494_v15 = vadd.f32 %v4493_v8, %v4492_v5  ;;  %v4508_v16 = vadd.f32 %v4507_v9, %v4506_v6 }
 0x320   : > { %v4501_v17 = vadd.f32 %v4500_v13, %v4499_v10  ;;  %v4515_v18 = vadd.f32 %v4514_v14, %v4513_v11 }
 0x321   : > { %v4495_v20 = vrot.slane %v4494_v15, 2  ;;  %v4509_v21 = vrot.slane %v4508_v16, 2 }
 0x322   : > { %v4502_v23 = vrot.slane %v4501_v17, 2  ;;  %v4516_v19 = vrot.slane %v4515_v18, 2 }
 0x323   : > { %v4496_v25 = vadd.f32 %v4495_v20, %v4494_v15  ;;  %v4510_v12 = vadd.f32 %v4509_v21, %v4508_v16 }
 0x324   : > { %v4503_v27 = vadd.f32 %v4502_v23, %v4501_v17  ;;  %v4517_v28 = vadd.f32 %v4516_v19, %v4515_v18 }
 0x325   : > { %v4497_v30 = vrot.slane %v4496_v25, 1  ;;  %v4511_v31 = vrot.slane %v4510_v12, 1 }
 0x326   : > { %v4504_v22 = vrot.slane %v4503_v27, 1  ;;  %v4518_v32 = vrot.slane %v4517_v28, 1 }
 0x327   : > { %v4498_v33 = vadd.f32 %v4497_v30, %v4496_v25  ;;  %v4512_v26 = vadd.f32 %v4511_v31, %v4510_v12 }
 0x328   : > { %v4505_v36 = vadd.f32 %v4504_v22, %v4503_v27  ;;  %v4519_v24 = vadd.f32 %v4518_v32, %v4517_v28 }
 0x329   : > { %v4521_v37 = vmul.f32 0.25, %v4498_v33  ;;  %v4523_v38 = vmul.f32 0.25, %v4512_v26 }
 0x32a   : > { %v4522_v40 = vmul.f32 0.25, %v4505_v36  ;;  %v4524_v41 = vmul.f32 0.25, %v4519_v24 }
 0x32b   : > { %v4525_v29 = vsub.f32 %v5261_v50, %v4521_v37  ;;  %v4527_v43 = vsub.f32 %v5263_v62, %v4523_v38 }
 0x32c   : > { %v4526_v44 = vsub.f32 %v5262_v1, %v4522_v40  ;;  %v4528_v35 = vsub.f32 %v5264_v2, %v4524_v41 }
 0x32d   : > { %v4529_v46 = vmul.f32 %v4525_v29, %v4525_v29  ;;  %v4531_v47 = vmul.f32 %v4527_v43, %v4527_v43 }
 0x32e   : > { %v4530_v34 = vmul.f32 %v4526_v44, %v4526_v44  ;;  %v4532_v48 = vmul.f32 %v4528_v35, %v4528_v35 }
 0x32f   : > { %v4533_v51 = vsel %vm4491_vm0, %v4529_v46, 0.0  ;;  %v4547_v52 = vsel %vm4491_vm0, %v4531_v47, 0.0 }
 0x330   : > { %v4534_v53 = vrot.slane %v4533_v51, 4  ;;  %v4548_v39 = vrot.slane %v4547_v52, 4  ;;  %v4540_v54 = vsel %vm4491_vm0, %v4530_v34, 0.0  ;;  %v4554_v55 = vsel %vm4491_vm0, %v4532_v48, 0.0 }
 0x331   : > { %v4541_v56 = vrot.slane %v4540_v54, 4  ;;  %v4555_v57 = vrot.slane %v4554_v55, 4 }
 0x332   : > { %v4535_v45 = vadd.f32 %v4534_v53, %v4533_v51  ;;  %v4549_v58 = vadd.f32 %v4548_v39, %v4547_v52 }
 0x333   : > { %v4542_v59 = vadd.f32 %v4541_v56, %v4540_v54  ;;  %v4556_v60 = vadd.f32 %v4555_v57, %v4554_v55 }
 0x334   : > { %v4536_v61 = vrot.slane %v4535_v45, 2  ;;  %v4550_v50 = vrot.slane %v4549_v58, 2 }
 0x335   : > { %v4543_v62 = vrot.slane %v4542_v59, 2  ;;  %v4557_v63 = vrot.slane %v4556_v60, 2 }
 0x336   : > { %v4537_v0 = vadd.f32 %v4536_v61, %v4535_v45  ;;  %v4551_v1 = vadd.f32 %v4550_v50, %v4549_v58 }
 0x337   : > { %v4544_v2 = vadd.f32 %v4543_v62, %v4542_v59  ;;  %v4558_v3 = vadd.f32 %v4557_v63, %v4556_v60 }
 0x338   : > { %v4538_v4 = vrot.slane %v4537_v0, 1  ;;  %v4552_v5 = vrot.slane %v4551_v1, 1 }
 0x339   : > { %v4545_v6 = vrot.slane %v4544_v2, 1  ;;  %v4559_v42 = vrot.slane %v4558_v3, 1 }
 0x33a   : > { %v4539_v7 = vadd.f32 %v4538_v4, %v4537_v0  ;;  %v4553_v8 = vadd.f32 %v4552_v5, %v4551_v1 }
 0x33b   : > { %v4546_v9 = vadd.f32 %v4545_v6, %v4544_v2  ;;  %v4560_v10 = vadd.f32 %v4559_v42, %v4558_v3 }
 0x33c   : > { %v4561_v11 = vmul.f32 0.25, %v4539_v7  ;;  %v4563_v13 = vmul.f32 0.25, %v4553_v8 }
 0x33d   : > { %v4562_v14 = vmul.f32 0.25, %v4546_v9  ;;  %v4564_v15 = vmul.f32 0.25, %v4560_v10 }
 0x33e   : > { %v4565_v16 = vadd.f32 1e-05, %v4561_v11  ;;  %v4567_v17 = vadd.f32 1e-05, %v4563_v13 }
 0x33f   : > { %v4566_v18 = vadd.f32 1e-05, %v4562_v14  ;;  %v4568_v20 = vadd.f32 1e-05, %v4564_v15 }
 0x340   : > { %6207 = vrsqrt.f32 %v4565_v16 }
 0x341   : > { %6209 = vrsqrt.f32 %v4567_v17 }
 0x342   : > { %6211 = vrsqrt.f32 %v4566_v18 }
 0x343   : > { %6213 = vrsqrt.f32 %v4568_v20 }
 0x34a   : > { %v6208_v21 = vpop.eup %6207 }
 0x34b   : > { %v6210_v23 = vpop.eup %6209  ;;  %v4573_v19 = vmul.f32 %v6208_v21, %v4525_v29 }
 0x34c   : > { %v6212_v25 = vpop.eup %6211  ;;  %v4575_v12 = vmul.f32 %v6210_v23, %v4527_v43 }
 0x34d   : > { %v6214_v27 = vpop.eup %6213  ;;  %vm4577_vm1 = vcmp.ge.f32.partialorder %v4573_v19, 0.0  ;;  %v4581_v28 = vmul.f32 0.2, %v4573_v19  ;;  %v4574_v30 = vmul.f32 %v6212_v25, %v4526_v44 }
 0x34e   : > { %vm4579_vm2 = vcmp.ge.f32.partialorder %v4575_v12, 0.0  ;;  %v4583_v31 = vmul.f32 0.2, %v4575_v12  ;;  %v4576_v22 = vmul.f32 %v6214_v27, %v4528_v35 }
 0x34f   : > { %v4585_v32 = vsel %vm4577_vm1, %v4573_v19, %v4581_v28  ;;  %vm4578_vm3 = vcmp.ge.f32.partialorder %v4574_v30, 0.0  ;;  %v4582_v33 = vmul.f32 0.2, %v4574_v30 }
 0x350   : > { %v4587_v26 = vsel %vm4579_vm2, %v4575_v12, %v4583_v31  ;;  %vm4580_vm4 = vcmp.ge.f32.partialorder %v4576_v22, 0.0  ;;  %v4584_v36 = vmul.f32 0.2, %v4576_v22 }
 0x351   : > { %v4586_v24 = vsel %vm4578_vm3, %v4574_v30, %v4582_v33 }
 0x352   : > { %v5256_v37 = vpack.c.bf16 %v4586_v24, %v4585_v32  ;;  %v4588_v38 = vsel %vm4580_vm4, %v4576_v22, %v4584_v36 }
 0x353   : > { %v5257_v40 = vpack.c.bf16 %v4588_v38, %v4587_v26 }
 0x354   : > { %v4605_v41 = vrot.slane %v5256_v37, %v6399_v49 }
 0x355   : > { %v4612_v29 = vrot.slane %v5257_v40, %v6399_v49 }
 0x357   : > { %v4613_v43 = vcombine.low %v4605_v41, %v4612_v29 }
 0x359   : > { %4615 = vst [vmem:[%s170_s14] sm:$0xff] %v4613_v43 }
 0x35a PF: > { %s13_s12 = sadd.s32 1, %s6221_s12  }
 0x35b   : > { %p10_p4 = scmp.ge.s32.totalorder %s13_s12, 4  }
 0x35d   :  { %12 = sbr.rel (!%p10_p4) target bundleno = 1 (0x1), region = 62 }

</bundles_post_ra>
